<compile_context>
chip_gen: v7x
topology: tpu7x:2x2x1
jax: 0.10.0
libtpu: 0.0.40
codegen_flags: <defaults>
</compile_context>

<pallas_src>
import math
from functools import partial

import numpy as np
import jax
import jax.numpy as jnp
from jax import lax
from jax.experimental import pallas as pl
from jax.experimental.pallas import tpu as pltpu

# ----------------------------- configuration --------------------------------
N_BATCH = 2
DIM = 32                  # embed_dim of incoming stage
DIM_OUT = 64              # dim_out after stage transition
NUM_HEADS = 2
HEAD_DIM = DIM_OUT // NUM_HEADS
MLP_RATIO = 4
MLP_HIDDEN = int(DIM_OUT * MLP_RATIO)
INPUT_SIZE = (2, 8, 8)    # (T, H, W); L = T*H*W
SEQ_LEN = INPUT_SIZE[0] * INPUT_SIZE[1] * INPUT_SIZE[2]
KERNEL_Q = (3, 3, 3)
KERNEL_KV = (3, 3, 3)
STRIDE_Q = (1, 2, 2)
STRIDE_KV = (1, 2, 2)
N_TAPS = KERNEL_Q[0] * KERNEL_Q[1] * KERNEL_Q[2]
TAP_CHUNK = 3             # taps per selection-matmul chunk (96 rows; keeps partials in vregs)
SLAB_W = 4 * DIM_OUT      # [res(64) | q(64) | k(64) | v(64)] = 256 lanes
N_GROUPS = 4 * NUM_HEADS  # eight 32-channel per-head LayerNorm groups

EPS_OUTER = 1e-6          # AttentionSubBlock.norm / MLPSubblock.norm (eps=1e-6)
EPS_POOL = 1e-5           # norm_q / norm_k / norm_v (nn.LayerNorm default eps)


# --------------------------- trace-time constants -----------------------------
def build_selection_matrix():
    """0/1 im2col selection matrix S (N_TAPS*Lq, L): row (k*Lq + r) selects the input token
    feeding tap k of pooled position r; out-of-bounds (padding) taps are all-zero rows.
    Matches Conv3d(kernel, stride, padding=kernel//2) geometry used by pool_q/pool_kv."""
    T, H, W = INPUT_SIZE
    kt, kh, kw = KERNEL_Q
    st, sh, sw = STRIDE_Q
    pt, ph, pw = kt // 2, kh // 2, kw // 2
    To = (T + 2 * pt - kt) // st + 1
    Ho = (H + 2 * ph - kh) // sh + 1
    Wo = (W + 2 * pw - kw) // sw + 1
    lq = To * Ho * Wo
    sel = np.zeros((N_TAPS * lq, T * H * W), dtype=np.float32)
    for it in range(kt):
        for ih in range(kh):
            for iw in range(kw):
                k = (it * kh + ih) * kw + iw
                for to in range(To):
                    for ho in range(Ho):
                        for wo in range(Wo):
                            r = (to * Ho + ho) * Wo + wo
                            t = to * st + it - pt
                            h = ho * sh + ih - ph
                            w = wo * sw + iw - pw
                            if 0 <= t < T and 0 <= h < H and 0 <= w < W:
                                sel[k * lq + r, (t * H + h) * W + w] = 1.0
    return sel, lq


def _group_mean_matrix(n_groups):
    """(n_groups*HEAD_DIM)^2 block-diag matrix: x @ M broadcasts each 32-channel group mean."""
    return np.kron(np.eye(n_groups, dtype=np.float32),
                   np.full((HEAD_DIM, HEAD_DIM), 1.0 / HEAD_DIM, dtype=np.float32))


def _has_two_tensorcores():
    """v7x has 2 TensorCores per chip (batch grid axis is real parallelism); older
    generations have 1 (the grid is a serial loop paying per-step overhead)."""
    try:
        kind = jax.devices()[0].device_kind.lower()
    except Exception:
        return False
    return ("v7" in kind) or ("7x" in kind)


# ------------------------------ Pallas kernel ---------------------------------
def _erf_poly(x):
    # Abramowitz & Stegun 7.1.26, |err| <= 1.5e-7 — matches exact-erf GELU to f32 noise.
    a1, a2, a3, a4, a5 = 0.254829592, -0.284496736, 1.421413741, -1.453152027, 1.061405429
    pp = 0.3275911
    sgn = jnp.where(x >= 0.0, 1.0, -1.0)
    ax = jnp.abs(x)
    t = 1.0 / (1.0 + pp * ax)
    y = 1.0 - (((((a5 * t + a4) * t + a3) * t + a2) * t + a1) * t) * jnp.exp(-ax * ax)
    return sgn * y


def fused_block_kernel(x_ref, g1_ref, b1_ref, wbig_ref, bbig_ref,
                       sel_ref, wtap_ref, mg_ref, gp_ref, bp_ref,
                       wproj_ref, bproj_ref, g2_ref, b2_ref,
                       wfc1_ref, bfc1_ref, wfc2_ref, bfc2_ref,
                       o_ref, *, nb, seq, lq, n_taps, tap_chunk,
                       scale, eps_outer, eps_pool):
    # ---- TwoStreamFusion("avg") + pre-LN (norm1, eps=1e-6), all nb batches stacked on rows ----
    xin = x_ref[...].reshape(nb * seq, 2 * DIM)
    xf = 0.5 * (xin[:, :DIM] + xin[:, DIM:])                      # (nb*L, DIM)
    mu1 = jnp.mean(xf, axis=-1, keepdims=True)
    d1 = xf - mu1
    var1 = jnp.mean(d1 * d1, axis=-1, keepdims=True)
    xn = d1 * lax.rsqrt(var1 + eps_outer) * g1_ref[...] + b1_ref[...]

    # ---- fused [res | qkv] projection: one (nb*L, 64) @ blockdiag(w_res, w_qkv) (64, 256) ----
    fused_in = jnp.concatenate([xf, xn], axis=-1)                 # (nb*L, 2*DIM)
    slab = jnp.dot(fused_in, wbig_ref[...],
                   preferred_element_type=jnp.float32) + bbig_ref[...]   # (nb*L, 256)

    mg = mg_ref[...].astype(jnp.float32)                          # (256, 256) group-mean matrix
    n_chunks = n_taps // tap_chunk
    chunk_rows = tap_chunk * lq

    xmids = []
    for b in range(nb):                                           # static unroll over batch
        sb = slab[b * seq:(b + 1) * seq, :]                       # (L, 256)

        # depthwise Conv3d pooling (res/q/k/v share geometry): chunked im2col selection
        # matmul with the per-tap depthwise weight applied as a broadcast-row multiply and
        # folded into a running (lq, 256) accumulator (no (864,256) intermediate).
        acc = jnp.zeros((lq, SLAB_W), jnp.float32)
        for c in range(n_chunks):                                 # 9 chunks of 3 taps
            sel_c = sel_ref[c * chunk_rows:(c + 1) * chunk_rows, :].astype(jnp.float32)
            part = jnp.dot(sel_c, sb, preferred_element_type=jnp.float32)  # (96, 256)
            for j in range(tap_chunk):
                t = c * tap_chunk + j
                acc = acc + part[j * lq:(j + 1) * lq, :] * wtap_ref[t:t + 1, :]

        # per-head LayerNorm (norm_q / norm_k / norm_v, eps=1e-5) via block-diag mean matmul
        mu = jnp.dot(acc, mg, preferred_element_type=jnp.float32)
        d = acc - mu
        var = jnp.dot(d * d, mg, preferred_element_type=jnp.float32)
        ps = d * lax.rsqrt(var + eps_pool) * gp_ref[...] + bp_ref[...]     # (lq, 256)

        # attention per head (+ residual_pooling) fused with out-projection & residual add
        xmid = ps[:, :DIM_OUT] + bproj_ref[...]                            # res path + proj bias
        for h in range(NUM_HEADS):                                # static unroll (2 heads)
            q_h = ps[:, DIM_OUT + h * HEAD_DIM:DIM_OUT + (h + 1) * HEAD_DIM]
            k_h = ps[:, 2 * DIM_OUT + h * HEAD_DIM:2 * DIM_OUT + (h + 1) * HEAD_DIM]
            v_h = ps[:, 3 * DIM_OUT + h * HEAD_DIM:3 * DIM_OUT + (h + 1) * HEAD_DIM]
            s = lax.dot_general(q_h * scale, k_h, (((1,), (1,)), ((), ())),
                                preferred_element_type=jnp.float32)        # (lq, lq)
            s = s - jnp.max(s, axis=-1, keepdims=True)
            e = jnp.exp(s)
            p = e * pl.reciprocal(jnp.sum(e, axis=-1, keepdims=True), approx=True)
            o_h = jnp.dot(p, v_h, preferred_element_type=jnp.float32) + q_h  # residual_pooling
            xmid = xmid + jnp.dot(o_h, wproj_ref[h * HEAD_DIM:(h + 1) * HEAD_DIM, :],
                                  preferred_element_type=jnp.float32)
        xmids.append(xmid)

    xmid_all = xmids[0] if nb == 1 else jnp.concatenate(xmids, axis=0)     # (nb*lq, 64)

    # ---- MLP sub-block (pre-LN eps=1e-6, exact-erf GELU) with fused residual add ----
    mu2 = jnp.mean(xmid_all, axis=-1, keepdims=True)
    d2 = xmid_all - mu2
    var2 = jnp.mean(d2 * d2, axis=-1, keepdims=True)
    xn2 = d2 * lax.rsqrt(var2 + eps_outer) * g2_ref[...] + b2_ref[...]
    hid = jnp.dot(xn2, wfc1_ref[...], preferred_element_type=jnp.float32) + bfc1_ref[...]
    hid = 0.5 * hid * (1.0 + _erf_poly(hid * (1.0 / math.sqrt(2.0))))
    out = xmid_all + jnp.dot(hid, wfc2_ref[...], preferred_element_type=jnp.float32) + bfc2_ref[...]
    # drop_path(rate=0.0) / dropout(rate=0.0) are identities.

    for b in range(nb):
        o_ref[b] = out[b * lq:(b + 1) * lq, :]


# ------------------------------ wrapper ----------------------------------------
def stage_transition_block(x, p):
    """x: (N, L, 2*DIM) float32 — two reversible streams concatenated on channels."""
    n, l, _ = x.shape
    sel_np, lq = build_selection_matrix()
    # 0/1 selection matrix and 0 / 1/32 group-mean matrix are exact in bf16 (halved DMA).
    sel = jnp.asarray(sel_np, dtype=jnp.bfloat16)                         # (27*lq, L)
    m_group = jnp.asarray(_group_mean_matrix(N_GROUPS), dtype=jnp.bfloat16)  # (256, 256)

    # Fused [res | qkv] projection weight: blockdiag(w_res, w_qkv) -> (2*DIM, 256).
    w_big = jnp.zeros((2 * DIM, SLAB_W), jnp.float32)
    w_big = w_big.at[:DIM, :DIM_OUT].set(p["w_res"])
    w_big = w_big.at[DIM:, DIM_OUT:].set(p["w_qkv"])
    b_big = jnp.concatenate([p["b_res"], p["b_qkv"]], axis=1)             # (1, 256)

    # Compact per-tap pooling weights / LN affine for the 256-lane slab
    #   groups: [res_h0|res_h1 | q_h0|q_h1 | k_h0|k_h1 | v_h0|v_h1]
    #   (residual path is pooled with pool_q and normed with norm_q — same as q).
    wtap = jnp.concatenate([p["w_pool_q"]] * (2 * NUM_HEADS)
                           + [p["w_pool_k"]] * NUM_HEADS
                           + [p["w_pool_v"]] * NUM_HEADS, axis=1)         # (27, 256)
    gp = jnp.concatenate([p["g_q"]] * (2 * NUM_HEADS) + [p["g_k"]] * NUM_HEADS
                         + [p["g_v"]] * NUM_HEADS, axis=1)                # (1, 256)
    bp = jnp.concatenate([p["b_q"]] * (2 * NUM_HEADS) + [p["b_k"]] * NUM_HEADS
                         + [p["b_v"]] * NUM_HEADS, axis=1)                # (1, 256)

    params = [p["g_norm1"], p["b_norm1"], w_big, b_big, sel, wtap, m_group, gp, bp,
              p["w_proj"], p["b_proj"], p["g_norm2"], p["b_norm2"],
              p["w_fc1"], p["b_fc1"], p["w_fc2"], p["b_fc2"]]

    # Backend-gated batch handling: parallel batch grid on 2-TC chips (v7x), folded
    # single grid step (M = N*L matmuls, no per-step overhead) on 1-TC chips (v5e/v6e).
    parallel_batch = _has_two_tensorcores() and n > 1
    if parallel_batch:
        nb, grid = 1, (n,)
        x_spec = pl.BlockSpec((1, l, 2 * DIM), lambda b: (b, 0, 0))
        o_spec = pl.BlockSpec((1, lq, DIM_OUT), lambda b: (b, 0, 0))
        dims = ("parallel",)
    else:
        nb, grid = n, (1,)
        x_spec = pl.BlockSpec((n, l, 2 * DIM), lambda b: (0, 0, 0))
        o_spec = pl.BlockSpec((n, lq, DIM_OUT), lambda b: (0, 0, 0))
        dims = ("arbitrary",)

    def full_spec(a):
        nd = a.ndim
        return pl.BlockSpec(tuple(int(s) for s in a.shape),
                            lambda b, _nd=nd: (0,) * _nd)

    kern = partial(fused_block_kernel, nb=nb, seq=l, lq=lq, n_taps=N_TAPS,
                   tap_chunk=TAP_CHUNK, scale=HEAD_DIM ** -0.5,
                   eps_outer=EPS_OUTER, eps_pool=EPS_POOL)
    return pl.pallas_call(
        kern,
        out_shape=jax.ShapeDtypeStruct((n, lq, DIM_OUT), jnp.float32),
        grid=grid,
        in_specs=[x_spec] + [full_spec(a) for a in params],
        out_specs=o_spec,
        compiler_params=pltpu.CompilerParams(dimension_semantics=dims),
    )(x, *params)


# ------------------------------ pure-JAX reference -----------------------------
def extract_taps(x, kernel, stride):
    """x: (BH, T, H, W, C) channels-last. Returns (BH*To*Ho*Wo, prod(kernel), C), (To,Ho,Wo)."""
    kt, kh, kw = kernel
    st, sh, sw = stride
    pt, ph, pw = kt // 2, kh // 2, kw // 2
    bh, t, h, w, c = x.shape
    xp = jnp.pad(x, ((0, 0), (pt, pt), (ph, ph), (pw, pw), (0, 0)))
    to = (t + 2 * pt - kt) // st + 1
    ho = (h + 2 * ph - kh) // sh + 1
    wo = (w + 2 * pw - kw) // sw + 1
    taps = []
    for it in range(kt):
        for ih in range(kh):
            for iw in range(kw):
                taps.append(xp[:, it:it + (to - 1) * st + 1:st,
                               ih:ih + (ho - 1) * sh + 1:sh,
                               iw:iw + (wo - 1) * sw + 1:sw, :])
    patches = jnp.stack(taps, axis=-2)                 # (BH, To, Ho, Wo, K, C)
    return patches.reshape(bh * to * ho * wo, len(taps), c), (to, ho, wo)


def reference_forward(x, p):
    n, l, _ = x.shape
    t, h, w = INPUT_SIZE
    xf = 0.5 * (x[..., :DIM] + x[..., DIM:])

    def ln(v_, g, b, eps):
        mu = v_.mean(-1, keepdims=True)
        var = jnp.square(v_ - mu).mean(-1, keepdims=True)
        return (v_ - mu) / jnp.sqrt(var + eps) * g.reshape(-1) + b.reshape(-1)

    def pool(th, w_pool, g, b, kernel, stride):
        t5 = th.reshape(n * NUM_HEADS, t, h, w, HEAD_DIM)
        patches, thw = extract_taps(t5, kernel, stride)
        y = jnp.einsum("rkc,kc->rc", patches, w_pool)
        y = ln(y, g, b, EPS_POOL)
        lp = thw[0] * thw[1] * thw[2]
        return y.reshape(n, NUM_HEADS, lp, HEAD_DIM), lp

    xr = xf @ p["w_res"] + p["b_res"].reshape(-1)
    xr = xr.reshape(n, l, NUM_HEADS, HEAD_DIM).transpose(0, 2, 1, 3)
    xr_p, lq = pool(xr, p["w_pool_q"], p["g_q"], p["b_q"], KERNEL_Q, STRIDE_Q)
    xr_p = xr_p.transpose(0, 2, 1, 3).reshape(n, lq, DIM_OUT)

    xn = ln(xf, p["g_norm1"], p["b_norm1"], EPS_OUTER)
    qkv = (xn @ p["w_qkv"] + p["b_qkv"].reshape(-1))
    qkv = qkv.reshape(n, l, 3, NUM_HEADS, HEAD_DIM).transpose(2, 0, 3, 1, 4)
    q, k, v = qkv[0], qkv[1], qkv[2]
    qp, _ = pool(q, p["w_pool_q"], p["g_q"], p["b_q"], KERNEL_Q, STRIDE_Q)
    kp, _ = pool(k, p["w_pool_k"], p["g_k"], p["b_k"], KERNEL_KV, STRIDE_KV)
    vp, _ = pool(v, p["w_pool_v"], p["g_v"], p["b_v"], KERNEL_KV, STRIDE_KV)

    scale = HEAD_DIM ** -0.5
    attn = jax.nn.softmax((qp * scale) @ kp.transpose(0, 1, 3, 2), axis=-1)
    o = attn @ vp + qp
    o = o.transpose(0, 2, 1, 3).reshape(n, lq, DIM_OUT)
    o = o @ p["w_proj"] + p["b_proj"].reshape(-1)
    xmid = xr_p + o

    g = ln(xmid, p["g_norm2"], p["b_norm2"], EPS_OUTER)
    g = g @ p["w_fc1"] + p["b_fc1"].reshape(-1)
    g = jax.nn.gelu(g, approximate=False)
    g = g @ p["w_fc2"] + p["b_fc2"].reshape(-1)
    return xmid + g


# ------------------------------ deterministic params ---------------------------
def init_params(key):
    keys = iter(jax.random.split(key, 32))

    def wgt(shape, s=0.05):
        return s * jax.random.normal(next(keys), shape, jnp.float32)

    def gamma(c):
        return 1.0 + 0.05 * jax.random.normal(next(keys), (1, c), jnp.float32)

    def beta(c):
        return 0.05 * jax.random.normal(next(keys), (1, c), jnp.float32)

    return {
        "g_norm1": gamma(DIM), "b_norm1": beta(DIM),
        "w_qkv": wgt((DIM, 3 * DIM_OUT)), "b_qkv": wgt((1, 3 * DIM_OUT)),
        "w_pool_q": wgt((N_TAPS, HEAD_DIM)), "g_q": gamma(HEAD_DIM), "b_q": beta(HEAD_DIM),
        "w_pool_k": wgt((N_TAPS, HEAD_DIM)), "g_k": gamma(HEAD_DIM), "b_k": beta(HEAD_DIM),
        "w_pool_v": wgt((N_TAPS, HEAD_DIM)), "g_v": gamma(HEAD_DIM), "b_v": beta(HEAD_DIM),
        "w_proj": wgt((DIM_OUT, DIM_OUT)), "b_proj": wgt((1, DIM_OUT)),
        "w_res": wgt((DIM, DIM_OUT)), "b_res": wgt((1, DIM_OUT)),
        "g_norm2": gamma(DIM_OUT), "b_norm2": beta(DIM_OUT),
        "w_fc1": wgt((DIM_OUT, MLP_HIDDEN)), "b_fc1": wgt((1, MLP_HIDDEN)),
        "w_fc2": wgt((MLP_HIDDEN, DIM_OUT)), "b_fc2": wgt((1, DIM_OUT)),
    }


# ----------------------------------- main ---------------------------------------
if __name__ == "__main__":
    root = jax.random.PRNGKey(0)
    kx, kp = jax.random.split(root)
    x = jax.random.normal(kx, (N_BATCH, SEQ_LEN, 2 * DIM), jnp.float32)
    params = init_params(kp)

    fwd = jax.jit(stage_transition_block)
    out = jax.block_until_ready(fwd(x, params))

    ref = jax.block_until_ready(reference_forward(x, params))
    assert out.shape == ref.shape, (out.shape, ref.shape)
    max_err = float(jnp.max(jnp.abs(out - ref)))
    if max_err > 2e-3:
        raise AssertionError(f"mismatch vs reference: max abs err = {max_err}")

    print("KERNEL_OK")
</pallas_src>

<mosaic_0001>
module attributes {stable_mosaic.version = 11 : i64} {
  func.func @fused_block_kernel(%arg0: i32, %arg1: memref<2x128x64xf32, #tpu.memory_space<vmem>>, %arg2: memref<1x32xf32, #tpu.memory_space<vmem>>, %arg3: memref<1x32xf32, #tpu.memory_space<vmem>>, %arg4: memref<64x256xf32, #tpu.memory_space<vmem>>, %arg5: memref<1x256xf32, #tpu.memory_space<vmem>>, %arg6: memref<864x128xbf16, #tpu.memory_space<vmem>>, %arg7: memref<27x256xf32, #tpu.memory_space<vmem>>, %arg8: memref<256x256xbf16, #tpu.memory_space<vmem>>, %arg9: memref<1x256xf32, #tpu.memory_space<vmem>>, %arg10: memref<1x256xf32, #tpu.memory_space<vmem>>, %arg11: memref<64x64xf32, #tpu.memory_space<vmem>>, %arg12: memref<1x64xf32, #tpu.memory_space<vmem>>, %arg13: memref<1x64xf32, #tpu.memory_space<vmem>>, %arg14: memref<1x64xf32, #tpu.memory_space<vmem>>, %arg15: memref<64x256xf32, #tpu.memory_space<vmem>>, %arg16: memref<1x256xf32, #tpu.memory_space<vmem>>, %arg17: memref<256x64xf32, #tpu.memory_space<vmem>>, %arg18: memref<1x64xf32, #tpu.memory_space<vmem>>, %arg19: memref<2x32x64xf32, #tpu.memory_space<vmem>>) attributes {dimension_semantics = [#tpu.dimension_semantics<arbitrary>], iteration_bounds = array<i64: 1>, scalar_prefetch = 0 : i64, scratch_operands = 0 : i64, tpu.core_type = #tpu.core_type<tc>, window_params = [{pipeline_mode = #tpu.pipeline_mode<synchronous>, transform_indices = @transform_0, window_bounds = array<i64: 2, 128, 64>}, {pipeline_mode = #tpu.pipeline_mode<synchronous>, transform_indices = @transform_1, window_bounds = array<i64: 1, 32>}, {pipeline_mode = #tpu.pipeline_mode<synchronous>, transform_indices = @transform_2, window_bounds = array<i64: 1, 32>}, {pipeline_mode = #tpu.pipeline_mode<synchronous>, transform_indices = @transform_3, window_bounds = array<i64: 64, 256>}, {pipeline_mode = #tpu.pipeline_mode<synchronous>, transform_indices = @transform_4, window_bounds = array<i64: 1, 256>}, {pipeline_mode = #tpu.pipeline_mode<synchronous>, transform_indices = @transform_5, window_bounds = array<i64: 864, 128>}, {pipeline_mode = #tpu.pipeline_mode<synchronous>, transform_indices = @transform_6, window_bounds = array<i64: 27, 256>}, {pipeline_mode = #tpu.pipeline_mode<synchronous>, transform_indices = @transform_7, window_bounds = array<i64: 256, 256>}, {pipeline_mode = #tpu.pipeline_mode<synchronous>, transform_indices = @transform_8, window_bounds = array<i64: 1, 256>}, {pipeline_mode = #tpu.pipeline_mode<synchronous>, transform_indices = @transform_9, window_bounds = array<i64: 1, 256>}, {pipeline_mode = #tpu.pipeline_mode<synchronous>, transform_indices = @transform_10, window_bounds = array<i64: 64, 64>}, {pipeline_mode = #tpu.pipeline_mode<synchronous>, transform_indices = @transform_11, window_bounds = array<i64: 1, 64>}, {pipeline_mode = #tpu.pipeline_mode<synchronous>, transform_indices = @transform_12, window_bounds = array<i64: 1, 64>}, {pipeline_mode = #tpu.pipeline_mode<synchronous>, transform_indices = @transform_13, window_bounds = array<i64: 1, 64>}, {pipeline_mode = #tpu.pipeline_mode<synchronous>, transform_indices = @transform_14, window_bounds = array<i64: 64, 256>}, {pipeline_mode = #tpu.pipeline_mode<synchronous>, transform_indices = @transform_15, window_bounds = array<i64: 1, 256>}, {pipeline_mode = #tpu.pipeline_mode<synchronous>, transform_indices = @transform_16, window_bounds = array<i64: 256, 64>}, {pipeline_mode = #tpu.pipeline_mode<synchronous>, transform_indices = @transform_17, window_bounds = array<i64: 1, 64>}, {pipeline_mode = #tpu.pipeline_mode<synchronous>, transform_indices = @transform_18, window_bounds = array<i64: 2, 32, 64>}]} {
    %c0 = arith.constant 0 : index
    %c0_0 = arith.constant 0 : index
    %c0_1 = arith.constant 0 : index
    %0 = vector.load %arg1[%c0, %c0_0, %c0_1] : memref<2x128x64xf32, #tpu.memory_space<vmem>>, vector<2x128x64xf32>
    %1 = vector.shape_cast %0 : vector<2x128x64xf32> to vector<256x64xf32>
    %2 = vector.extract_strided_slice %1 {offsets = [0, 0], sizes = [256, 32], strides = [1, 1]} : vector<256x64xf32> to vector<256x32xf32>
    %3 = vector.extract_strided_slice %1 {offsets = [0, 32], sizes = [256, 32], strides = [1, 1]} : vector<256x64xf32> to vector<256x32xf32>
    %4 = arith.addf %2, %3 : vector<256x32xf32>
    %cst = arith.constant 5.000000e-01 : f32
    %5 = vector.broadcast %cst : f32 to vector<256x32xf32>
    %6 = arith.mulf %5, %4 : vector<256x32xf32>
    %cst_2 = arith.constant dense<0.000000e+00> : vector<256xf32>
    %7 = vector.multi_reduction <add>, %6, %cst_2 [1] : vector<256x32xf32> to vector<256xf32>
    %8 = vector.shape_cast %7 : vector<256xf32> to vector<256x1xf32>
    %cst_3 = arith.constant 3.200000e+01 : f32
    %9 = vector.broadcast %cst_3 : f32 to vector<256x1xf32>
    %10 = arith.divf %8, %9 : vector<256x1xf32>
    %11 = vector.broadcast %10 : vector<256x1xf32> to vector<256x32xf32>
    %12 = arith.subf %6, %11 : vector<256x32xf32>
    %13 = arith.mulf %12, %12 : vector<256x32xf32>
    %cst_4 = arith.constant dense<0.000000e+00> : vector<256xf32>
    %14 = vector.multi_reduction <add>, %13, %cst_4 [1] : vector<256x32xf32> to vector<256xf32>
    %15 = vector.shape_cast %14 : vector<256xf32> to vector<256x1xf32>
    %cst_5 = arith.constant 3.200000e+01 : f32
    %16 = vector.broadcast %cst_5 : f32 to vector<256x1xf32>
    %17 = arith.divf %15, %16 : vector<256x1xf32>
    %cst_6 = arith.constant 9.99999997E-7 : f32
    %18 = vector.broadcast %cst_6 : f32 to vector<256x1xf32>
    %19 = arith.addf %17, %18 : vector<256x1xf32>
    %20 = math.rsqrt %19 : vector<256x1xf32>
    %21 = vector.broadcast %20 : vector<256x1xf32> to vector<256x32xf32>
    %22 = arith.mulf %12, %21 : vector<256x32xf32>
    %c0_7 = arith.constant 0 : index
    %c0_8 = arith.constant 0 : index
    %23 = vector.load %arg2[%c0_7, %c0_8] : memref<1x32xf32, #tpu.memory_space<vmem>>, vector<1x32xf32>
    %24 = vector.broadcast %23 : vector<1x32xf32> to vector<256x32xf32>
    %25 = arith.mulf %22, %24 : vector<256x32xf32>
    %c0_9 = arith.constant 0 : index
    %c0_10 = arith.constant 0 : index
    %26 = vector.load %arg3[%c0_9, %c0_10] : memref<1x32xf32, #tpu.memory_space<vmem>>, vector<1x32xf32>
    %27 = vector.broadcast %26 : vector<1x32xf32> to vector<256x32xf32>
    %28 = arith.addf %25, %27 : vector<256x32xf32>
    %29 = tpu.concatenate %6, %28 in 1 : vector<256x32xf32>, vector<256x32xf32> -> vector<256x64xf32>
    %c0_11 = arith.constant 0 : index
    %c0_12 = arith.constant 0 : index
    %30 = vector.load %arg4[%c0_11, %c0_12] : memref<64x256xf32, #tpu.memory_space<vmem>>, vector<64x256xf32>
    %cst_13 = arith.constant dense<0.000000e+00> : vector<256x256xf32>
    %31 = tpu.matmul %29, %30, %cst_13 {dimension_numbers = #tpu.dot_dimension_numbers<[1], [0], [0], [1], [0, 0, 1, 1], [], []>} : vector<256x64xf32>, vector<64x256xf32>, vector<256x256xf32> -> vector<256x256xf32>
    %c0_14 = arith.constant 0 : index
    %c0_15 = arith.constant 0 : index
    %32 = vector.load %arg5[%c0_14, %c0_15] : memref<1x256xf32, #tpu.memory_space<vmem>>, vector<1x256xf32>
    %33 = vector.broadcast %32 : vector<1x256xf32> to vector<256x256xf32>
    %34 = arith.addf %31, %33 : vector<256x256xf32>
    %c0_16 = arith.constant 0 : index
    %c0_17 = arith.constant 0 : index
    %35 = vector.load %arg8[%c0_16, %c0_17] : memref<256x256xbf16, #tpu.memory_space<vmem>>, vector<256x256xbf16>
    %36 = arith.extf %35 : vector<256x256xbf16> to vector<256x256xf32>
    %37 = vector.extract_strided_slice %34 {offsets = [0, 0], sizes = [128, 256], strides = [1, 1]} : vector<256x256xf32> to vector<128x256xf32>
    %cst_18 = arith.constant 0.000000e+00 : f32
    %38 = vector.broadcast %cst_18 : f32 to vector<32x256xf32>
    %c0_19 = arith.constant 0 : index
    %c0_20 = arith.constant 0 : index
    %39 = vector.load %arg6[%c0_19, %c0_20] : memref<864x128xbf16, #tpu.memory_space<vmem>>, vector<96x128xbf16>
    %40 = arith.extf %39 : vector<96x128xbf16> to vector<96x128xf32>
    %cst_21 = arith.constant dense<0.000000e+00> : vector<96x256xf32>
    %41 = tpu.matmul %40, %37, %cst_21 {dimension_numbers = #tpu.dot_dimension_numbers<[1], [0], [0], [1], [0, 0, 1, 1], [], []>} : vector<96x128xf32>, vector<128x256xf32>, vector<96x256xf32> -> vector<96x256xf32>
    %42 = vector.extract_strided_slice %41 {offsets = [0, 0], sizes = [32, 256], strides = [1, 1]} : vector<96x256xf32> to vector<32x256xf32>
    %c0_22 = arith.constant 0 : index
    %c0_23 = arith.constant 0 : index
    %43 = vector.load %arg7[%c0_22, %c0_23] : memref<27x256xf32, #tpu.memory_space<vmem>>, vector<1x256xf32>
    %44 = vector.broadcast %43 : vector<1x256xf32> to vector<32x256xf32>
    %45 = arith.mulf %42, %44 : vector<32x256xf32>
    %46 = arith.addf %38, %45 : vector<32x256xf32>
    %47 = vector.extract_strided_slice %41 {offsets = [32, 0], sizes = [32, 256], strides = [1, 1]} : vector<96x256xf32> to vector<32x256xf32>
    %c1 = arith.constant 1 : index
    %c0_24 = arith.constant 0 : index
    %48 = vector.load %arg7[%c1, %c0_24] : memref<27x256xf32, #tpu.memory_space<vmem>>, vector<1x256xf32>
    %49 = vector.broadcast %48 : vector<1x256xf32> to vector<32x256xf32>
    %50 = arith.mulf %47, %49 : vector<32x256xf32>
    %51 = arith.addf %46, %50 : vector<32x256xf32>
    %52 = vector.extract_strided_slice %41 {offsets = [64, 0], sizes = [32, 256], strides = [1, 1]} : vector<96x256xf32> to vector<32x256xf32>
    %c2 = arith.constant 2 : index
    %c0_25 = arith.constant 0 : index
    %53 = vector.load %arg7[%c2, %c0_25] : memref<27x256xf32, #tpu.memory_space<vmem>>, vector<1x256xf32>
    %54 = vector.broadcast %53 : vector<1x256xf32> to vector<32x256xf32>
    %55 = arith.mulf %52, %54 : vector<32x256xf32>
    %56 = arith.addf %51, %55 : vector<32x256xf32>
    %c96 = arith.constant 96 : index
    %c0_26 = arith.constant 0 : index
    %57 = vector.load %arg6[%c96, %c0_26] : memref<864x128xbf16, #tpu.memory_space<vmem>>, vector<96x128xbf16>
    %58 = arith.extf %57 : vector<96x128xbf16> to vector<96x128xf32>
    %cst_27 = arith.constant dense<0.000000e+00> : vector<96x256xf32>
    %59 = tpu.matmul %58, %37, %cst_27 {dimension_numbers = #tpu.dot_dimension_numbers<[1], [0], [0], [1], [0, 0, 1, 1], [], []>} : vector<96x128xf32>, vector<128x256xf32>, vector<96x256xf32> -> vector<96x256xf32>
    %60 = vector.extract_strided_slice %59 {offsets = [0, 0], sizes = [32, 256], strides = [1, 1]} : vector<96x256xf32> to vector<32x256xf32>
    %c3 = arith.constant 3 : index
    %c0_28 = arith.constant 0 : index
    %61 = vector.load %arg7[%c3, %c0_28] : memref<27x256xf32, #tpu.memory_space<vmem>>, vector<1x256xf32>
    %62 = vector.broadcast %61 : vector<1x256xf32> to vector<32x256xf32>
    %63 = arith.mulf %60, %62 : vector<32x256xf32>
    %64 = arith.addf %56, %63 : vector<32x256xf32>
    %65 = vector.extract_strided_slice %59 {offsets = [32, 0], sizes = [32, 256], strides = [1, 1]} : vector<96x256xf32> to vector<32x256xf32>
    %c4 = arith.constant 4 : index
    %c0_29 = arith.constant 0 : index
    %66 = vector.load %arg7[%c4, %c0_29] : memref<27x256xf32, #tpu.memory_space<vmem>>, vector<1x256xf32>
    %67 = vector.broadcast %66 : vector<1x256xf32> to vector<32x256xf32>
    %68 = arith.mulf %65, %67 : vector<32x256xf32>
    %69 = arith.addf %64, %68 : vector<32x256xf32>
    %70 = vector.extract_strided_slice %59 {offsets = [64, 0], sizes = [32, 256], strides = [1, 1]} : vector<96x256xf32> to vector<32x256xf32>
    %c5 = arith.constant 5 : index
    %c0_30 = arith.constant 0 : index
    %71 = vector.load %arg7[%c5, %c0_30] : memref<27x256xf32, #tpu.memory_space<vmem>>, vector<1x256xf32>
    %72 = vector.broadcast %71 : vector<1x256xf32> to vector<32x256xf32>
    %73 = arith.mulf %70, %72 : vector<32x256xf32>
    %74 = arith.addf %69, %73 : vector<32x256xf32>
    %c192 = arith.constant 192 : index
    %c0_31 = arith.constant 0 : index
    %75 = vector.load %arg6[%c192, %c0_31] : memref<864x128xbf16, #tpu.memory_space<vmem>>, vector<96x128xbf16>
    %76 = arith.extf %75 : vector<96x128xbf16> to vector<96x128xf32>
    %cst_32 = arith.constant dense<0.000000e+00> : vector<96x256xf32>
    %77 = tpu.matmul %76, %37, %cst_32 {dimension_numbers = #tpu.dot_dimension_numbers<[1], [0], [0], [1], [0, 0, 1, 1], [], []>} : vector<96x128xf32>, vector<128x256xf32>, vector<96x256xf32> -> vector<96x256xf32>
    %78 = vector.extract_strided_slice %77 {offsets = [0, 0], sizes = [32, 256], strides = [1, 1]} : vector<96x256xf32> to vector<32x256xf32>
    %c6 = arith.constant 6 : index
    %c0_33 = arith.constant 0 : index
    %79 = vector.load %arg7[%c6, %c0_33] : memref<27x256xf32, #tpu.memory_space<vmem>>, vector<1x256xf32>
    %80 = vector.broadcast %79 : vector<1x256xf32> to vector<32x256xf32>
    %81 = arith.mulf %78, %80 : vector<32x256xf32>
    %82 = arith.addf %74, %81 : vector<32x256xf32>
    %83 = vector.extract_strided_slice %77 {offsets = [32, 0], sizes = [32, 256], strides = [1, 1]} : vector<96x256xf32> to vector<32x256xf32>
    %c7 = arith.constant 7 : index
    %c0_34 = arith.constant 0 : index
    %84 = vector.load %arg7[%c7, %c0_34] : memref<27x256xf32, #tpu.memory_space<vmem>>, vector<1x256xf32>
    %85 = vector.broadcast %84 : vector<1x256xf32> to vector<32x256xf32>
    %86 = arith.mulf %83, %85 : vector<32x256xf32>
    %87 = arith.addf %82, %86 : vector<32x256xf32>
    %88 = vector.extract_strided_slice %77 {offsets = [64, 0], sizes = [32, 256], strides = [1, 1]} : vector<96x256xf32> to vector<32x256xf32>
    %c8 = arith.constant 8 : index
    %c0_35 = arith.constant 0 : index
    %89 = vector.load %arg7[%c8, %c0_35] : memref<27x256xf32, #tpu.memory_space<vmem>>, vector<1x256xf32>
    %90 = vector.broadcast %89 : vector<1x256xf32> to vector<32x256xf32>
    %91 = arith.mulf %88, %90 : vector<32x256xf32>
    %92 = arith.addf %87, %91 : vector<32x256xf32>
    %c288 = arith.constant 288 : index
    %c0_36 = arith.constant 0 : index
    %93 = vector.load %arg6[%c288, %c0_36] : memref<864x128xbf16, #tpu.memory_space<vmem>>, vector<96x128xbf16>
    %94 = arith.extf %93 : vector<96x128xbf16> to vector<96x128xf32>
    %cst_37 = arith.constant dense<0.000000e+00> : vector<96x256xf32>
    %95 = tpu.matmul %94, %37, %cst_37 {dimension_numbers = #tpu.dot_dimension_numbers<[1], [0], [0], [1], [0, 0, 1, 1], [], []>} : vector<96x128xf32>, vector<128x256xf32>, vector<96x256xf32> -> vector<96x256xf32>
    %96 = vector.extract_strided_slice %95 {offsets = [0, 0], sizes = [32, 256], strides = [1, 1]} : vector<96x256xf32> to vector<32x256xf32>
    %c9 = arith.constant 9 : index
    %c0_38 = arith.constant 0 : index
    %97 = vector.load %arg7[%c9, %c0_38] : memref<27x256xf32, #tpu.memory_space<vmem>>, vector<1x256xf32>
    %98 = vector.broadcast %97 : vector<1x256xf32> to vector<32x256xf32>
    %99 = arith.mulf %96, %98 : vector<32x256xf32>
    %100 = arith.addf %92, %99 : vector<32x256xf32>
    %101 = vector.extract_strided_slice %95 {offsets = [32, 0], sizes = [32, 256], strides = [1, 1]} : vector<96x256xf32> to vector<32x256xf32>
    %c10 = arith.constant 10 : index
    %c0_39 = arith.constant 0 : index
    %102 = vector.load %arg7[%c10, %c0_39] : memref<27x256xf32, #tpu.memory_space<vmem>>, vector<1x256xf32>
    %103 = vector.broadcast %102 : vector<1x256xf32> to vector<32x256xf32>
    %104 = arith.mulf %101, %103 : vector<32x256xf32>
    %105 = arith.addf %100, %104 : vector<32x256xf32>
    %106 = vector.extract_strided_slice %95 {offsets = [64, 0], sizes = [32, 256], strides = [1, 1]} : vector<96x256xf32> to vector<32x256xf32>
    %c11 = arith.constant 11 : index
    %c0_40 = arith.constant 0 : index
    %107 = vector.load %arg7[%c11, %c0_40] : memref<27x256xf32, #tpu.memory_space<vmem>>, vector<1x256xf32>
    %108 = vector.broadcast %107 : vector<1x256xf32> to vector<32x256xf32>
    %109 = arith.mulf %106, %108 : vector<32x256xf32>
    %110 = arith.addf %105, %109 : vector<32x256xf32>
    %c384 = arith.constant 384 : index
    %c0_41 = arith.constant 0 : index
    %111 = vector.load %arg6[%c384, %c0_41] : memref<864x128xbf16, #tpu.memory_space<vmem>>, vector<96x128xbf16>
    %112 = arith.extf %111 : vector<96x128xbf16> to vector<96x128xf32>
    %cst_42 = arith.constant dense<0.000000e+00> : vector<96x256xf32>
    %113 = tpu.matmul %112, %37, %cst_42 {dimension_numbers = #tpu.dot_dimension_numbers<[1], [0], [0], [1], [0, 0, 1, 1], [], []>} : vector<96x128xf32>, vector<128x256xf32>, vector<96x256xf32> -> vector<96x256xf32>
    %114 = vector.extract_strided_slice %113 {offsets = [0, 0], sizes = [32, 256], strides = [1, 1]} : vector<96x256xf32> to vector<32x256xf32>
    %c12 = arith.constant 12 : index
    %c0_43 = arith.constant 0 : index
    %115 = vector.load %arg7[%c12, %c0_43] : memref<27x256xf32, #tpu.memory_space<vmem>>, vector<1x256xf32>
    %116 = vector.broadcast %115 : vector<1x256xf32> to vector<32x256xf32>
    %117 = arith.mulf %114, %116 : vector<32x256xf32>
    %118 = arith.addf %110, %117 : vector<32x256xf32>
    %119 = vector.extract_strided_slice %113 {offsets = [32, 0], sizes = [32, 256], strides = [1, 1]} : vector<96x256xf32> to vector<32x256xf32>
    %c13 = arith.constant 13 : index
    %c0_44 = arith.constant 0 : index
    %120 = vector.load %arg7[%c13, %c0_44] : memref<27x256xf32, #tpu.memory_space<vmem>>, vector<1x256xf32>
    %121 = vector.broadcast %120 : vector<1x256xf32> to vector<32x256xf32>
    %122 = arith.mulf %119, %121 : vector<32x256xf32>
    %123 = arith.addf %118, %122 : vector<32x256xf32>
    %124 = vector.extract_strided_slice %113 {offsets = [64, 0], sizes = [32, 256], strides = [1, 1]} : vector<96x256xf32> to vector<32x256xf32>
    %c14 = arith.constant 14 : index
    %c0_45 = arith.constant 0 : index
    %125 = vector.load %arg7[%c14, %c0_45] : memref<27x256xf32, #tpu.memory_space<vmem>>, vector<1x256xf32>
    %126 = vector.broadcast %125 : vector<1x256xf32> to vector<32x256xf32>
    %127 = arith.mulf %124, %126 : vector<32x256xf32>
    %128 = arith.addf %123, %127 : vector<32x256xf32>
    %c480 = arith.constant 480 : index
    %c0_46 = arith.constant 0 : index
    %129 = vector.load %arg6[%c480, %c0_46] : memref<864x128xbf16, #tpu.memory_space<vmem>>, vector<96x128xbf16>
    %130 = arith.extf %129 : vector<96x128xbf16> to vector<96x128xf32>
    %cst_47 = arith.constant dense<0.000000e+00> : vector<96x256xf32>
    %131 = tpu.matmul %130, %37, %cst_47 {dimension_numbers = #tpu.dot_dimension_numbers<[1], [0], [0], [1], [0, 0, 1, 1], [], []>} : vector<96x128xf32>, vector<128x256xf32>, vector<96x256xf32> -> vector<96x256xf32>
    %132 = vector.extract_strided_slice %131 {offsets = [0, 0], sizes = [32, 256], strides = [1, 1]} : vector<96x256xf32> to vector<32x256xf32>
    %c15 = arith.constant 15 : index
    %c0_48 = arith.constant 0 : index
    %133 = vector.load %arg7[%c15, %c0_48] : memref<27x256xf32, #tpu.memory_space<vmem>>, vector<1x256xf32>
    %134 = vector.broadcast %133 : vector<1x256xf32> to vector<32x256xf32>
    %135 = arith.mulf %132, %134 : vector<32x256xf32>
    %136 = arith.addf %128, %135 : vector<32x256xf32>
    %137 = vector.extract_strided_slice %131 {offsets = [32, 0], sizes = [32, 256], strides = [1, 1]} : vector<96x256xf32> to vector<32x256xf32>
    %c16 = arith.constant 16 : index
    %c0_49 = arith.constant 0 : index
    %138 = vector.load %arg7[%c16, %c0_49] : memref<27x256xf32, #tpu.memory_space<vmem>>, vector<1x256xf32>
    %139 = vector.broadcast %138 : vector<1x256xf32> to vector<32x256xf32>
    %140 = arith.mulf %137, %139 : vector<32x256xf32>
    %141 = arith.addf %136, %140 : vector<32x256xf32>
    %142 = vector.extract_strided_slice %131 {offsets = [64, 0], sizes = [32, 256], strides = [1, 1]} : vector<96x256xf32> to vector<32x256xf32>
    %c17 = arith.constant 17 : index
    %c0_50 = arith.constant 0 : index
    %143 = vector.load %arg7[%c17, %c0_50] : memref<27x256xf32, #tpu.memory_space<vmem>>, vector<1x256xf32>
    %144 = vector.broadcast %143 : vector<1x256xf32> to vector<32x256xf32>
    %145 = arith.mulf %142, %144 : vector<32x256xf32>
    %146 = arith.addf %141, %145 : vector<32x256xf32>
    %c576 = arith.constant 576 : index
    %c0_51 = arith.constant 0 : index
    %147 = vector.load %arg6[%c576, %c0_51] : memref<864x128xbf16, #tpu.memory_space<vmem>>, vector<96x128xbf16>
    %148 = arith.extf %147 : vector<96x128xbf16> to vector<96x128xf32>
    %cst_52 = arith.constant dense<0.000000e+00> : vector<96x256xf32>
    %149 = tpu.matmul %148, %37, %cst_52 {dimension_numbers = #tpu.dot_dimension_numbers<[1], [0], [0], [1], [0, 0, 1, 1], [], []>} : vector<96x128xf32>, vector<128x256xf32>, vector<96x256xf32> -> vector<96x256xf32>
    %150 = vector.extract_strided_slice %149 {offsets = [0, 0], sizes = [32, 256], strides = [1, 1]} : vector<96x256xf32> to vector<32x256xf32>
    %c18 = arith.constant 18 : index
    %c0_53 = arith.constant 0 : index
    %151 = vector.load %arg7[%c18, %c0_53] : memref<27x256xf32, #tpu.memory_space<vmem>>, vector<1x256xf32>
    %152 = vector.broadcast %151 : vector<1x256xf32> to vector<32x256xf32>
    %153 = arith.mulf %150, %152 : vector<32x256xf32>
    %154 = arith.addf %146, %153 : vector<32x256xf32>
    %155 = vector.extract_strided_slice %149 {offsets = [32, 0], sizes = [32, 256], strides = [1, 1]} : vector<96x256xf32> to vector<32x256xf32>
    %c19 = arith.constant 19 : index
    %c0_54 = arith.constant 0 : index
    %156 = vector.load %arg7[%c19, %c0_54] : memref<27x256xf32, #tpu.memory_space<vmem>>, vector<1x256xf32>
    %157 = vector.broadcast %156 : vector<1x256xf32> to vector<32x256xf32>
    %158 = arith.mulf %155, %157 : vector<32x256xf32>
    %159 = arith.addf %154, %158 : vector<32x256xf32>
    %160 = vector.extract_strided_slice %149 {offsets = [64, 0], sizes = [32, 256], strides = [1, 1]} : vector<96x256xf32> to vector<32x256xf32>
    %c20 = arith.constant 20 : index
    %c0_55 = arith.constant 0 : index
    %161 = vector.load %arg7[%c20, %c0_55] : memref<27x256xf32, #tpu.memory_space<vmem>>, vector<1x256xf32>
    %162 = vector.broadcast %161 : vector<1x256xf32> to vector<32x256xf32>
    %163 = arith.mulf %160, %162 : vector<32x256xf32>
    %164 = arith.addf %159, %163 : vector<32x256xf32>
    %c672 = arith.constant 672 : index
    %c0_56 = arith.constant 0 : index
    %165 = vector.load %arg6[%c672, %c0_56] : memref<864x128xbf16, #tpu.memory_space<vmem>>, vector<96x128xbf16>
    %166 = arith.extf %165 : vector<96x128xbf16> to vector<96x128xf32>
    %cst_57 = arith.constant dense<0.000000e+00> : vector<96x256xf32>
    %167 = tpu.matmul %166, %37, %cst_57 {dimension_numbers = #tpu.dot_dimension_numbers<[1], [0], [0], [1], [0, 0, 1, 1], [], []>} : vector<96x128xf32>, vector<128x256xf32>, vector<96x256xf32> -> vector<96x256xf32>
    %168 = vector.extract_strided_slice %167 {offsets = [0, 0], sizes = [32, 256], strides = [1, 1]} : vector<96x256xf32> to vector<32x256xf32>
    %c21 = arith.constant 21 : index
    %c0_58 = arith.constant 0 : index
    %169 = vector.load %arg7[%c21, %c0_58] : memref<27x256xf32, #tpu.memory_space<vmem>>, vector<1x256xf32>
    %170 = vector.broadcast %169 : vector<1x256xf32> to vector<32x256xf32>
    %171 = arith.mulf %168, %170 : vector<32x256xf32>
    %172 = arith.addf %164, %171 : vector<32x256xf32>
    %173 = vector.extract_strided_slice %167 {offsets = [32, 0], sizes = [32, 256], strides = [1, 1]} : vector<96x256xf32> to vector<32x256xf32>
    %c22 = arith.constant 22 : index
    %c0_59 = arith.constant 0 : index
    %174 = vector.load %arg7[%c22, %c0_59] : memref<27x256xf32, #tpu.memory_space<vmem>>, vector<1x256xf32>
    %175 = vector.broadcast %174 : vector<1x256xf32> to vector<32x256xf32>
    %176 = arith.mulf %173, %175 : vector<32x256xf32>
    %177 = arith.addf %172, %176 : vector<32x256xf32>
    %178 = vector.extract_strided_slice %167 {offsets = [64, 0], sizes = [32, 256], strides = [1, 1]} : vector<96x256xf32> to vector<32x256xf32>
    %c23 = arith.constant 23 : index
    %c0_60 = arith.constant 0 : index
    %179 = vector.load %arg7[%c23, %c0_60] : memref<27x256xf32, #tpu.memory_space<vmem>>, vector<1x256xf32>
    %180 = vector.broadcast %179 : vector<1x256xf32> to vector<32x256xf32>
    %181 = arith.mulf %178, %180 : vector<32x256xf32>
    %182 = arith.addf %177, %181 : vector<32x256xf32>
    %c768 = arith.constant 768 : index
    %c0_61 = arith.constant 0 : index
    %183 = vector.load %arg6[%c768, %c0_61] : memref<864x128xbf16, #tpu.memory_space<vmem>>, vector<96x128xbf16>
    %184 = arith.extf %183 : vector<96x128xbf16> to vector<96x128xf32>
    %cst_62 = arith.constant dense<0.000000e+00> : vector<96x256xf32>
    %185 = tpu.matmul %184, %37, %cst_62 {dimension_numbers = #tpu.dot_dimension_numbers<[1], [0], [0], [1], [0, 0, 1, 1], [], []>} : vector<96x128xf32>, vector<128x256xf32>, vector<96x256xf32> -> vector<96x256xf32>
    %186 = vector.extract_strided_slice %185 {offsets = [0, 0], sizes = [32, 256], strides = [1, 1]} : vector<96x256xf32> to vector<32x256xf32>
    %c24 = arith.constant 24 : index
    %c0_63 = arith.constant 0 : index
    %187 = vector.load %arg7[%c24, %c0_63] : memref<27x256xf32, #tpu.memory_space<vmem>>, vector<1x256xf32>
    %188 = vector.broadcast %187 : vector<1x256xf32> to vector<32x256xf32>
    %189 = arith.mulf %186, %188 : vector<32x256xf32>
    %190 = arith.addf %182, %189 : vector<32x256xf32>
    %191 = vector.extract_strided_slice %185 {offsets = [32, 0], sizes = [32, 256], strides = [1, 1]} : vector<96x256xf32> to vector<32x256xf32>
    %c25 = arith.constant 25 : index
    %c0_64 = arith.constant 0 : index
    %192 = vector.load %arg7[%c25, %c0_64] : memref<27x256xf32, #tpu.memory_space<vmem>>, vector<1x256xf32>
    %193 = vector.broadcast %192 : vector<1x256xf32> to vector<32x256xf32>
    %194 = arith.mulf %191, %193 : vector<32x256xf32>
    %195 = arith.addf %190, %194 : vector<32x256xf32>
    %196 = vector.extract_strided_slice %185 {offsets = [64, 0], sizes = [32, 256], strides = [1, 1]} : vector<96x256xf32> to vector<32x256xf32>
    %c26 = arith.constant 26 : index
    %c0_65 = arith.constant 0 : index
    %197 = vector.load %arg7[%c26, %c0_65] : memref<27x256xf32, #tpu.memory_space<vmem>>, vector<1x256xf32>
    %198 = vector.broadcast %197 : vector<1x256xf32> to vector<32x256xf32>
    %199 = arith.mulf %196, %198 : vector<32x256xf32>
    %200 = arith.addf %195, %199 : vector<32x256xf32>
    %cst_66 = arith.constant dense<0.000000e+00> : vector<32x256xf32>
    %201 = tpu.matmul %200, %36, %cst_66 {dimension_numbers = #tpu.dot_dimension_numbers<[1], [0], [0], [1], [0, 0, 1, 1], [], []>} : vector<32x256xf32>, vector<256x256xf32>, vector<32x256xf32> -> vector<32x256xf32>
    %202 = arith.subf %200, %201 : vector<32x256xf32>
    %203 = arith.mulf %202, %202 : vector<32x256xf32>
    %cst_67 = arith.constant dense<0.000000e+00> : vector<32x256xf32>
    %204 = tpu.matmul %203, %36, %cst_67 {dimension_numbers = #tpu.dot_dimension_numbers<[1], [0], [0], [1], [0, 0, 1, 1], [], []>} : vector<32x256xf32>, vector<256x256xf32>, vector<32x256xf32> -> vector<32x256xf32>
    %cst_68 = arith.constant 9.99999974E-6 : f32
    %205 = vector.broadcast %cst_68 : f32 to vector<32x256xf32>
    %206 = arith.addf %204, %205 : vector<32x256xf32>
    %207 = math.rsqrt %206 : vector<32x256xf32>
    %208 = arith.mulf %202, %207 : vector<32x256xf32>
    %c0_69 = arith.constant 0 : index
    %c0_70 = arith.constant 0 : index
    %209 = vector.load %arg9[%c0_69, %c0_70] : memref<1x256xf32, #tpu.memory_space<vmem>>, vector<1x256xf32>
    %210 = vector.broadcast %209 : vector<1x256xf32> to vector<32x256xf32>
    %211 = arith.mulf %208, %210 : vector<32x256xf32>
    %c0_71 = arith.constant 0 : index
    %c0_72 = arith.constant 0 : index
    %212 = vector.load %arg10[%c0_71, %c0_72] : memref<1x256xf32, #tpu.memory_space<vmem>>, vector<1x256xf32>
    %213 = vector.broadcast %212 : vector<1x256xf32> to vector<32x256xf32>
    %214 = arith.addf %211, %213 : vector<32x256xf32>
    %215 = vector.extract_strided_slice %214 {offsets = [0, 0], sizes = [32, 64], strides = [1, 1]} : vector<32x256xf32> to vector<32x64xf32>
    %c0_73 = arith.constant 0 : index
    %c0_74 = arith.constant 0 : index
    %216 = vector.load %arg12[%c0_73, %c0_74] : memref<1x64xf32, #tpu.memory_space<vmem>>, vector<1x64xf32>
    %217 = vector.broadcast %216 : vector<1x64xf32> to vector<32x64xf32>
    %218 = arith.addf %215, %217 : vector<32x64xf32>
    %219 = vector.extract_strided_slice %214 {offsets = [0, 64], sizes = [32, 32], strides = [1, 1]} : vector<32x256xf32> to vector<32x32xf32>
    %220 = vector.extract_strided_slice %214 {offsets = [0, 128], sizes = [32, 32], strides = [1, 1]} : vector<32x256xf32> to vector<32x32xf32>
    %221 = vector.extract_strided_slice %214 {offsets = [0, 192], sizes = [32, 32], strides = [1, 1]} : vector<32x256xf32> to vector<32x32xf32>
    %cst_75 = arith.constant 0.176776692 : f32
    %222 = vector.broadcast %cst_75 : f32 to vector<32x32xf32>
    %223 = arith.mulf %219, %222 : vector<32x32xf32>
    %cst_76 = arith.constant dense<0.000000e+00> : vector<32x32xf32>
    %224 = tpu.matmul %223, %220, %cst_76 {dimension_numbers = #tpu.dot_dimension_numbers<[1], [1], [0], [0], [0, 0, 1, 0], [], []>} : vector<32x32xf32>, vector<32x32xf32>, vector<32x32xf32> -> vector<32x32xf32>
    %cst_77 = arith.constant dense<0xFF800000> : vector<32xf32>
    %225 = vector.multi_reduction <maximumf>, %224, %cst_77 [1] : vector<32x32xf32> to vector<32xf32>
    %226 = vector.shape_cast %225 : vector<32xf32> to vector<32x1xf32>
    %227 = vector.broadcast %226 : vector<32x1xf32> to vector<32x32xf32>
    %228 = arith.subf %224, %227 : vector<32x32xf32>
    %229 = math.exp %228 : vector<32x32xf32>
    %cst_78 = arith.constant dense<0.000000e+00> : vector<32xf32>
    %230 = vector.multi_reduction <add>, %229, %cst_78 [1] : vector<32x32xf32> to vector<32xf32>
    %231 = vector.shape_cast %230 : vector<32xf32> to vector<32x1xf32>
    %232 = tpu.reciprocal %231 {approx = true} : vector<32x1xf32> -> vector<32x1xf32>
    %233 = vector.broadcast %232 : vector<32x1xf32> to vector<32x32xf32>
    %234 = arith.mulf %229, %233 : vector<32x32xf32>
    %cst_79 = arith.constant dense<0.000000e+00> : vector<32x32xf32>
    %235 = tpu.matmul %234, %221, %cst_79 {dimension_numbers = #tpu.dot_dimension_numbers<[1], [0], [0], [1], [0, 0, 1, 1], [], []>} : vector<32x32xf32>, vector<32x32xf32>, vector<32x32xf32> -> vector<32x32xf32>
    %236 = arith.addf %235, %219 : vector<32x32xf32>
    %c0_80 = arith.constant 0 : index
    %c0_81 = arith.constant 0 : index
    %237 = vector.load %arg11[%c0_80, %c0_81] : memref<64x64xf32, #tpu.memory_space<vmem>>, vector<32x64xf32>
    %cst_82 = arith.constant dense<0.000000e+00> : vector<32x64xf32>
    %238 = tpu.matmul %236, %237, %cst_82 {dimension_numbers = #tpu.dot_dimension_numbers<[1], [0], [0], [1], [0, 0, 1, 1], [], []>} : vector<32x32xf32>, vector<32x64xf32>, vector<32x64xf32> -> vector<32x64xf32>
    %239 = arith.addf %218, %238 : vector<32x64xf32>
    %240 = vector.extract_strided_slice %214 {offsets = [0, 96], sizes = [32, 32], strides = [1, 1]} : vector<32x256xf32> to vector<32x32xf32>
    %241 = vector.extract_strided_slice %214 {offsets = [0, 160], sizes = [32, 32], strides = [1, 1]} : vector<32x256xf32> to vector<32x32xf32>
    %242 = vector.extract_strided_slice %214 {offsets = [0, 224], sizes = [32, 32], strides = [1, 1]} : vector<32x256xf32> to vector<32x32xf32>
    %cst_83 = arith.constant 0.176776692 : f32
    %243 = vector.broadcast %cst_83 : f32 to vector<32x32xf32>
    %244 = arith.mulf %240, %243 : vector<32x32xf32>
    %cst_84 = arith.constant dense<0.000000e+00> : vector<32x32xf32>
    %245 = tpu.matmul %244, %241, %cst_84 {dimension_numbers = #tpu.dot_dimension_numbers<[1], [1], [0], [0], [0, 0, 1, 0], [], []>} : vector<32x32xf32>, vector<32x32xf32>, vector<32x32xf32> -> vector<32x32xf32>
    %cst_85 = arith.constant dense<0xFF800000> : vector<32xf32>
    %246 = vector.multi_reduction <maximumf>, %245, %cst_85 [1] : vector<32x32xf32> to vector<32xf32>
    %247 = vector.shape_cast %246 : vector<32xf32> to vector<32x1xf32>
    %248 = vector.broadcast %247 : vector<32x1xf32> to vector<32x32xf32>
    %249 = arith.subf %245, %248 : vector<32x32xf32>
    %250 = math.exp %249 : vector<32x32xf32>
    %cst_86 = arith.constant dense<0.000000e+00> : vector<32xf32>
    %251 = vector.multi_reduction <add>, %250, %cst_86 [1] : vector<32x32xf32> to vector<32xf32>
    %252 = vector.shape_cast %251 : vector<32xf32> to vector<32x1xf32>
    %253 = tpu.reciprocal %252 {approx = true} : vector<32x1xf32> -> vector<32x1xf32>
    %254 = vector.broadcast %253 : vector<32x1xf32> to vector<32x32xf32>
    %255 = arith.mulf %250, %254 : vector<32x32xf32>
    %cst_87 = arith.constant dense<0.000000e+00> : vector<32x32xf32>
    %256 = tpu.matmul %255, %242, %cst_87 {dimension_numbers = #tpu.dot_dimension_numbers<[1], [0], [0], [1], [0, 0, 1, 1], [], []>} : vector<32x32xf32>, vector<32x32xf32>, vector<32x32xf32> -> vector<32x32xf32>
    %257 = arith.addf %256, %240 : vector<32x32xf32>
    %c32 = arith.constant 32 : index
    %c0_88 = arith.constant 0 : index
    %258 = vector.load %arg11[%c32, %c0_88] : memref<64x64xf32, #tpu.memory_space<vmem>>, vector<32x64xf32>
    %cst_89 = arith.constant dense<0.000000e+00> : vector<32x64xf32>
    %259 = tpu.matmul %257, %258, %cst_89 {dimension_numbers = #tpu.dot_dimension_numbers<[1], [0], [0], [1], [0, 0, 1, 1], [], []>} : vector<32x32xf32>, vector<32x64xf32>, vector<32x64xf32> -> vector<32x64xf32>
    %260 = arith.addf %239, %259 : vector<32x64xf32>
    %261 = vector.extract_strided_slice %34 {offsets = [128, 0], sizes = [128, 256], strides = [1, 1]} : vector<256x256xf32> to vector<128x256xf32>
    %cst_90 = arith.constant 0.000000e+00 : f32
    %262 = vector.broadcast %cst_90 : f32 to vector<32x256xf32>
    %c0_91 = arith.constant 0 : index
    %c0_92 = arith.constant 0 : index
    %263 = vector.load %arg6[%c0_91, %c0_92] : memref<864x128xbf16, #tpu.memory_space<vmem>>, vector<96x128xbf16>
    %264 = arith.extf %263 : vector<96x128xbf16> to vector<96x128xf32>
    %cst_93 = arith.constant dense<0.000000e+00> : vector<96x256xf32>
    %265 = tpu.matmul %264, %261, %cst_93 {dimension_numbers = #tpu.dot_dimension_numbers<[1], [0], [0], [1], [0, 0, 1, 1], [], []>} : vector<96x128xf32>, vector<128x256xf32>, vector<96x256xf32> -> vector<96x256xf32>
    %266 = vector.extract_strided_slice %265 {offsets = [0, 0], sizes = [32, 256], strides = [1, 1]} : vector<96x256xf32> to vector<32x256xf32>
    %c0_94 = arith.constant 0 : index
    %c0_95 = arith.constant 0 : index
    %267 = vector.load %arg7[%c0_94, %c0_95] : memref<27x256xf32, #tpu.memory_space<vmem>>, vector<1x256xf32>
    %268 = vector.broadcast %267 : vector<1x256xf32> to vector<32x256xf32>
    %269 = arith.mulf %266, %268 : vector<32x256xf32>
    %270 = arith.addf %262, %269 : vector<32x256xf32>
    %271 = vector.extract_strided_slice %265 {offsets = [32, 0], sizes = [32, 256], strides = [1, 1]} : vector<96x256xf32> to vector<32x256xf32>
    %c1_96 = arith.constant 1 : index
    %c0_97 = arith.constant 0 : index
    %272 = vector.load %arg7[%c1_96, %c0_97] : memref<27x256xf32, #tpu.memory_space<vmem>>, vector<1x256xf32>
    %273 = vector.broadcast %272 : vector<1x256xf32> to vector<32x256xf32>
    %274 = arith.mulf %271, %273 : vector<32x256xf32>
    %275 = arith.addf %270, %274 : vector<32x256xf32>
    %276 = vector.extract_strided_slice %265 {offsets = [64, 0], sizes = [32, 256], strides = [1, 1]} : vector<96x256xf32> to vector<32x256xf32>
    %c2_98 = arith.constant 2 : index
    %c0_99 = arith.constant 0 : index
    %277 = vector.load %arg7[%c2_98, %c0_99] : memref<27x256xf32, #tpu.memory_space<vmem>>, vector<1x256xf32>
    %278 = vector.broadcast %277 : vector<1x256xf32> to vector<32x256xf32>
    %279 = arith.mulf %276, %278 : vector<32x256xf32>
    %280 = arith.addf %275, %279 : vector<32x256xf32>
    %c96_100 = arith.constant 96 : index
    %c0_101 = arith.constant 0 : index
    %281 = vector.load %arg6[%c96_100, %c0_101] : memref<864x128xbf16, #tpu.memory_space<vmem>>, vector<96x128xbf16>
    %282 = arith.extf %281 : vector<96x128xbf16> to vector<96x128xf32>
    %cst_102 = arith.constant dense<0.000000e+00> : vector<96x256xf32>
    %283 = tpu.matmul %282, %261, %cst_102 {dimension_numbers = #tpu.dot_dimension_numbers<[1], [0], [0], [1], [0, 0, 1, 1], [], []>} : vector<96x128xf32>, vector<128x256xf32>, vector<96x256xf32> -> vector<96x256xf32>
    %284 = vector.extract_strided_slice %283 {offsets = [0, 0], sizes = [32, 256], strides = [1, 1]} : vector<96x256xf32> to vector<32x256xf32>
    %c3_103 = arith.constant 3 : index
    %c0_104 = arith.constant 0 : index
    %285 = vector.load %arg7[%c3_103, %c0_104] : memref<27x256xf32, #tpu.memory_space<vmem>>, vector<1x256xf32>
    %286 = vector.broadcast %285 : vector<1x256xf32> to vector<32x256xf32>
    %287 = arith.mulf %284, %286 : vector<32x256xf32>
    %288 = arith.addf %280, %287 : vector<32x256xf32>
    %289 = vector.extract_strided_slice %283 {offsets = [32, 0], sizes = [32, 256], strides = [1, 1]} : vector<96x256xf32> to vector<32x256xf32>
    %c4_105 = arith.constant 4 : index
    %c0_106 = arith.constant 0 : index
    %290 = vector.load %arg7[%c4_105, %c0_106] : memref<27x256xf32, #tpu.memory_space<vmem>>, vector<1x256xf32>
    %291 = vector.broadcast %290 : vector<1x256xf32> to vector<32x256xf32>
    %292 = arith.mulf %289, %291 : vector<32x256xf32>
    %293 = arith.addf %288, %292 : vector<32x256xf32>
    %294 = vector.extract_strided_slice %283 {offsets = [64, 0], sizes = [32, 256], strides = [1, 1]} : vector<96x256xf32> to vector<32x256xf32>
    %c5_107 = arith.constant 5 : index
    %c0_108 = arith.constant 0 : index
    %295 = vector.load %arg7[%c5_107, %c0_108] : memref<27x256xf32, #tpu.memory_space<vmem>>, vector<1x256xf32>
    %296 = vector.broadcast %295 : vector<1x256xf32> to vector<32x256xf32>
    %297 = arith.mulf %294, %296 : vector<32x256xf32>
    %298 = arith.addf %293, %297 : vector<32x256xf32>
    %c192_109 = arith.constant 192 : index
    %c0_110 = arith.constant 0 : index
    %299 = vector.load %arg6[%c192_109, %c0_110] : memref<864x128xbf16, #tpu.memory_space<vmem>>, vector<96x128xbf16>
    %300 = arith.extf %299 : vector<96x128xbf16> to vector<96x128xf32>
    %cst_111 = arith.constant dense<0.000000e+00> : vector<96x256xf32>
    %301 = tpu.matmul %300, %261, %cst_111 {dimension_numbers = #tpu.dot_dimension_numbers<[1], [0], [0], [1], [0, 0, 1, 1], [], []>} : vector<96x128xf32>, vector<128x256xf32>, vector<96x256xf32> -> vector<96x256xf32>
    %302 = vector.extract_strided_slice %301 {offsets = [0, 0], sizes = [32, 256], strides = [1, 1]} : vector<96x256xf32> to vector<32x256xf32>
    %c6_112 = arith.constant 6 : index
    %c0_113 = arith.constant 0 : index
    %303 = vector.load %arg7[%c6_112, %c0_113] : memref<27x256xf32, #tpu.memory_space<vmem>>, vector<1x256xf32>
    %304 = vector.broadcast %303 : vector<1x256xf32> to vector<32x256xf32>
    %305 = arith.mulf %302, %304 : vector<32x256xf32>
    %306 = arith.addf %298, %305 : vector<32x256xf32>
    %307 = vector.extract_strided_slice %301 {offsets = [32, 0], sizes = [32, 256], strides = [1, 1]} : vector<96x256xf32> to vector<32x256xf32>
    %c7_114 = arith.constant 7 : index
    %c0_115 = arith.constant 0 : index
    %308 = vector.load %arg7[%c7_114, %c0_115] : memref<27x256xf32, #tpu.memory_space<vmem>>, vector<1x256xf32>
    %309 = vector.broadcast %308 : vector<1x256xf32> to vector<32x256xf32>
    %310 = arith.mulf %307, %309 : vector<32x256xf32>
    %311 = arith.addf %306, %310 : vector<32x256xf32>
    %312 = vector.extract_strided_slice %301 {offsets = [64, 0], sizes = [32, 256], strides = [1, 1]} : vector<96x256xf32> to vector<32x256xf32>
    %c8_116 = arith.constant 8 : index
    %c0_117 = arith.constant 0 : index
    %313 = vector.load %arg7[%c8_116, %c0_117] : memref<27x256xf32, #tpu.memory_space<vmem>>, vector<1x256xf32>
    %314 = vector.broadcast %313 : vector<1x256xf32> to vector<32x256xf32>
    %315 = arith.mulf %312, %314 : vector<32x256xf32>
    %316 = arith.addf %311, %315 : vector<32x256xf32>
    %c288_118 = arith.constant 288 : index
    %c0_119 = arith.constant 0 : index
    %317 = vector.load %arg6[%c288_118, %c0_119] : memref<864x128xbf16, #tpu.memory_space<vmem>>, vector<96x128xbf16>
    %318 = arith.extf %317 : vector<96x128xbf16> to vector<96x128xf32>
    %cst_120 = arith.constant dense<0.000000e+00> : vector<96x256xf32>
    %319 = tpu.matmul %318, %261, %cst_120 {dimension_numbers = #tpu.dot_dimension_numbers<[1], [0], [0], [1], [0, 0, 1, 1], [], []>} : vector<96x128xf32>, vector<128x256xf32>, vector<96x256xf32> -> vector<96x256xf32>
    %320 = vector.extract_strided_slice %319 {offsets = [0, 0], sizes = [32, 256], strides = [1, 1]} : vector<96x256xf32> to vector<32x256xf32>
    %c9_121 = arith.constant 9 : index
    %c0_122 = arith.constant 0 : index
    %321 = vector.load %arg7[%c9_121, %c0_122] : memref<27x256xf32, #tpu.memory_space<vmem>>, vector<1x256xf32>
    %322 = vector.broadcast %321 : vector<1x256xf32> to vector<32x256xf32>
    %323 = arith.mulf %320, %322 : vector<32x256xf32>
    %324 = arith.addf %316, %323 : vector<32x256xf32>
    %325 = vector.extract_strided_slice %319 {offsets = [32, 0], sizes = [32, 256], strides = [1, 1]} : vector<96x256xf32> to vector<32x256xf32>
    %c10_123 = arith.constant 10 : index
    %c0_124 = arith.constant 0 : index
    %326 = vector.load %arg7[%c10_123, %c0_124] : memref<27x256xf32, #tpu.memory_space<vmem>>, vector<1x256xf32>
    %327 = vector.broadcast %326 : vector<1x256xf32> to vector<32x256xf32>
    %328 = arith.mulf %325, %327 : vector<32x256xf32>
    %329 = arith.addf %324, %328 : vector<32x256xf32>
    %330 = vector.extract_strided_slice %319 {offsets = [64, 0], sizes = [32, 256], strides = [1, 1]} : vector<96x256xf32> to vector<32x256xf32>
    %c11_125 = arith.constant 11 : index
    %c0_126 = arith.constant 0 : index
    %331 = vector.load %arg7[%c11_125, %c0_126] : memref<27x256xf32, #tpu.memory_space<vmem>>, vector<1x256xf32>
    %332 = vector.broadcast %331 : vector<1x256xf32> to vector<32x256xf32>
    %333 = arith.mulf %330, %332 : vector<32x256xf32>
    %334 = arith.addf %329, %333 : vector<32x256xf32>
    %c384_127 = arith.constant 384 : index
    %c0_128 = arith.constant 0 : index
    %335 = vector.load %arg6[%c384_127, %c0_128] : memref<864x128xbf16, #tpu.memory_space<vmem>>, vector<96x128xbf16>
    %336 = arith.extf %335 : vector<96x128xbf16> to vector<96x128xf32>
    %cst_129 = arith.constant dense<0.000000e+00> : vector<96x256xf32>
    %337 = tpu.matmul %336, %261, %cst_129 {dimension_numbers = #tpu.dot_dimension_numbers<[1], [0], [0], [1], [0, 0, 1, 1], [], []>} : vector<96x128xf32>, vector<128x256xf32>, vector<96x256xf32> -> vector<96x256xf32>
    %338 = vector.extract_strided_slice %337 {offsets = [0, 0], sizes = [32, 256], strides = [1, 1]} : vector<96x256xf32> to vector<32x256xf32>
    %c12_130 = arith.constant 12 : index
    %c0_131 = arith.constant 0 : index
    %339 = vector.load %arg7[%c12_130, %c0_131] : memref<27x256xf32, #tpu.memory_space<vmem>>, vector<1x256xf32>
    %340 = vector.broadcast %339 : vector<1x256xf32> to vector<32x256xf32>
    %341 = arith.mulf %338, %340 : vector<32x256xf32>
    %342 = arith.addf %334, %341 : vector<32x256xf32>
    %343 = vector.extract_strided_slice %337 {offsets = [32, 0], sizes = [32, 256], strides = [1, 1]} : vector<96x256xf32> to vector<32x256xf32>
    %c13_132 = arith.constant 13 : index
    %c0_133 = arith.constant 0 : index
    %344 = vector.load %arg7[%c13_132, %c0_133] : memref<27x256xf32, #tpu.memory_space<vmem>>, vector<1x256xf32>
    %345 = vector.broadcast %344 : vector<1x256xf32> to vector<32x256xf32>
    %346 = arith.mulf %343, %345 : vector<32x256xf32>
    %347 = arith.addf %342, %346 : vector<32x256xf32>
    %348 = vector.extract_strided_slice %337 {offsets = [64, 0], sizes = [32, 256], strides = [1, 1]} : vector<96x256xf32> to vector<32x256xf32>
    %c14_134 = arith.constant 14 : index
    %c0_135 = arith.constant 0 : index
    %349 = vector.load %arg7[%c14_134, %c0_135] : memref<27x256xf32, #tpu.memory_space<vmem>>, vector<1x256xf32>
    %350 = vector.broadcast %349 : vector<1x256xf32> to vector<32x256xf32>
    %351 = arith.mulf %348, %350 : vector<32x256xf32>
    %352 = arith.addf %347, %351 : vector<32x256xf32>
    %c480_136 = arith.constant 480 : index
    %c0_137 = arith.constant 0 : index
    %353 = vector.load %arg6[%c480_136, %c0_137] : memref<864x128xbf16, #tpu.memory_space<vmem>>, vector<96x128xbf16>
    %354 = arith.extf %353 : vector<96x128xbf16> to vector<96x128xf32>
    %cst_138 = arith.constant dense<0.000000e+00> : vector<96x256xf32>
    %355 = tpu.matmul %354, %261, %cst_138 {dimension_numbers = #tpu.dot_dimension_numbers<[1], [0], [0], [1], [0, 0, 1, 1], [], []>} : vector<96x128xf32>, vector<128x256xf32>, vector<96x256xf32> -> vector<96x256xf32>
    %356 = vector.extract_strided_slice %355 {offsets = [0, 0], sizes = [32, 256], strides = [1, 1]} : vector<96x256xf32> to vector<32x256xf32>
    %c15_139 = arith.constant 15 : index
    %c0_140 = arith.constant 0 : index
    %357 = vector.load %arg7[%c15_139, %c0_140] : memref<27x256xf32, #tpu.memory_space<vmem>>, vector<1x256xf32>
    %358 = vector.broadcast %357 : vector<1x256xf32> to vector<32x256xf32>
    %359 = arith.mulf %356, %358 : vector<32x256xf32>
    %360 = arith.addf %352, %359 : vector<32x256xf32>
    %361 = vector.extract_strided_slice %355 {offsets = [32, 0], sizes = [32, 256], strides = [1, 1]} : vector<96x256xf32> to vector<32x256xf32>
    %c16_141 = arith.constant 16 : index
    %c0_142 = arith.constant 0 : index
    %362 = vector.load %arg7[%c16_141, %c0_142] : memref<27x256xf32, #tpu.memory_space<vmem>>, vector<1x256xf32>
    %363 = vector.broadcast %362 : vector<1x256xf32> to vector<32x256xf32>
    %364 = arith.mulf %361, %363 : vector<32x256xf32>
    %365 = arith.addf %360, %364 : vector<32x256xf32>
    %366 = vector.extract_strided_slice %355 {offsets = [64, 0], sizes = [32, 256], strides = [1, 1]} : vector<96x256xf32> to vector<32x256xf32>
    %c17_143 = arith.constant 17 : index
    %c0_144 = arith.constant 0 : index
    %367 = vector.load %arg7[%c17_143, %c0_144] : memref<27x256xf32, #tpu.memory_space<vmem>>, vector<1x256xf32>
    %368 = vector.broadcast %367 : vector<1x256xf32> to vector<32x256xf32>
    %369 = arith.mulf %366, %368 : vector<32x256xf32>
    %370 = arith.addf %365, %369 : vector<32x256xf32>
    %c576_145 = arith.constant 576 : index
    %c0_146 = arith.constant 0 : index
    %371 = vector.load %arg6[%c576_145, %c0_146] : memref<864x128xbf16, #tpu.memory_space<vmem>>, vector<96x128xbf16>
    %372 = arith.extf %371 : vector<96x128xbf16> to vector<96x128xf32>
    %cst_147 = arith.constant dense<0.000000e+00> : vector<96x256xf32>
    %373 = tpu.matmul %372, %261, %cst_147 {dimension_numbers = #tpu.dot_dimension_numbers<[1], [0], [0], [1], [0, 0, 1, 1], [], []>} : vector<96x128xf32>, vector<128x256xf32>, vector<96x256xf32> -> vector<96x256xf32>
    %374 = vector.extract_strided_slice %373 {offsets = [0, 0], sizes = [32, 256], strides = [1, 1]} : vector<96x256xf32> to vector<32x256xf32>
    %c18_148 = arith.constant 18 : index
    %c0_149 = arith.constant 0 : index
    %375 = vector.load %arg7[%c18_148, %c0_149] : memref<27x256xf32, #tpu.memory_space<vmem>>, vector<1x256xf32>
    %376 = vector.broadcast %375 : vector<1x256xf32> to vector<32x256xf32>
    %377 = arith.mulf %374, %376 : vector<32x256xf32>
    %378 = arith.addf %370, %377 : vector<32x256xf32>
    %379 = vector.extract_strided_slice %373 {offsets = [32, 0], sizes = [32, 256], strides = [1, 1]} : vector<96x256xf32> to vector<32x256xf32>
    %c19_150 = arith.constant 19 : index
    %c0_151 = arith.constant 0 : index
    %380 = vector.load %arg7[%c19_150, %c0_151] : memref<27x256xf32, #tpu.memory_space<vmem>>, vector<1x256xf32>
    %381 = vector.broadcast %380 : vector<1x256xf32> to vector<32x256xf32>
    %382 = arith.mulf %379, %381 : vector<32x256xf32>
    %383 = arith.addf %378, %382 : vector<32x256xf32>
    %384 = vector.extract_strided_slice %373 {offsets = [64, 0], sizes = [32, 256], strides = [1, 1]} : vector<96x256xf32> to vector<32x256xf32>
    %c20_152 = arith.constant 20 : index
    %c0_153 = arith.constant 0 : index
    %385 = vector.load %arg7[%c20_152, %c0_153] : memref<27x256xf32, #tpu.memory_space<vmem>>, vector<1x256xf32>
    %386 = vector.broadcast %385 : vector<1x256xf32> to vector<32x256xf32>
    %387 = arith.mulf %384, %386 : vector<32x256xf32>
    %388 = arith.addf %383, %387 : vector<32x256xf32>
    %c672_154 = arith.constant 672 : index
    %c0_155 = arith.constant 0 : index
    %389 = vector.load %arg6[%c672_154, %c0_155] : memref<864x128xbf16, #tpu.memory_space<vmem>>, vector<96x128xbf16>
    %390 = arith.extf %389 : vector<96x128xbf16> to vector<96x128xf32>
    %cst_156 = arith.constant dense<0.000000e+00> : vector<96x256xf32>
    %391 = tpu.matmul %390, %261, %cst_156 {dimension_numbers = #tpu.dot_dimension_numbers<[1], [0], [0], [1], [0, 0, 1, 1], [], []>} : vector<96x128xf32>, vector<128x256xf32>, vector<96x256xf32> -> vector<96x256xf32>
    %392 = vector.extract_strided_slice %391 {offsets = [0, 0], sizes = [32, 256], strides = [1, 1]} : vector<96x256xf32> to vector<32x256xf32>
    %c21_157 = arith.constant 21 : index
    %c0_158 = arith.constant 0 : index
    %393 = vector.load %arg7[%c21_157, %c0_158] : memref<27x256xf32, #tpu.memory_space<vmem>>, vector<1x256xf32>
    %394 = vector.broadcast %393 : vector<1x256xf32> to vector<32x256xf32>
    %395 = arith.mulf %392, %394 : vector<32x256xf32>
    %396 = arith.addf %388, %395 : vector<32x256xf32>
    %397 = vector.extract_strided_slice %391 {offsets = [32, 0], sizes = [32, 256], strides = [1, 1]} : vector<96x256xf32> to vector<32x256xf32>
    %c22_159 = arith.constant 22 : index
    %c0_160 = arith.constant 0 : index
    %398 = vector.load %arg7[%c22_159, %c0_160] : memref<27x256xf32, #tpu.memory_space<vmem>>, vector<1x256xf32>
    %399 = vector.broadcast %398 : vector<1x256xf32> to vector<32x256xf32>
    %400 = arith.mulf %397, %399 : vector<32x256xf32>
    %401 = arith.addf %396, %400 : vector<32x256xf32>
    %402 = vector.extract_strided_slice %391 {offsets = [64, 0], sizes = [32, 256], strides = [1, 1]} : vector<96x256xf32> to vector<32x256xf32>
    %c23_161 = arith.constant 23 : index
    %c0_162 = arith.constant 0 : index
    %403 = vector.load %arg7[%c23_161, %c0_162] : memref<27x256xf32, #tpu.memory_space<vmem>>, vector<1x256xf32>
    %404 = vector.broadcast %403 : vector<1x256xf32> to vector<32x256xf32>
    %405 = arith.mulf %402, %404 : vector<32x256xf32>
    %406 = arith.addf %401, %405 : vector<32x256xf32>
    %c768_163 = arith.constant 768 : index
    %c0_164 = arith.constant 0 : index
    %407 = vector.load %arg6[%c768_163, %c0_164] : memref<864x128xbf16, #tpu.memory_space<vmem>>, vector<96x128xbf16>
    %408 = arith.extf %407 : vector<96x128xbf16> to vector<96x128xf32>
    %cst_165 = arith.constant dense<0.000000e+00> : vector<96x256xf32>
    %409 = tpu.matmul %408, %261, %cst_165 {dimension_numbers = #tpu.dot_dimension_numbers<[1], [0], [0], [1], [0, 0, 1, 1], [], []>} : vector<96x128xf32>, vector<128x256xf32>, vector<96x256xf32> -> vector<96x256xf32>
    %410 = vector.extract_strided_slice %409 {offsets = [0, 0], sizes = [32, 256], strides = [1, 1]} : vector<96x256xf32> to vector<32x256xf32>
    %c24_166 = arith.constant 24 : index
    %c0_167 = arith.constant 0 : index
    %411 = vector.load %arg7[%c24_166, %c0_167] : memref<27x256xf32, #tpu.memory_space<vmem>>, vector<1x256xf32>
    %412 = vector.broadcast %411 : vector<1x256xf32> to vector<32x256xf32>
    %413 = arith.mulf %410, %412 : vector<32x256xf32>
    %414 = arith.addf %406, %413 : vector<32x256xf32>
    %415 = vector.extract_strided_slice %409 {offsets = [32, 0], sizes = [32, 256], strides = [1, 1]} : vector<96x256xf32> to vector<32x256xf32>
    %c25_168 = arith.constant 25 : index
    %c0_169 = arith.constant 0 : index
    %416 = vector.load %arg7[%c25_168, %c0_169] : memref<27x256xf32, #tpu.memory_space<vmem>>, vector<1x256xf32>
    %417 = vector.broadcast %416 : vector<1x256xf32> to vector<32x256xf32>
    %418 = arith.mulf %415, %417 : vector<32x256xf32>
    %419 = arith.addf %414, %418 : vector<32x256xf32>
    %420 = vector.extract_strided_slice %409 {offsets = [64, 0], sizes = [32, 256], strides = [1, 1]} : vector<96x256xf32> to vector<32x256xf32>
    %c26_170 = arith.constant 26 : index
    %c0_171 = arith.constant 0 : index
    %421 = vector.load %arg7[%c26_170, %c0_171] : memref<27x256xf32, #tpu.memory_space<vmem>>, vector<1x256xf32>
    %422 = vector.broadcast %421 : vector<1x256xf32> to vector<32x256xf32>
    %423 = arith.mulf %420, %422 : vector<32x256xf32>
    %424 = arith.addf %419, %423 : vector<32x256xf32>
    %cst_172 = arith.constant dense<0.000000e+00> : vector<32x256xf32>
    %425 = tpu.matmul %424, %36, %cst_172 {dimension_numbers = #tpu.dot_dimension_numbers<[1], [0], [0], [1], [0, 0, 1, 1], [], []>} : vector<32x256xf32>, vector<256x256xf32>, vector<32x256xf32> -> vector<32x256xf32>
    %426 = arith.subf %424, %425 : vector<32x256xf32>
    %427 = arith.mulf %426, %426 : vector<32x256xf32>
    %cst_173 = arith.constant dense<0.000000e+00> : vector<32x256xf32>
    %428 = tpu.matmul %427, %36, %cst_173 {dimension_numbers = #tpu.dot_dimension_numbers<[1], [0], [0], [1], [0, 0, 1, 1], [], []>} : vector<32x256xf32>, vector<256x256xf32>, vector<32x256xf32> -> vector<32x256xf32>
    %cst_174 = arith.constant 9.99999974E-6 : f32
    %429 = vector.broadcast %cst_174 : f32 to vector<32x256xf32>
    %430 = arith.addf %428, %429 : vector<32x256xf32>
    %431 = math.rsqrt %430 : vector<32x256xf32>
    %432 = arith.mulf %426, %431 : vector<32x256xf32>
    %c0_175 = arith.constant 0 : index
    %c0_176 = arith.constant 0 : index
    %433 = vector.load %arg9[%c0_175, %c0_176] : memref<1x256xf32, #tpu.memory_space<vmem>>, vector<1x256xf32>
    %434 = vector.broadcast %433 : vector<1x256xf32> to vector<32x256xf32>
    %435 = arith.mulf %432, %434 : vector<32x256xf32>
    %c0_177 = arith.constant 0 : index
    %c0_178 = arith.constant 0 : index
    %436 = vector.load %arg10[%c0_177, %c0_178] : memref<1x256xf32, #tpu.memory_space<vmem>>, vector<1x256xf32>
    %437 = vector.broadcast %436 : vector<1x256xf32> to vector<32x256xf32>
    %438 = arith.addf %435, %437 : vector<32x256xf32>
    %439 = vector.extract_strided_slice %438 {offsets = [0, 0], sizes = [32, 64], strides = [1, 1]} : vector<32x256xf32> to vector<32x64xf32>
    %c0_179 = arith.constant 0 : index
    %c0_180 = arith.constant 0 : index
    %440 = vector.load %arg12[%c0_179, %c0_180] : memref<1x64xf32, #tpu.memory_space<vmem>>, vector<1x64xf32>
    %441 = vector.broadcast %440 : vector<1x64xf32> to vector<32x64xf32>
    %442 = arith.addf %439, %441 : vector<32x64xf32>
    %443 = vector.extract_strided_slice %438 {offsets = [0, 64], sizes = [32, 32], strides = [1, 1]} : vector<32x256xf32> to vector<32x32xf32>
    %444 = vector.extract_strided_slice %438 {offsets = [0, 128], sizes = [32, 32], strides = [1, 1]} : vector<32x256xf32> to vector<32x32xf32>
    %445 = vector.extract_strided_slice %438 {offsets = [0, 192], sizes = [32, 32], strides = [1, 1]} : vector<32x256xf32> to vector<32x32xf32>
    %cst_181 = arith.constant 0.176776692 : f32
    %446 = vector.broadcast %cst_181 : f32 to vector<32x32xf32>
    %447 = arith.mulf %443, %446 : vector<32x32xf32>
    %cst_182 = arith.constant dense<0.000000e+00> : vector<32x32xf32>
    %448 = tpu.matmul %447, %444, %cst_182 {dimension_numbers = #tpu.dot_dimension_numbers<[1], [1], [0], [0], [0, 0, 1, 0], [], []>} : vector<32x32xf32>, vector<32x32xf32>, vector<32x32xf32> -> vector<32x32xf32>
    %cst_183 = arith.constant dense<0xFF800000> : vector<32xf32>
    %449 = vector.multi_reduction <maximumf>, %448, %cst_183 [1] : vector<32x32xf32> to vector<32xf32>
    %450 = vector.shape_cast %449 : vector<32xf32> to vector<32x1xf32>
    %451 = vector.broadcast %450 : vector<32x1xf32> to vector<32x32xf32>
    %452 = arith.subf %448, %451 : vector<32x32xf32>
    %453 = math.exp %452 : vector<32x32xf32>
    %cst_184 = arith.constant dense<0.000000e+00> : vector<32xf32>
    %454 = vector.multi_reduction <add>, %453, %cst_184 [1] : vector<32x32xf32> to vector<32xf32>
    %455 = vector.shape_cast %454 : vector<32xf32> to vector<32x1xf32>
    %456 = tpu.reciprocal %455 {approx = true} : vector<32x1xf32> -> vector<32x1xf32>
    %457 = vector.broadcast %456 : vector<32x1xf32> to vector<32x32xf32>
    %458 = arith.mulf %453, %457 : vector<32x32xf32>
    %cst_185 = arith.constant dense<0.000000e+00> : vector<32x32xf32>
    %459 = tpu.matmul %458, %445, %cst_185 {dimension_numbers = #tpu.dot_dimension_numbers<[1], [0], [0], [1], [0, 0, 1, 1], [], []>} : vector<32x32xf32>, vector<32x32xf32>, vector<32x32xf32> -> vector<32x32xf32>
    %460 = arith.addf %459, %443 : vector<32x32xf32>
    %c0_186 = arith.constant 0 : index
    %c0_187 = arith.constant 0 : index
    %461 = vector.load %arg11[%c0_186, %c0_187] : memref<64x64xf32, #tpu.memory_space<vmem>>, vector<32x64xf32>
    %cst_188 = arith.constant dense<0.000000e+00> : vector<32x64xf32>
    %462 = tpu.matmul %460, %461, %cst_188 {dimension_numbers = #tpu.dot_dimension_numbers<[1], [0], [0], [1], [0, 0, 1, 1], [], []>} : vector<32x32xf32>, vector<32x64xf32>, vector<32x64xf32> -> vector<32x64xf32>
    %463 = arith.addf %442, %462 : vector<32x64xf32>
    %464 = vector.extract_strided_slice %438 {offsets = [0, 96], sizes = [32, 32], strides = [1, 1]} : vector<32x256xf32> to vector<32x32xf32>
    %465 = vector.extract_strided_slice %438 {offsets = [0, 160], sizes = [32, 32], strides = [1, 1]} : vector<32x256xf32> to vector<32x32xf32>
    %466 = vector.extract_strided_slice %438 {offsets = [0, 224], sizes = [32, 32], strides = [1, 1]} : vector<32x256xf32> to vector<32x32xf32>
    %cst_189 = arith.constant 0.176776692 : f32
    %467 = vector.broadcast %cst_189 : f32 to vector<32x32xf32>
    %468 = arith.mulf %464, %467 : vector<32x32xf32>
    %cst_190 = arith.constant dense<0.000000e+00> : vector<32x32xf32>
    %469 = tpu.matmul %468, %465, %cst_190 {dimension_numbers = #tpu.dot_dimension_numbers<[1], [1], [0], [0], [0, 0, 1, 0], [], []>} : vector<32x32xf32>, vector<32x32xf32>, vector<32x32xf32> -> vector<32x32xf32>
    %cst_191 = arith.constant dense<0xFF800000> : vector<32xf32>
    %470 = vector.multi_reduction <maximumf>, %469, %cst_191 [1] : vector<32x32xf32> to vector<32xf32>
    %471 = vector.shape_cast %470 : vector<32xf32> to vector<32x1xf32>
    %472 = vector.broadcast %471 : vector<32x1xf32> to vector<32x32xf32>
    %473 = arith.subf %469, %472 : vector<32x32xf32>
    %474 = math.exp %473 : vector<32x32xf32>
    %cst_192 = arith.constant dense<0.000000e+00> : vector<32xf32>
    %475 = vector.multi_reduction <add>, %474, %cst_192 [1] : vector<32x32xf32> to vector<32xf32>
    %476 = vector.shape_cast %475 : vector<32xf32> to vector<32x1xf32>
    %477 = tpu.reciprocal %476 {approx = true} : vector<32x1xf32> -> vector<32x1xf32>
    %478 = vector.broadcast %477 : vector<32x1xf32> to vector<32x32xf32>
    %479 = arith.mulf %474, %478 : vector<32x32xf32>
    %cst_193 = arith.constant dense<0.000000e+00> : vector<32x32xf32>
    %480 = tpu.matmul %479, %466, %cst_193 {dimension_numbers = #tpu.dot_dimension_numbers<[1], [0], [0], [1], [0, 0, 1, 1], [], []>} : vector<32x32xf32>, vector<32x32xf32>, vector<32x32xf32> -> vector<32x32xf32>
    %481 = arith.addf %480, %464 : vector<32x32xf32>
    %c32_194 = arith.constant 32 : index
    %c0_195 = arith.constant 0 : index
    %482 = vector.load %arg11[%c32_194, %c0_195] : memref<64x64xf32, #tpu.memory_space<vmem>>, vector<32x64xf32>
    %cst_196 = arith.constant dense<0.000000e+00> : vector<32x64xf32>
    %483 = tpu.matmul %481, %482, %cst_196 {dimension_numbers = #tpu.dot_dimension_numbers<[1], [0], [0], [1], [0, 0, 1, 1], [], []>} : vector<32x32xf32>, vector<32x64xf32>, vector<32x64xf32> -> vector<32x64xf32>
    %484 = arith.addf %463, %483 : vector<32x64xf32>
    %485 = tpu.concatenate %260, %484 in 0 : vector<32x64xf32>, vector<32x64xf32> -> vector<64x64xf32>
    %cst_197 = arith.constant dense<0.000000e+00> : vector<64xf32>
    %486 = vector.multi_reduction <add>, %485, %cst_197 [1] : vector<64x64xf32> to vector<64xf32>
    %487 = vector.shape_cast %486 : vector<64xf32> to vector<64x1xf32>
    %cst_198 = arith.constant 6.400000e+01 : f32
    %488 = vector.broadcast %cst_198 : f32 to vector<64x1xf32>
    %489 = arith.divf %487, %488 : vector<64x1xf32>
    %490 = vector.broadcast %489 : vector<64x1xf32> to vector<64x64xf32>
    %491 = arith.subf %485, %490 : vector<64x64xf32>
    %492 = arith.mulf %491, %491 : vector<64x64xf32>
    %cst_199 = arith.constant dense<0.000000e+00> : vector<64xf32>
    %493 = vector.multi_reduction <add>, %492, %cst_199 [1] : vector<64x64xf32> to vector<64xf32>
    %494 = vector.shape_cast %493 : vector<64xf32> to vector<64x1xf32>
    %cst_200 = arith.constant 6.400000e+01 : f32
    %495 = vector.broadcast %cst_200 : f32 to vector<64x1xf32>
    %496 = arith.divf %494, %495 : vector<64x1xf32>
    %cst_201 = arith.constant 9.99999997E-7 : f32
    %497 = vector.broadcast %cst_201 : f32 to vector<64x1xf32>
    %498 = arith.addf %496, %497 : vector<64x1xf32>
    %499 = math.rsqrt %498 : vector<64x1xf32>
    %500 = vector.broadcast %499 : vector<64x1xf32> to vector<64x64xf32>
    %501 = arith.mulf %491, %500 : vector<64x64xf32>
    %c0_202 = arith.constant 0 : index
    %c0_203 = arith.constant 0 : index
    %502 = vector.load %arg13[%c0_202, %c0_203] : memref<1x64xf32, #tpu.memory_space<vmem>>, vector<1x64xf32>
    %503 = vector.broadcast %502 : vector<1x64xf32> to vector<64x64xf32>
    %504 = arith.mulf %501, %503 : vector<64x64xf32>
    %c0_204 = arith.constant 0 : index
    %c0_205 = arith.constant 0 : index
    %505 = vector.load %arg14[%c0_204, %c0_205] : memref<1x64xf32, #tpu.memory_space<vmem>>, vector<1x64xf32>
    %506 = vector.broadcast %505 : vector<1x64xf32> to vector<64x64xf32>
    %507 = arith.addf %504, %506 : vector<64x64xf32>
    %c0_206 = arith.constant 0 : index
    %c0_207 = arith.constant 0 : index
    %508 = vector.load %arg15[%c0_206, %c0_207] : memref<64x256xf32, #tpu.memory_space<vmem>>, vector<64x256xf32>
    %cst_208 = arith.constant dense<0.000000e+00> : vector<64x256xf32>
    %509 = tpu.matmul %507, %508, %cst_208 {dimension_numbers = #tpu.dot_dimension_numbers<[1], [0], [0], [1], [0, 0, 1, 1], [], []>} : vector<64x64xf32>, vector<64x256xf32>, vector<64x256xf32> -> vector<64x256xf32>
    %c0_209 = arith.constant 0 : index
    %c0_210 = arith.constant 0 : index
    %510 = vector.load %arg16[%c0_209, %c0_210] : memref<1x256xf32, #tpu.memory_space<vmem>>, vector<1x256xf32>
    %511 = vector.broadcast %510 : vector<1x256xf32> to vector<64x256xf32>
    %512 = arith.addf %509, %511 : vector<64x256xf32>
    %cst_211 = arith.constant 5.000000e-01 : f32
    %513 = vector.broadcast %cst_211 : f32 to vector<64x256xf32>
    %514 = arith.mulf %513, %512 : vector<64x256xf32>
    %cst_212 = arith.constant 0.707106769 : f32
    %515 = vector.broadcast %cst_212 : f32 to vector<64x256xf32>
    %516 = arith.mulf %512, %515 : vector<64x256xf32>
    %cst_213 = arith.constant 0.000000e+00 : f32
    %517 = vector.broadcast %cst_213 : f32 to vector<64x256xf32>
    %518 = arith.cmpf oge, %516, %517 : vector<64x256xf32>
    %cst_214 = arith.constant 1.000000e+00 : f32
    %cst_215 = arith.constant -1.000000e+00 : f32
    %519 = vector.broadcast %cst_214 : f32 to vector<64x256xf32>
    %520 = vector.broadcast %cst_215 : f32 to vector<64x256xf32>
    %521 = arith.select %518, %519, %520 : vector<64x256xi1>, vector<64x256xf32>
    %522 = math.absf %516 : vector<64x256xf32>
    %cst_216 = arith.constant 0.327591091 : f32
    %523 = vector.broadcast %cst_216 : f32 to vector<64x256xf32>
    %524 = arith.mulf %523, %522 : vector<64x256xf32>
    %cst_217 = arith.constant 1.000000e+00 : f32
    %525 = vector.broadcast %cst_217 : f32 to vector<64x256xf32>
    %526 = arith.addf %525, %524 : vector<64x256xf32>
    %cst_218 = arith.constant 1.000000e+00 : f32
    %527 = vector.broadcast %cst_218 : f32 to vector<64x256xf32>
    %528 = arith.divf %527, %526 : vector<64x256xf32>
    %cst_219 = arith.constant 1.06140542 : f32
    %529 = vector.broadcast %cst_219 : f32 to vector<64x256xf32>
    %530 = arith.mulf %529, %528 : vector<64x256xf32>
    %cst_220 = arith.constant -1.45315206 : f32
    %531 = vector.broadcast %cst_220 : f32 to vector<64x256xf32>
    %532 = arith.addf %530, %531 : vector<64x256xf32>
    %533 = arith.mulf %532, %528 : vector<64x256xf32>
    %cst_221 = arith.constant 1.42141378 : f32
    %534 = vector.broadcast %cst_221 : f32 to vector<64x256xf32>
    %535 = arith.addf %533, %534 : vector<64x256xf32>
    %536 = arith.mulf %535, %528 : vector<64x256xf32>
    %cst_222 = arith.constant -0.284496725 : f32
    %537 = vector.broadcast %cst_222 : f32 to vector<64x256xf32>
    %538 = arith.addf %536, %537 : vector<64x256xf32>
    %539 = arith.mulf %538, %528 : vector<64x256xf32>
    %cst_223 = arith.constant 0.254829586 : f32
    %540 = vector.broadcast %cst_223 : f32 to vector<64x256xf32>
    %541 = arith.addf %539, %540 : vector<64x256xf32>
    %542 = arith.mulf %541, %528 : vector<64x256xf32>
    %cst_224 = arith.constant 0.000000e+00 : f32
    %543 = vector.broadcast %cst_224 : f32 to vector<64x256xf32>
    %544 = arith.subf %543, %522 : vector<64x256xf32>
    %545 = arith.mulf %544, %522 : vector<64x256xf32>
    %546 = math.exp %545 : vector<64x256xf32>
    %547 = arith.mulf %542, %546 : vector<64x256xf32>
    %cst_225 = arith.constant 1.000000e+00 : f32
    %548 = vector.broadcast %cst_225 : f32 to vector<64x256xf32>
    %549 = arith.subf %548, %547 : vector<64x256xf32>
    %550 = arith.mulf %521, %549 : vector<64x256xf32>
    %cst_226 = arith.constant 1.000000e+00 : f32
    %551 = vector.broadcast %cst_226 : f32 to vector<64x256xf32>
    %552 = arith.addf %551, %550 : vector<64x256xf32>
    %553 = arith.mulf %514, %552 : vector<64x256xf32>
    %c0_227 = arith.constant 0 : index
    %c0_228 = arith.constant 0 : index
    %554 = vector.load %arg17[%c0_227, %c0_228] : memref<256x64xf32, #tpu.memory_space<vmem>>, vector<256x64xf32>
    %cst_229 = arith.constant dense<0.000000e+00> : vector<64x64xf32>
    %555 = tpu.matmul %553, %554, %cst_229 {dimension_numbers = #tpu.dot_dimension_numbers<[1], [0], [0], [1], [0, 0, 1, 1], [], []>} : vector<64x256xf32>, vector<256x64xf32>, vector<64x64xf32> -> vector<64x64xf32>
    %556 = arith.addf %485, %555 : vector<64x64xf32>
    %c0_230 = arith.constant 0 : index
    %c0_231 = arith.constant 0 : index
    %557 = vector.load %arg18[%c0_230, %c0_231] : memref<1x64xf32, #tpu.memory_space<vmem>>, vector<1x64xf32>
    %558 = vector.broadcast %557 : vector<1x64xf32> to vector<64x64xf32>
    %559 = arith.addf %556, %558 : vector<64x64xf32>
    %560 = vector.extract_strided_slice %559 {offsets = [0, 0], sizes = [32, 64], strides = [1, 1]} : vector<64x64xf32> to vector<32x64xf32>
    %c0_232 = arith.constant 0 : index
    %c0_233 = arith.constant 0 : index
    %c0_234 = arith.constant 0 : index
    %561 = vector.load %arg19[%c0_232, %c0_233, %c0_234] : memref<2x32x64xf32, #tpu.memory_space<vmem>>, vector<1x32x64xf32>
    %562 = vector.shape_cast %561 : vector<1x32x64xf32> to vector<32x64xf32>
    %563 = vector.shape_cast %560 : vector<32x64xf32> to vector<1x32x64xf32>
    tpu.vector_store %arg19[%c0_232, %c0_233, %c0_234], %563 {strides = array<i32>} : memref<2x32x64xf32, #tpu.memory_space<vmem>>, vector<1x32x64xf32>,
    %564 = vector.extract_strided_slice %559 {offsets = [32, 0], sizes = [32, 64], strides = [1, 1]} : vector<64x64xf32> to vector<32x64xf32>
    %c1_235 = arith.constant 1 : index
    %c0_236 = arith.constant 0 : index
    %c0_237 = arith.constant 0 : index
    %565 = vector.load %arg19[%c1_235, %c0_236, %c0_237] : memref<2x32x64xf32, #tpu.memory_space<vmem>>, vector<1x32x64xf32>
    %566 = vector.shape_cast %565 : vector<1x32x64xf32> to vector<32x64xf32>
    %567 = vector.shape_cast %564 : vector<32x64xf32> to vector<1x32x64xf32>
    tpu.vector_store %arg19[%c1_235, %c0_236, %c0_237], %567 {strides = array<i32>} : memref<2x32x64xf32, #tpu.memory_space<vmem>>, vector<1x32x64xf32>,
    return
  }
  func.func @transform_0(%arg0: i32) -> (i32, i32, i32) {
    %c0_i32 = arith.constant 0 : i32
    %c0_i32_0 = arith.constant 0 : i32
    %c0_i32_1 = arith.constant 0 : i32
    %c0_i32_2 = arith.constant 0 : i32
    return %c0_i32, %c0_i32_0, %c0_i32_1 : i32, i32, i32
  }
  func.func @transform_1(%arg0: i32) -> (i32, i32) {
    %c0_i32 = arith.constant 0 : i32
    %c0_i32_0 = arith.constant 0 : i32
    %c0_i32_1 = arith.constant 0 : i32
    return %c0_i32, %c0_i32_0 : i32, i32
  }
  func.func @transform_2(%arg0: i32) -> (i32, i32) {
    %c0_i32 = arith.constant 0 : i32
    %c0_i32_0 = arith.constant 0 : i32
    %c0_i32_1 = arith.constant 0 : i32
    return %c0_i32, %c0_i32_0 : i32, i32
  }
  func.func @transform_3(%arg0: i32) -> (i32, i32) {
    %c0_i32 = arith.constant 0 : i32
    %c0_i32_0 = arith.constant 0 : i32
    %c0_i32_1 = arith.constant 0 : i32
    return %c0_i32, %c0_i32_0 : i32, i32
  }
  func.func @transform_4(%arg0: i32) -> (i32, i32) {
    %c0_i32 = arith.constant 0 : i32
    %c0_i32_0 = arith.constant 0 : i32
    %c0_i32_1 = arith.constant 0 : i32
    return %c0_i32, %c0_i32_0 : i32, i32
  }
  func.func @transform_5(%arg0: i32) -> (i32, i32) {
    %c0_i32 = arith.constant 0 : i32
    %c0_i32_0 = arith.constant 0 : i32
    %c0_i32_1 = arith.constant 0 : i32
    return %c0_i32, %c0_i32_0 : i32, i32
  }
  func.func @transform_6(%arg0: i32) -> (i32, i32) {
    %c0_i32 = arith.constant 0 : i32
    %c0_i32_0 = arith.constant 0 : i32
    %c0_i32_1 = arith.constant 0 : i32
    return %c0_i32, %c0_i32_0 : i32, i32
  }
  func.func @transform_7(%arg0: i32) -> (i32, i32) {
    %c0_i32 = arith.constant 0 : i32
    %c0_i32_0 = arith.constant 0 : i32
    %c0_i32_1 = arith.constant 0 : i32
    return %c0_i32, %c0_i32_0 : i32, i32
  }
  func.func @transform_8(%arg0: i32) -> (i32, i32) {
    %c0_i32 = arith.constant 0 : i32
    %c0_i32_0 = arith.constant 0 : i32
    %c0_i32_1 = arith.constant 0 : i32
    return %c0_i32, %c0_i32_0 : i32, i32
  }
  func.func @transform_9(%arg0: i32) -> (i32, i32) {
    %c0_i32 = arith.constant 0 : i32
    %c0_i32_0 = arith.constant 0 : i32
    %c0_i32_1 = arith.constant 0 : i32
    return %c0_i32, %c0_i32_0 : i32, i32
  }
  func.func @transform_10(%arg0: i32) -> (i32, i32) {
    %c0_i32 = arith.constant 0 : i32
    %c0_i32_0 = arith.constant 0 : i32
    %c0_i32_1 = arith.constant 0 : i32
    return %c0_i32, %c0_i32_0 : i32, i32
  }
  func.func @transform_11(%arg0: i32) -> (i32, i32) {
    %c0_i32 = arith.constant 0 : i32
    %c0_i32_0 = arith.constant 0 : i32
    %c0_i32_1 = arith.constant 0 : i32
    return %c0_i32, %c0_i32_0 : i32, i32
  }
  func.func @transform_12(%arg0: i32) -> (i32, i32) {
    %c0_i32 = arith.constant 0 : i32
    %c0_i32_0 = arith.constant 0 : i32
    %c0_i32_1 = arith.constant 0 : i32
    return %c0_i32, %c0_i32_0 : i32, i32
  }
  func.func @transform_13(%arg0: i32) -> (i32, i32) {
    %c0_i32 = arith.constant 0 : i32
    %c0_i32_0 = arith.constant 0 : i32
    %c0_i32_1 = arith.constant 0 : i32
    return %c0_i32, %c0_i32_0 : i32, i32
  }
  func.func @transform_14(%arg0: i32) -> (i32, i32) {
    %c0_i32 = arith.constant 0 : i32
    %c0_i32_0 = arith.constant 0 : i32
    %c0_i32_1 = arith.constant 0 : i32
    return %c0_i32, %c0_i32_0 : i32, i32
  }
  func.func @transform_15(%arg0: i32) -> (i32, i32) {
    %c0_i32 = arith.constant 0 : i32
    %c0_i32_0 = arith.constant 0 : i32
    %c0_i32_1 = arith.constant 0 : i32
    return %c0_i32, %c0_i32_0 : i32, i32
  }
  func.func @transform_16(%arg0: i32) -> (i32, i32) {
    %c0_i32 = arith.constant 0 : i32
    %c0_i32_0 = arith.constant 0 : i32
    %c0_i32_1 = arith.constant 0 : i32
    return %c0_i32, %c0_i32_0 : i32, i32
  }
  func.func @transform_17(%arg0: i32) -> (i32, i32) {
    %c0_i32 = arith.constant 0 : i32
    %c0_i32_0 = arith.constant 0 : i32
    %c0_i32_1 = arith.constant 0 : i32
    return %c0_i32, %c0_i32_0 : i32, i32
  }
  func.func @transform_18(%arg0: i32) -> (i32, i32, i32) {
    %c0_i32 = arith.constant 0 : i32
    %c0_i32_0 = arith.constant 0 : i32
    %c0_i32_1 = arith.constant 0 : i32
    %c0_i32_2 = arith.constant 0 : i32
    return %c0_i32, %c0_i32_0, %c0_i32_1 : i32, i32, i32
  }
}

</mosaic_0001>

<bundles_post_ra>
// kernel: stage_transition_block.1
= control target key start
LH: loop header
LB: loop body
LE: loop exit
PB: predicated region body
PF: predicated region fallthrough
CT: control target
= control target key end

     0   :  { %s15933_s0 = inlined_call_operand.vmem [shape: f32[2,128,64], index: 0, kind: input, shape index: {}]   ;;  %s15934_s1 = inlined_call_operand.vmem [shape: f32[1,32], index: 1, kind: input, shape index: {}]   ;;  %s15935_s2 = inlined_call_operand.vmem [shape: f32[1,32], index: 2, kind: input, shape index: {}]   ;;  %s15936_s3 = inlined_call_operand.vmem [shape: f32[64,256], index: 3, kind: input, shape index: {}]   ;;  %s15937_s4 = inlined_call_operand.vmem [shape: f32[1,256], index: 4, kind: input, shape index: {}]   ;;  %s15938_s5 = inlined_call_operand.vmem [shape: bf16[864,128], index: 5, kind: input, shape index: {}]   ;;  %s15939_s6 = inlined_call_operand.vmem [shape: f32[27,256], index: 6, kind: input, shape index: {}]   ;;  %s15940_s7 = inlined_call_operand.vmem [shape: bf16[256,256], index: 7, kind: input, shape index: {}]   ;;  %s15941_s8 = inlined_call_operand.vmem [shape: f32[1,256], index: 8, kind: input, shape index: {}]   ;;  %s15942_s9 = inlined_call_operand.vmem [shape: f32[1,256], index: 9, kind: input, shape index: {}]   ;;  %s15943_s10 = inlined_call_operand.vmem [shape: f32[64,64], index: 10, kind: input, shape index: {}]   ;;  %s15944_s11 = inlined_call_operand.vmem [shape: f32[1,64], index: 11, kind: input, shape index: {}]   ;;  %s15945_s12 = inlined_call_operand.vmem [shape: f32[1,64], index: 12, kind: input, shape index: {}]   ;;  %s15946_s13 = inlined_call_operand.vmem [shape: f32[1,64], index: 13, kind: input, shape index: {}]   ;;  %s15947_s14 = inlined_call_operand.vmem [shape: f32[64,256], index: 14, kind: input, shape index: {}]   ;;  %s15948_s15 = inlined_call_operand.vmem [shape: f32[1,256], index: 15, kind: input, shape index: {}]   ;;  %s15949_s16 = inlined_call_operand.vmem [shape: f32[256,64], index: 16, kind: input, shape index: {}]   ;;  %s15950_s17 = inlined_call_operand.vmem [shape: f32[1,64], index: 17, kind: input, shape index: {}]   ;;  %s15951_s18 = inlined_call_operand.hbm [shape: f32[2,32,64], index: 18, kind: output, shape index: {}]  }
   0x1   :  { %16342 = sst [smem:[#allocation163_spill]] %s15933_s0 }
   0x2   :  { %16343 = sst [smem:[#allocation164_spill]] %s15934_s1 }
   0x3   :  { %16344 = sst [smem:[#allocation165_spill]] %s15935_s2 }
   0x4   :  { %s16345_s29 = sld [smem:[#allocation163_spill]]  ;;  %s10585_s19 = smov 96  }
   0xa   :  { %v60_v0 = vld [vmem:[%s16345_s29] sm:$0xff]  ;;  %v62_v1 = vld [vmem:[%s16345_s29 + $0x10] sm:$0xff]  ;;  %v61_v2 = vld [vmem:[%s16345_s29 + $0x8] sm:$0xff] }
   0xb   :  { %124 = vrot.lane.b32.xlu0 %v60_v0, %s10585_s19  ;;  %128 = vrot.lane.b32.xlu1 %v62_v1, %s10585_s19  ;;  %v63_v3 = vld [vmem:[%s16345_s29 + $0x18] sm:$0xff]  ;;  %v64_v4 = vld [vmem:[%s16345_s29 + $0x20] sm:$0xff] }
   0xc   :  { %v65_v5 = vld [vmem:[%s16345_s29 + $0x28] sm:$0xff]  ;;  %v66_v6 = vld [vmem:[%s16345_s29 + $0x30] sm:$0xff]  ;;  %v67_v7 = vld [vmem:[%s16345_s29 + $0x38] sm:$0xff] }
   0xd   :  { %v68_v8 = vld [vmem:[%s16345_s29 + $0x40] sm:$0xff]  ;;  %v69_v9 = vld [vmem:[%s16345_s29 + $0x48] sm:$0xff] }
   0xf   :  { %126 = vrot.lane.b32.xlu0 %v61_v2, %s10585_s19  ;;  %130 = vrot.lane.b32.xlu1 %v63_v3, %s10585_s19 }
  0x13   :  { %132 = vrot.lane.b32.xlu0 %v64_v4, %s10585_s19  ;;  %134 = vrot.lane.b32.xlu1 %v65_v5, %s10585_s19 }
  0x17   :  { %136 = vrot.lane.b32.xlu0 %v66_v6, %s10585_s19  ;;  %138 = vrot.lane.b32.xlu1 %v67_v7, %s10585_s19 }
  0x1b   :  { %140 = vrot.lane.b32.xlu0 %v68_v8, %s10585_s19  ;;  %142 = vrot.lane.b32.xlu1 %v69_v9, %s10585_s19 }
  0x1c   :  { %23 = vsyncpa [#allocation3], 0  ;;  %v70_v10 = vld [vmem:[%s16345_s29 + $0x50] sm:$0xff]  ;;  %v71_v11 = vld [vmem:[%s16345_s29 + $0x58] sm:$0xff]  ;;  %vm284_vm0 = vcmask 261120   ;;  %s16346_s27 = sld [smem:[#allocation164_spill]] }
  0x1d   :  { %v10739_v12 = vld [vmem:[%s16345_s29 + $0x60] sm:$0xff]  ;;  %v10744_v13 = vld [vmem:[%s16345_s29 + $0x68] sm:$0xff]  ;;  %v10753_v14 = vld [vmem:[%s16345_s29 + $0x70] sm:$0xff]  ;;  %s16347_s0 = sld [smem:[#allocation165_spill]]  ;;  %s10587_s1 = smov 32   ;;  %vm968_vm1 = vcmask 523264  }
  0x1e   :  { %v10758_v15 = vld [vmem:[%s16345_s29 + $0x78] sm:$0xff]  ;;  %vm13751_vm2 = vmpackc.low %vm284_vm0, %vm284_vm0 }
  0x1f   :  { %144 = vrot.lane.b32.xlu0 %v70_v10, %s10585_s19  ;;  %146 = vrot.lane.b32.xlu1 %v71_v11, %s10585_s19 }
  0x23   :  { %148 = vrot.lane.b32.xlu0 %v10739_v12, %s10585_s19  ;;  %150 = vrot.lane.b32.xlu1 %v10744_v13, %s10585_s19 }
  0x27   :  { %152 = vrot.lane.b32.xlu0 %v10753_v14, %s10585_s19  ;;  %154 = vrot.lane.b32.xlu1 %v10758_v15, %s10585_s19 }
  0x7d   :  { %v125_v16 = vpop.permute.xlu0 %124  ;;  %v129_v17 = vpop.permute.xlu1 %128 }
  0x7e   :  { %v220_v18 = vadd.f32 %v125_v16, %v60_v0  ;;  %v222_v19 = vadd.f32 %v129_v17, %v62_v1 }
  0x80   :  { %v10764_v20 = vmul.f32 0.5, %v220_v18  ;;  %v10766_v21 = vmul.f32 0.5, %v222_v19 }
  0x81   :  { %v127_v22 = vpop.permute.xlu0 %126  ;;  %v131_v23 = vpop.permute.xlu1 %130 }
  0x82   :  { %v221_v24 = vadd.f32 %v127_v22, %v61_v2  ;;  %v285_v25 = vsel %vm284_vm0, %v10764_v20, 0.0  ;;  %v223_v26 = vadd.f32 %v131_v23, %v63_v3  ;;  %v291_v29 = vsel %vm284_vm0, %v10766_v21, 0.0 }
  0x83   :  { %286 = vadd.xlane.f32.xlu0 %v285_v25 }
  0x84   :  { %v10770_v27 = vmul.f32 0.5, %v221_v24  ;;  %v10772_v28 = vmul.f32 0.5, %v223_v26 }
  0x85   :  { %v133_v30 = vpop.permute.xlu0 %132  ;;  %v135_v31 = vpop.permute.xlu1 %134 }
  0x86   :  { %v224_v32 = vadd.f32 %v133_v30, %v64_v4  ;;  %v288_v33 = vsel %vm284_vm0, %v10770_v27, 0.0  ;;  %v225_v34 = vadd.f32 %v135_v31, %v65_v5  ;;  %v294_v37 = vsel %vm284_vm0, %v10772_v28, 0.0 }
  0x87   :  { %292 = vadd.xlane.f32.xlu0 %v291_v29  ;;  %289 = vadd.xlane.f32.xlu1 %v288_v33 }
  0x88   :  { %v10778_v35 = vmul.f32 0.5, %v224_v32  ;;  %v10780_v36 = vmul.f32 0.5, %v225_v34 }
  0x89   :  { %v137_v38 = vpop.permute.xlu0 %136  ;;  %v139_v39 = vpop.permute.xlu1 %138 }
  0x8a   :  { %v226_v40 = vadd.f32 %v137_v38, %v66_v6  ;;  %v297_v41 = vsel %vm284_vm0, %v10778_v35, 0.0  ;;  %v227_v42 = vadd.f32 %v139_v39, %v67_v7  ;;  %v300_v45 = vsel %vm284_vm0, %v10780_v36, 0.0 }
  0x8b   :  { %295 = vadd.xlane.f32.xlu0 %v294_v37  ;;  %298 = vadd.xlane.f32.xlu1 %v297_v41 }
  0x8c   :  { %v10786_v43 = vmul.f32 0.5, %v226_v40  ;;  %v10788_v44 = vmul.f32 0.5, %v227_v42 }
  0x8d   :  { %v141_v46 = vpop.permute.xlu0 %140  ;;  %v143_v47 = vpop.permute.xlu1 %142 }
  0x8e   :  { %v228_v48 = vadd.f32 %v141_v46, %v68_v8  ;;  %v303_v49 = vsel %vm284_vm0, %v10786_v43, 0.0  ;;  %v229_v50 = vadd.f32 %v143_v47, %v69_v9  ;;  %v306_v53 = vsel %vm284_vm0, %v10788_v44, 0.0 }
  0x8f   :  { %301 = vadd.xlane.f32.xlu0 %v300_v45  ;;  %304 = vadd.xlane.f32.xlu1 %v303_v49 }
  0x90   :  { %v10794_v51 = vmul.f32 0.5, %v228_v48  ;;  %v10796_v52 = vmul.f32 0.5, %v229_v50 }
  0x91   :  { %v145_v54 = vpop.permute.xlu0 %144  ;;  %v147_v55 = vpop.permute.xlu1 %146 }
  0x92   :  { %v230_v56 = vadd.f32 %v145_v54, %v70_v10  ;;  %v309_v57 = vsel %vm284_vm0, %v10794_v51, 0.0  ;;  %v231_v58 = vadd.f32 %v147_v55, %v71_v11  ;;  %v312_v61 = vsel %vm284_vm0, %v10796_v52, 0.0 }
  0x93   :  { %307 = vadd.xlane.f32.xlu0 %v306_v53  ;;  %310 = vadd.xlane.f32.xlu1 %v309_v57 }
  0x94   :  { %v10802_v59 = vmul.f32 0.5, %v230_v56  ;;  %v10804_v60 = vmul.f32 0.5, %v231_v58 }
  0x95   :  { %v149_v62 = vpop.permute.xlu0 %148  ;;  %v151_v63 = vpop.permute.xlu1 %150 }
  0x96   :  { %v232_v0 = vadd.f32 %v149_v62, %v10739_v12  ;;  %v315_v1 = vsel %vm284_vm0, %v10802_v59, 0.0  ;;  %v233_v2 = vadd.f32 %v151_v63, %v10744_v13  ;;  %v318_v5 = vsel %vm284_vm0, %v10804_v60, 0.0 }
  0x97   :  { %313 = vadd.xlane.f32.xlu0 %v312_v61  ;;  %316 = vadd.xlane.f32.xlu1 %v315_v1 }
  0x98   :  { %v10812_v3 = vmul.f32 0.5, %v232_v0  ;;  %v10814_v4 = vmul.f32 0.5, %v233_v2 }
  0x99   :  { %v153_v6 = vpop.permute.xlu0 %152  ;;  %v155_v7 = vpop.permute.xlu1 %154 }
  0x9a   :  { %v234_v8 = vadd.f32 %v153_v6, %v10753_v14  ;;  %v321_v9 = vsel %vm284_vm0, %v10812_v3, 0.0  ;;  %v235_v10 = vadd.f32 %v155_v7, %v10758_v15  ;;  %v324_v13 = vsel %vm284_vm0, %v10814_v4, 0.0 }
  0x9b   :  { %319 = vadd.xlane.f32.xlu0 %v318_v5  ;;  %322 = vadd.xlane.f32.xlu1 %v321_v9 }
  0x9c   :  { %v10822_v11 = vmul.f32 0.5, %v234_v8  ;;  %v10824_v12 = vmul.f32 0.5, %v235_v10 }
  0x9e   :  { %v327_v16 = vsel %vm284_vm0, %v10822_v11, 0.0  ;;  %v330_v14 = vsel %vm284_vm0, %v10824_v12, 0.0 }
  0x9f   :  { %325 = vadd.xlane.f32.xlu0 %v324_v13  ;;  %328 = vadd.xlane.f32.xlu1 %v327_v16 }
  0xa3   :  { %331 = vadd.xlane.f32.xlu0 %v330_v14 }
 0x110   :  { %v287_v17 = vpop.xlane.xlu0 %286 }
 0x111   :  { %v382_v15 = vmul.f32 0.03125, %v287_v17 }
 0x113   :  { %v10833_v18 = vsub.f32 %v10764_v20, %v382_v15 }
 0x114   :  { %v290_v19 = vpop.xlane.xlu1 %289  ;;  %v293_v22 = vpop.xlane.xlu0 %292 }
 0x115   :  { %v383_v23 = vmul.f32 0.03125, %v290_v19  ;;  %v384_v24 = vmul.f32 0.03125, %v293_v22  ;;  %v446_v25 = vmul.f32 %v10833_v18, %v10833_v18 }
 0x117   :  { %v10838_v26 = vsub.f32 %v10770_v27, %v383_v23  ;;  %v10841_v29 = vsub.f32 %v10766_v21, %v384_v24  ;;  %v478_v30 = vsel %vm284_vm0, %v446_v25, 0.0 }
 0x118   :  { %v299_v31 = vpop.xlane.xlu1 %298  ;;  %479 = vadd.xlane.f32.xlu1 %v478_v30  ;;  %v296_v32 = vpop.xlane.xlu0 %295 }
 0x119   :  { %v386_v33 = vmul.f32 0.03125, %v299_v31  ;;  %v385_v34 = vmul.f32 0.03125, %v296_v32  ;;  %v447_v37 = vmul.f32 %v10838_v26, %v10838_v26  ;;  %v448_v38 = vmul.f32 %v10841_v29, %v10841_v29 }
 0x11b   :  { %v10849_v39 = vsub.f32 %v10778_v35, %v386_v33  ;;  %v10852_v40 = vsub.f32 %v10772_v28, %v385_v34  ;;  %v481_v41 = vsel %vm284_vm0, %v447_v37, 0.0  ;;  %v484_v42 = vsel %vm284_vm0, %v448_v38, 0.0 }
 0x11c   :  { %482 = vadd.xlane.f32.xlu0 %v481_v41  ;;  %v305_v45 = vpop.xlane.xlu1 %304  ;;  %485 = vadd.xlane.f32.xlu1 %v484_v42  ;;  %v302_v46 = vpop.xlane.xlu0 %301 }
 0x11d   :  { %v388_v47 = vmul.f32 0.03125, %v305_v45  ;;  %v387_v48 = vmul.f32 0.03125, %v302_v46  ;;  %v450_v49 = vmul.f32 %v10849_v39, %v10849_v39  ;;  %v449_v50 = vmul.f32 %v10852_v40, %v10852_v40 }
 0x11f   :  { %v10861_v53 = vsub.f32 %v10786_v43, %v388_v47  ;;  %v10864_v54 = vsub.f32 %v10780_v36, %v387_v48  ;;  %v490_v55 = vsel %vm284_vm0, %v450_v49, 0.0  ;;  %v487_v56 = vsel %vm284_vm0, %v449_v50, 0.0 }
 0x120   :  { %v311_v57 = vpop.xlane.xlu1 %310  ;;  %491 = vadd.xlane.f32.xlu1 %v490_v55  ;;  %488 = vadd.xlane.f32.xlu0 %v487_v56  ;;  %v308_v58 = vpop.xlane.xlu0 %307 }
 0x121   :  { %v390_v61 = vmul.f32 0.03125, %v311_v57  ;;  %v389_v62 = vmul.f32 0.03125, %v308_v58  ;;  %v452_v63 = vmul.f32 %v10861_v53, %v10861_v53  ;;  %v451_v0 = vmul.f32 %v10864_v54, %v10864_v54 }
 0x123   :  { %v10873_v1 = vsub.f32 %v10794_v51, %v390_v61  ;;  %v10876_v2 = vsub.f32 %v10788_v44, %v389_v62  ;;  %v496_v5 = vsel %vm284_vm0, %v452_v63, 0.0  ;;  %v493_v6 = vsel %vm284_vm0, %v451_v0, 0.0 }
 0x124   :  { %v317_v7 = vpop.xlane.xlu1 %316  ;;  %497 = vadd.xlane.f32.xlu1 %v496_v5  ;;  %494 = vadd.xlane.f32.xlu0 %v493_v6  ;;  %v314_v8 = vpop.xlane.xlu0 %313 }
 0x125   :  { %v392_v9 = vmul.f32 0.03125, %v317_v7  ;;  %v391_v10 = vmul.f32 0.03125, %v314_v8  ;;  %v454_v13 = vmul.f32 %v10873_v1, %v10873_v1  ;;  %v453_v16 = vmul.f32 %v10876_v2, %v10876_v2  ;;  %v941_v7 = vld [vmem:[%s15936_s3 + $0x8] sm:$0xff]  ;;  %v943_v8 = vld [vmem:[%s15936_s3 + $0x18] sm:$0xff] }
 0x127   :  { %v10885_v14 = vsub.f32 %v10802_v59, %v392_v9  ;;  %v10888_v17 = vsub.f32 %v10796_v52, %v391_v10  ;;  %v502_v15 = vsel %vm284_vm0, %v454_v13, 0.0  ;;  %v499_v19 = vsel %vm284_vm0, %v453_v16, 0.0  ;;  %v940_v9 = vld [vmem:[%s15936_s3] sm:$0xff]  ;;  %v942_v13 = vld [vmem:[%s15936_s3 + $0x10] sm:$0xff]  ;;  %v945_v16 = vld [vmem:[%s15936_s3 + $0x28] sm:$0xff] }
 0x128   :  { %v323_v22 = vpop.xlane.xlu1 %322  ;;  %503 = vadd.xlane.f32.xlu1 %v502_v15  ;;  %500 = vadd.xlane.f32.xlu0 %v499_v19  ;;  %v320_v23 = vpop.xlane.xlu0 %319  ;;  %v9003_v10 = vpack.c.bf16 %v943_v8, %v941_v7  ;;  %v947_v15 = vld [vmem:[%s15936_s3 + $0x38] sm:$0xff]  ;;  %v9005_v19 = vpack.c.bf16 %v942_v13, %v940_v9 }
 0x129   :  { %v394_v24 = vmul.f32 0.03125, %v323_v22  ;;  %v393_v25 = vmul.f32 0.03125, %v320_v23  ;;  %v456_v30 = vmul.f32 %v10885_v14, %v10885_v14  ;;  %v455_v31 = vmul.f32 %v10888_v17, %v10888_v17  ;;  %v944_v23 = vld [vmem:[%s15936_s3 + $0x20] sm:$0xff] }
 0x12a   :  { %v9007_v22 = vpack.c.bf16 %v947_v15, %v945_v16  ;;  %9004 = vmatprep.subr.bf16.mxu0 %v9003_v10  ;;  %v15986_v16 = vmov 0.0  }
 0x12b   :  { %v10897_v32 = vsub.f32 %v10812_v3, %v394_v24  ;;  %v10900_v33 = vsub.f32 %v10804_v60, %v393_v25  ;;  %v508_v34 = vsel %vm284_vm0, %v456_v30, 0.0  ;;  %v505_v37 = vsel %vm284_vm0, %v455_v31, 0.0  ;;  %v946_v24 = vld [vmem:[%s15936_s3 + $0x30] sm:$0xff]  ;;  %v949_v25 = vld [vmem:[%s15936_s3 + $0x48] sm:$0xff]  ;;  %v951_v30 = vld [vmem:[%s15936_s3 + $0x58] sm:$0xff]  ;;  %9006 = vmatpush1.bf16.msra.mxu0 %v9005_v19  ;;  %1129 = vmatprep.mubr.f32.mxu0 %v15986_v16 }
 0x12c   :  { %v329_v38 = vpop.xlane.xlu1 %328  ;;  %509 = vadd.xlane.f32.xlu1 %v508_v34  ;;  %506 = vadd.xlane.f32.xlu0 %v505_v37  ;;  %v326_v41 = vpop.xlane.xlu0 %325  ;;  %v9009_v31 = vpack.c.bf16 %v946_v24, %v944_v23  ;;  %v9011_v34 = vpack.c.bf16 %v951_v30, %v949_v25  ;;  %v948_v37 = vld [vmem:[%s15936_s3 + $0x40] sm:$0xff] }
 0x12d   :  { %v396_v42 = vmul.f32 0.03125, %v329_v38  ;;  %v395_v45 = vmul.f32 0.03125, %v326_v41  ;;  %v458_v46 = vmul.f32 %v10897_v32, %v10897_v32  ;;  %v457_v47 = vmul.f32 %v10900_v33, %v10900_v33  ;;  %9008 = vmatprep.subr.bf16.mxu0 %v9007_v22  ;;  %v950_v38 = vld [vmem:[%s15936_s3 + $0x50] sm:$0xff]  ;;  %v953_v41 = vld [vmem:[%s15936_s3 + $0x68] sm:$0xff]  ;;  %1530 = vmatprep.mubr.f32.mxu1 %v15986_v16 }
 0x12f   :  { %v10909_v48 = vsub.f32 %v10822_v11, %v396_v42  ;;  %v10912_v49 = vsub.f32 %v10814_v4, %v395_v45  ;;  %v514_v50 = vsel %vm284_vm0, %v458_v46, 0.0  ;;  %v511_v55 = vsel %vm284_vm0, %v457_v47, 0.0  ;;  %v955_v42 = vld [vmem:[%s15936_s3 + $0x78] sm:$0xff]  ;;  %9010 = vmatpush1.bf16.msra.mxu0 %v9009_v31  ;;  %v952_v47 = vld [vmem:[%s15936_s3 + $0x60] sm:$0xff] }
 0x130   :  { %515 = vadd.xlane.f32.xlu1 %v514_v50  ;;  %512 = vadd.xlane.f32.xlu0 %v511_v55  ;;  %v332_v56 = vpop.xlane.xlu0 %331  ;;  %v9013_v45 = vpack.c.bf16 %v950_v38, %v948_v37  ;;  %v9015_v46 = vpack.c.bf16 %v955_v42, %v953_v41  ;;  %v954_v50 = vld [vmem:[%s15936_s3 + $0x70] sm:$0xff]  ;;  %v10981_v37 = vld [vmem:[%s16346_s27] ss:$0 sm:$0xff] }
 0x131   :  { %v397_v57 = vmul.f32 0.03125, %v332_v56  ;;  %v460_v58 = vmul.f32 %v10909_v48, %v10909_v48  ;;  %v459_v61 = vmul.f32 %v10912_v49, %v10912_v49  ;;  %9012 = vmatprep.subr.bf16.mxu0 %v9011_v34  ;;  %v9017_v55 = vpack.c.bf16 %v954_v50, %v952_v47  ;;  %v10987_v47 = vld [vmem:[%s16347_s0] ss:$0 sm:$0xff] }
 0x133   :  { %v10921_v62 = vsub.f32 %v10824_v12, %v397_v57  ;;  %v520_v63 = vsel %vm284_vm0, %v460_v58, 0.0  ;;  %v517_v0 = vsel %vm284_vm0, %v459_v61, 0.0  ;;  %9014 = vmatpush1.bf16.msra.mxu0 %v9013_v45 }
 0x134   :  { %521 = vadd.xlane.f32.xlu1 %v520_v63  ;;  %518 = vadd.xlane.f32.xlu0 %v517_v0 }
 0x135   :  { %v461_v5 = vmul.f32 %v10921_v62, %v10921_v62  ;;  %9016 = vmatprep.subr.bf16.mxu0 %v9015_v46 }
 0x137   :  { %v523_v6 = vsel %vm284_vm0, %v461_v5, 0.0  ;;  %9018 = vmatpush1.bf16.msra.mxu0 %v9017_v55 }
 0x138   :  { %524 = vadd.xlane.f32.xlu0 %v523_v6 }
 0x1a5   :  { %v480_v56 = vpop.xlane.xlu1 %479 }
 0x1a6   :  { %v574_v57 = vmul.f32 0.03125, %v480_v56 }
 0x1a8   :  { %v606_v58 = vadd.f32 1e-06, %v574_v57 }
 0x1a9   :  { %v486_v61 = vpop.xlane.xlu1 %485  ;;  %v483_v63 = vpop.xlane.xlu0 %482 }
 0x1aa   :  { %10287 = vrsqrt.f32 %v606_v58  ;;  %v576_v0 = vmul.f32 0.03125, %v486_v61  ;;  %v575_v5 = vmul.f32 0.03125, %v483_v63 }
 0x1ac   :  { %v608_v6 = vadd.f32 1e-06, %v576_v0  ;;  %v607_v7 = vadd.f32 1e-06, %v575_v5 }
 0x1ad   :  { %v492_v8 = vpop.xlane.xlu1 %491  ;;  %v489_v9 = vpop.xlane.xlu0 %488 }
 0x1ae   :  { %10289 = vrsqrt.f32 %v608_v6  ;;  %v578_v10 = vmul.f32 0.03125, %v492_v8  ;;  %v577_v13 = vmul.f32 0.03125, %v489_v9 }
 0x1af   :  { %10291 = vrsqrt.f32 %v607_v7 }
 0x1b0   :  { %v610_v15 = vadd.f32 1e-06, %v578_v10  ;;  %v609_v19 = vadd.f32 1e-06, %v577_v13 }
 0x1b1   :  { %v498_v22 = vpop.xlane.xlu1 %497  ;;  %v495_v23 = vpop.xlane.xlu0 %494 }
 0x1b2   :  { %10293 = vrsqrt.f32 %v610_v15  ;;  %v580_v24 = vmul.f32 0.03125, %v498_v22  ;;  %v579_v25 = vmul.f32 0.03125, %v495_v23 }
 0x1b3   :  { %10295 = vrsqrt.f32 %v609_v19 }
 0x1b4   :  { %v10288_v30 = vpop.eup %10287  ;;  %v612_v31 = vadd.f32 1e-06, %v580_v24  ;;  %v611_v34 = vadd.f32 1e-06, %v579_v25 }
 0x1b5   :  { %v504_v38 = vpop.xlane.xlu1 %503  ;;  %v501_v41 = vpop.xlane.xlu0 %500  ;;  %v670_v42 = vmul.f32 %v10288_v30, %v10833_v18 }
 0x1b6   :  { %10297 = vrsqrt.f32 %v612_v31  ;;  %v582_v45 = vmul.f32 0.03125, %v504_v38  ;;  %v581_v46 = vmul.f32 0.03125, %v501_v41 }
 0x1b7   :  { %10299 = vrsqrt.f32 %v611_v34  ;;  %v709_v50 = vmul.f32 %v10981_v37, %v670_v42 }
 0x1b8   :  { %v10290_v55 = vpop.eup %10289  ;;  %v614_v56 = vadd.f32 1e-06, %v582_v45  ;;  %v613_v57 = vadd.f32 1e-06, %v581_v46 }
 0x1b9   :  { %v10292_v58 = vpop.eup %10291  ;;  %v510_v61 = vpop.xlane.xlu1 %509  ;;  %v748_v0 = vadd.f32 %v10987_v47, %v709_v50  ;;  %v672_v18 = vmul.f32 %v10290_v55, %v10841_v29 }
 0x1ba   :  { %v507_v63 = vpop.xlane.xlu0 %506  ;;  %10301 = vrsqrt.f32 %v614_v56  ;;  %v584_v5 = vmul.f32 0.03125, %v510_v61  ;;  %v671_v7 = vmul.f32 %v10292_v58, %v10838_v26 }
 0x1bb   :  { %v583_v6 = vmul.f32 0.03125, %v507_v63  ;;  %10303 = vrsqrt.f32 %v613_v57  ;;  %812 = vrot.lane.b32.xlu1 %v748_v0, %s10587_s1  ;;  %v711_v8 = vmul.f32 %v10981_v37, %v672_v18 }
 0x1bc   :  { %v10294_v9 = vpop.eup %10293  ;;  %v616_v10 = vadd.f32 1e-06, %v584_v5  ;;  %v710_v15 = vmul.f32 %v10981_v37, %v671_v7 }
 0x1bd   :  { %v615_v13 = vadd.f32 1e-06, %v583_v6  ;;  %v10296_v19 = vpop.eup %10295  ;;  %v516_v22 = vpop.xlane.xlu1 %515  ;;  %v750_v29 = vadd.f32 %v10987_v47, %v711_v8  ;;  %v674_v24 = vmul.f32 %v10294_v9, %v10849_v39 }
 0x1be   :  { %v513_v23 = vpop.xlane.xlu0 %512  ;;  %10305 = vrsqrt.f32 %v616_v10  ;;  %v586_v26 = vmul.f32 0.03125, %v516_v22  ;;  %v749_v30 = vadd.f32 %v10987_v47, %v710_v15  ;;  %v673_v34 = vmul.f32 %v10296_v19, %v10852_v40 }
 0x1bf   :  { %v585_v25 = vmul.f32 0.03125, %v513_v23  ;;  %10307 = vrsqrt.f32 %v615_v13  ;;  %816 = vrot.lane.b32.xlu1 %v750_v29, %s10587_s1  ;;  %v713_v31 = vmul.f32 %v10981_v37, %v674_v24 }
 0x1c0   :  { %v10298_v38 = vpop.eup %10297  ;;  %v618_v41 = vadd.f32 1e-06, %v586_v26  ;;  %814 = vrot.lane.b32.xlu0 %v749_v30, %s10587_s1  ;;  %v712_v55 = vmul.f32 %v10981_v37, %v673_v34 }
 0x1c1   :  { %v617_v42 = vadd.f32 1e-06, %v585_v25  ;;  %v10300_v45 = vpop.eup %10299  ;;  %v522_v46 = vpop.xlane.xlu1 %521  ;;  %v752_v50 = vadd.f32 %v10987_v47, %v713_v31  ;;  %v676_v56 = vmul.f32 %v10298_v38, %v10861_v53 }
 0x1c2   :  { %v519_v39 = vpop.xlane.xlu0 %518  ;;  %10309 = vrsqrt.f32 %v618_v41  ;;  %v588_v57 = vmul.f32 0.03125, %v522_v46  ;;  %v675_v61 = vmul.f32 %v10300_v45, %v10864_v54  ;;  %v751_v40 = vadd.f32 %v10987_v47, %v712_v55 }
 0x1c3   :  { %v587_v58 = vmul.f32 0.03125, %v519_v39  ;;  %10311 = vrsqrt.f32 %v617_v42  ;;  %v715_v63 = vmul.f32 %v10981_v37, %v676_v56 }
 0x1c4   :  { %v10302_v0 = vpop.eup %10301  ;;  %v620_v18 = vadd.f32 1e-06, %v588_v57  ;;  %820 = vrot.lane.b32.xlu0 %v752_v50, %s10587_s1  ;;  %v714_v6 = vmul.f32 %v10981_v37, %v675_v61  ;;  %818 = vrot.lane.b32.xlu1 %v751_v40, %s10587_s1 }
 0x1c5   :  { %v619_v5 = vadd.f32 1e-06, %v587_v58  ;;  %v10304_v7 = vpop.eup %10303  ;;  %v754_v8 = vadd.f32 %v10987_v47, %v715_v63  ;;  %v678_v54 = vmul.f32 %v10302_v0, %v10873_v1 }
 0x1c6   :  { %v525_v53 = vpop.xlane.xlu0 %524  ;;  %10313 = vrsqrt.f32 %v620_v18  ;;  %v753_v10 = vadd.f32 %v10987_v47, %v714_v6  ;;  %v677_v13 = vmul.f32 %v10304_v7, %v10876_v2  ;;  %v11081_v18 = vld [vmem:[%s16345_s29 + $0x98] sm:$0xff]  ;;  %v11095_v6 = vld [vmem:[%s16345_s29 + $0xa8] sm:$0xff]  ;;  %v11104_v7 = vld [vmem:[%s16345_s29 + $0xc0] sm:$0xff] }
 0x1c7   :  { %v589_v9 = vmul.f32 0.03125, %v525_v53  ;;  %10315 = vrsqrt.f32 %v619_v5  ;;  %v717_v15 = vmul.f32 %v10981_v37, %v678_v54  ;;  %v11090_v5 = vld [vmem:[%s16345_s29 + $0xb0] sm:$0xff]  ;;  %v11109_v53 = vld [vmem:[%s16345_s29 + $0xb8] sm:$0xff]  ;;  %v11123_v54 = vld [vmem:[%s16345_s29 + $0xc8] sm:$0xff] }
 0x1c8   :  { %v10306_v19 = vpop.eup %10305  ;;  %824 = vrot.lane.b32.xlu0 %v754_v8, %s10587_s1  ;;  %v716_v23 = vmul.f32 %v10981_v37, %v677_v13  ;;  %822 = vrot.lane.b32.xlu1 %v753_v10, %s10587_s1  ;;  %v11118_v8 = vld [vmem:[%s16345_s29 + $0xd0] sm:$0xff]  ;;  %v11137_v10 = vld [vmem:[%s16345_s29 + $0xd8] sm:$0xff] }
 0x1c9   :  { %v621_v22 = vadd.f32 1e-06, %v589_v9  ;;  %v10308_v29 = vpop.eup %10307  ;;  %v756_v1 = vadd.f32 %v10987_v47, %v717_v15  ;;  %v680_v24 = vmul.f32 %v10306_v19, %v10885_v14  ;;  %v11132_v9 = vld [vmem:[%s16345_s29 + $0xe0] sm:$0xff]  ;;  %v11146_v13 = vld [vmem:[%s16345_s29 + $0xf0] sm:$0xff]  ;;  %v11151_v15 = vld [vmem:[%s16345_s29 + $0xe8] sm:$0xff] }
 0x1ca   :  { %v755_v26 = vadd.f32 %v10987_v47, %v716_v23  ;;  %v679_v2 = vmul.f32 %v10308_v29, %v10888_v17  ;;  %v11160_v19 = vld [vmem:[%s16345_s29 + $0xf8] sm:$0xff] }
 0x1cb   :  { %10317 = vrsqrt.f32 %v621_v22  ;;  %v719_v25 = vmul.f32 %v10981_v37, %v680_v24 }
 0x1cc   :  { %v10310_v30 = vpop.eup %10309  ;;  %828 = vrot.lane.b32.xlu0 %v756_v1, %s10587_s1  ;;  %v718_v31 = vmul.f32 %v10981_v37, %v679_v2  ;;  %826 = vrot.lane.b32.xlu1 %v755_v26, %s10587_s1 }
 0x1cd   :  { %v10312_v34 = vpop.eup %10311  ;;  %v758_v38 = vadd.f32 %v10987_v47, %v719_v25  ;;  %v682_v41 = vmul.f32 %v10310_v30, %v10897_v32 }
 0x1ce   :  { %v757_v14 = vadd.f32 %v10987_v47, %v718_v31  ;;  %v681_v42 = vmul.f32 %v10312_v34, %v10900_v33 }
 0x1cf   :  { %v721_v17 = vmul.f32 %v10981_v37, %v682_v41 }
 0x1d0   :  { %v10314_v45 = vpop.eup %10313  ;;  %832 = vrot.lane.b32.xlu0 %v758_v38, %s10587_s1  ;;  %v720_v46 = vmul.f32 %v10981_v37, %v681_v42  ;;  %830 = vrot.lane.b32.xlu1 %v757_v14, %s10587_s1 }
 0x1d1   :  { %v10316_v39 = vpop.eup %10315  ;;  %v760_v50 = vadd.f32 %v10987_v47, %v721_v17  ;;  %v684_v55 = vmul.f32 %v10314_v45, %v10909_v48 }
 0x1d2   :  { %v759_v32 = vadd.f32 %v10987_v47, %v720_v46  ;;  %v683_v56 = vmul.f32 %v10316_v39, %v10912_v49  ;;  %v11053_v49 = vld [vmem:[%s16345_s29 + $0x80] sm:$0xff] }
 0x1d3   :  { %v723_v33 = vmul.f32 %v10981_v37, %v684_v55 }
 0x1d4   :  { %836 = vrot.lane.b32.xlu0 %v760_v50, %s10587_s1  ;;  %v722_v58 = vmul.f32 %v10981_v37, %v683_v56  ;;  %834 = vrot.lane.b32.xlu1 %v759_v32, %s10587_s1 }
 0x1d5   :  { %v10318_v57 = vpop.eup %10317  ;;  %v762_v61 = vadd.f32 %v10987_v47, %v723_v33 }
 0x1d6   :  { %v685_v40 = vmul.f32 %v10318_v57, %v10921_v62  ;;  %v761_v63 = vadd.f32 %v10987_v47, %v722_v58  ;;  %v11062_v62 = vld [vmem:[%s16345_s29 + $0x90] sm:$0xff] }
 0x1d8   :  { %v724_v48 = vmul.f32 %v10981_v37, %v685_v40  ;;  %840 = vrot.lane.b32.xlu0 %v762_v61, %s10587_s1  ;;  %838 = vrot.lane.b32.xlu1 %v761_v63, %s10587_s1  ;;  %v11067_v37 = vld [vmem:[%s16345_s29 + $0x88] sm:$0xff] }
 0x1da   :  { %v763_v0 = vadd.f32 %v10987_v47, %v724_v48  ;;  %v11076_v47 = vld [vmem:[%s16345_s29 + $0xa0] sm:$0xff] }
 0x1dc   :  { %156 = vrot.lane.b32.xlu0 %v11053_v49, %s10585_s19  ;;  %842 = vrot.lane.b32.xlu1 %v763_v0, %s10587_s1 }
 0x1e0   :  { %160 = vrot.lane.b32.xlu0 %v11062_v62, %s10585_s19  ;;  %158 = vrot.lane.b32.xlu1 %v11067_v37, %s10585_s19 }
 0x1e4   :  { %164 = vrot.lane.b32.xlu0 %v11076_v47, %s10585_s19  ;;  %162 = vrot.lane.b32.xlu1 %v11081_v18, %s10585_s19 }
 0x1e8   :  { %168 = vrot.lane.b32.xlu0 %v11090_v5, %s10585_s19  ;;  %166 = vrot.lane.b32.xlu1 %v11095_v6, %s10585_s19 }
 0x1ec   :  { %172 = vrot.lane.b32.xlu0 %v11104_v7, %s10585_s19  ;;  %170 = vrot.lane.b32.xlu1 %v11109_v53, %s10585_s19 }
 0x1f0   :  { %176 = vrot.lane.b32.xlu0 %v11118_v8, %s10585_s19  ;;  %174 = vrot.lane.b32.xlu1 %v11123_v54, %s10585_s19 }
 0x1f4   :  { %180 = vrot.lane.b32.xlu0 %v11132_v9, %s10585_s19  ;;  %178 = vrot.lane.b32.xlu1 %v11137_v10, %s10585_s19 }
 0x1f8   :  { %184 = vrot.lane.b32.xlu0 %v11146_v13, %s10585_s19  ;;  %182 = vrot.lane.b32.xlu1 %v11151_v15, %s10585_s19 }
 0x1fc   :  { %186 = vrot.lane.b32.xlu1 %v11160_v19, %s10585_s19 }
 0x22d   :  { %v813_v22 = vpop.permute.xlu1 %812 }
 0x22e   :  { %v908_v23 = vsel %vm284_vm0, %v10764_v20, %v813_v22 }
 0x22f   :  { %8280 = vmatmul.mubr.msk.f32.vlgmr.msra.gmra.mrb[0].mxu0 %vm968_vm1, %v908_v23 }
 0x230   :  { %1135 = vmatprep.mubr.f32.mxu0 %v15986_v16 }
 0x231   :  { %v817_v29 = vpop.permute.xlu1 %816 }
 0x232   :  { %v815_v1 = vpop.permute.xlu0 %814  ;;  %v910_v2 = vsel %vm284_vm0, %v10766_v21, %v817_v29 }
 0x233   :  { %v909_v24 = vsel %vm284_vm0, %v10770_v27, %v815_v1 }
 0x234   :  { %8281 = vmatmul.mubr.msk.f32.gmra.mrb[2].mxu0 %vm968_vm1, %v909_v24 }
 0x235   :  { %1141 = vmatprep.mubr.f32.mxu0 %v15986_v16 }
 0x236   :  { %v821_v26 = vpop.permute.xlu0 %820  ;;  %v819_v25 = vpop.permute.xlu1 %818 }
 0x237   :  { %v911_v30 = vsel %vm284_vm0, %v10772_v28, %v819_v25  ;;  %v912_v34 = vsel %vm284_vm0, %v10778_v35, %v821_v26 }
 0x238   :  { %8282 = vmatmul.mubr.msk.f32.gmra.mrb[4].mxu0 %vm968_vm1, %v910_v2 }
 0x239   :  { %1147 = vmatprep.mubr.f32.mxu0 %v15986_v16 }
 0x23a   :  { %v825_v20 = vpop.permute.xlu0 %824  ;;  %v823_v31 = vpop.permute.xlu1 %822 }
 0x23b   :  { %v913_v41 = vsel %vm284_vm0, %v10780_v36, %v823_v31  ;;  %v914_v42 = vsel %vm284_vm0, %v10786_v43, %v825_v20 }
 0x23c   :  { %8283 = vmatmul.mubr.msk.f32.gmra.mrb[6].mxu0 %vm968_vm1, %v911_v30 }
 0x23d   :  { %1153 = vmatprep.mubr.f32.mxu0 %v15986_v16 }
 0x23e   :  { %v829_v27 = vpop.permute.xlu0 %828  ;;  %v827_v38 = vpop.permute.xlu1 %826 }
 0x23f   :  { %v915_v45 = vsel %vm284_vm0, %v10788_v44, %v827_v38  ;;  %v916_v39 = vsel %vm284_vm0, %v10794_v51, %v829_v27 }
 0x240   :  { %8284 = vmatmul.mubr.msk.f32.gmra.mrb[8].mxu0 %vm968_vm1, %v912_v34 }
 0x241   :  { %1159 = vmatprep.mubr.f32.mxu0 %v15986_v16 }
 0x242   :  { %v833_v21 = vpop.permute.xlu0 %832  ;;  %v831_v14 = vpop.permute.xlu1 %830 }
 0x243   :  { %v917_v32 = vsel %vm284_vm0, %v10796_v52, %v831_v14  ;;  %v918_v52 = vsel %vm284_vm0, %v10802_v59, %v833_v21 }
 0x244   :  { %8285 = vmatmul.mubr.msk.f32.gmra.mrb[10].mxu0 %vm968_vm1, %v913_v41 }
 0x245   :  { %1165 = vmatprep.mubr.f32.mxu0 %v15986_v16 }
 0x246   :  { %v837_v28 = vpop.permute.xlu0 %836  ;;  %v835_v17 = vpop.permute.xlu1 %834 }
 0x248   :  { %8286 = vmatmul.mubr.msk.f32.gmra.mrb[12].mxu0 %vm968_vm1, %v914_v42 }
 0x249   :  { %1171 = vmatprep.mubr.f32.mxu0 %v15986_v16 }
 0x24a   :  { %v11192_v35 = vpop.permute.xlu0 %840  ;;  %v839_v36 = vpop.permute.xlu1 %838 }
 0x24c   :  { %8287 = vmatmul.mubr.msk.f32.gmra.mrb[14].mxu0 %vm968_vm1, %v915_v45 }
 0x24d   :  { %1177 = vmatprep.mubr.f32.mxu0 %v15986_v16 }
 0x24e   :  { %v157_v46 = vpop.permute.xlu0 %156  ;;  %v11200_v43 = vpop.permute.xlu1 %842 }
 0x24f   :  { %v236_v50 = vadd.f32 %v157_v46, %v11053_v49 }
 0x250   :  { %8288 = vmatmul.mubr.msk.f32.gmra.mrb[16].mxu0 %vm968_vm1, %v916_v39 }
 0x251   :  { %v11204_v55 = vmul.f32 0.5, %v236_v50  ;;  %1183 = vmatprep.mubr.f32.mxu0 %v15986_v16 }
 0x252   :  { %v161_v44 = vpop.permute.xlu0 %160  ;;  %v159_v56 = vpop.permute.xlu1 %158 }
 0x253   :  { %v238_v33 = vadd.f32 %v161_v44, %v11062_v62  ;;  %v333_v51 = vsel %vm284_vm0, %v11204_v55, 0.0  ;;  %v237_v57 = vadd.f32 %v159_v56, %v11067_v37 }
 0x254   :  { %8289 = vmatmul.mubr.msk.f32.gmra.mrb[18].mxu0 %vm968_vm1, %v917_v32  ;;  %334 = vadd.xlane.f32.xlu0 %v333_v51 }
 0x255   :  { %v11214_v58 = vmul.f32 0.5, %v238_v33  ;;  %1189 = vmatprep.mubr.f32.mxu0 %v15986_v16  ;;  %v11217_v61 = vmul.f32 0.5, %v237_v57 }
 0x256   :  { %v165_v40 = vpop.permute.xlu0 %164  ;;  %v163_v63 = vpop.permute.xlu1 %162 }
 0x257   :  { %v240_v48 = vadd.f32 %v165_v40, %v11076_v47  ;;  %v339_v49 = vsel %vm284_vm0, %v11214_v58, 0.0  ;;  %v239_v0 = vadd.f32 %v163_v63, %v11081_v18  ;;  %v336_v62 = vsel %vm284_vm0, %v11217_v61, 0.0 }
 0x258   :  { %8290 = vmatmul.mubr.msk.f32.gmra.mrb[20].mxu0 %vm968_vm1, %v918_v52  ;;  %340 = vadd.xlane.f32.xlu0 %v339_v49  ;;  %v919_v47 = vsel %vm284_vm0, %v10804_v60, %v835_v17 }
 0x259   :  { %v11228_v37 = vmul.f32 0.5, %v240_v48  ;;  %337 = vadd.xlane.f32.xlu1 %v336_v62  ;;  %1195 = vmatprep.mubr.f32.mxu0 %v15986_v16  ;;  %v11231_v59 = vmul.f32 0.5, %v239_v0 }
 0x25a   :  { %v169_v22 = vpop.permute.xlu0 %168  ;;  %v167_v23 = vpop.permute.xlu1 %166 }
 0x25b   :  { %v242_v18 = vadd.f32 %v169_v22, %v11090_v5  ;;  %v345_v29 = vsel %vm284_vm0, %v11228_v37, 0.0  ;;  %v241_v1 = vadd.f32 %v167_v23, %v11095_v6  ;;  %v342_v24 = vsel %vm284_vm0, %v11231_v59, 0.0 }
 0x25c   :  { %8291 = vmatmul.mubr.msk.f32.gmra.mrb[22].mxu0 %vm968_vm1, %v919_v47  ;;  %343 = vadd.xlane.f32.xlu0 %v342_v24  ;;  %v920_v5 = vsel %vm284_vm0, %v10812_v3, %v837_v28 }
 0x25d   :  { %v11242_v26 = vmul.f32 0.5, %v242_v18  ;;  %346 = vadd.xlane.f32.xlu1 %v345_v29  ;;  %v11244_v2 = vmul.f32 0.5, %v241_v1  ;;  %1201 = vmatprep.mubr.f32.mxu0 %v15986_v16 }
 0x25e   :  { %v173_v60 = vpop.permute.xlu0 %172  ;;  %v171_v25 = vpop.permute.xlu1 %170 }
 0x25f   :  { %v244_v6 = vadd.f32 %v173_v60, %v11104_v7  ;;  %v351_v20 = vsel %vm284_vm0, %v11242_v26, 0.0  ;;  %v243_v30 = vadd.f32 %v171_v25, %v11109_v53  ;;  %v348_v31 = vsel %vm284_vm0, %v11244_v2, 0.0 }
 0x260   :  { %8292 = vmatmul.mubr.msk.f32.gmra.mrb[24].mxu0 %vm968_vm1, %v920_v5  ;;  %349 = vadd.xlane.f32.xlu0 %v348_v31  ;;  %v921_v7 = vsel %vm284_vm0, %v10814_v4, %v839_v36 }
 0x261   :  { %v11256_v27 = vmul.f32 0.5, %v244_v6  ;;  %352 = vadd.xlane.f32.xlu1 %v351_v20  ;;  %v11258_v34 = vmul.f32 0.5, %v243_v30  ;;  %1207 = vmatprep.mubr.f32.mxu0 %v15986_v16 }
 0x262   :  { %v177_v3 = vpop.permute.xlu0 %176  ;;  %v175_v38 = vpop.permute.xlu1 %174 }
 0x263   :  { %v246_v53 = vadd.f32 %v177_v3, %v11118_v8  ;;  %v357_v21 = vsel %vm284_vm0, %v11256_v27, 0.0  ;;  %v245_v41 = vadd.f32 %v175_v38, %v11123_v54  ;;  %v354_v14 = vsel %vm284_vm0, %v11258_v34, 0.0 }
 0x264   :  { %8293 = vmatmul.mubr.msk.f32.gmra.mrb[26].mxu0 %vm968_vm1, %v921_v7  ;;  %355 = vadd.xlane.f32.xlu0 %v354_v14  ;;  %v922_v8 = vsel %vm284_vm0, %v10822_v11, %v11192_v35 }
 0x265   :  { %v11270_v28 = vmul.f32 0.5, %v246_v53  ;;  %358 = vadd.xlane.f32.xlu1 %v357_v21  ;;  %v11272_v42 = vmul.f32 0.5, %v245_v41  ;;  %1213 = vmatprep.mubr.f32.mxu0 %v15986_v16 }
 0x266   :  { %v181_v4 = vpop.permute.xlu0 %180  ;;  %v179_v17 = vpop.permute.xlu1 %178 }
 0x267   :  { %v248_v54 = vadd.f32 %v181_v4, %v11132_v9  ;;  %v363_v45 = vsel %vm284_vm0, %v11270_v28, 0.0  ;;  %v247_v36 = vadd.f32 %v179_v17, %v11137_v10  ;;  %v360_v46 = vsel %vm284_vm0, %v11272_v42, 0.0 }
 0x268   :  { %8294 = vmatmul.mubr.msk.f32.gmra.mrb[28].mxu0 %vm968_vm1, %v922_v8  ;;  %361 = vadd.xlane.f32.xlu0 %v360_v46  ;;  %v923_v9 = vsel %vm284_vm0, %v10824_v12, %v11200_v43 }
 0x269   :  { %v11285_v39 = vmul.f32 0.5, %v248_v54  ;;  %364 = vadd.xlane.f32.xlu1 %v363_v45  ;;  %v11287_v50 = vmul.f32 0.5, %v247_v36  ;;  %1219 = vmatprep.mubr.f32.mxu0 %v15986_v16 }
 0x26a   :  { %v185_v11 = vpop.permute.xlu0 %184  ;;  %v183_v35 = vpop.permute.xlu1 %182 }
 0x26b   :  { %16348 = vst [vmem:[#allocation5_spill] sm:$0xff] %v11285_v39  ;;  %v250_v10 = vadd.f32 %v185_v11, %v11146_v13  ;;  %v369_v44 = vsel %vm284_vm0, %v11285_v39, 0.0  ;;  %v249_v32 = vadd.f32 %v183_v35, %v11151_v15  ;;  %v366_v56 = vsel %vm284_vm0, %v11287_v50, 0.0 }
 0x26c   :  { %8295 = vmatmul.mubr.msk.f32.gmra.mrb[30].mxu0 %vm968_vm1, %v923_v9  ;;  %367 = vadd.xlane.f32.xlu0 %v366_v56 }
 0x26d   :  { %v11300_v33 = vmul.f32 0.5, %v250_v10  ;;  %370 = vadd.xlane.f32.xlu1 %v369_v44  ;;  %v11302_v51 = vmul.f32 0.5, %v249_v32  ;;  %1225 = vmatprep.mubr.f32.mxu0 %v15986_v16 }
 0x26e   :  { %v187_v12 = vpop.permute.xlu1 %186 }
 0x26f   :  { %16349 = vst [vmem:[#allocation6_spill] sm:$0xff] %v11300_v33  ;;  %16350 = vst [vmem:[#allocation7_spill] sm:$0xff] %v11302_v51  ;;  %v375_v13 = vsel %vm284_vm0, %v11300_v33, 0.0  ;;  %v251_v43 = vadd.f32 %v187_v12, %v11160_v19  ;;  %v372_v15 = vsel %vm284_vm0, %v11302_v51, 0.0 }
 0x270   :  { %373 = vadd.xlane.f32.xlu0 %v372_v15 }
 0x271   :  { %376 = vadd.xlane.f32.xlu1 %v375_v13  ;;  %v11310_v57 = vmul.f32 0.5, %v251_v43 }
 0x273   :  { %16351 = vst [vmem:[#allocation8_spill] sm:$0xff] %v11310_v57  ;;  %v378_v40 = vsel %vm284_vm0, %v11310_v57, 0.0 }
 0x274   :  { %379 = vadd.xlane.f32.xlu0 %v378_v40 }
 0x2e1   :  { %v335_v52 = vpop.xlane.xlu0 %334 }
 0x2e2   :  { %v398_v63 = vmul.f32 0.03125, %v335_v52  ;;  %v958_v52 = vlaneseq }
 0x2e4   :  { %v11315_v48 = vsub.f32 %v11204_v55, %v398_v63 }
 0x2e5   :  { %v341_v49 = vpop.xlane.xlu0 %340 }
 0x2e6   :  { %v338_v0 = vpop.xlane.xlu1 %337  ;;  %v400_v62 = vmul.f32 0.03125, %v341_v49  ;;  %v462_v19 = vmul.f32 %v11315_v48, %v11315_v48 }
 0x2e7   :  { %v399_v22 = vmul.f32 0.03125, %v338_v0 }
 0x2e8   :  { %v11320_v47 = vsub.f32 %v11214_v58, %v400_v62  ;;  %v526_v23 = vsel %vm284_vm0, %v462_v19, 0.0 }
 0x2e9   :  { %v11324_v18 = vsub.f32 %v11217_v61, %v399_v22  ;;  %527 = vadd.xlane.f32.xlu1 %v526_v23  ;;  %v344_v1 = vpop.xlane.xlu0 %343 }
 0x2ea   :  { %v347_v29 = vpop.xlane.xlu1 %346  ;;  %v464_v24 = vmul.f32 %v11320_v47, %v11320_v47  ;;  %v401_v5 = vmul.f32 0.03125, %v344_v1 }
 0x2eb   :  { %v402_v60 = vmul.f32 0.03125, %v347_v29  ;;  %v463_v25 = vmul.f32 %v11324_v18, %v11324_v18 }
 0x2ec   :  { %v532_v6 = vsel %vm284_vm0, %v464_v24, 0.0  ;;  %v11335_v30 = vsub.f32 %v11231_v59, %v401_v5 }
 0x2ed   :  { %v11332_v20 = vsub.f32 %v11228_v37, %v402_v60  ;;  %v529_v31 = vsel %vm284_vm0, %v463_v25, 0.0  ;;  %533 = vadd.xlane.f32.xlu1 %v532_v6  ;;  %v350_v7 = vpop.xlane.xlu0 %349  ;;  %v959_v60 = vshrl.u32 %v958_v52, 7 }
 0x2ee   :  { %530 = vadd.xlane.f32.xlu0 %v529_v31  ;;  %v353_v3 = vpop.xlane.xlu1 %352  ;;  %v403_v53 = vmul.f32 0.03125, %v350_v7  ;;  %v465_v41 = vmul.f32 %v11335_v30, %v11335_v30 }
 0x2ef   :  { %v404_v38 = vmul.f32 0.03125, %v353_v3  ;;  %v466_v21 = vmul.f32 %v11332_v20, %v11332_v20 }
 0x2f0   :  { %v11346_v4 = vsub.f32 %v11244_v2, %v403_v53  ;;  %v535_v17 = vsel %vm284_vm0, %v465_v41, 0.0 }
 0x2f1   :  { %v11343_v14 = vsub.f32 %v11242_v26, %v404_v38  ;;  %v538_v8 = vsel %vm284_vm0, %v466_v21, 0.0  ;;  %v356_v45 = vpop.xlane.xlu0 %355 }
 0x2f2   :  { %v359_v54 = vpop.xlane.xlu1 %358  ;;  %539 = vadd.xlane.f32.xlu1 %v538_v8  ;;  %536 = vadd.xlane.f32.xlu0 %v535_v17  ;;  %v405_v46 = vmul.f32 0.03125, %v356_v45  ;;  %v467_v9 = vmul.f32 %v11346_v4, %v11346_v4  ;;  %v11390_v8 = vsub.s32 0, %v959_v60  ;;  %v11392_v17 = vsub.s32 1, %v959_v60 }
 0x2f3   :  { %v406_v36 = vmul.f32 0.03125, %v359_v54  ;;  %v468_v11 = vmul.f32 %v11343_v14, %v11343_v14 }
 0x2f4   :  { %v11358_v10 = vsub.f32 %v11258_v34, %v405_v46  ;;  %v541_v32 = vsel %vm284_vm0, %v467_v9, 0.0  ;;  %16352 = vst [vmem:[#allocation9_spill] sm:$0xff] %v11390_v8  ;;  %16353 = vst [vmem:[#allocation10_spill] sm:$0xff] %v11392_v17 }
 0x2f5   :  { %v11355_v35 = vsub.f32 %v11256_v27, %v406_v36  ;;  %v544_v44 = vsel %vm284_vm0, %v468_v11, 0.0  ;;  %v362_v12 = vpop.xlane.xlu0 %361  ;;  %v956_v11 = vld [vmem:[%s15937_s4] sm:$0x3] }
 0x2f6   :  { %v365_v56 = vpop.xlane.xlu1 %364  ;;  %545 = vadd.xlane.f32.xlu1 %v544_v44  ;;  %542 = vadd.xlane.f32.xlu0 %v541_v32  ;;  %v407_v43 = vmul.f32 0.03125, %v362_v12  ;;  %v469_v40 = vmul.f32 %v11358_v10, %v11358_v10 }
 0x2f7   :  { %v408_v13 = vmul.f32 0.03125, %v365_v56  ;;  %v470_v15 = vmul.f32 %v11355_v35, %v11355_v35 }
 0x2f8   :  { %v11370_v49 = vsub.f32 %v11272_v42, %v407_v43  ;;  %v547_v62 = vsel %vm284_vm0, %v469_v40, 0.0  ;;  %v11410_v43 = vrot.slane %v956_v11, %v11390_v8  ;;  %v11416_v40 = vrot.slane %v956_v11, %v11392_v17 }
 0x2f9   :  { %v11367_v63 = vsub.f32 %v11270_v28, %v408_v13  ;;  %v550_v0 = vsel %vm284_vm0, %v470_v15, 0.0  ;;  %v368_v22 = vpop.xlane.xlu0 %367 }
 0x2fa   :  { %v371_v19 = vpop.xlane.xlu1 %370  ;;  %551 = vadd.xlane.f32.xlu1 %v550_v0  ;;  %548 = vadd.xlane.f32.xlu0 %v547_v62  ;;  %v409_v29 = vmul.f32 0.03125, %v368_v22  ;;  %v471_v24 = vmul.f32 %v11370_v49, %v11370_v49  ;;  %16354 = vst [vmem:[#allocation11_spill] sm:$0xff] %v11410_v43  ;;  %16355 = vst [vmem:[#allocation12_spill] sm:$0xff] %v11416_v40 }
 0x2fb   :  { %v410_v23 = vmul.f32 0.03125, %v371_v19  ;;  %v472_v1 = vmul.f32 %v11367_v63, %v11367_v63 }
 0x2fc   :  { %v11382_v25 = vsub.f32 %v11287_v50, %v409_v29  ;;  %v553_v31 = vsel %vm284_vm0, %v471_v24, 0.0 }
 0x2fd   :  { %v11379_v5 = vsub.f32 %v11285_v39, %v410_v23  ;;  %v556_v6 = vsel %vm284_vm0, %v472_v1, 0.0  ;;  %v374_v7 = vpop.xlane.xlu0 %373 }
 0x2fe   :  { %v377_v3 = vpop.xlane.xlu1 %376  ;;  %557 = vadd.xlane.f32.xlu1 %v556_v6  ;;  %554 = vadd.xlane.f32.xlu0 %v553_v31  ;;  %v411_v53 = vmul.f32 0.03125, %v374_v7  ;;  %v473_v41 = vmul.f32 %v11382_v25, %v11382_v25 }
 0x2ff   :  { %v412_v38 = vmul.f32 0.03125, %v377_v3  ;;  %v474_v21 = vmul.f32 %v11379_v5, %v11379_v5 }
 0x300   :  { %v11398_v45 = vsub.f32 %v11302_v51, %v411_v53  ;;  %v559_v46 = vsel %vm284_vm0, %v473_v41, 0.0 }
 0x301   :  { %v11395_v54 = vsub.f32 %v11300_v33, %v412_v38  ;;  %v562_v36 = vsel %vm284_vm0, %v474_v21, 0.0  ;;  %v380_v9 = vpop.xlane.xlu0 %379 }
 0x302   :  { %563 = vadd.xlane.f32.xlu1 %v562_v36  ;;  %560 = vadd.xlane.f32.xlu0 %v559_v46  ;;  %v1131_v44 = vpop.f32.mrb[0].mxu0  ;;  %v413_v32 = vmul.f32 0.03125, %v380_v9  ;;  %v475_v13 = vmul.f32 %v11398_v45, %v11398_v45 }
 0x303   :  { %v1133_v56 = vpop.f32.mrb[1].mxu0  ;;  %v476_v12 = vmul.f32 %v11395_v54, %v11395_v54  ;;  %v1132_v22 = vadd.f32 %v1131_v44, %v11410_v43 }
 0x304   :  { %v11413_v15 = vsub.f32 %v11310_v57, %v413_v32  ;;  %v565_v0 = vsel %vm284_vm0, %v475_v13, 0.0  ;;  %v1134_v1 = vadd.f32 %v1133_v56, %v11416_v40 }
 0x305   :  { %v568_v52 = vsel %vm284_vm0, %v476_v12, 0.0 }
 0x306   :  { %569 = vadd.xlane.f32.xlu1 %v568_v52  ;;  %566 = vadd.xlane.f32.xlu0 %v565_v0  ;;  %v477_v19 = vmul.f32 %v11413_v15, %v11413_v15 }
 0x307   :  { %v1137_v62 = vpop.f32.mrb[2].mxu0 }
 0x308   :  { %v1138_v23 = vadd.f32 %v1137_v62, %v11410_v43  ;;  %v1139_v29 = vpop.f32.mrb[3].mxu0  ;;  %v571_v60 = vsel %vm284_vm0, %v477_v19, 0.0 }
 0x309   :  { %v1140_v24 = vadd.f32 %v1139_v29, %v11416_v40 }
 0x30a   :  { %v11427_v6 = vpack.c.bf16 %v1138_v23, %v1132_v22  ;;  %572 = vadd.xlane.f32.xlu0 %v571_v60 }
 0x30b   :  { %v11429_v31 = vpack.c.bf16 %v1140_v24, %v1134_v1  ;;  %v1143_v3 = vpop.f32.mrb[4].mxu0 }
 0x30c   :  { %v1145_v7 = vpop.f32.mrb[5].mxu0  ;;  %v1144_v53 = vadd.f32 %v1143_v3, %v11410_v43 }
 0x30d   :  { %9020 = vmatprep.subr.bf16.mxu0 %v11429_v31  ;;  %10011 = vmatprep.subr.bf16.mxu1 %v11429_v31  ;;  %v1146_v36 = vadd.f32 %v1145_v7, %v11416_v40 }
 0x30e   :  { %9022 = vmatpush1.bf16.msra.mxu0 %v11427_v6  ;;  %10019 = vmatpush1.bf16.msra.mxu1 %v11427_v6 }
 0x30f   :  { %v1149_v38 = vpop.f32.mrb[6].mxu0 }
 0x310   :  { %v1150_v21 = vadd.f32 %v1149_v38, %v11410_v43  ;;  %v1151_v41 = vpop.f32.mrb[7].mxu0 }
 0x311   :  { %v1152_v46 = vadd.f32 %v1151_v41, %v11416_v40 }
 0x312   :  { %v11439_v11 = vpack.c.bf16 %v1150_v21, %v1144_v53 }
 0x313   :  { %v11441_v9 = vpack.c.bf16 %v1152_v46, %v1146_v36  ;;  %v1155_v44 = vpop.f32.mrb[8].mxu0 }
 0x314   :  { %v1157_v32 = vpop.f32.mrb[9].mxu0  ;;  %v1156_v12 = vadd.f32 %v1155_v44, %v11410_v43 }
 0x315   :  { %9024 = vmatprep.subr.bf16.mxu0 %v11441_v9  ;;  %10012 = vmatprep.subr.bf16.mxu1 %v11441_v9  ;;  %v1158_v0 = vadd.f32 %v1157_v32, %v11416_v40 }
 0x316   :  { %9026 = vmatpush1.bf16.msra.mxu0 %v11439_v11  ;;  %10020 = vmatpush1.bf16.msra.mxu1 %v11439_v11 }
 0x317   :  { %v1161_v56 = vpop.f32.mrb[10].mxu0 }
 0x318   :  { %v1162_v13 = vadd.f32 %v1161_v56, %v11410_v43  ;;  %v1163_v52 = vpop.f32.mrb[11].mxu0 }
 0x319   :  { %v1164_v62 = vadd.f32 %v1163_v52, %v11416_v40 }
 0x31a   :  { %v11451_v19 = vpack.c.bf16 %v1162_v13, %v1156_v12 }
 0x31b   :  { %v11453_v22 = vpack.c.bf16 %v1164_v62, %v1158_v0  ;;  %v1167_v23 = vpop.f32.mrb[12].mxu0 }
 0x31c   :  { %v1169_v29 = vpop.f32.mrb[13].mxu0  ;;  %v1168_v24 = vadd.f32 %v1167_v23, %v11410_v43 }
 0x31d   :  { %9028 = vmatprep.subr.bf16.mxu0 %v11453_v22  ;;  %10013 = vmatprep.subr.bf16.mxu1 %v11453_v22  ;;  %v1170_v7 = vadd.f32 %v1169_v29, %v11416_v40 }
 0x31e   :  { %9030 = vmatpush1.bf16.msra.mxu0 %v11451_v19  ;;  %10021 = vmatpush1.bf16.msra.mxu1 %v11451_v19 }
 0x31f   :  { %v1173_v1 = vpop.f32.mrb[14].mxu0 }
 0x320   :  { %v1174_v60 = vadd.f32 %v1173_v1, %v11410_v43  ;;  %v1175_v3 = vpop.f32.mrb[15].mxu0 }
 0x321   :  { %v1176_v38 = vadd.f32 %v1175_v3, %v11416_v40 }
 0x322   :  { %v11463_v53 = vpack.c.bf16 %v1174_v60, %v1168_v24 }
 0x323   :  { %v11465_v21 = vpack.c.bf16 %v1176_v38, %v1170_v7  ;;  %v1179_v41 = vpop.f32.mrb[16].mxu0 }
 0x324   :  { %v1181_v36 = vpop.f32.mrb[17].mxu0  ;;  %v1180_v44 = vadd.f32 %v1179_v41, %v11410_v43 }
 0x325   :  { %9032 = vmatprep.subr.bf16.mxu0 %v11465_v21  ;;  %10014 = vmatprep.subr.bf16.mxu1 %v11465_v21  ;;  %v1182_v12 = vadd.f32 %v1181_v36, %v11416_v40 }
 0x326   :  { %9034 = vmatpush1.bf16.msra.mxu0 %v11463_v53  ;;  %10022 = vmatpush1.bf16.msra.mxu1 %v11463_v53 }
 0x327   :  { %v1185_v46 = vpop.f32.mrb[18].mxu0 }
 0x328   :  { %v1186_v32 = vadd.f32 %v1185_v46, %v11410_v43  ;;  %v1187_v56 = vpop.f32.mrb[19].mxu0 }
 0x329   :  { %v1188_v13 = vadd.f32 %v1187_v56, %v11416_v40 }
 0x32a   :  { %v11475_v52 = vpack.c.bf16 %v1186_v32, %v1180_v44 }
 0x32b   :  { %v11477_v0 = vpack.c.bf16 %v1188_v13, %v1182_v12  ;;  %v1191_v62 = vpop.f32.mrb[20].mxu0 }
 0x32c   :  { %v1193_v23 = vpop.f32.mrb[21].mxu0  ;;  %v1192_v1 = vadd.f32 %v1191_v62, %v11410_v43 }
 0x32d   :  { %9036 = vmatprep.subr.bf16.mxu0 %v11477_v0  ;;  %10015 = vmatprep.subr.bf16.mxu1 %v11477_v0  ;;  %v1194_v3 = vadd.f32 %v1193_v23, %v11416_v40 }
 0x32e   :  { %9038 = vmatpush1.bf16.msra.mxu0 %v11475_v52  ;;  %10023 = vmatpush1.bf16.msra.mxu1 %v11475_v52 }
 0x32f   :  { %v1197_v29 = vpop.f32.mrb[22].mxu0 }
 0x330   :  { %v1198_v24 = vadd.f32 %v1197_v29, %v11410_v43  ;;  %v1199_v60 = vpop.f32.mrb[23].mxu0 }
 0x331   :  { %v1200_v7 = vadd.f32 %v1199_v60, %v11416_v40 }
 0x332   :  { %v11487_v38 = vpack.c.bf16 %v1198_v24, %v1192_v1 }
 0x333   :  { %v11489_v41 = vpack.c.bf16 %v1200_v7, %v1194_v3  ;;  %v1203_v36 = vpop.f32.mrb[24].mxu0 }
 0x334   :  { %v1205_v46 = vpop.f32.mrb[25].mxu0  ;;  %v1204_v32 = vadd.f32 %v1203_v36, %v11410_v43 }
 0x335   :  { %9040 = vmatprep.subr.bf16.mxu0 %v11489_v41  ;;  %10016 = vmatprep.subr.bf16.mxu1 %v11489_v41  ;;  %v1206_v13 = vadd.f32 %v1205_v46, %v11416_v40 }
 0x336   :  { %9042 = vmatpush1.bf16.msra.mxu0 %v11487_v38  ;;  %10024 = vmatpush1.bf16.msra.mxu1 %v11487_v38 }
 0x337   :  { %v1209_v44 = vpop.f32.mrb[26].mxu0 }
 0x338   :  { %v1210_v56 = vadd.f32 %v1209_v44, %v11410_v43  ;;  %v1211_v12 = vpop.f32.mrb[27].mxu0 }
 0x339   :  { %v1212_v62 = vadd.f32 %v1211_v12, %v11416_v40 }
 0x33a   :  { %v11499_v23 = vpack.c.bf16 %v1210_v56, %v1204_v32  ;;  %v11516_v56 = vld [vmem:[%s15938_s5 + $0x10] sm:$0xff]  }
 0x33b   :  { %v11501_v29 = vpack.c.bf16 %v1212_v62, %v1206_v13  ;;  %v1215_v1 = vpop.f32.mrb[28].mxu0  ;;  %16356 = vst [vmem:[#allocation13_spill] sm:$0xff] %v11516_v56  ;;  %v15965_v13 = vunpack.c.l.bf16 %v11516_v56  ;;  %v15963_v62 = vunpack.c.h.bf16 %v11516_v56 }
 0x33c   :  { %v1217_v24 = vpop.f32.mrb[29].mxu0  ;;  %v1216_v3 = vadd.f32 %v1215_v1, %v11410_v43  ;;  %v11535_v1 = vld [vmem:[%s15938_s5 + $0x18] sm:$0xff]  }
 0x33d   :  { %9044 = vmatprep.subr.bf16.mxu0 %v11501_v29  ;;  %10017 = vmatprep.subr.bf16.mxu1 %v11501_v29  ;;  %v1218_v46 = vadd.f32 %v1217_v24, %v11416_v40  ;;  %16357 = vst [vmem:[#allocation14_spill] sm:$0xff] %v11535_v1  ;;  %v15960_v24 = vunpack.c.l.bf16 %v11535_v1 }
 0x33e   :  { %9046 = vmatpush1.bf16.msra.mxu0 %v11499_v23  ;;  %10025 = vmatpush1.bf16.msra.mxu1 %v11499_v23 }
 0x33f   :  { %v1221_v60 = vpop.f32.mrb[30].mxu0 }
 0x340   :  { %v1222_v7 = vadd.f32 %v1221_v60, %v11410_v43  ;;  %v1223_v36 = vpop.f32.mrb[31].mxu0  ;;  %v15957_v60 = vunpack.c.h.bf16 %v11535_v1 }
 0x341   :  { %v1224_v44 = vadd.f32 %v1223_v36, %v11416_v40 }
 0x342   :  { %v11511_v32 = vpack.c.bf16 %v1222_v7, %v1216_v3  ;;  %v11552_v3 = vld [vmem:[%s15938_s5 + $0x20] sm:$0xff]  }
 0x343   :  { %v11518_v12 = vpack.c.bf16 %v1224_v44, %v1218_v46  ;;  %16358 = vst [vmem:[#allocation15_spill] sm:$0xff] %v11552_v3  ;;  %v15955_v7 = vunpack.c.l.bf16 %v11552_v3  ;;  %v15956_v36 = vunpack.c.h.bf16 %v11552_v3  ;;  %v11569_v46 = vld [vmem:[%s15938_s5 + $0x28] sm:$0xff]  }
 0x344   :  { %16359 = vst [vmem:[#allocation16_spill] sm:$0xff] %v11569_v46  ;;  %v15958_v44 = vunpack.c.l.bf16 %v11569_v46 }
 0x345   :  { %9048 = vmatprep.subr.bf16.mxu0 %v11518_v12  ;;  %10018 = vmatprep.subr.bf16.mxu1 %v11518_v12 }
 0x346   :  { %9050 = vmatpush1.bf16.msra.mxu0 %v11511_v32  ;;  %10026 = vmatpush1.bf16.msra.mxu1 %v11511_v32 }
 0x347   :  { %9052 = vmatprep.subr.bf16.mxu1 %v11429_v31  ;;  %9116 = vmatprep.subr.bf16.mxu0 %v11429_v31 }
 0x349   :  { %1531 = vmatmul.mubr.f32.vlgmr.msra.gmra.mrb[0].mxu1 %v15965_v13 }
 0x34a   :  { %9054 = vmatpush1.bf16.msra.mxu1 %v11427_v6  ;;  %1536 = vmatprep.mubr.f32.mxu1 %v15986_v16 }
 0x34b   :  { %9056 = vmatprep.subr.bf16.mxu1 %v11441_v9 }
 0x34d   :  { %1537 = vmatmul.mubr.f32.gmra.mrb[2].mxu1 %v15963_v62 }
 0x34e   :  { %9058 = vmatpush1.bf16.msra.mxu1 %v11439_v11  ;;  %1542 = vmatprep.mubr.f32.mxu1 %v15986_v16 }
 0x34f   :  { %9060 = vmatprep.subr.bf16.mxu1 %v11453_v22 }
 0x351   :  { %1543 = vmatmul.mubr.f32.gmra.mrb[4].mxu1 %v15960_v24 }
 0x352   :  { %9062 = vmatpush1.bf16.msra.mxu1 %v11451_v19  ;;  %1548 = vmatprep.mubr.f32.mxu1 %v15986_v16 }
 0x353   :  { %9064 = vmatprep.subr.bf16.mxu1 %v11465_v21 }
 0x355   :  { %1549 = vmatmul.mubr.f32.gmra.mrb[6].mxu1 %v15957_v60 }
 0x356   :  { %9066 = vmatpush1.bf16.msra.mxu1 %v11463_v53  ;;  %1554 = vmatprep.mubr.f32.mxu1 %v15986_v16 }
 0x357   :  { %9068 = vmatprep.subr.bf16.mxu1 %v11477_v0 }
 0x359   :  { %1555 = vmatmul.mubr.f32.gmra.mrb[8].mxu1 %v15955_v7  ;;  %v15959_v7 = vunpack.c.h.bf16 %v11569_v46 }
 0x35a   :  { %9070 = vmatpush1.bf16.msra.mxu1 %v11475_v52  ;;  %1560 = vmatprep.mubr.f32.mxu1 %v15986_v16 }
 0x35b   :  { %9072 = vmatprep.subr.bf16.mxu1 %v11489_v41 }
 0x35d   :  { %1561 = vmatmul.mubr.f32.gmra.mrb[10].mxu1 %v15956_v36  ;;  %v11586_v36 = vld [vmem:[%s15938_s5 + $0x30] sm:$0xff]  }
 0x35e   :  { %9074 = vmatpush1.bf16.msra.mxu1 %v11487_v38  ;;  %1566 = vmatprep.mubr.f32.mxu1 %v15986_v16  ;;  %16360 = vst [vmem:[#allocation17_spill] sm:$0xff] %v11586_v36  ;;  %v15961_v60 = vunpack.c.l.bf16 %v11586_v36 }
 0x35f   :  { %9076 = vmatprep.subr.bf16.mxu1 %v11501_v29 }
 0x361   :  { %1567 = vmatmul.mubr.f32.gmra.mrb[12].mxu1 %v15958_v44  ;;  %v15962_v44 = vunpack.c.h.bf16 %v11586_v36 }
 0x362   :  { %9078 = vmatpush1.bf16.msra.mxu1 %v11499_v23  ;;  %1572 = vmatprep.mubr.f32.mxu1 %v15986_v16 }
 0x363   :  { %9080 = vmatprep.subr.bf16.mxu1 %v11518_v12 }
 0x365   :  { %1573 = vmatmul.mubr.f32.gmra.mrb[14].mxu1 %v15959_v7  ;;  %v11603_v7 = vld [vmem:[%s15938_s5 + $0x38] sm:$0xff]  }
 0x366   :  { %9082 = vmatpush1.bf16.msra.mxu1 %v11511_v32  ;;  %1753 = vmatprep.mubr.f32.mxu1 %v15986_v16  ;;  %16361 = vst [vmem:[#allocation18_spill] sm:$0xff] %v11603_v7  ;;  %v15964_v24 = vunpack.c.l.bf16 %v11603_v7 }
 0x367   :  { %9084 = vmatprep.subr.bf16.mxu1 %v11429_v31 }
 0x369   :  { %1754 = vmatmul.mubr.f32.vlgmr.msra.gmra.mrb[16].mxu1 %v15961_v60  ;;  %v15972_v60 = vunpack.c.h.bf16 %v11603_v7 }
 0x36a   :  { %9086 = vmatpush1.bf16.msra.mxu1 %v11427_v6  ;;  %1759 = vmatprep.mubr.f32.mxu1 %v15986_v16 }
 0x36b   :  { %9088 = vmatprep.subr.bf16.mxu1 %v11441_v9 }
 0x36d   :  { %1760 = vmatmul.mubr.f32.gmra.mrb[18].mxu1 %v15962_v44  ;;  %v11620_v44 = vld [vmem:[%s15938_s5 + $0x40] sm:$0xff]  }
 0x36e   :  { %9090 = vmatpush1.bf16.msra.mxu1 %v11439_v11  ;;  %1765 = vmatprep.mubr.f32.mxu1 %v15986_v16  ;;  %16362 = vst [vmem:[#allocation19_spill] sm:$0xff] %v11620_v44  ;;  %v15977_v62 = vunpack.c.l.bf16 %v11620_v44  ;;  %v15984_v46 = vunpack.c.h.bf16 %v11620_v44  ;;  %v16365_v44 = vmov 0.0  }
 0x36f   :  { %9092 = vmatprep.subr.bf16.mxu1 %v11453_v22 }
 0x371   :  { %1766 = vmatmul.mubr.f32.gmra.mrb[20].mxu1 %v15964_v24 }
 0x372   :  { %9094 = vmatpush1.bf16.msra.mxu1 %v11451_v19  ;;  %1771 = vmatprep.mubr.f32.mxu1 %v15986_v16 }
 0x373   :  { %9096 = vmatprep.subr.bf16.mxu1 %v11465_v21 }
 0x375   :  { %1772 = vmatmul.mubr.f32.gmra.mrb[22].mxu1 %v15972_v60  ;;  %v11637_v60 = vld [vmem:[%s15938_s5 + $0x48] sm:$0xff]  }
 0x376   :  { %9098 = vmatpush1.bf16.msra.mxu1 %v11463_v53  ;;  %v528_v24 = vpop.xlane.xlu1 %527  ;;  %1777 = vmatprep.mubr.f32.mxu1 %v15986_v16  ;;  %16363 = vst [vmem:[#allocation20_spill] sm:$0xff] %v11637_v60 }
 0x377   :  { %v590_v13 = vmul.f32 0.03125, %v528_v24  ;;  %9100 = vmatprep.subr.bf16.mxu1 %v11477_v0 }
 0x379   :  { %v622_v36 = vadd.f32 1e-06, %v590_v13  ;;  %1778 = vmatmul.mubr.f32.gmra.mrb[24].mxu1 %v15977_v62  ;;  %v15985_v62 = vunpack.c.l.bf16 %v11637_v60 }
 0x37a   :  { %9102 = vmatpush1.bf16.msra.mxu1 %v11475_v52  ;;  %v534_v7 = vpop.xlane.xlu1 %533  ;;  %1783 = vmatprep.mubr.f32.mxu1 %v15986_v16 }
 0x37b   :  { %10319 = vrsqrt.f32 %v622_v36  ;;  %v592_v24 = vmul.f32 0.03125, %v534_v7  ;;  %v531_v3 = vpop.xlane.xlu0 %530  ;;  %9104 = vmatprep.subr.bf16.mxu1 %v11489_v41 }
 0x37c   :  { %v591_v13 = vmul.f32 0.03125, %v531_v3  ;;  %v15995_v3 = vunpack.c.h.bf16 %v11637_v60 }
 0x37d   :  { %v624_v1 = vadd.f32 1e-06, %v592_v24  ;;  %1784 = vmatmul.mubr.f32.gmra.mrb[26].mxu1 %v15984_v46 }
 0x37e   :  { %v623_v56 = vadd.f32 1e-06, %v591_v13  ;;  %9106 = vmatpush1.bf16.msra.mxu1 %v11487_v38  ;;  %1789 = vmatprep.mubr.f32.mxu1 %v15986_v16 }
 0x37f   :  { %10321 = vrsqrt.f32 %v624_v1  ;;  %v540_v17 = vpop.xlane.xlu1 %539  ;;  %v537_v8 = vpop.xlane.xlu0 %536  ;;  %9108 = vmatprep.subr.bf16.mxu1 %v11501_v29  ;;  %v11654_v1 = vld [vmem:[%s15938_s5 + $0x50] sm:$0xff]  }
 0x380   :  { %10323 = vrsqrt.f32 %v623_v56  ;;  %v594_v7 = vmul.f32 0.03125, %v540_v17  ;;  %v593_v36 = vmul.f32 0.03125, %v537_v8  ;;  %16364 = vst [vmem:[#allocation21_spill] sm:$0xff] %v11654_v1 }
 0x381   :  { %1790 = vmatmul.mubr.f32.gmra.mrb[28].mxu1 %v15985_v62 }
 0x382   :  { %v626_v24 = vadd.f32 1e-06, %v594_v7  ;;  %v625_v46 = vadd.f32 1e-06, %v593_v36  ;;  %9110 = vmatpush1.bf16.msra.mxu1 %v11499_v23  ;;  %1795 = vmatprep.mubr.f32.mxu1 %v15986_v16  ;;  %v15996_v7 = vunpack.c.l.bf16 %v11654_v1 }
 0x383   :  { %v546_v13 = vpop.xlane.xlu1 %545  ;;  %v543_v56 = vpop.xlane.xlu0 %542  ;;  %9112 = vmatprep.subr.bf16.mxu1 %v11518_v12 }
 0x384   :  { %10325 = vrsqrt.f32 %v626_v24  ;;  %v596_v8 = vmul.f32 0.03125, %v546_v13  ;;  %v595_v17 = vmul.f32 0.03125, %v543_v56  ;;  %v11667_v13 = vld [vmem:[%s16346_s27] ss:$0 sm:$0xff] }
 0x385   :  { %v10320_v62 = vpop.eup %10319  ;;  %10327 = vrsqrt.f32 %v625_v46  ;;  %1796 = vmatmul.mubr.f32.gmra.mrb[30].mxu1 %v15995_v3 }
 0x386   :  { %v628_v36 = vadd.f32 1e-06, %v596_v8  ;;  %v627_v16 = vadd.f32 1e-06, %v595_v17  ;;  %9114 = vmatpush1.bf16.msra.mxu1 %v11511_v32  ;;  %1801 = vmatprep.mubr.f32.mxu1 %v16365_v44  ;;  %v686_v40 = vmul.f32 %v10320_v62, %v11315_v48 }
 0x387   :  { %v552_v43 = vpop.xlane.xlu1 %551  ;;  %v549_v57 = vpop.xlane.xlu0 %548  ;;  %9148 = vmatprep.subr.bf16.mxu1 %v11429_v31 }
 0x388   :  { %10329 = vrsqrt.f32 %v628_v36  ;;  %v598_v24 = vmul.f32 0.03125, %v552_v43  ;;  %v597_v46 = vmul.f32 0.03125, %v549_v57  ;;  %v725_v56 = vmul.f32 %v11667_v13, %v686_v40  ;;  %v11677_v57 = vld [vmem:[%s16347_s0] ss:$0 sm:$0xff] }
 0x389   :  { %v10322_v8 = vpop.eup %10321  ;;  %10331 = vrsqrt.f32 %v627_v16  ;;  %1802 = vmatmul.mubr.f32.gmra.mrb[32].mxu1 %v15996_v7  ;;  %v11684_v16 = vld [vmem:[%s15938_s5 + $0x58] sm:$0xff]  }
 0x38a   :  { %v10324_v62 = vpop.eup %10323  ;;  %v630_v17 = vadd.f32 1e-06, %v598_v24  ;;  %v629_v3 = vadd.f32 1e-06, %v597_v46  ;;  %1807 = vmatprep.mubr.f32.mxu1 %v16365_v44  ;;  %v764_v43 = vadd.f32 %v11677_v57, %v725_v56  ;;  %v688_v40 = vmul.f32 %v10322_v8, %v11320_v47  ;;  %16366 = vst [vmem:[#allocation22_spill] sm:$0xff] %v11684_v16 }
 0x38b   :  { %v558_v36 = vpop.xlane.xlu1 %557  ;;  %v555_v7 = vpop.xlane.xlu0 %554  ;;  %v687_v24 = vmul.f32 %v10324_v62, %v11324_v18  ;;  %v16367_v56 = vunpack.c.h.bf16 %v11654_v1  ;;  %v16003_v8 = vunpack.c.l.bf16 %v11684_v16 }
 0x38c   :  { %10333 = vrsqrt.f32 %v630_v17  ;;  %v600_v46 = vmul.f32 0.03125, %v558_v36  ;;  %v599_v48 = vmul.f32 0.03125, %v555_v7  ;;  %844 = vrot.lane.b32.xlu1 %v764_v43, %s10587_s1  ;;  %v727_v60 = vmul.f32 %v11667_v13, %v688_v40 }
 0x38d   :  { %10335 = vrsqrt.f32 %v629_v3  ;;  %1808 = vmatmul.mubr.f32.gmra.mrb[34].mxu1 %v16367_v56  ;;  %v726_v47 = vmul.f32 %v11667_v13, %v687_v24 }
 0x38e   :  { %v10326_v33 = vpop.eup %10325  ;;  %v632_v51 = vadd.f32 1e-06, %v600_v46  ;;  %v631_v39 = vadd.f32 1e-06, %v599_v48  ;;  %1813 = vmatprep.mubr.f32.mxu1 %v16365_v44  ;;  %v766_v18 = vadd.f32 %v11677_v57, %v727_v60  ;;  %v16002_v48 = vunpack.c.h.bf16 %v11684_v16 }
 0x38f   :  { %v10328_v7 = vpop.eup %10327  ;;  %v564_v62 = vpop.xlane.xlu1 %563  ;;  %v765_v43 = vadd.f32 %v11677_v57, %v726_v47  ;;  %v690_v3 = vmul.f32 %v10326_v33, %v11332_v20 }
 0x390   :  { %v561_v17 = vpop.xlane.xlu0 %560  ;;  %10337 = vrsqrt.f32 %v632_v51  ;;  %v602_v40 = vmul.f32 0.03125, %v564_v62  ;;  %848 = vrot.lane.b32.xlu1 %v766_v18, %s10587_s1  ;;  %v689_v24 = vmul.f32 %v10328_v7, %v11335_v30 }
 0x391   :  { %v601_v36 = vmul.f32 0.03125, %v561_v17  ;;  %10339 = vrsqrt.f32 %v631_v39  ;;  %846 = vrot.lane.b32.xlu0 %v765_v43, %s10587_s1  ;;  %1814 = vmatmul.mubr.f32.gmra.mrb[36].mxu1 %v16003_v8  ;;  %v729_v60 = vmul.f32 %v11667_v13, %v690_v3  ;;  %v11709_v39 = vld [vmem:[%s15938_s5 + $0x60] sm:$0xff]  }
 0x392   :  { %v10330_v46 = vpop.eup %10329  ;;  %v634_v56 = vadd.f32 1e-06, %v602_v40  ;;  %1819 = vmatprep.mubr.f32.mxu1 %v16365_v44  ;;  %v728_v51 = vmul.f32 %v11667_v13, %v689_v24  ;;  %16368 = vst [vmem:[#allocation23_spill] sm:$0xff] %v11709_v39 }
 0x393   :  { %v633_v33 = vadd.f32 1e-06, %v601_v36  ;;  %v10332_v20 = vpop.eup %10331  ;;  %v570_v30 = vpop.xlane.xlu1 %569  ;;  %v768_v18 = vadd.f32 %v11677_v57, %v729_v60  ;;  %v692_v7 = vmul.f32 %v10330_v46, %v11343_v14  ;;  %v16042_v36 = vunpack.c.l.bf16 %v11709_v39 }
 0x394   :  { %v567_v47 = vpop.xlane.xlu0 %566  ;;  %10341 = vrsqrt.f32 %v634_v56  ;;  %v604_v62 = vmul.f32 0.03125, %v570_v30  ;;  %v767_v43 = vadd.f32 %v11677_v57, %v728_v51  ;;  %v691_v40 = vmul.f32 %v10332_v20, %v11346_v4 }
 0x395   :  { %v603_v17 = vmul.f32 0.03125, %v567_v47  ;;  %10343 = vrsqrt.f32 %v633_v33  ;;  %852 = vrot.lane.b32.xlu0 %v768_v18, %s10587_s1  ;;  %1820 = vmatmul.mubr.f32.gmra.mrb[38].mxu1 %v16002_v48  ;;  %v731_v3 = vmul.f32 %v11667_v13, %v692_v7  ;;  %v16041_v7 = vunpack.c.h.bf16 %v11709_v39 }
 0x396   :  { %v10334_v24 = vpop.eup %10333  ;;  %v636_v60 = vadd.f32 1e-06, %v604_v62  ;;  %850 = vrot.lane.b32.xlu1 %v767_v43, %s10587_s1  ;;  %2001 = vmatprep.mubr.f32.mxu1 %v16365_v44  ;;  %v730_v51 = vmul.f32 %v11667_v13, %v691_v40 }
 0x397   :  { %v635_v14 = vadd.f32 1e-06, %v603_v17  ;;  %v10336_v46 = vpop.eup %10335  ;;  %v770_v33 = vadd.f32 %v11677_v57, %v731_v3  ;;  %v694_v30 = vmul.f32 %v10334_v24, %v11355_v35 }
 0x398   :  { %v573_v56 = vpop.xlane.xlu0 %572  ;;  %10345 = vrsqrt.f32 %v636_v60  ;;  %v693_v4 = vmul.f32 %v10336_v46, %v11358_v10  ;;  %v769_v20 = vadd.f32 %v11677_v57, %v730_v51  ;;  %v11738_v10 = vld [vmem:[%s15938_s5 + $0x68] sm:$0xff]  }
 0x399   :  { %v605_v47 = vmul.f32 0.03125, %v573_v56  ;;  %10347 = vrsqrt.f32 %v635_v14  ;;  %856 = vrot.lane.b32.xlu0 %v770_v33, %s10587_s1  ;;  %2002 = vmatmul.mubr.f32.vlgmr.msra.gmra.mrb[40].mxu1 %v16042_v36  ;;  %v733_v18 = vmul.f32 %v11667_v13, %v694_v30  ;;  %16369 = vst [vmem:[#allocation24_spill] sm:$0xff] %v11738_v10  ;;  %v16039_v46 = vunpack.c.l.bf16 %v11738_v10 }
 0x39a   :  { %v10338_v62 = vpop.eup %10337  ;;  %9150 = vmatpush1.bf16.msra.mxu1 %v11427_v6  ;;  %2007 = vmatprep.mubr.f32.mxu1 %v16365_v44  ;;  %v732_v35 = vmul.f32 %v11667_v13, %v693_v4 }
 0x39b   :  { %v637_v17 = vadd.f32 1e-06, %v605_v47  ;;  %v10340_v43 = vpop.eup %10339  ;;  %854 = vrot.lane.b32.xlu1 %v769_v20, %s10587_s1  ;;  %9152 = vmatprep.subr.bf16.mxu1 %v11441_v9  ;;  %v772_v3 = vadd.f32 %v11677_v57, %v733_v18  ;;  %v696_v40 = vmul.f32 %v10338_v62, %v11367_v63  ;;  %v16038_v20 = vunpack.c.h.bf16 %v11738_v10 }
 0x39c   :  { %v771_v24 = vadd.f32 %v11677_v57, %v732_v35  ;;  %v695_v60 = vmul.f32 %v10340_v43, %v11370_v49 }
 0x39d   :  { %10349 = vrsqrt.f32 %v637_v17  ;;  %860 = vrot.lane.b32.xlu0 %v772_v3, %s10587_s1  ;;  %2008 = vmatmul.mubr.f32.gmra.mrb[42].mxu1 %v16041_v7  ;;  %v735_v14 = vmul.f32 %v11667_v13, %v696_v40 }
 0x39e   :  { %v10342_v56 = vpop.eup %10341  ;;  %9154 = vmatpush1.bf16.msra.mxu1 %v11439_v11  ;;  %2013 = vmatprep.mubr.f32.mxu1 %v16365_v44  ;;  %v734_v63 = vmul.f32 %v11667_v13, %v695_v60 }
 0x39f   :  { %v10344_v33 = vpop.eup %10343  ;;  %858 = vrot.lane.b32.xlu1 %v771_v24, %s10587_s1  ;;  %9156 = vmatprep.subr.bf16.mxu1 %v11453_v22  ;;  %v774_v49 = vadd.f32 %v11677_v57, %v735_v14  ;;  %v698_v51 = vmul.f32 %v10342_v56, %v11379_v5 }
 0x3a0   :  { %v773_v30 = vadd.f32 %v11677_v57, %v734_v63  ;;  %v697_v47 = vmul.f32 %v10344_v33, %v11382_v25  ;;  %v11771_v25 = vld [vmem:[%s15938_s5 + $0x70] sm:$0xff]  }
 0x3a1   :  { %864 = vrot.lane.b32.xlu0 %v774_v49, %s10587_s1  ;;  %2014 = vmatmul.mubr.f32.gmra.mrb[44].mxu1 %v16039_v46  ;;  %v737_v4 = vmul.f32 %v11667_v13, %v698_v51  ;;  %16370 = vst [vmem:[#allocation25_spill] sm:$0xff] %v11771_v25  ;;  %v16036_v24 = vunpack.c.l.bf16 %v11771_v25  ;;  %v16035_v33 = vunpack.c.h.bf16 %v11771_v25  ;;  %v11802_v49 = vld [vmem:[%s15938_s5 + $0x78] sm:$0xff]  }
 0x3a2   :  { %v10346_v18 = vpop.eup %10345  ;;  %9158 = vmatpush1.bf16.msra.mxu1 %v11451_v19  ;;  %2019 = vmatprep.mubr.f32.mxu1 %v16365_v44  ;;  %v736_v5 = vmul.f32 %v11667_v13, %v697_v47  ;;  %16371 = vst [vmem:[#allocation26_spill] sm:$0xff] %v11802_v49  ;;  %v16032_v51 = vunpack.c.h.bf16 %v11802_v49 }
 0x3a3   :  { %v10348_v62 = vpop.eup %10347  ;;  %862 = vrot.lane.b32.xlu1 %v773_v30, %s10587_s1  ;;  %9160 = vmatprep.subr.bf16.mxu1 %v11465_v21  ;;  %v776_v17 = vadd.f32 %v11677_v57, %v737_v4  ;;  %v700_v35 = vmul.f32 %v10346_v18, %v11395_v54  ;;  %v11838_v4 = vld [vmem:[%s15938_s5 + $0x88] sm:$0xff]  }
 0x3a4   :  { %v775_v43 = vadd.f32 %v11677_v57, %v736_v5  ;;  %v699_v3 = vmul.f32 %v10348_v62, %v11398_v45  ;;  %16373 = vst [vmem:[#allocation28_spill] sm:$0xff] %v11838_v4  ;;  %v16029_v18 = vunpack.c.l.bf16 %v11838_v4  ;;  %v16027_v5 = vunpack.c.h.bf16 %v11838_v4  ;;  %v11851_v62 = vld [vmem:[%s15938_s5 + $0xc0] sm:$0xff]  }
 0x3a5   :  { %868 = vrot.lane.b32.xlu0 %v776_v17, %s10587_s1  ;;  %2020 = vmatmul.mubr.f32.gmra.mrb[46].mxu1 %v16038_v20  ;;  %v739_v40 = vmul.f32 %v11667_v13, %v700_v35  ;;  %16374 = vst [vmem:[#allocation29_spill] sm:$0xff] %v11851_v62  ;;  %v16026_v17 = vunpack.c.l.bf16 %v11851_v62  ;;  %v16025_v35 = vunpack.c.h.bf16 %v11851_v62 }
 0x3a6   :  { %9162 = vmatpush1.bf16.msra.mxu1 %v11463_v53  ;;  %2025 = vmatprep.mubr.f32.mxu1 %v16365_v44  ;;  %v738_v54 = vmul.f32 %v11667_v13, %v699_v3 }
 0x3a7   :  { %v10350_v60 = vpop.eup %10349  ;;  %866 = vrot.lane.b32.xlu1 %v775_v43, %s10587_s1  ;;  %9164 = vmatprep.subr.bf16.mxu1 %v11477_v0  ;;  %v778_v45 = vadd.f32 %v11677_v57, %v739_v40  ;;  %v11865_v43 = vld [vmem:[%s15938_s5 + $0xc8] sm:$0xff]  }
 0x3a8   :  { %v701_v14 = vmul.f32 %v10350_v60, %v11413_v15  ;;  %v777_v56 = vadd.f32 %v11677_v57, %v738_v54  ;;  %16375 = vst [vmem:[#allocation30_spill] sm:$0xff] %v11865_v43  ;;  %v16024_v3 = vunpack.c.l.bf16 %v11865_v43  ;;  %v16013_v40 = vunpack.c.h.bf16 %v11865_v43  ;;  %v11882_v60 = vld [vmem:[%s15938_s5 + $0xd0] sm:$0xff]  }
 0x3a9   :  { %872 = vrot.lane.b32.xlu0 %v778_v45, %s10587_s1  ;;  %2026 = vmatmul.mubr.f32.gmra.mrb[48].mxu1 %v16036_v24  ;;  %16376 = vst [vmem:[#allocation31_spill] sm:$0xff] %v11882_v60  ;;  %v16012_v54 = vunpack.c.l.bf16 %v11882_v60  ;;  %v16007_v45 = vunpack.c.h.bf16 %v11882_v60 }
 0x3aa   :  { %v740_v63 = vmul.f32 %v11667_v13, %v701_v14  ;;  %9166 = vmatpush1.bf16.msra.mxu1 %v11475_v52  ;;  %2031 = vmatprep.mubr.f32.mxu1 %v16365_v44  ;;  %v16034_v13 = vunpack.c.l.bf16 %v11802_v49  ;;  %v11899_v14 = vld [vmem:[%s15938_s5 + $0xd8] sm:$0xff]  }
 0x3ab   :  { %870 = vrot.lane.b32.xlu1 %v777_v56, %s10587_s1  ;;  %9168 = vmatprep.subr.bf16.mxu1 %v11489_v41  ;;  %16377 = vst [vmem:[#allocation32_spill] sm:$0xff] %v11899_v14  ;;  %v16004_v56 = vunpack.c.l.bf16 %v11899_v14 }
 0x3ac   :  { %v779_v15 = vadd.f32 %v11677_v57, %v740_v63  ;;  %v11822_v57 = vld [vmem:[%s15938_s5 + $0x80] sm:$0xff]   ;;  %v16005_v63 = vunpack.c.h.bf16 %v11899_v14 }
 0x3ad   :  { %2032 = vmatmul.mubr.f32.gmra.mrb[50].mxu1 %v16035_v33  ;;  %16372 = vst [vmem:[#allocation27_spill] sm:$0xff] %v11822_v57  ;;  %v16031_v30 = vunpack.c.l.bf16 %v11822_v57  ;;  %v16030_v47 = vunpack.c.h.bf16 %v11822_v57 }
 0x3ae   :  { %9170 = vmatpush1.bf16.msra.mxu1 %v11487_v38  ;;  %2037 = vmatprep.mubr.f32.mxu1 %v16365_v44 }
 0x3af   :  { %874 = vrot.lane.b32.xlu1 %v779_v15, %s10587_s1  ;;  %9172 = vmatprep.subr.bf16.mxu1 %v11501_v29  ;;  %v11916_v15 = vld [vmem:[%s15938_s5 + $0xe0] sm:$0xff]  }
 0x3b0   :  { %16378 = vst [vmem:[#allocation33_spill] sm:$0xff] %v11916_v15  ;;  %v16006_v48 = vunpack.c.l.bf16 %v11916_v15  ;;  %v16008_v8 = vunpack.c.h.bf16 %v11916_v15 }
 0x3b1   :  { %2038 = vmatmul.mubr.f32.gmra.mrb[52].mxu1 %v16034_v13 }
 0x3b2   :  { %9174 = vmatpush1.bf16.msra.mxu1 %v11499_v23  ;;  %2043 = vmatprep.mubr.f32.mxu1 %v16365_v44 }
 0x3b3   :  { %9176 = vmatprep.subr.bf16.mxu1 %v11518_v12 }
 0x3b5   :  { %2044 = vmatmul.mubr.f32.gmra.mrb[54].mxu1 %v16032_v51 }
 0x3b6   :  { %9178 = vmatpush1.bf16.msra.mxu1 %v11511_v32  ;;  %2049 = vmatprep.mubr.f32.mxu1 %v16365_v44 }
 0x3b7   :  { %9212 = vmatprep.subr.bf16.mxu1 %v11429_v31 }
 0x3b9   :  { %2050 = vmatmul.mubr.f32.gmra.mrb[56].mxu1 %v16031_v30 }
 0x3ba   :  { %2055 = vmatprep.mubr.f32.mxu1 %v16365_v44 }
 0x3bd   :  { %2056 = vmatmul.mubr.f32.gmra.mrb[58].mxu1 %v16030_v47 }
 0x3be   :  { %2061 = vmatprep.mubr.f32.mxu1 %v16365_v44 }
 0x3c1   :  { %2062 = vmatmul.mubr.f32.gmra.mrb[60].mxu1 %v16029_v18 }
 0x3c2   :  { %2067 = vmatprep.mubr.f32.mxu1 %v16365_v44 }
 0x3c5   :  { %2068 = vmatmul.mubr.f32.gmra.mrb[62].mxu1 %v16027_v5 }
 0x3c6   :  { %2497 = vmatprep.mubr.f32.mxu1 %v16365_v44 }
 0x3c9   :  { %2498 = vmatmul.mubr.f32.vlgmr.msra.gmra.mrb[64].mxu1 %v16026_v17 }
 0x3ca   :  { %9214 = vmatpush1.bf16.msra.mxu1 %v11427_v6  ;;  %2503 = vmatprep.mubr.f32.mxu1 %v16365_v44 }
 0x3cb   :  { %9216 = vmatprep.subr.bf16.mxu1 %v11441_v9 }
 0x3cd   :  { %2504 = vmatmul.mubr.f32.gmra.mrb[66].mxu1 %v16025_v35 }
 0x3ce   :  { %9218 = vmatpush1.bf16.msra.mxu1 %v11439_v11  ;;  %2509 = vmatprep.mubr.f32.mxu1 %v16365_v44 }
 0x3cf   :  { %9220 = vmatprep.subr.bf16.mxu1 %v11453_v22 }
 0x3d1   :  { %2510 = vmatmul.mubr.f32.gmra.mrb[68].mxu1 %v16024_v3  ;;  %v12136_v3 = vld [vmem:[%s15938_s5 + $0x180] sm:$0xff]  }
 0x3d2   :  { %9222 = vmatpush1.bf16.msra.mxu1 %v11451_v19  ;;  %2515 = vmatprep.mubr.f32.mxu1 %v16365_v44  ;;  %16392 = vst [vmem:[#allocation39_spill] sm:$0xff] %v12136_v3  ;;  %v16033_v5 = vunpack.c.l.bf16 %v12136_v3  ;;  %v16037_v30 = vunpack.c.h.bf16 %v12136_v3  ;;  %v12247_v3 = vld [vmem:[%s15938_s5 + $0x98] sm:$0xff]  }
 0x3d3   :  { %9224 = vmatprep.subr.bf16.mxu1 %v11465_v21  ;;  %16397 = vst [vmem:[#allocation44_spill] sm:$0xff] %v12247_v3 }
 0x3d5   :  { %2516 = vmatmul.mubr.f32.gmra.mrb[70].mxu1 %v16013_v40 }
 0x3d6   :  { %9226 = vmatpush1.bf16.msra.mxu1 %v11463_v53  ;;  %2521 = vmatprep.mubr.f32.mxu1 %v16365_v44 }
 0x3d7   :  { %9228 = vmatprep.subr.bf16.mxu1 %v11477_v0 }
 0x3d9   :  { %2522 = vmatmul.mubr.f32.gmra.mrb[72].mxu1 %v16012_v54 }
 0x3da   :  { %9230 = vmatpush1.bf16.msra.mxu1 %v11475_v52  ;;  %2527 = vmatprep.mubr.f32.mxu1 %v16365_v44 }
 0x3db   :  { %9232 = vmatprep.subr.bf16.mxu1 %v11489_v41 }
 0x3dd   :  { %2528 = vmatmul.mubr.f32.gmra.mrb[74].mxu1 %v16007_v45  ;;  %v11945_v45 = vld [vmem:[%s15938_s5 + $0x120] sm:$0xff]  }
 0x3de   :  { %9234 = vmatpush1.bf16.msra.mxu1 %v11487_v38  ;;  %2533 = vmatprep.mubr.f32.mxu1 %v16365_v44  ;;  %16380 = vst [vmem:[#allocation35_spill] sm:$0xff] %v11945_v45 }
 0x3df   :  { %9236 = vmatprep.subr.bf16.mxu1 %v11501_v29 }
 0x3e1   :  { %2534 = vmatmul.mubr.f32.gmra.mrb[76].mxu1 %v16004_v56  ;;  %v11932_v56 = vld [vmem:[%s15938_s5 + $0xe8] sm:$0xff]  }
 0x3e2   :  { %9238 = vmatpush1.bf16.msra.mxu1 %v11499_v23  ;;  %2539 = vmatprep.mubr.f32.mxu1 %v16365_v44  ;;  %16379 = vst [vmem:[#allocation34_spill] sm:$0xff] %v11932_v56 }
 0x3e3   :  { %9240 = vmatprep.subr.bf16.mxu1 %v11518_v12 }
 0x3e5   :  { %2540 = vmatmul.mubr.f32.gmra.mrb[78].mxu1 %v16005_v63  ;;  %v16009_v63 = vunpack.c.l.bf16 %v11932_v56 }
 0x3e6   :  { %9242 = vmatpush1.bf16.msra.mxu1 %v11511_v32  ;;  %2545 = vmatprep.mubr.f32.mxu1 %v16365_v44 }
 0x3e7   :  { %9276 = vmatprep.subr.bf16.mxu1 %v11429_v31 }
 0x3e9   :  { %2546 = vmatmul.mubr.f32.gmra.mrb[80].mxu1 %v16006_v48  ;;  %v16010_v48 = vunpack.c.h.bf16 %v11932_v56 }
 0x3ea   :  { %2551 = vmatprep.mubr.f32.mxu1 %v16365_v44 }
 0x3ed   :  { %2552 = vmatmul.mubr.f32.gmra.mrb[82].mxu1 %v16008_v8  ;;  %v16011_v8 = vunpack.c.l.bf16 %v11945_v45 }
 0x3ee   :  { %2557 = vmatprep.mubr.f32.mxu1 %v16365_v44 }
 0x3f1   :  { %2558 = vmatmul.mubr.f32.gmra.mrb[84].mxu1 %v16009_v63 }
 0x3f2   :  { %2563 = vmatprep.mubr.f32.mxu1 %v16365_v44 }
 0x3f5   :  { %2564 = vmatmul.mubr.f32.gmra.mrb[86].mxu1 %v16010_v48 }
 0x3f6   :  { %2993 = vmatprep.mubr.f32.mxu1 %v16365_v44 }
 0x3f9   :  { %2994 = vmatmul.mubr.f32.vlgmr.msra.gmra.mrb[88].mxu1 %v16011_v8 }
 0x3fa   :  { %9278 = vmatpush1.bf16.msra.mxu1 %v11427_v6  ;;  %2999 = vmatprep.mubr.f32.mxu1 %v16365_v44 }
 0x3fb   :  { %9280 = vmatprep.subr.bf16.mxu1 %v11441_v9 }
 0x3fe   :  { %9282 = vmatpush1.bf16.msra.mxu1 %v11439_v11  ;;  %v845_v63 = vpop.permute.xlu1 %844 }
 0x3ff   :  { %9284 = vmatprep.subr.bf16.mxu1 %v11453_v22  ;;  %v924_v48 = vsel %vm284_vm0, %v11204_v55, %v845_v63 }
 0x400   :  { %8296 = vmatmul.mubr.msk.f32.gmra.mrb[32].mxu0 %vm968_vm1, %v924_v48 }
 0x401   :  { %1231 = vmatprep.mubr.f32.mxu0 %v16365_v44 }
 0x402   :  { %9286 = vmatpush1.bf16.msra.mxu1 %v11451_v19  ;;  %v849_v8 = vpop.permute.xlu1 %848 }
 0x403   :  { %9288 = vmatprep.subr.bf16.mxu1 %v11465_v21  ;;  %v847_v54 = vpop.permute.xlu0 %846  ;;  %v926_v55 = vsel %vm284_vm0, %v11214_v58, %v849_v8 }
 0x404   :  { %v925_v40 = vsel %vm284_vm0, %v11217_v61, %v847_v54 }
 0x405   :  { %8297 = vmatmul.mubr.msk.f32.gmra.mrb[34].mxu0 %vm968_vm1, %v925_v40 }
 0x406   :  { %9290 = vmatpush1.bf16.msra.mxu1 %v11463_v53  ;;  %1237 = vmatprep.mubr.f32.mxu0 %v16365_v44 }
 0x407   :  { %9292 = vmatprep.subr.bf16.mxu1 %v11477_v0  ;;  %v853_v40 = vpop.permute.xlu0 %852 }
 0x408   :  { %v851_v48 = vpop.permute.xlu1 %850  ;;  %v928_v58 = vsel %vm284_vm0, %v11228_v37, %v853_v40 }
 0x409   :  { %8298 = vmatmul.mubr.msk.f32.gmra.mrb[36].mxu0 %vm968_vm1, %v926_v55  ;;  %v927_v61 = vsel %vm284_vm0, %v11231_v59, %v851_v48  ;;  %v16022_v55 = vunpack.c.h.bf16 %v11945_v45  ;;  %v12006_v48 = vld [vmem:[%s15938_s5 + $0x128] sm:$0xff]  }
 0x40a   :  { %9294 = vmatpush1.bf16.msra.mxu1 %v11475_v52  ;;  %1243 = vmatprep.mubr.f32.mxu0 %v16365_v44  ;;  %16381 = vst [vmem:[#allocation36_spill] sm:$0xff] %v12006_v48 }
 0x40b   :  { %9296 = vmatprep.subr.bf16.mxu1 %v11489_v41  ;;  %v857_v54 = vpop.permute.xlu0 %856  ;;  %3000 = vmatmul.mubr.f32.gmra.mrb[90].mxu1 %v16022_v55  ;;  %v12125_v55 = vld [vmem:[%s15938_s5 + $0x8] sm:$0xff]  }
 0x40c   :  { %v930_v37 = vsel %vm284_vm0, %v11242_v26, %v857_v54  ;;  %3005 = vmatprep.mubr.f32.mxu1 %v16365_v44  ;;  %v16045_v35 = vunpack.c.l.bf16 %v12125_v55  ;;  %v16044_v18 = vunpack.c.h.bf16 %v12125_v55 }
 0x40d   :  { %8299 = vmatmul.mubr.msk.f32.gmra.mrb[38].mxu0 %vm968_vm1, %v927_v61  ;;  %v855_v8 = vpop.permute.xlu1 %854  ;;  %v16020_v61 = vunpack.c.l.bf16 %v12006_v48 }
 0x40e   :  { %9298 = vmatpush1.bf16.msra.mxu1 %v11487_v38  ;;  %1249 = vmatprep.mubr.f32.mxu0 %v16365_v44  ;;  %v929_v59 = vsel %vm284_vm0, %v11244_v2, %v855_v8 }
 0x40f   :  { %9300 = vmatprep.subr.bf16.mxu1 %v11501_v29  ;;  %v861_v26 = vpop.permute.xlu0 %860  ;;  %3006 = vmatmul.mubr.f32.gmra.mrb[92].mxu1 %v16020_v61 }
 0x410   :  { %3011 = vmatprep.mubr.f32.mxu1 %v16365_v44 }
 0x411   :  { %8300 = vmatmul.mubr.msk.f32.gmra.mrb[40].mxu0 %vm968_vm1, %v928_v58  ;;  %v859_v63 = vpop.permute.xlu1 %858  ;;  %v16019_v58 = vunpack.c.h.bf16 %v12006_v48 }
 0x412   :  { %9302 = vmatpush1.bf16.msra.mxu1 %v11499_v23  ;;  %1255 = vmatprep.mubr.f32.mxu0 %v16365_v44  ;;  %v931_v2 = vsel %vm284_vm0, %v11258_v34, %v859_v63  ;;  %v932_v34 = vsel %vm284_vm0, %v11256_v27, %v861_v26  ;;  %v12027_v27 = vld [vmem:[%s15938_s5 + $0x130] sm:$0xff]  }
 0x413   :  { %9304 = vmatprep.subr.bf16.mxu1 %v11518_v12  ;;  %3012 = vmatmul.mubr.f32.gmra.mrb[94].mxu1 %v16019_v58  ;;  %16382 = vst [vmem:[#allocation37_spill] sm:$0xff] %v12027_v27  ;;  %v16018_v54 = vunpack.c.l.bf16 %v12027_v27  ;;  %v16016_v63 = vunpack.c.h.bf16 %v12027_v27 }
 0x414   :  { %3017 = vmatprep.mubr.f32.mxu1 %v16365_v44 }
 0x415   :  { %8301 = vmatmul.mubr.msk.f32.gmra.mrb[42].mxu0 %vm968_vm1, %v929_v59  ;;  %v863_v40 = vpop.permute.xlu1 %862  ;;  %v865_v59 = vpop.permute.xlu0 %864 }
 0x416   :  { %9306 = vmatpush1.bf16.msra.mxu1 %v11511_v32  ;;  %1261 = vmatprep.mubr.f32.mxu0 %v16365_v44  ;;  %v933_v8 = vsel %vm284_vm0, %v11272_v42, %v863_v40  ;;  %v934_v42 = vsel %vm284_vm0, %v11270_v28, %v865_v59  ;;  %v12048_v28 = vld [vmem:[%s15938_s5 + $0x138] sm:$0xff]   ;;  %v16384_v40 = vld [vmem:[#allocation5_spill] sm:$0xff] }
 0x417   :  { %3018 = vmatmul.mubr.f32.gmra.mrb[96].mxu1 %v16018_v54  ;;  %16383 = vst [vmem:[#allocation38_spill] sm:$0xff] %v12048_v28  ;;  %v16014_v59 = vunpack.c.h.bf16 %v12048_v28 }
 0x418   :  { %3023 = vmatprep.mubr.f32.mxu1 %v16365_v44 }
 0x419   :  { %8302 = vmatmul.mubr.msk.f32.gmra.mrb[44].mxu0 %vm968_vm1, %v930_v37  ;;  %v867_v37 = vpop.permute.xlu1 %866  ;;  %v869_v26 = vpop.permute.xlu0 %868 }
 0x41a   :  { %1267 = vmatprep.mubr.f32.mxu0 %v16365_v44 }
 0x41b   :  { %3024 = vmatmul.mubr.f32.gmra.mrb[98].mxu1 %v16016_v63  ;;  %v12089_v63 = vld [vmem:[%s15938_s5] sm:$0xff]  }
 0x41c   :  { %3029 = vmatprep.mubr.f32.mxu1 %v16365_v44  ;;  %v16048_v54 = vunpack.c.l.bf16 %v12089_v63 }
 0x41d   :  { %8303 = vmatmul.mubr.msk.f32.gmra.mrb[46].mxu0 %vm968_vm1, %v931_v2  ;;  %v935_v2 = vsel %vm284_vm0, %v11287_v50, %v867_v37  ;;  %v936_v50 = vsel %vm284_vm0, %v16384_v40, %v869_v26  ;;  %v873_v26 = vpop.permute.xlu0 %872 }
 0x41e   :  { %1273 = vmatprep.mubr.f32.mxu0 %v16365_v44 }
 0x421   :  { %8304 = vmatmul.mubr.msk.f32.gmra.mrb[48].mxu0 %vm968_vm1, %v932_v34  ;;  %v16015_v34 = vunpack.c.l.bf16 %v12048_v28 }
 0x422   :  { %1279 = vmatprep.mubr.f32.mxu0 %v16365_v44 }
 0x423   :  { %3030 = vmatmul.mubr.f32.gmra.mrb[100].mxu1 %v16015_v34 }
 0x424   :  { %3035 = vmatprep.mubr.f32.mxu1 %v16365_v44 }
 0x425   :  { %8305 = vmatmul.mubr.msk.f32.gmra.mrb[50].mxu0 %vm968_vm1, %v933_v8  ;;  %v871_v8 = vpop.permute.xlu1 %870 }
 0x426   :  { %1285 = vmatprep.mubr.f32.mxu0 %v16365_v44 }
 0x427   :  { %3036 = vmatmul.mubr.f32.gmra.mrb[102].mxu1 %v16014_v59 }
 0x428   :  { %3041 = vmatprep.mubr.f32.mxu1 %v16365_v44 }
 0x429   :  { %8306 = vmatmul.mubr.msk.f32.gmra.mrb[52].mxu0 %vm968_vm1, %v934_v42  ;;  %v16385_v42 = vld [vmem:[#allocation7_spill] sm:$0xff]  ;;  %v875_v59 = vpop.permute.xlu1 %874 }
 0x42a   :  { %1291 = vmatprep.mubr.f32.mxu0 %v16365_v44  ;;  %v937_v37 = vsel %vm284_vm0, %v16385_v42, %v871_v8  ;;  %v16387_v8 = vld [vmem:[#allocation6_spill] sm:$0xff]  ;;  %16388 = vst [vmem:[#allocation7_spill] sm:$0xff] %v12089_v63 }
 0x42b   :  { %v938_v42 = vsel %vm284_vm0, %v16387_v8, %v873_v26  ;;  %v16389_v26 = vld [vmem:[#allocation8_spill] sm:$0xff] }
 0x42c   :  { %v939_v8 = vsel %vm284_vm0, %v16389_v26, %v875_v59  ;;  %v16046_v59 = vunpack.c.h.bf16 %v12089_v63  ;;  %16391 = vst [vmem:[#allocation8_spill] sm:$0xff] %v12125_v55 }
 0x42d   :  { %8307 = vmatmul.mubr.msk.f32.gmra.mrb[54].mxu0 %vm968_vm1, %v935_v2  ;;  %v12069_v2 = vld [vmem:[%s15938_s5 + $0x140] sm:$0xff]  }
 0x42e   :  { %1297 = vmatprep.mubr.f32.mxu0 %v16365_v44  ;;  %16386 = vst [vmem:[#allocation5_spill] sm:$0xff] %v12069_v2  ;;  %v16017_v40 = vunpack.c.l.bf16 %v12069_v2 }
 0x430   :  { %3042 = vmatmul.mubr.f32.gmra.mrb[104].mxu1 %v16017_v40 }
 0x431   :  { %8308 = vmatmul.mubr.msk.f32.gmra.mrb[56].mxu0 %vm968_vm1, %v936_v50  ;;  %v12074_v50 = vpop.f32.mrb[0].mxu1  ;;  %3047 = vmatprep.mubr.f32.mxu1 %v16365_v44 }
 0x432   :  { %1303 = vmatprep.mubr.f32.mxu0 %v16365_v44  ;;  %v12082_v34 = vpop.f32.mrb[1].mxu1 }
 0x433   :  { %v12091_v40 = vpop.f32.mrb[2].mxu1 }
 0x434   :  { %v12105_v58 = vpop.f32.mrb[3].mxu1 }
 0x435   :  { %8309 = vmatmul.mubr.msk.f32.gmra.mrb[58].mxu0 %vm968_vm1, %v937_v37  ;;  %v16021_v37 = vunpack.c.h.bf16 %v12069_v2  ;;  %v16079_v2 = vunpack.c.l.bf16 %v12247_v3 }
 0x436   :  { %1309 = vmatprep.mubr.f32.mxu0 %v16365_v44 }
 0x437   :  { %3048 = vmatmul.mubr.f32.gmra.mrb[106].mxu1 %v16021_v37  ;;  %v12109_v37 = vpop.f32.mrb[4].mxu1 }
 0x438   :  { %3053 = vmatprep.mubr.f32.mxu1 %v16365_v44  ;;  %v12117_v26 = vpop.f32.mrb[5].mxu1 }
 0x439   :  { %8310 = vmatmul.mubr.msk.f32.gmra.mrb[60].mxu0 %vm968_vm1, %v938_v42  ;;  %v12101_v42 = vld [vmem:[%s15938_s5 + $0x148] sm:$0xff]  }
 0x43a   :  { %1315 = vmatprep.mubr.f32.mxu0 %v16365_v44  ;;  %16390 = vst [vmem:[#allocation6_spill] sm:$0xff] %v12101_v42  ;;  %v16023_v61 = vunpack.c.l.bf16 %v12101_v42 }
 0x43c   :  { %3054 = vmatmul.mubr.f32.gmra.mrb[108].mxu1 %v16023_v61  ;;  %v12127_v61 = vpop.f32.mrb[6].mxu1 }
 0x43d   :  { %8311 = vmatmul.mubr.msk.f32.gmra.mrb[62].mxu0 %vm968_vm1, %v939_v8  ;;  %3059 = vmatprep.mubr.f32.mxu1 %v16365_v44  ;;  %v16028_v8 = vunpack.c.h.bf16 %v12101_v42  ;;  %v12141_v17 = vpop.f32.mrb[7].mxu1 }
 0x43e   :  { %1506 = vmatprep.mubr.f32.mxu0 %v16365_v44 }
 0x440   :  { %3060 = vmatmul.mubr.f32.gmra.mrb[110].mxu1 %v16028_v8  ;;  %v12146_v8 = vpop.f32.mrb[8].mxu1 }
 0x441   :  { %1507 = vmatmul.mubr.f32.vlgmr.msra.gmra.mrb[64].mxu0 %v16048_v54  ;;  %3489 = vmatprep.mubr.f32.mxu1 %v16365_v44  ;;  %v12155_v47 = vpop.f32.mrb[9].mxu1 }
 0x442   :  { %9118 = vmatpush1.bf16.msra.mxu0 %v11427_v6  ;;  %1512 = vmatprep.mubr.f32.mxu0 %v16365_v44  ;;  %v12160_v51 = vpop.f32.mrb[10].mxu1 }
 0x443   :  { %9120 = vmatprep.subr.bf16.mxu0 %v11441_v9  ;;  %v12173_v13 = vpop.f32.mrb[11].mxu1 }
 0x444   :  { %3490 = vmatmul.mubr.f32.vlgmr.msra.gmra.mrb[112].mxu1 %v16033_v5  ;;  %v12169_v5 = vld [vmem:[%s15938_s5 + $0x188] sm:$0xff]   ;;  %v12178_v24 = vpop.f32.mrb[12].mxu1 }
 0x445   :  { %1513 = vmatmul.mubr.f32.gmra.mrb[66].mxu0 %v16046_v59  ;;  %3495 = vmatprep.mubr.f32.mxu1 %v16365_v44  ;;  %16393 = vst [vmem:[#allocation40_spill] sm:$0xff] %v12169_v5  ;;  %v16040_v33 = vunpack.c.l.bf16 %v12169_v5  ;;  %v16043_v20 = vunpack.c.h.bf16 %v12169_v5 }
 0x446   :  { %9122 = vmatpush1.bf16.msra.mxu0 %v11439_v11  ;;  %1518 = vmatprep.mubr.f32.mxu0 %v16365_v44 }
 0x447   :  { %9124 = vmatprep.subr.bf16.mxu0 %v11453_v22 }
 0x448   :  { %3496 = vmatmul.mubr.f32.gmra.mrb[114].mxu1 %v16037_v30  ;;  %v12184_v30 = vpop.f32.mrb[13].mxu1 }
 0x449   :  { %1519 = vmatmul.mubr.f32.gmra.mrb[68].mxu0 %v16045_v35  ;;  %3501 = vmatprep.mubr.f32.mxu1 %v16365_v44  ;;  %v12191_v46 = vpop.f32.mrb[14].mxu1 }
 0x44a   :  { %9126 = vmatpush1.bf16.msra.mxu0 %v11451_v19  ;;  %1524 = vmatprep.mubr.f32.mxu0 %v16365_v44  ;;  %v12199_v7 = vpop.f32.mrb[15].mxu1 }
 0x44b   :  { %9128 = vmatprep.subr.bf16.mxu0 %v11465_v21  ;;  %v12214_v35 = vpop.f32.mrb[16].mxu1 }
 0x44c   :  { %3502 = vmatmul.mubr.f32.gmra.mrb[116].mxu1 %v16040_v33  ;;  %v12197_v33 = vld [vmem:[%s15938_s5 + $0x190] sm:$0xff]   ;;  %v12217_v59 = vpop.f32.mrb[17].mxu1 }
 0x44d   :  { %1525 = vmatmul.mubr.f32.gmra.mrb[70].mxu0 %v16044_v18  ;;  %3507 = vmatprep.mubr.f32.mxu1 %v16365_v44  ;;  %16394 = vst [vmem:[#allocation41_spill] sm:$0xff] %v12197_v33  ;;  %v16047_v36 = vunpack.c.l.bf16 %v12197_v33  ;;  %v12212_v18 = vld [vmem:[%s15938_s5 + $0x90] sm:$0xff]   ;;  %v12228_v16 = vpop.f32.mrb[18].mxu1 }
 0x44e   :  { %9130 = vmatpush1.bf16.msra.mxu0 %v11463_v53  ;;  %2249 = vmatprep.mubr.f32.mxu0 %v16365_v44  ;;  %16395 = vst [vmem:[#allocation42_spill] sm:$0xff] %v12212_v18  ;;  %v16063_v54 = vunpack.c.l.bf16 %v12212_v18  ;;  %v12232_v5 = vpop.f32.mrb[19].mxu1 }
 0x44f   :  { %9132 = vmatprep.subr.bf16.mxu0 %v11477_v0  ;;  %v12249_v42 = vpop.f32.mrb[20].mxu1 }
 0x450   :  { %3508 = vmatmul.mubr.f32.gmra.mrb[118].mxu1 %v16043_v20  ;;  %v16055_v20 = vunpack.c.h.bf16 %v12197_v33 }
 0x451   :  { %3513 = vmatprep.mubr.f32.mxu1 %v16365_v44 }
 0x452   :  { %9134 = vmatpush1.bf16.msra.mxu0 %v11475_v52 }
 0x453   :  { %9136 = vmatprep.subr.bf16.mxu0 %v11489_v41 }
 0x454   :  { %3514 = vmatmul.mubr.f32.gmra.mrb[120].mxu1 %v16047_v36  ;;  %v12225_v36 = vld [vmem:[%s15938_s5 + $0x198] sm:$0xff]  }
 0x455   :  { %3519 = vmatprep.mubr.f32.mxu1 %v16365_v44  ;;  %16396 = vst [vmem:[#allocation43_spill] sm:$0xff] %v12225_v36  ;;  %v16062_v1 = vunpack.c.l.bf16 %v12225_v36  ;;  %v16070_v33 = vunpack.c.h.bf16 %v12225_v36  ;;  %v12285_v36 = vld [vmem:[%s15938_s5 + $0xa0] sm:$0xff]  }
 0x456   :  { %9138 = vmatpush1.bf16.msra.mxu0 %v11487_v38  ;;  %16399 = vst [vmem:[#allocation46_spill] sm:$0xff] %v12285_v36  ;;  %v16095_v45 = vunpack.c.l.bf16 %v12285_v36 }
 0x457   :  { %9140 = vmatprep.subr.bf16.mxu0 %v11501_v29 }
 0x458   :  { %3520 = vmatmul.mubr.f32.gmra.mrb[122].mxu1 %v16055_v20  ;;  %v16071_v20 = vunpack.c.h.bf16 %v12212_v18 }
 0x459   :  { %3525 = vmatprep.mubr.f32.mxu1 %v16365_v44 }
 0x45a   :  { %9142 = vmatpush1.bf16.msra.mxu0 %v11499_v23 }
 0x45b   :  { %9144 = vmatprep.subr.bf16.mxu0 %v11518_v12 }
 0x45c   :  { %3526 = vmatmul.mubr.f32.gmra.mrb[124].mxu1 %v16062_v1  ;;  %v12252_v1 = vpop.f32.mrb[21].mxu1 }
 0x45d   :  { %3531 = vmatprep.mubr.f32.mxu1 %v16365_v44  ;;  %v12265_v28 = vpop.f32.mrb[22].mxu1 }
 0x45e   :  { %9146 = vmatpush1.bf16.msra.mxu0 %v11511_v32 }
 0x45f   :  { %9180 = vmatprep.subr.bf16.mxu0 %v11429_v31 }
 0x460   :  { %3532 = vmatmul.mubr.f32.gmra.mrb[126].mxu1 %v16070_v33  ;;  %v12270_v33 = vpop.f32.mrb[23].mxu1 }
 0x461   :  { %2250 = vmatmul.mubr.f32.vlgmr.msra.gmra.mrb[72].mxu0 %v16063_v54  ;;  %3537 = vmatprep.mubr.f32.mxu1 %v16365_v44  ;;  %v12260_v54 = vld [vmem:[%s15938_s5 + $0x1a0] sm:$0xff]   ;;  %v12287_v48 = vpop.f32.mrb[24].mxu1 }
 0x462   :  { %9182 = vmatpush1.bf16.msra.mxu0 %v11427_v6  ;;  %2255 = vmatprep.mubr.f32.mxu0 %v16365_v44  ;;  %16398 = vst [vmem:[#allocation45_spill] sm:$0xff] %v12260_v54  ;;  %v16078_v27 = vunpack.c.l.bf16 %v12260_v54  ;;  %v16086_v18 = vunpack.c.h.bf16 %v12260_v54  ;;  %v12323_v54 = vld [vmem:[%s15938_s5 + $0xa8] sm:$0xff]  }
 0x463   :  { %9184 = vmatprep.subr.bf16.mxu0 %v11441_v9  ;;  %16401 = vst [vmem:[#allocation48_spill] sm:$0xff] %v12323_v54 }
 0x464   :  { %3538 = vmatmul.mubr.f32.gmra.mrb[128].mxu1 %v16078_v27  ;;  %v12290_v27 = vpop.f32.mrb[25].mxu1 }
 0x465   :  { %2256 = vmatmul.mubr.f32.gmra.mrb[74].mxu0 %v16071_v20  ;;  %3543 = vmatprep.mubr.f32.mxu1 %v16365_v44  ;;  %v16087_v20 = vunpack.c.h.bf16 %v12247_v3  ;;  %v12303_v56 = vpop.f32.mrb[26].mxu1 }
 0x466   :  { %9186 = vmatpush1.bf16.msra.mxu0 %v11439_v11  ;;  %2261 = vmatprep.mubr.f32.mxu0 %v16365_v44 }
 0x467   :  { %9188 = vmatprep.subr.bf16.mxu0 %v11453_v22 }
 0x468   :  { %3544 = vmatmul.mubr.f32.gmra.mrb[130].mxu1 %v16086_v18  ;;  %v12308_v18 = vpop.f32.mrb[27].mxu1 }
 0x469   :  { %2262 = vmatmul.mubr.f32.gmra.mrb[76].mxu0 %v16079_v2  ;;  %3549 = vmatprep.mubr.f32.mxu1 %v16365_v44  ;;  %v12298_v2 = vld [vmem:[%s15938_s5 + $0x1a8] sm:$0xff]   ;;  %v12325_v14 = vpop.f32.mrb[28].mxu1 }
 0x46a   :  { %9190 = vmatpush1.bf16.msra.mxu0 %v11451_v19  ;;  %2267 = vmatprep.mubr.f32.mxu0 %v16365_v44  ;;  %16400 = vst [vmem:[#allocation47_spill] sm:$0xff] %v12298_v2  ;;  %v16094_v15 = vunpack.c.l.bf16 %v12298_v2  ;;  %v16100_v3 = vunpack.c.h.bf16 %v12298_v2 }
 0x46b   :  { %9192 = vmatprep.subr.bf16.mxu0 %v11465_v21 }
 0x46c   :  { %3550 = vmatmul.mubr.f32.gmra.mrb[132].mxu1 %v16094_v15  ;;  %v12328_v15 = vpop.f32.mrb[29].mxu1 }
 0x46d   :  { %2268 = vmatmul.mubr.f32.gmra.mrb[78].mxu0 %v16087_v20  ;;  %3555 = vmatprep.mubr.f32.mxu1 %v16365_v44  ;;  %v16101_v20 = vunpack.c.h.bf16 %v12285_v36  ;;  %v12335_v60 = vpop.f32.mrb[30].mxu1 }
 0x46e   :  { %9194 = vmatpush1.bf16.msra.mxu0 %v11463_v53  ;;  %2273 = vmatprep.mubr.f32.mxu0 %v16365_v44  ;;  %v12339_v43 = vpop.f32.mrb[31].mxu1 }
 0x46f   :  { %9196 = vmatprep.subr.bf16.mxu0 %v11477_v0  ;;  %v12352_v36 = vpop.f32.mrb[32].mxu1 }
 0x470   :  { %3556 = vmatmul.mubr.f32.gmra.mrb[134].mxu1 %v16100_v3  ;;  %v16113_v3 = vunpack.c.h.bf16 %v12323_v54  ;;  %v12355_v2 = vpop.f32.mrb[33].mxu1 }
 0x471   :  { %2274 = vmatmul.mubr.f32.gmra.mrb[80].mxu0 %v16095_v45  ;;  %v16106_v45 = vunpack.c.l.bf16 %v12323_v54  ;;  %v12360_v62 = vpop.f32.mrb[34].mxu1 }
 0x472   :  { %9198 = vmatpush1.bf16.msra.mxu0 %v11475_v52  ;;  %2279 = vmatprep.mubr.f32.mxu0 %v16365_v44  ;;  %v12364_v4 = vpop.f32.mrb[35].mxu1 }
 0x473   :  { %9200 = vmatprep.subr.bf16.mxu0 %v11489_v41  ;;  %v12376_v54 = vpop.f32.mrb[36].mxu1 }
 0x474   :  { %v12378_v49 = vpop.f32.mrb[37].mxu1 }
 0x475   :  { %2280 = vmatmul.mubr.f32.gmra.mrb[82].mxu0 %v16101_v20  ;;  %v12350_v20 = vld [vmem:[%s15938_s5 + $0xb0] sm:$0xff]   ;;  %v12383_v25 = vpop.f32.mrb[38].mxu1 }
 0x476   :  { %9202 = vmatpush1.bf16.msra.mxu0 %v11487_v38  ;;  %2285 = vmatprep.mubr.f32.mxu0 %v16365_v44  ;;  %16402 = vst [vmem:[#allocation49_spill] sm:$0xff] %v12350_v20  ;;  %v16125_v57 = vunpack.c.h.bf16 %v12350_v20 }
 0x477   :  { %9204 = vmatprep.subr.bf16.mxu0 %v11501_v29 }
 0x479   :  { %2286 = vmatmul.mubr.f32.gmra.mrb[84].mxu0 %v16106_v45  ;;  %v16120_v45 = vunpack.c.l.bf16 %v12350_v20  ;;  %v12395_v20 = vld [vmem:[%s15938_s5 + $0xf0] sm:$0xff]  }
 0x47a   :  { %9206 = vmatpush1.bf16.msra.mxu0 %v11499_v23  ;;  %2291 = vmatprep.mubr.f32.mxu0 %v16365_v44  ;;  %16405 = vst [vmem:[#allocation52_spill] sm:$0xff] %v12395_v20  ;;  %v16136_v55 = vunpack.c.l.bf16 %v12395_v20 }
 0x47b   :  { %9208 = vmatprep.subr.bf16.mxu0 %v11518_v12 }
 0x47d   :  { %2292 = vmatmul.mubr.f32.gmra.mrb[86].mxu0 %v16113_v3  ;;  %v12374_v3 = vld [vmem:[%s15938_s5 + $0xb8] sm:$0xff]  }
 0x47e   :  { %9210 = vmatpush1.bf16.msra.mxu0 %v11511_v32  ;;  %2297 = vmatprep.mubr.f32.mxu0 %v16365_v44  ;;  %16403 = vst [vmem:[#allocation50_spill] sm:$0xff] %v12374_v3  ;;  %v16133_v10 = vunpack.c.h.bf16 %v12374_v3 }
 0x47f   :  { %9244 = vmatprep.subr.bf16.mxu0 %v11429_v31  ;;  %v16132_v31 = vunpack.c.l.bf16 %v12374_v3 }
 0x481   :  { %2298 = vmatmul.mubr.f32.gmra.mrb[88].mxu0 %v16120_v45  ;;  %v12386_v45 = vpop.f32.mrb[39].mxu1 }
 0x482   :  { %2303 = vmatprep.mubr.f32.mxu0 %v16365_v44  ;;  %16404 = vst [vmem:[#allocation51_spill] sm:$0xff] %v12386_v45  ;;  %v16137_v45 = vunpack.c.h.bf16 %v12395_v20 }
 0x485   :  { %2304 = vmatmul.mubr.f32.gmra.mrb[90].mxu0 %v16125_v57  ;;  %v12397_v57 = vpop.f32.mrb[40].mxu1 }
 0x486   :  { %2309 = vmatprep.mubr.f32.mxu0 %v16365_v44  ;;  %v12399_v39 = vpop.f32.mrb[41].mxu1 }
 0x487   :  { %v12404_v63 = vpop.f32.mrb[42].mxu1 }
 0x488   :  { %16406 = vst [vmem:[#allocation53_spill] sm:$0xff] %v12404_v63 }
 0x489   :  { %2310 = vmatmul.mubr.f32.gmra.mrb[92].mxu0 %v16132_v31  ;;  %v12407_v31 = vpop.f32.mrb[43].mxu1 }
 0x48a   :  { %2315 = vmatprep.mubr.f32.mxu0 %v16365_v44  ;;  %16407 = vst [vmem:[#allocation54_spill] sm:$0xff] %v12407_v31  ;;  %v12419_v3 = vpop.f32.mrb[44].mxu1 }
 0x48b   :  { %v12422_v63 = vpop.f32.mrb[45].mxu1 }
 0x48c   :  { %16409 = vst [vmem:[#allocation56_spill] sm:$0xff] %v12422_v63 }
 0x48d   :  { %2316 = vmatmul.mubr.f32.gmra.mrb[94].mxu0 %v16133_v10  ;;  %v12417_v10 = vld [vmem:[%s15938_s5 + $0xf8] sm:$0xff]  }
 0x48e   :  { %2745 = vmatprep.mubr.f32.mxu0 %v16365_v44  ;;  %16408 = vst [vmem:[#allocation55_spill] sm:$0xff] %v12417_v10 }
 0x491   :  { %2746 = vmatmul.mubr.f32.vlgmr.msra.gmra.mrb[96].mxu0 %v16136_v55  ;;  %v16138_v55 = vunpack.c.l.bf16 %v12417_v10 }
 0x492   :  { %9246 = vmatpush1.bf16.msra.mxu0 %v11427_v6  ;;  %2751 = vmatprep.mubr.f32.mxu0 %v16365_v44  ;;  %v12429_v6 = vpop.f32.mrb[46].mxu1 }
 0x493   :  { %9248 = vmatprep.subr.bf16.mxu0 %v11441_v9  ;;  %16410 = vst [vmem:[#allocation57_spill] sm:$0xff] %v12429_v6  ;;  %v12432_v31 = vpop.f32.mrb[47].mxu1  ;;  %v16141_v9 = vunpack.c.h.bf16 %v12417_v10 }
 0x494   :  { %16411 = vst [vmem:[#allocation58_spill] sm:$0xff] %v12432_v31 }
 0x495   :  { %2752 = vmatmul.mubr.f32.gmra.mrb[98].mxu0 %v16137_v45  ;;  %v12444_v45 = vpop.f32.mrb[48].mxu1 }
 0x496   :  { %9250 = vmatpush1.bf16.msra.mxu0 %v11439_v11  ;;  %2757 = vmatprep.mubr.f32.mxu0 %v16365_v44  ;;  %v12442_v11 = vld [vmem:[%s15938_s5 + $0x100] sm:$0xff]   ;;  %16413 = vst [vmem:[#allocation60_spill] sm:$0xff] %v12444_v45 }
 0x497   :  { %9252 = vmatprep.subr.bf16.mxu0 %v11453_v22  ;;  %16412 = vst [vmem:[#allocation59_spill] sm:$0xff] %v12442_v11  ;;  %v12447_v22 = vpop.f32.mrb[49].mxu1 }
 0x498   :  { %16414 = vst [vmem:[#allocation61_spill] sm:$0xff] %v12447_v22 }
 0x499   :  { %2758 = vmatmul.mubr.f32.gmra.mrb[100].mxu0 %v16138_v55  ;;  %v16144_v55 = vunpack.c.l.bf16 %v12442_v11 }
 0x49a   :  { %9254 = vmatpush1.bf16.msra.mxu0 %v11451_v19  ;;  %2763 = vmatprep.mubr.f32.mxu0 %v16365_v44  ;;  %v12454_v19 = vpop.f32.mrb[50].mxu1 }
 0x49b   :  { %9256 = vmatprep.subr.bf16.mxu0 %v11465_v21  ;;  %16415 = vst [vmem:[#allocation62_spill] sm:$0xff] %v12454_v19  ;;  %v12457_v20 = vpop.f32.mrb[51].mxu1  ;;  %v16146_v21 = vunpack.c.h.bf16 %v12442_v11 }
 0x49c   :  { %16416 = vst [vmem:[#allocation63_spill] sm:$0xff] %v12457_v20  ;;  %v12459_v31 = vpop.f32.mrb[52].mxu1 }
 0x49d   :  { %2764 = vmatmul.mubr.f32.gmra.mrb[102].mxu0 %v16141_v9  ;;  %16417 = vst [vmem:[#allocation64_spill] sm:$0xff] %v12459_v31  ;;  %v12464_v9 = vpop.f32.mrb[53].mxu1  ;;  %v16452_v31 = vld [vmem:[#allocation11_spill] sm:$0xff] }
 0x49e   :  { %9258 = vmatpush1.bf16.msra.mxu0 %v11463_v53  ;;  %2769 = vmatprep.mubr.f32.mxu0 %v16365_v44  ;;  %16418 = vst [vmem:[#allocation65_spill] sm:$0xff] %v12464_v9  ;;  %v12471_v53 = vld [vmem:[%s15938_s5 + $0x108] sm:$0xff]  }
 0x49f   :  { %9260 = vmatprep.subr.bf16.mxu0 %v11477_v0  ;;  %16419 = vst [vmem:[#allocation66_spill] sm:$0xff] %v12471_v53  ;;  %v12473_v0 = vpop.f32.mrb[54].mxu1 }
 0x4a0   :  { %16420 = vst [vmem:[#allocation67_spill] sm:$0xff] %v12473_v0  ;;  %v12476_v10 = vpop.f32.mrb[55].mxu1 }
 0x4a1   :  { %2770 = vmatmul.mubr.f32.gmra.mrb[104].mxu0 %v16144_v55  ;;  %16421 = vst [vmem:[#allocation68_spill] sm:$0xff] %v12476_v10  ;;  %v12478_v55 = vpop.f32.mrb[56].mxu1 }
 0x4a2   :  { %9262 = vmatpush1.bf16.msra.mxu0 %v11475_v52  ;;  %2775 = vmatprep.mubr.f32.mxu0 %v16365_v44  ;;  %16422 = vst [vmem:[#allocation69_spill] sm:$0xff] %v12478_v55  ;;  %v16145_v52 = vunpack.c.l.bf16 %v12471_v53  ;;  %v12483_v6 = vpop.f32.mrb[57].mxu1 }
 0x4a3   :  { %9264 = vmatprep.subr.bf16.mxu0 %v11489_v41  ;;  %16423 = vst [vmem:[#allocation70_spill] sm:$0xff] %v12483_v6  ;;  %v12488_v0 = vpop.f32.mrb[58].mxu1  ;;  %v16149_v41 = vunpack.c.h.bf16 %v12471_v53  ;;  %v12536_v53 = vld [vmem:[%s15938_s5 + $0x150] sm:$0xff]  }
 0x4a4   :  { %16424 = vst [vmem:[#allocation71_spill] sm:$0xff] %v12488_v0  ;;  %v12493_v10 = vpop.f32.mrb[59].mxu1  ;;  %16432 = vst [vmem:[#allocation79_spill] sm:$0xff] %v12536_v53 }
 0x4a5   :  { %2776 = vmatmul.mubr.f32.gmra.mrb[106].mxu0 %v16146_v21  ;;  %16425 = vst [vmem:[#allocation72_spill] sm:$0xff] %v12493_v10 }
 0x4a6   :  { %9266 = vmatpush1.bf16.msra.mxu0 %v11487_v38  ;;  %2781 = vmatprep.mubr.f32.mxu0 %v16365_v44  ;;  %v12500_v38 = vld [vmem:[%s15938_s5 + $0x110] sm:$0xff]  }
 0x4a7   :  { %9268 = vmatprep.subr.bf16.mxu0 %v11501_v29  ;;  %16426 = vst [vmem:[#allocation73_spill] sm:$0xff] %v12500_v38  ;;  %v12503_v29 = vpop.f32.mrb[60].mxu1 }
 0x4a8   :  { %16427 = vst [vmem:[#allocation74_spill] sm:$0xff] %v12503_v29  ;;  %v12508_v21 = vpop.f32.mrb[61].mxu1 }
 0x4a9   :  { %2782 = vmatmul.mubr.f32.gmra.mrb[108].mxu0 %v16145_v52  ;;  %v16150_v52 = vunpack.c.l.bf16 %v12500_v38  ;;  %16428 = vst [vmem:[#allocation75_spill] sm:$0xff] %v12508_v21  ;;  %v16163_v21 = vunpack.c.h.bf16 %v12536_v53 }
 0x4aa   :  { %9270 = vmatpush1.bf16.msra.mxu0 %v11499_v23  ;;  %2787 = vmatprep.mubr.f32.mxu0 %v16365_v44  ;;  %v12512_v23 = vpop.f32.mrb[62].mxu1 }
 0x4ab   :  { %9272 = vmatprep.subr.bf16.mxu0 %v11518_v12  ;;  %16429 = vst [vmem:[#allocation76_spill] sm:$0xff] %v12512_v23  ;;  %v16155_v12 = vunpack.c.h.bf16 %v12500_v38  ;;  %v12517_v11 = vpop.f32.mrb[63].mxu1 }
 0x4ac   :  { %16430 = vst [vmem:[#allocation77_spill] sm:$0xff] %v12517_v11  ;;  %v12538_v11 = vpop.f32.mrb[64].mxu1 }
 0x4ad   :  { %2788 = vmatmul.mubr.f32.gmra.mrb[110].mxu0 %v16149_v41  ;;  %v12523_v41 = vld [vmem:[%s15938_s5 + $0x118] sm:$0xff]   ;;  %16433 = vst [vmem:[#allocation80_spill] sm:$0xff] %v12538_v11  ;;  %v12540_v38 = vpop.f32.mrb[65].mxu1 }
 0x4ae   :  { %9274 = vmatpush1.bf16.msra.mxu0 %v11511_v32  ;;  %2793 = vmatprep.mubr.f32.mxu0 %v16365_v44  ;;  %16431 = vst [vmem:[#allocation78_spill] sm:$0xff] %v12523_v41  ;;  %v16156_v32 = vunpack.c.l.bf16 %v12523_v41  ;;  %16434 = vst [vmem:[#allocation81_spill] sm:$0xff] %v12540_v38 }
 0x4b1   :  { %2794 = vmatmul.mubr.f32.gmra.mrb[112].mxu0 %v16150_v52  ;;  %v16159_v52 = vunpack.c.h.bf16 %v12523_v41  ;;  %v12557_v41 = vld [vmem:[%s15938_s5 + $0x158] sm:$0xff]  }
 0x4b2   :  { %2799 = vmatprep.mubr.f32.mxu0 %v16365_v44  ;;  %16437 = vst [vmem:[#allocation84_spill] sm:$0xff] %v12557_v41  ;;  %v16167_v11 = vunpack.c.h.bf16 %v12557_v41 }
 0x4b5   :  { %2800 = vmatmul.mubr.f32.gmra.mrb[114].mxu0 %v16155_v12  ;;  %v16160_v12 = vunpack.c.l.bf16 %v12536_v53  ;;  %v12578_v53 = vld [vmem:[%s15938_s5 + $0x160] sm:$0xff]  }
 0x4b6   :  { %2805 = vmatprep.mubr.f32.mxu0 %v16365_v44  ;;  %16442 = vst [vmem:[#allocation89_spill] sm:$0xff] %v12578_v53 }
 0x4b9   :  { %2806 = vmatmul.mubr.f32.gmra.mrb[116].mxu0 %v16156_v32  ;;  %v12546_v32 = vpop.f32.mrb[66].mxu1 }
 0x4ba   :  { %2811 = vmatprep.mubr.f32.mxu0 %v16365_v44  ;;  %16435 = vst [vmem:[#allocation82_spill] sm:$0xff] %v12546_v32  ;;  %v12548_v23 = vpop.f32.mrb[67].mxu1 }
 0x4bb   :  { %16436 = vst [vmem:[#allocation83_spill] sm:$0xff] %v12548_v23  ;;  %v16164_v23 = vunpack.c.l.bf16 %v12557_v41  ;;  %v12599_v41 = vld [vmem:[%s15938_s5 + $0x168] sm:$0xff]  }
 0x4bc   :  { %16447 = vst [vmem:[#allocation94_spill] sm:$0xff] %v12599_v41 }
 0x4bd   :  { %2812 = vmatmul.mubr.f32.gmra.mrb[118].mxu0 %v16159_v52  ;;  %v12559_v52 = vpop.f32.mrb[68].mxu1 }
 0x4be   :  { %3241 = vmatprep.mubr.f32.mxu0 %v16365_v44  ;;  %16438 = vst [vmem:[#allocation85_spill] sm:$0xff] %v12559_v52  ;;  %v12561_v38 = vpop.f32.mrb[69].mxu1  ;;  %v16171_v52 = vunpack.c.h.bf16 %v12578_v53 }
 0x4bf   :  { %16439 = vst [vmem:[#allocation86_spill] sm:$0xff] %v12561_v38 }
 0x4c1   :  { %3242 = vmatmul.mubr.f32.vlgmr.msra.gmra.mrb[120].mxu0 %v16160_v12  ;;  %v12567_v12 = vpop.f32.mrb[70].mxu1 }
 0x4c2   :  { %3247 = vmatprep.mubr.f32.mxu0 %v16365_v44  ;;  %16440 = vst [vmem:[#allocation87_spill] sm:$0xff] %v12567_v12  ;;  %v12569_v32 = vpop.f32.mrb[71].mxu1 }
 0x4c3   :  { %16441 = vst [vmem:[#allocation88_spill] sm:$0xff] %v12569_v32  ;;  %v16168_v32 = vunpack.c.l.bf16 %v12578_v53 }
 0x4c5   :  { %3248 = vmatmul.mubr.f32.gmra.mrb[122].mxu0 %v16163_v21  ;;  %v12580_v21 = vpop.f32.mrb[72].mxu1 }
 0x4c6   :  { %3253 = vmatprep.mubr.f32.mxu0 %v16365_v44  ;;  %16443 = vst [vmem:[#allocation90_spill] sm:$0xff] %v12580_v21  ;;  %v12582_v38 = vpop.f32.mrb[73].mxu1 }
 0x4c7   :  { %16444 = vst [vmem:[#allocation91_spill] sm:$0xff] %v12582_v38 }
 0x4c9   :  { %3254 = vmatmul.mubr.f32.gmra.mrb[124].mxu0 %v16164_v23  ;;  %v12588_v23 = vpop.f32.mrb[74].mxu1 }
 0x4ca   :  { %3259 = vmatprep.mubr.f32.mxu0 %v16365_v44  ;;  %16445 = vst [vmem:[#allocation92_spill] sm:$0xff] %v12588_v23  ;;  %v12590_v12 = vpop.f32.mrb[75].mxu1 }
 0x4cb   :  { %16446 = vst [vmem:[#allocation93_spill] sm:$0xff] %v12590_v12 }
 0x4cd   :  { %3260 = vmatmul.mubr.f32.gmra.mrb[126].mxu0 %v16167_v11  ;;  %v12601_v11 = vpop.f32.mrb[76].mxu1 }
 0x4ce   :  { %3265 = vmatprep.mubr.f32.mxu0 %v16365_v44  ;;  %16448 = vst [vmem:[#allocation95_spill] sm:$0xff] %v12601_v11  ;;  %v12603_v21 = vpop.f32.mrb[77].mxu1 }
 0x4cf   :  { %16449 = vst [vmem:[#allocation96_spill] sm:$0xff] %v12603_v21  ;;  %v12609_v12 = vpop.f32.mrb[78].mxu1 }
 0x4d0   :  { %16450 = vst [vmem:[#allocation97_spill] sm:$0xff] %v12609_v12  ;;  %v12611_v29 = vpop.f32.mrb[79].mxu1 }
 0x4d1   :  { %3266 = vmatmul.mubr.f32.gmra.mrb[128].mxu0 %v16168_v32  ;;  %v16172_v32 = vunpack.c.l.bf16 %v12599_v41  ;;  %16451 = vst [vmem:[#allocation98_spill] sm:$0xff] %v12611_v29  ;;  %v12624_v29 = vld [vmem:[%s15938_s5 + $0x170] sm:$0xff]  }
 0x4d2   :  { %3271 = vmatprep.mubr.f32.mxu0 %v16365_v44  ;;  %16454 = vst [vmem:[#allocation11_spill] sm:$0xff] %v12624_v29  ;;  %v16177_v55 = vunpack.c.l.bf16 %v12624_v29 }
 0x4d3   :  { %v1227_v38 = vpop.f32.mrb[32].mxu0 }
 0x4d4   :  { %v1229_v23 = vpop.f32.mrb[33].mxu0  ;;  %v1228_v10 = vadd.f32 %v1227_v38, %v16452_v31  ;;  %v12626_v38 = vpop.f32.mrb[80].mxu1 }
 0x4d5   :  { %3272 = vmatmul.mubr.f32.gmra.mrb[130].mxu0 %v16171_v52  ;;  %v16453_v52 = vld [vmem:[#allocation12_spill] sm:$0xff]  ;;  %v12630_v12 = vpop.f32.mrb[81].mxu1 }
 0x4d6   :  { %3277 = vmatprep.mubr.f32.mxu0 %v16365_v44  ;;  %v1230_v0 = vadd.f32 %v1229_v23, %v16453_v52  ;;  %16455 = vst [vmem:[#allocation12_spill] sm:$0xff] %v12626_v38  ;;  %16457 = vst [vmem:[#allocation100_spill] sm:$0xff] %v12630_v12  ;;  %v16459_v23 = vunpack.c.h.bf16 %v12599_v41  ;;  %v12638_v20 = vpop.f32.mrb[82].mxu1 }
 0x4d7   :  { %16460 = vst [vmem:[#allocation102_spill] sm:$0xff] %v12638_v20  ;;  %v12640_v19 = vpop.f32.mrb[83].mxu1 }
 0x4d8   :  { %v1233_v9 = vpop.f32.mrb[34].mxu0  ;;  %16461 = vst [vmem:[#allocation103_spill] sm:$0xff] %v12640_v19 }
 0x4d9   :  { %v1234_v11 = vadd.f32 %v1233_v9, %v16452_v31  ;;  %3278 = vmatmul.mubr.f32.gmra.mrb[132].mxu0 %v16172_v32  ;;  %v1235_v21 = vpop.f32.mrb[35].mxu0 }
 0x4da   :  { %v1236_v6 = vadd.f32 %v1235_v21, %v16453_v52  ;;  %3283 = vmatprep.mubr.f32.mxu0 %v16365_v44 }
 0x4db   :  { %v12628_v9 = vpack.c.bf16 %v1234_v11, %v1228_v10 }
 0x4dc   :  { %v12632_v32 = vpack.c.bf16 %v1236_v6, %v1230_v0  ;;  %v1239_v53 = vpop.f32.mrb[36].mxu0 }
 0x4dd   :  { %16456 = vst [vmem:[#allocation99_spill] sm:$0xff] %v12628_v9  ;;  %3284 = vmatmul.mubr.f32.gmra.mrb[134].mxu0 %v16459_v23  ;;  %v1241_v21 = vpop.f32.mrb[37].mxu0  ;;  %v1240_v10 = vadd.f32 %v1239_v53, %v16452_v31  ;;  %v12653_v9 = vld [vmem:[%s15938_s5 + $0x178] sm:$0xff]   ;;  %v12655_v53 = vpop.f32.mrb[84].mxu1 }
 0x4de   :  { %16458 = vst [vmem:[#allocation101_spill] sm:$0xff] %v12632_v32  ;;  %3289 = vmatprep.mubr.f32.mxu0 %v16365_v44  ;;  %v1242_v23 = vadd.f32 %v1241_v21, %v16453_v52  ;;  %16462 = vst [vmem:[#allocation104_spill] sm:$0xff] %v12653_v9  ;;  %v12659_v32 = vpop.f32.mrb[85].mxu1  ;;  %v16467_v21 = vunpack.c.h.bf16 %v12624_v29  ;;  %v16182_v19 = vunpack.c.l.bf16 %v12653_v9 }
 0x4df   :  { %16463 = vst [vmem:[#allocation105_spill] sm:$0xff] %v12655_v53  ;;  %16465 = vst [vmem:[#allocation107_spill] sm:$0xff] %v12659_v32  ;;  %v12667_v20 = vpop.f32.mrb[86].mxu1 }
 0x4e0   :  { %v1245_v38 = vpop.f32.mrb[38].mxu0  ;;  %16468 = vst [vmem:[#allocation109_spill] sm:$0xff] %v12667_v20  ;;  %v12669_v12 = vpop.f32.mrb[87].mxu1 }
 0x4e1   :  { %v1246_v11 = vadd.f32 %v1245_v38, %v16452_v31  ;;  %3290 = vmatmul.mubr.f32.gmra.mrb[136].mxu0 %v16177_v55  ;;  %v1247_v6 = vpop.f32.mrb[39].mxu0  ;;  %16469 = vst [vmem:[#allocation110_spill] sm:$0xff] %v12669_v12 }
 0x4e2   :  { %v1248_v41 = vadd.f32 %v1247_v6, %v16453_v52  ;;  %3295 = vmatprep.mubr.f32.mxu0 %v16365_v44 }
 0x4e3   :  { %v12657_v38 = vpack.c.bf16 %v1246_v11, %v1240_v10 }
 0x4e4   :  { %v12661_v55 = vpack.c.bf16 %v1248_v41, %v1242_v23  ;;  %v1251_v0 = vpop.f32.mrb[40].mxu0  ;;  %v16185_v23 = vunpack.c.h.bf16 %v12653_v9 }
 0x4e5   :  { %16464 = vst [vmem:[#allocation106_spill] sm:$0xff] %v12657_v38  ;;  %3296 = vmatmul.mubr.f32.gmra.mrb[138].mxu0 %v16467_v21  ;;  %v1253_v6 = vpop.f32.mrb[41].mxu0  ;;  %v1252_v10 = vadd.f32 %v1251_v0, %v16452_v31  ;;  %v12679_v38 = vpop.f32.mrb[88].mxu1 }
 0x4e6   :  { %16466 = vst [vmem:[#allocation108_spill] sm:$0xff] %v12661_v55  ;;  %3301 = vmatprep.mubr.f32.mxu0 %v16365_v44  ;;  %v1254_v21 = vadd.f32 %v1253_v6, %v16453_v52  ;;  %16470 = vst [vmem:[#allocation111_spill] sm:$0xff] %v12679_v38  ;;  %v12683_v12 = vpop.f32.mrb[89].mxu1 }
 0x4e7   :  { %16472 = vst [vmem:[#allocation113_spill] sm:$0xff] %v12683_v12  ;;  %v12689_v20 = vpop.f32.mrb[90].mxu1 }
 0x4e8   :  { %v1257_v53 = vpop.f32.mrb[42].mxu0  ;;  %16474 = vst [vmem:[#allocation115_spill] sm:$0xff] %v12689_v20  ;;  %v12691_v6 = vpop.f32.mrb[91].mxu1 }
 0x4e9   :  { %v1258_v11 = vadd.f32 %v1257_v53, %v16452_v31  ;;  %3302 = vmatmul.mubr.f32.gmra.mrb[140].mxu0 %v16182_v19  ;;  %v1259_v41 = vpop.f32.mrb[43].mxu0  ;;  %16475 = vst [vmem:[#allocation116_spill] sm:$0xff] %v12691_v6 }
 0x4ea   :  { %v1260_v29 = vadd.f32 %v1259_v41, %v16453_v52  ;;  %3307 = vmatprep.mubr.f32.mxu0 %v16365_v44 }
 0x4eb   :  { %v12681_v55 = vpack.c.bf16 %v1258_v11, %v1252_v10 }
 0x4ec   :  { %v12685_v0 = vpack.c.bf16 %v1260_v29, %v1254_v21  ;;  %v1263_v53 = vpop.f32.mrb[44].mxu0  ;;  %v12697_v21 = vpop.f32.mrb[92].mxu1 }
 0x4ed   :  { %16471 = vst [vmem:[#allocation112_spill] sm:$0xff] %v12681_v55  ;;  %3308 = vmatmul.mubr.f32.gmra.mrb[142].mxu0 %v16185_v23  ;;  %v1265_v19 = vpop.f32.mrb[45].mxu0  ;;  %v1264_v44 = vadd.f32 %v1263_v53, %v16452_v31  ;;  %16476 = vst [vmem:[#allocation117_spill] sm:$0xff] %v12697_v21  ;;  %v12701_v23 = vpop.f32.mrb[93].mxu1 }
 0x4ee   :  { %16473 = vst [vmem:[#allocation114_spill] sm:$0xff] %v12685_v0  ;;  %v1266_v11 = vadd.f32 %v1265_v19, %v16453_v52  ;;  %16478 = vst [vmem:[#allocation119_spill] sm:$0xff] %v12701_v23  ;;  %v12705_v20 = vpop.f32.mrb[94].mxu1 }
 0x4ef   :  { %16480 = vst [vmem:[#allocation121_spill] sm:$0xff] %v12705_v20  ;;  %v12707_v53 = vpop.f32.mrb[95].mxu1 }
 0x4f0   :  { %v1269_v41 = vpop.f32.mrb[46].mxu0  ;;  %16481 = vst [vmem:[#allocation122_spill] sm:$0xff] %v12707_v53 }
 0x4f1   :  { %v1270_v38 = vadd.f32 %v1269_v41, %v16452_v31  ;;  %v1271_v10 = vpop.f32.mrb[47].mxu0 }
 0x4f2   :  { %v1272_v29 = vadd.f32 %v1271_v10, %v16453_v52 }
 0x4f3   :  { %v12699_v55 = vpack.c.bf16 %v1270_v38, %v1264_v44  ;;  %v12713_v38 = vpop.f32.mrb[96].mxu1 }
 0x4f4   :  { %v12703_v9 = vpack.c.bf16 %v1272_v29, %v1266_v11  ;;  %v1275_v0 = vpop.f32.mrb[48].mxu0  ;;  %16482 = vst [vmem:[#allocation123_spill] sm:$0xff] %v12713_v38  ;;  %v12717_v29 = vpop.f32.mrb[97].mxu1  ;;  %v8314_v38 = vld [vmem:[%s15939_s6 + $0x3] ss:$8 sm:$0x3] }
 0x4f5   :  { %16477 = vst [vmem:[#allocation118_spill] sm:$0xff] %v12699_v55  ;;  %v1277_v6 = vpop.f32.mrb[49].mxu0  ;;  %v1276_v12 = vadd.f32 %v1275_v0, %v16452_v31  ;;  %16484 = vst [vmem:[#allocation125_spill] sm:$0xff] %v12717_v29  ;;  %v8312_v55 = vld [vmem:[%s15939_s6 + $0x1] ss:$8 sm:$0x3] }
 0x4f6   :  { %16479 = vst [vmem:[#allocation120_spill] sm:$0xff] %v12703_v9  ;;  %v1278_v21 = vadd.f32 %v1277_v6, %v16453_v52  ;;  %v8313_v6 = vld [vmem:[%s15939_s6 + $0x2] ss:$8 sm:$0x3] }
 0x4f8   :  { %v1281_v41 = vpop.f32.mrb[50].mxu0 }
 0x4f9   :  { %v1282_v19 = vadd.f32 %v1281_v41, %v16452_v31  ;;  %v1283_v10 = vpop.f32.mrb[51].mxu0  ;;  %v12727_v41 = vpop.f32.mrb[98].mxu1 }
 0x4fa   :  { %v1284_v44 = vadd.f32 %v1283_v10, %v16453_v52  ;;  %16486 = vst [vmem:[#allocation127_spill] sm:$0xff] %v12727_v41  ;;  %v16487_v10 = vld [vmem:[#allocation9_spill] sm:$0xff] }
 0x4fb   :  { %v12715_v11 = vpack.c.bf16 %v1282_v19, %v1276_v12  ;;  %v12730_v20 = vrot.slane %v8312_v55, %v16487_v10  ;;  %v12732_v12 = vpop.f32.mrb[99].mxu1  ;;  %v16490_v19 = vld [vmem:[#allocation10_spill] sm:$0xff] }
 0x4fc   :  { %v12722_v9 = vpack.c.bf16 %v1284_v44, %v1278_v21  ;;  %v1287_v0 = vpop.f32.mrb[52].mxu0  ;;  %16489 = vst [vmem:[#allocation129_spill] sm:$0xff] %v12732_v12  ;;  %v10239_v21 = vld [vmem:[%s15940_s7 + $0x4] ss:$8 sps:$4 sm:$0xff]   ;;  %v12741_v44 = vrot.slane %v8313_v6, %v16487_v10  ;;  %v10241_v12 = vld [vmem:[%s15940_s7] ss:$8 sps:$4 sm:$0xff]  }
 0x4fd   :  { %16483 = vst [vmem:[#allocation124_spill] sm:$0xff] %v12715_v11  ;;  %v1289_v53 = vpop.f32.mrb[53].mxu0  ;;  %16488 = vst [vmem:[#allocation128_spill] sm:$0xff] %v12730_v20  ;;  %v12735_v11 = vrot.slane %v8312_v55, %v16490_v19  ;;  %v12749_v55 = vrot.slane %v8313_v6, %v16490_v19  ;;  %v12756_v45 = vpop.f32.mrb[100].mxu1  ;;  %9308 = vmatprep.subr.bf16.mxu0 %v10239_v21  ;;  %9372 = vmatprep.subr.bf16.mxu1 %v10239_v21 }
 0x4fe   :  { %16485 = vst [vmem:[#allocation126_spill] sm:$0xff] %v12722_v9  ;;  %16492 = vst [vmem:[#allocation131_spill] sm:$0xff] %v12741_v44  ;;  %v1288_v9 = vadd.f32 %v1287_v0, %v16452_v31  ;;  %v1290_v32 = vadd.f32 %v1289_v53, %v16453_v52  ;;  %v12764_v6 = vpop.f32.mrb[101].mxu1  ;;  %9310 = vmatpush1.bf16.msra.mxu0 %v10241_v12  ;;  %9374 = vmatpush1.bf16.msra.mxu1 %v10241_v12  ;;  %v8315_v21 = vld [vmem:[%s15939_s6 + $0x4] ss:$8 sm:$0x3] }
 0x4ff   :  { %16491 = vst [vmem:[#allocation130_spill] sm:$0xff] %v12735_v11  ;;  %16493 = vst [vmem:[#allocation132_spill] sm:$0xff] %v12749_v55  ;;  %v12768_v63 = vmul.f32 %v12735_v11, %v12082_v34  ;;  %v12772_v53 = vmul.f32 %v12730_v20, %v12091_v40  ;;  %v12785_v12 = vmul.f32 %v12730_v20, %v12109_v37 }
 0x500   :  { %v1293_v23 = vpop.f32.mrb[54].mxu0  ;;  %16494 = vst [vmem:[#allocation133_spill] sm:$0xff] %v12756_v45  ;;  %16496 = vst [vmem:[#allocation135_spill] sm:$0xff] %v12764_v6  ;;  %v12789_v34 = vmul.f32 %v12735_v11, %v12117_v26  ;;  %v12793_v40 = vmul.f32 %v12730_v20, %v12127_v61  ;;  %v12803_v37 = vmul.f32 %v12735_v11, %v12141_v17 }
 0x501   :  { %v1294_v41 = vadd.f32 %v1293_v23, %v16452_v31  ;;  %v1295_v29 = vpop.f32.mrb[55].mxu0  ;;  %v12760_v23 = vmul.f32 %v12730_v20, %v12074_v50  ;;  %v12807_v26 = vmul.f32 %v12741_v44, %v12146_v8  ;;  %v12811_v61 = vmul.f32 %v12749_v55, %v12155_v47  ;;  %v12816_v20 = vpop.f32.mrb[102].mxu1 }
 0x502   :  { %v1296_v22 = vadd.f32 %v1295_v29, %v16453_v52  ;;  %v12776_v29 = vmul.f32 %v12735_v11, %v12105_v58  ;;  %v12796_v58 = vrot.slane %v8314_v38, %v16487_v10  ;;  %16499 = vst [vmem:[#allocation138_spill] sm:$0xff] %v12816_v20  ;;  %v12820_v17 = vmul.f32 %v12741_v44, %v12160_v51  ;;  %v12829_v47 = vpop.f32.mrb[103].mxu1 }
 0x503   :  { %v12762_v0 = vpack.c.bf16 %v1294_v41, %v1288_v9  ;;  %v10242_v41 = vld [vmem:[%s15940_s7 + $0x14] ss:$8 sps:$4 sm:$0xff]   ;;  %v12824_v8 = vmul.f32 %v12749_v55, %v12173_v13  ;;  %v12827_v11 = vrot.slane %v8314_v38, %v16490_v19  ;;  %16501 = vst [vmem:[#allocation140_spill] sm:$0xff] %v12829_v47  ;;  %v12841_v51 = vmul.f32 %v12741_v44, %v12191_v46  ;;  %v8316_v46 = vld [vmem:[%s15939_s6 + $0x5] ss:$8 sm:$0x3] }
 0x504   :  { %v12778_v50 = vpack.c.bf16 %v1296_v22, %v1290_v32  ;;  %v1299_v9 = vpop.f32.mrb[56].mxu0  ;;  %16498 = vst [vmem:[#allocation137_spill] sm:$0xff] %v12796_v58  ;;  %v10244_v32 = vld [vmem:[%s15940_s7 + $0x10] ss:$8 sps:$4 sm:$0xff]   ;;  %9312 = vmatprep.subr.bf16.mxu0 %v10242_v41  ;;  %9376 = vmatprep.subr.bf16.mxu1 %v10242_v41  ;;  %v12837_v41 = vmul.f32 %v12749_v55, %v12184_v30  ;;  %v12870_v6 = vpop.f32.mrb[104].mxu1 }
 0x505   :  { %16495 = vst [vmem:[#allocation134_spill] sm:$0xff] %v12762_v0  ;;  %v1301_v22 = vpop.f32.mrb[57].mxu0  ;;  %16500 = vst [vmem:[#allocation139_spill] sm:$0xff] %v12827_v11  ;;  %9314 = vmatpush1.bf16.msra.mxu0 %v10244_v32  ;;  %9378 = vmatpush1.bf16.msra.mxu1 %v10244_v32  ;;  %v12833_v0 = vmul.f32 %v12741_v44, %v12178_v24  ;;  %v12845_v13 = vmul.f32 %v12749_v55, %v12199_v7  ;;  %v10245_v32 = vld [vmem:[%s15940_s7 + $0x24] ss:$8 sps:$4 sm:$0xff]  }
 0x506   :  { %16497 = vst [vmem:[#allocation136_spill] sm:$0xff] %v12778_v50  ;;  %v12852_v24 = vmul.f32 %v12796_v58, %v12214_v35  ;;  %v12855_v30 = vrot.slane %v8315_v21, %v16487_v10  ;;  %v1300_v44 = vadd.f32 %v1299_v9, %v16452_v31  ;;  %v10247_v50 = vld [vmem:[%s15940_s7 + $0x20] ss:$8 sps:$4 sm:$0xff]   ;;  %v12866_v47 = vrot.slane %v8315_v21, %v16490_v19  ;;  %v12882_v21 = vpop.f32.mrb[105].mxu1 }
 0x507   :  { %v1302_v35 = vadd.f32 %v1301_v22, %v16453_v52  ;;  %16504 = vst [vmem:[#allocation143_spill] sm:$0xff] %v12870_v6  ;;  %9316 = vmatprep.subr.bf16.mxu0 %v10245_v32  ;;  %9380 = vmatprep.subr.bf16.mxu1 %v10245_v32  ;;  %v12874_v9 = vmul.f32 %v12827_v11, %v12217_v59  ;;  %16506 = vst [vmem:[#allocation145_spill] sm:$0xff] %v12882_v21 }
 0x508   :  { %v1305_v38 = vpop.f32.mrb[58].mxu0  ;;  %16502 = vst [vmem:[#allocation141_spill] sm:$0xff] %v12855_v30  ;;  %16503 = vst [vmem:[#allocation142_spill] sm:$0xff] %v12866_v47  ;;  %v12889_v22 = vrot.slane %v8316_v46, %v16487_v10  ;;  %v12892_v59 = vrot.slane %v8316_v46, %v16490_v19  ;;  %v8317_v46 = vld [vmem:[%s15939_s6 + $0x6] ss:$8 sm:$0x3] }
 0x509   :  { %v1306_v7 = vadd.f32 %v1305_v38, %v16452_v31  ;;  %v1307_v55 = vpop.f32.mrb[59].mxu0  ;;  %v12878_v38 = vmul.f32 %v12796_v58, %v12228_v16  ;;  %9318 = vmatpush1.bf16.msra.mxu0 %v10247_v50  ;;  %9382 = vmatpush1.bf16.msra.mxu1 %v10247_v50  ;;  %v12901_v50 = vmul.f32 %v12796_v58, %v12249_v42  ;;  %v10250_v42 = vld [vmem:[%s15940_s7 + $0x30] ss:$8 sps:$4 sm:$0xff]  }
 0x50a   :  { %v1308_v20 = vadd.f32 %v1307_v55, %v16453_v52  ;;  %v12886_v55 = vmul.f32 %v12827_v11, %v12232_v5  ;;  %16507 = vst [vmem:[#allocation146_spill] sm:$0xff] %v12889_v22  ;;  %16508 = vst [vmem:[#allocation147_spill] sm:$0xff] %v12892_v59  ;;  %v12905_v5 = vmul.f32 %v12827_v11, %v12252_v1 }
 0x50b   :  { %v12880_v45 = vpack.c.bf16 %v1306_v7, %v1300_v44  ;;  %v10248_v44 = vld [vmem:[%s15940_s7 + $0x34] ss:$8 sps:$4 sm:$0xff]   ;;  %v12909_v7 = vmul.f32 %v12796_v58, %v12265_v28  ;;  %v12923_v1 = vmul.f32 %v12855_v30, %v12287_v48  ;;  %v12927_v28 = vmul.f32 %v12866_v47, %v12290_v27  ;;  %v12936_v58 = vpop.f32.mrb[106].mxu1 }
 0x50c   :  { %v12894_v32 = vpack.c.bf16 %v1308_v20, %v1302_v35  ;;  %v1311_v16 = vpop.f32.mrb[60].mxu0  ;;  %v12913_v20 = vmul.f32 %v12827_v11, %v12270_v33  ;;  %v12931_v33 = vmul.f32 %v12855_v30, %v12303_v56  ;;  %v1579_v11 = vld [vmem:[%s15939_s6] ss:$8 sm:$0x3]  ;;  %16510 = vst [vmem:[#allocation149_spill] sm:$0xff] %v12936_v58  ;;  %9320 = vmatprep.subr.bf16.mxu0 %v10248_v44 }
 0x50d   :  { %16505 = vst [vmem:[#allocation144_spill] sm:$0xff] %v12880_v45  ;;  %v1313_v35 = vpop.f32.mrb[61].mxu0  ;;  %9384 = vmatprep.subr.bf16.mxu1 %v10248_v44  ;;  %v12940_v48 = vmul.f32 %v12866_v47, %v12308_v18  ;;  %v12944_v27 = vmul.f32 %v12855_v30, %v12325_v14  ;;  %v12948_v56 = vmul.f32 %v12866_v47, %v12328_v15  ;;  %v12950_v45 = vpop.f32.mrb[107].mxu1 }
 0x50e   :  { %16509 = vst [vmem:[#allocation148_spill] sm:$0xff] %v12894_v32  ;;  %16511 = vst [vmem:[#allocation150_spill] sm:$0xff] %v12950_v45  ;;  %9322 = vmatpush1.bf16.msra.mxu0 %v10250_v42  ;;  %9386 = vmatpush1.bf16.msra.mxu1 %v10250_v42  ;;  %v12954_v32 = vmul.f32 %v12855_v30, %v12335_v60  ;;  %v12958_v18 = vmul.f32 %v12866_v47, %v12339_v43  ;;  %v10251_v42 = vld [vmem:[%s15940_s7 + $0x44] ss:$8 sps:$4 sm:$0xff]  }
 0x50f   :  { %v12962_v14 = vmul.f32 %v12889_v22, %v12352_v36  ;;  %v12966_v15 = vmul.f32 %v12892_v59, %v12355_v2  ;;  %v12972_v60 = vrot.slane %v8317_v46, %v16487_v10  ;;  %v1312_v30 = vadd.f32 %v1311_v16, %v16452_v31  ;;  %v10253_v2 = vld [vmem:[%s15940_s7 + $0x40] ss:$8 sps:$4 sm:$0xff]   ;;  %v12987_v6 = vpop.f32.mrb[108].mxu1  ;;  %9324 = vmatprep.subr.bf16.mxu0 %v10251_v42 }
 0x510   :  { %v1317_v44 = vpop.f32.mrb[62].mxu0  ;;  %v12977_v36 = vrot.slane %v1579_v11, %v16487_v10  ;;  %v1314_v45 = vadd.f32 %v1313_v35, %v16453_v52  ;;  %v12985_v21 = vrot.slane %v1579_v11, %v16490_v19  ;;  %16515 = vst [vmem:[#allocation154_spill] sm:$0xff] %v12987_v6  ;;  %9388 = vmatprep.subr.bf16.mxu1 %v10251_v42  ;;  %v10254_v42 = vld [vmem:[%s15940_s7 + $0x54] ss:$8 sps:$4 sm:$0xff]  }
 0x511   :  { %16512 = vst [vmem:[#allocation151_spill] sm:$0xff] %v12972_v60  ;;  %v1318_v43 = vadd.f32 %v1317_v44, %v16452_v31  ;;  %v1319_v47 = vpop.f32.mrb[63].mxu0  ;;  %v12991_v31 = vmul.f32 %v12889_v22, %v12360_v62  ;;  %v12994_v16 = vrot.slane %v8317_v46, %v16490_v19  ;;  %v13005_v11 = vmul.f32 %v12892_v59, %v12364_v4  ;;  %v16521_v4 = vld [vmem:[#allocation51_spill] sm:$0xff] }
 0x512   :  { %16513 = vst [vmem:[#allocation152_spill] sm:$0xff] %v12977_v36  ;;  %v1320_v58 = vadd.f32 %v1319_v47, %v16453_v52  ;;  %16514 = vst [vmem:[#allocation153_spill] sm:$0xff] %v12985_v21  ;;  %v8318_v52 = vld [vmem:[%s15939_s6 + $0x7] ss:$8 sm:$0x3]  ;;  %v13001_v47 = vpop.f32.mrb[109].mxu1  ;;  %9326 = vmatpush1.bf16.msra.mxu0 %v10253_v2  ;;  %9390 = vmatpush1.bf16.msra.mxu1 %v10253_v2  ;;  %v13009_v62 = vmul.f32 %v12889_v22, %v12376_v54 }
 0x513   :  { %16516 = vst [vmem:[#allocation155_spill] sm:$0xff] %v12994_v16  ;;  %v12996_v44 = vpack.c.bf16 %v1318_v43, %v1312_v30  ;;  %16518 = vst [vmem:[#allocation157_spill] sm:$0xff] %v13001_v47  ;;  %v13013_v30 = vmul.f32 %v12892_v59, %v12378_v49  ;;  %v13022_v43 = vmul.f32 %v12889_v22, %v12383_v25  ;;  %v10256_v25 = vld [vmem:[%s15940_s7 + $0x50] ss:$8 sps:$4 sm:$0xff]   ;;  %9328 = vmatprep.subr.bf16.mxu0 %v10254_v42 }
 0x514   :  { %v13015_v46 = vpack.c.bf16 %v1320_v58, %v1314_v45  ;;  %v1508_v35 = vpop.f32.mrb[64].mxu0  ;;  %v13026_v2 = vmul.f32 %v12892_v59, %v16521_v4  ;;  %v13030_v54 = vmul.f32 %v12972_v60, %v12397_v57  ;;  %v8319_v58 = vld [vmem:[%s15939_s6 + $0x10] ss:$8 sm:$0x3]  ;;  %v13041_v4 = vrot.slane %v8318_v52, %v16487_v10  ;;  %v13046_v57 = vpop.f32.mrb[110].mxu1  ;;  %9392 = vmatprep.subr.bf16.mxu1 %v10254_v42 }
 0x515   :  { %16517 = vst [vmem:[#allocation156_spill] sm:$0xff] %v12996_v44  ;;  %16520 = vst [vmem:[#allocation159_spill] sm:$0xff] %v13022_v43  ;;  %v1591_v49 = vmul.f32 %v12977_v36, %v1508_v35  ;;  %v1510_v45 = vpop.f32.mrb[65].mxu0  ;;  %v13044_v59 = vrot.slane %v8318_v52, %v16490_v19  ;;  %v13050_v35 = vmul.f32 %v12994_v16, %v12399_v39  ;;  %v16526_v44 = vld [vmem:[#allocation53_spill] sm:$0xff]  ;;  %v13057_v47 = vpop.f32.mrb[111].mxu1  ;;  %v16528_v52 = vld [vmem:[#allocation54_spill] sm:$0xff] }
 0x516   :  { %16519 = vst [vmem:[#allocation158_spill] sm:$0xff] %v13015_v46  ;;  %16522 = vst [vmem:[#allocation51_spill] sm:$0xff] %v13026_v2  ;;  %v1592_v22 = vmul.f32 %v12985_v21, %v1510_v45  ;;  %v13054_v46 = vmul.f32 %v12972_v60, %v16526_v44  ;;  %9330 = vmatpush1.bf16.msra.mxu0 %v10256_v25  ;;  %9394 = vmatpush1.bf16.msra.mxu1 %v10256_v25 }
 0x517   :  { %16523 = vst [vmem:[#allocation160_spill] sm:$0xff] %v13041_v4  ;;  %16524 = vst [vmem:[#allocation161_spill] sm:$0xff] %v13044_v59  ;;  %v1628_v45 = vadd.f32 %v12760_v23, %v1591_v49  ;;  %v13061_v6 = vmul.f32 %v12994_v16, %v16528_v52  ;;  %v13065_v42 = vmul.f32 %v12972_v60, %v12419_v3  ;;  %v10257_v23 = vld [vmem:[%s15940_s7 + $0x64] ss:$8 sps:$4 sm:$0xff]   ;;  %v16530_v49 = vld [vmem:[#allocation56_spill] sm:$0xff] }
 0x518   :  { %16525 = vst [vmem:[#allocation162_spill] sm:$0xff] %v13046_v57  ;;  %16527 = vst [vmem:[#allocation53_spill] sm:$0xff] %v13057_v47  ;;  %v1629_v39 = vadd.f32 %v12768_v63, %v1592_v22  ;;  %v1514_v57 = vpop.f32.mrb[66].mxu0  ;;  %v13069_v44 = vrot.slane %v8319_v58, %v16487_v10  ;;  %v13076_v25 = vmul.f32 %v12994_v16, %v16530_v49  ;;  %v10259_v63 = vld [vmem:[%s15940_s7 + $0x60] ss:$8 sps:$4 sm:$0xff]   ;;  %v16532_v10 = vld [vmem:[#allocation60_spill] sm:$0xff]  ;;  %9332 = vmatprep.subr.bf16.mxu0 %v10257_v23 }
 0x519   :  { %v1657_v52 = vadd.f32 %v12807_v26, %v1628_v45  ;;  %v1593_v47 = vmul.f32 %v12977_v36, %v1514_v57  ;;  %v1516_v3 = vpop.f32.mrb[67].mxu0  ;;  %v13081_v2 = vrot.slane %v8319_v58, %v16490_v19  ;;  %v2116_v43 = vmul.f32 %v13041_v4, %v16532_v10  ;;  %v16533_v16 = vld [vmem:[#allocation61_spill] sm:$0xff]  ;;  %v13092_v45 = vpop.f32.mrb[112].mxu1  ;;  %v16535_v19 = vld [vmem:[#allocation62_spill] sm:$0xff]  ;;  %9396 = vmatprep.subr.bf16.mxu1 %v10257_v23 }
 0x51a   :  { %16529 = vst [vmem:[#allocation54_spill] sm:$0xff] %v13069_v44  ;;  %v1658_v22 = vadd.f32 %v12811_v61, %v1629_v39  ;;  %v1594_v49 = vmul.f32 %v12985_v21, %v1516_v3  ;;  %v2117_v26 = vmul.f32 %v13044_v59, %v16533_v16  ;;  %16534 = vst [vmem:[#allocation60_spill] sm:$0xff] %v13092_v45  ;;  %v13100_v61 = vpop.f32.mrb[113].mxu1  ;;  %9334 = vmatpush1.bf16.msra.mxu0 %v10259_v63  ;;  %v16537_v3 = vld [vmem:[#allocation63_spill] sm:$0xff] }
 0x51b   :  { %16531 = vst [vmem:[#allocation56_spill] sm:$0xff] %v13081_v2  ;;  %v1847_v58 = vadd.f32 %v12852_v24, %v1657_v52  ;;  %v1630_v57 = vadd.f32 %v12772_v53, %v1593_v47  ;;  %v13098_v60 = vmul.f32 %v13041_v4, %v16535_v19  ;;  %16536 = vst [vmem:[#allocation61_spill] sm:$0xff] %v13100_v61  ;;  %v16538_v24 = vld [vmem:[#allocation69_spill] sm:$0xff]  ;;  %v10260_v19 = vld [vmem:[%s15940_s7 + $0x74] ss:$8 sps:$4 sm:$0xff]   ;;  %9398 = vmatpush1.bf16.msra.mxu1 %v10259_v63  ;;  %v13124_v61 = vpop.f32.mrb[114].mxu1 }
 0x51c   :  { %v1848_v10 = vadd.f32 %v12874_v9, %v1658_v22  ;;  %v1631_v39 = vadd.f32 %v12776_v29, %v1594_v49  ;;  %v1520_v16 = vpop.f32.mrb[68].mxu0  ;;  %v13106_v45 = vmul.f32 %v13044_v59, %v16537_v3  ;;  %v2145_v53 = vmul.f32 %v13069_v44, %v16538_v24  ;;  %v16539_v52 = vld [vmem:[#allocation70_spill] sm:$0xff]  ;;  %v10262_v49 = vld [vmem:[%s15940_s7 + $0x70] ss:$8 sps:$4 sm:$0xff]   ;;  %9336 = vmatprep.subr.bf16.mxu0 %v10260_v19 }
 0x51d   :  { %v1876_v47 = vadd.f32 %v12923_v1, %v1847_v58  ;;  %v1659_v23 = vadd.f32 %v12820_v17, %v1630_v57  ;;  %v1595_v9 = vmul.f32 %v12977_v36, %v1520_v16  ;;  %v1522_v29 = vpop.f32.mrb[69].mxu0  ;;  %v2146_v22 = vmul.f32 %v13081_v2, %v16539_v52  ;;  %9400 = vmatprep.subr.bf16.mxu1 %v10260_v19  ;;  %v16540_v57 = vld [vmem:[#allocation71_spill] sm:$0xff]  ;;  %v13131_v52 = vpop.f32.mrb[115].mxu1  ;;  %v16541_v19 = vld [vmem:[#allocation72_spill] sm:$0xff] }
 0x51e   :  { %v1877_v3 = vadd.f32 %v12927_v28, %v1848_v10  ;;  %v1660_v24 = vadd.f32 %v12824_v8, %v1631_v39  ;;  %v1596_v63 = vmul.f32 %v12985_v21, %v1522_v29  ;;  %v2147_v16 = vmul.f32 %v13069_v44, %v16540_v57  ;;  %9338 = vmatpush1.bf16.msra.mxu0 %v10262_v49 }
 0x51f   :  { %v1849_v17 = vadd.f32 %v12878_v38, %v1659_v23  ;;  %v1632_v1 = vadd.f32 %v12785_v12, %v1595_v9  ;;  %v1905_v58 = vadd.f32 %v12962_v14, %v1876_v47  ;;  %v2148_v38 = vmul.f32 %v13081_v2, %v16541_v19  ;;  %v10263_v12 = vld [vmem:[%s15940_s7 + $0x84] ss:$8 sps:$4 sm:$0xff]   ;;  %9402 = vmatpush1.bf16.msra.mxu1 %v10262_v49 }
 0x520   :  { %v1850_v8 = vadd.f32 %v12886_v55, %v1660_v24  ;;  %v1633_v28 = vadd.f32 %v12789_v34, %v1596_v63  ;;  %v1526_v10 = vpop.f32.mrb[70].mxu0  ;;  %v1906_v39 = vadd.f32 %v12966_v15, %v1877_v3  ;;  %v10265_v15 = vld [vmem:[%s15940_s7 + $0x80] ss:$8 sps:$4 sm:$0xff]   ;;  %9340 = vmatprep.subr.bf16.mxu0 %v10263_v12  ;;  %9404 = vmatprep.subr.bf16.mxu1 %v10263_v12 }
 0x521   :  { %v1878_v14 = vadd.f32 %v12931_v33, %v1849_v17  ;;  %v1661_v47 = vadd.f32 %v12833_v0, %v1632_v1  ;;  %v1597_v23 = vmul.f32 %v12977_v36, %v1526_v10  ;;  %v1528_v55 = vpop.f32.mrb[71].mxu0  ;;  %v2095_v34 = vadd.f32 %v13030_v54, %v1905_v58  ;;  %v13152_v33 = vpop.f32.mrb[116].mxu1  ;;  %v10266_v58 = vld [vmem:[%s15940_s7 + $0x94] ss:$8 sps:$4 sm:$0xff]   ;;  %v16544_v12 = vld [vmem:[#allocation74_spill] sm:$0xff] }
 0x522   :  { %v1879_v9 = vadd.f32 %v12940_v48, %v1850_v8  ;;  %v1662_v29 = vadd.f32 %v12837_v41, %v1633_v28  ;;  %v1598_v3 = vmul.f32 %v12985_v21, %v1528_v55  ;;  %v2096_v49 = vadd.f32 %v13050_v35, %v1906_v39  ;;  %v13157_v17 = vpop.f32.mrb[117].mxu1  ;;  %9342 = vmatpush1.bf16.msra.mxu0 %v10265_v15  ;;  %v16547_v55 = vld [vmem:[#allocation151_spill] sm:$0xff] }
 0x523   :  { %v1851_v0 = vadd.f32 %v12901_v50, %v1661_v47  ;;  %v1634_v24 = vadd.f32 %v12793_v40, %v1597_v23  ;;  %v2124_v54 = vadd.f32 %v2116_v43, %v2095_v34  ;;  %v1907_v63 = vadd.f32 %v12991_v31, %v1878_v14  ;;  %9406 = vmatpush1.bf16.msra.mxu1 %v10265_v15  ;;  %v16545_v23 = vld [vmem:[#allocation75_spill] sm:$0xff] }
 0x524   :  { %v1852_v48 = vadd.f32 %v12905_v5, %v1662_v29  ;;  %v1635_v41 = vadd.f32 %v12803_v37, %v1598_v3  ;;  %v2125_v1 = vadd.f32 %v2117_v26, %v2096_v49  ;;  %v1908_v35 = vadd.f32 %v13005_v11, %v1879_v9  ;;  %v10268_v37 = vld [vmem:[%s15940_s7 + $0x90] ss:$8 sps:$4 sm:$0xff]   ;;  %9344 = vmatprep.subr.bf16.mxu0 %v10266_v58 }
 0x525   :  { %v1880_v40 = vadd.f32 %v12944_v27, %v1851_v0  ;;  %v1663_v50 = vadd.f32 %v12841_v51, %v1634_v24  ;;  %v13167_v31 = vadd.f32 %v2145_v53, %v2124_v54  ;;  %v2097_v43 = vadd.f32 %v13054_v46, %v1907_v63  ;;  %v13178_v27 = vpop.f32.mrb[118].mxu1  ;;  %v16542_v53 = vld [vmem:[#allocation64_spill] sm:$0xff]  ;;  %9408 = vmatprep.subr.bf16.mxu1 %v10266_v58  ;;  %v16548_v9 = vld [vmem:[#allocation159_spill] sm:$0xff] }
 0x526   :  { %v1881_v5 = vadd.f32 %v12948_v56, %v1852_v48  ;;  %v1664_v11 = vadd.f32 %v12845_v13, %v1635_v41  ;;  %v13175_v26 = vadd.f32 %v2146_v22, %v2125_v1  ;;  %v2098_v57 = vadd.f32 %v13061_v6, %v1908_v35  ;;  %v13185_v10 = vpop.f32.mrb[119].mxu1  ;;  %9346 = vmatpush1.bf16.msra.mxu0 %v10268_v37  ;;  %v16543_v56 = vld [vmem:[#allocation65_spill] sm:$0xff]  ;;  %v16550_v49 = vld [vmem:[#allocation155_spill] sm:$0xff]  ;;  %v16553_v1 = vld [vmem:[#allocation68_spill] sm:$0xff] }
 0x527   :  { %v1909_v51 = vadd.f32 %v13009_v62, %v1880_v40  ;;  %v2120_v46 = vmul.f32 %v13041_v4, %v16542_v53  ;;  %v1853_v8 = vadd.f32 %v12909_v7, %v1663_v50  ;;  %v2126_v28 = vadd.f32 %v13098_v60, %v2097_v43  ;;  %v10269_v62 = vld [vmem:[%s15940_s7 + $0xa4] ss:$8 sps:$4 sm:$0xff]   ;;  %9410 = vmatpush1.bf16.msra.mxu1 %v10268_v37  ;;  %v16551_v0 = vld [vmem:[#allocation67_spill] sm:$0xff]  ;;  %v16554_v40 = vld [vmem:[#allocation76_spill] sm:$0xff] }
 0x528   :  { %v1910_v13 = vadd.f32 %v13013_v30, %v1881_v5  ;;  %v2121_v6 = vmul.f32 %v13044_v59, %v16543_v56  ;;  %v1854_v22 = vadd.f32 %v12913_v20, %v1664_v11  ;;  %v2127_v39 = vadd.f32 %v13106_v45, %v2098_v57  ;;  %v10271_v20 = vld [vmem:[%s15940_s7 + $0xa0] ss:$8 sps:$4 sm:$0xff]   ;;  %9348 = vmatprep.subr.bf16.mxu0 %v10269_v62  ;;  %v16552_v54 = vld [vmem:[#allocation51_spill] sm:$0xff] }
 0x529   :  { %v2099_v7 = vadd.f32 %v13065_v42, %v1909_v51  ;;  %v1882_v60 = vadd.f32 %v12954_v32, %v1853_v8  ;;  %v13197_v19 = vadd.f32 %v2147_v16, %v2126_v28  ;;  %v2149_v30 = vmul.f32 %v13069_v44, %v16544_v12  ;;  %v13210_v32 = vpop.f32.mrb[120].mxu1  ;;  %v16546_v16 = vld [vmem:[#allocation57_spill] sm:$0xff]  ;;  %v10272_v48 = vld [vmem:[%s15940_s7 + $0xb4] ss:$8 sps:$4 sm:$0xff]   ;;  %9412 = vmatprep.subr.bf16.mxu1 %v10269_v62  ;;  %v10274_v43 = vld [vmem:[%s15940_s7 + $0xb0] ss:$8 sps:$4 sm:$0xff]  }
 0x52a   :  { %v2100_v45 = vadd.f32 %v13076_v25, %v1910_v13  ;;  %v1883_v14 = vadd.f32 %v12958_v18, %v1854_v22  ;;  %v13206_v47 = vadd.f32 %v2148_v38, %v2127_v39  ;;  %v2150_v42 = vmul.f32 %v13081_v2, %v16545_v23  ;;  %v13215_v3 = vpop.f32.mrb[121].mxu1  ;;  %9350 = vmatpush1.bf16.msra.mxu0 %v10271_v20  ;;  %v16549_v25 = vld [vmem:[#allocation58_spill] sm:$0xff]  ;;  %v16555_v11 = vld [vmem:[#allocation77_spill] sm:$0xff]  ;;  %v8320_v51 = vld [vmem:[%s15939_s6 + $0x11] ss:$8 sm:$0x3] }
 0x52b   :  { %v2093_v34 = vmul.f32 %v16547_v55, %v16546_v16  ;;  %v2128_v15 = vadd.f32 %v2120_v46, %v2099_v7  ;;  %v1911_v29 = vadd.f32 %v16548_v9, %v1882_v60  ;;  %v2094_v18 = vmul.f32 %v16550_v49, %v16549_v25  ;;  %9414 = vmatpush1.bf16.msra.mxu1 %v10271_v20  ;;  %v13241_v53 = vpop.f32.mrb[122].mxu1  ;;  %v10275_v13 = vld [vmem:[%s15940_s7 + $0xc4] ss:$8 sps:$4 sm:$0xff]   ;;  %v10277_v39 = vld [vmem:[%s15940_s7 + $0xc0] ss:$8 sps:$4 sm:$0xff]   ;;  %v16582_v49 = vld [vmem:[#allocation92_spill] sm:$0xff] }
 0x52c   :  { %v2129_v38 = vadd.f32 %v2121_v6, %v2100_v45  ;;  %v2122_v24 = vmul.f32 %v13041_v4, %v16551_v0  ;;  %v1912_v63 = vadd.f32 %v16552_v54, %v1883_v14  ;;  %v2123_v35 = vmul.f32 %v13044_v59, %v16553_v1  ;;  %9352 = vmatprep.subr.bf16.mxu0 %v10272_v48  ;;  %v13243_v8 = vpop.f32.mrb[123].mxu1  ;;  %v16556_v6 = vld [vmem:[#allocation9_spill] sm:$0xff]  ;;  %v16558_v7 = vld [vmem:[#allocation10_spill] sm:$0xff]  ;;  %v10278_v45 = vld [vmem:[%s15940_s7 + $0xd4] ss:$8 sps:$4 sm:$0xff]  }
 0x52d   :  { %v2101_v41 = vadd.f32 %v2093_v34, %v1911_v29  ;;  %v13227_v58 = vadd.f32 %v2149_v30, %v2128_v15  ;;  %v2151_v50 = vmul.f32 %v13069_v44, %v16554_v40  ;;  %v2152_v57 = vmul.f32 %v13081_v2, %v16555_v11  ;;  %9416 = vmatprep.subr.bf16.mxu1 %v10272_v48  ;;  %v10284_v1 = vld [vmem:[%s15940_s7 + $0xf4] ss:$8 sps:$4 sm:$0xff]   ;;  %v16583_v55 = vld [vmem:[#allocation93_spill] sm:$0xff] }
 0x52e   :  { %v2102_v37 = vadd.f32 %v2094_v18, %v1912_v63  ;;  %v13234_v5 = vadd.f32 %v2150_v42, %v2129_v38  ;;  %9354 = vmatpush1.bf16.msra.mxu0 %v10274_v43  ;;  %v13249_v22 = vrot.slane %v8320_v51, %v16556_v6  ;;  %v13255_v60 = vrot.slane %v8320_v51, %v16558_v7  ;;  %v10280_v42 = vld [vmem:[%s15940_s7 + $0xd0] ss:$8 sps:$4 sm:$0xff]   ;;  %v10281_v18 = vld [vmem:[%s15940_s7 + $0xe4] ss:$8 sps:$4 sm:$0xff]  }
 0x52f   :  { %v2130_v46 = vadd.f32 %v2122_v24, %v2101_v41  ;;  %9418 = vmatpush1.bf16.msra.mxu1 %v10274_v43  ;;  %v13257_v12 = vpop.f32.mrb[124].mxu1  ;;  %9356 = vmatprep.subr.bf16.mxu0 %v10275_v13  ;;  %v10283_v24 = vld [vmem:[%s15940_s7 + $0xe0] ss:$8 sps:$4 sm:$0xff]   ;;  %v8321_v43 = vld [vmem:[%s15939_s6 + $0x12] ss:$8 sm:$0x3] }
 0x530   :  { %v2131_v28 = vadd.f32 %v2123_v35, %v2102_v37  ;;  %16557 = vst [vmem:[#allocation62_spill] sm:$0xff] %v13249_v22  ;;  %16559 = vst [vmem:[#allocation63_spill] sm:$0xff] %v13255_v60  ;;  %9420 = vmatprep.subr.bf16.mxu1 %v10275_v13  ;;  %v13259_v30 = vpop.f32.mrb[125].mxu1  ;;  %v13308_v13 = vrot.slane %v8321_v43, %v16556_v6  ;;  %v16579_v4 = vld [vmem:[#allocation100_spill] sm:$0xff] }
 0x531   :  { %v2159_v56 = vadd.f32 %v2151_v50, %v2130_v46  ;;  %v10286_v50 = vld [vmem:[%s15940_s7 + $0xf0] ss:$8 sps:$4 sm:$0xff]  }
 0x532   :  { %v2160_v62 = vadd.f32 %v2152_v57, %v2131_v28  ;;  %9358 = vmatpush1.bf16.msra.mxu0 %v10277_v39  ;;  %16561 = vst [vmem:[#allocation70_spill] sm:$0xff] %v13308_v13 }
 0x533   :  { %9422 = vmatpush1.bf16.msra.mxu1 %v10277_v39  ;;  %v13269_v34 = vpop.f32.mrb[126].mxu1  ;;  %9360 = vmatprep.subr.bf16.mxu0 %v10278_v45 }
 0x534   :  { %v2251_v20 = vpop.f32.mrb[72].mxu0  ;;  %9424 = vmatprep.subr.bf16.mxu1 %v10278_v45  ;;  %v13272_v9 = vpop.f32.mrb[127].mxu1 }
 0x535   :  { %v2335_v14 = vmul.f32 %v13249_v22, %v2251_v20  ;;  %v2253_v23 = vpop.f32.mrb[73].mxu0  ;;  %16560 = vst [vmem:[#allocation69_spill] sm:$0xff] %v13272_v9  ;;  %v13312_v20 = vrot.slane %v8321_v43, %v16558_v7 }
 0x536   :  { %v2336_v16 = vmul.f32 %v13255_v60, %v2253_v23  ;;  %9362 = vmatpush1.bf16.msra.mxu0 %v10280_v42 }
 0x537   :  { %v2343_v15 = vadd.f32 %v2335_v14, %v13167_v31  ;;  %9426 = vmatpush1.bf16.msra.mxu1 %v10280_v42  ;;  %v13283_v54 = vpop.f32.mrb[128].mxu1  ;;  %9364 = vmatprep.subr.bf16.mxu0 %v10281_v18  ;;  %16562 = vst [vmem:[#allocation71_spill] sm:$0xff] %v13312_v20 }
 0x538   :  { %v2344_v29 = vadd.f32 %v2336_v16, %v13175_v26  ;;  %v2257_v25 = vpop.f32.mrb[74].mxu0  ;;  %9428 = vmatprep.subr.bf16.mxu1 %v10281_v18  ;;  %v13286_v63 = vpop.f32.mrb[129].mxu1 }
 0x539   :  { %v2337_v38 = vmul.f32 %v13249_v22, %v2257_v25  ;;  %v2259_v0 = vpop.f32.mrb[75].mxu0 }
 0x53a   :  { %v2338_v31 = vmul.f32 %v13255_v60, %v2259_v0  ;;  %9366 = vmatpush1.bf16.msra.mxu0 %v10283_v24 }
 0x53b   :  { %v2345_v26 = vadd.f32 %v2337_v38, %v13197_v19  ;;  %9430 = vmatpush1.bf16.msra.mxu1 %v10283_v24  ;;  %9368 = vmatprep.subr.bf16.mxu0 %v10284_v1 }
 0x53c   :  { %v2346_v48 = vadd.f32 %v2338_v31, %v13206_v47  ;;  %v2263_v41 = vpop.f32.mrb[76].mxu0  ;;  %v13300_v47 = vpop.f32.mrb[130].mxu1  ;;  %9432 = vmatprep.subr.bf16.mxu1 %v10284_v1 }
 0x53d   :  { %v2339_v35 = vmul.f32 %v13249_v22, %v2263_v41  ;;  %v2265_v40 = vpop.f32.mrb[77].mxu0  ;;  %v13303_v11 = vpop.f32.mrb[131].mxu1 }
 0x53e   :  { %v2340_v19 = vmul.f32 %v13255_v60, %v2265_v40  ;;  %9370 = vmatpush1.bf16.msra.mxu0 %v10286_v50 }
 0x53f   :  { %v2347_v37 = vadd.f32 %v2339_v35, %v13227_v58  ;;  %9434 = vmatpush1.bf16.msra.mxu1 %v10286_v50  ;;  %v13314_v45 = vpop.f32.mrb[132].mxu1 }
 0x540   :  { %v2348_v57 = vadd.f32 %v2340_v19, %v13234_v5  ;;  %v2269_v51 = vpop.f32.mrb[78].mxu0  ;;  %v13316_v14 = vpop.f32.mrb[133].mxu1 }
 0x541   :  { %v2341_v46 = vmul.f32 %v13249_v22, %v2269_v51  ;;  %v2271_v28 = vpop.f32.mrb[79].mxu0  ;;  %v16576_v22 = vld [vmem:[#allocation90_spill] sm:$0xff] }
 0x542   :  { %v2342_v39 = vmul.f32 %v13255_v60, %v2271_v28 }
 0x543   :  { %v2349_v58 = vadd.f32 %v2341_v46, %v2159_v56  ;;  %v13320_v18 = vpop.f32.mrb[134].mxu1 }
 0x544   :  { %v2350_v23 = vadd.f32 %v2342_v39, %v2160_v62  ;;  %v2275_v5 = vpop.f32.mrb[80].mxu0  ;;  %v13322_v0 = vpop.f32.mrb[135].mxu1 }
 0x545   :  { %v2364_v42 = vmul.f32 %v13308_v13, %v2275_v5  ;;  %v2277_v16 = vpop.f32.mrb[81].mxu0  ;;  %16563 = vst [vmem:[#allocation72_spill] sm:$0xff] %v13322_v0  ;;  %v8324_v5 = vld [vmem:[%s15939_s6 + $0x15] ss:$8 sm:$0x3] }
 0x546   :  { %v2365_v25 = vmul.f32 %v13312_v20, %v2277_v16 }
 0x547   :  { %v2372_v38 = vadd.f32 %v2364_v42, %v2343_v15  ;;  %v8322_v15 = vld [vmem:[%s15939_s6 + $0x13] ss:$8 sm:$0x3] }
 0x548   :  { %v2373_v24 = vadd.f32 %v2365_v25, %v2344_v29  ;;  %v2281_v31 = vpop.f32.mrb[82].mxu0  ;;  %v8323_v29 = vld [vmem:[%s15939_s6 + $0x14] ss:$8 sm:$0x3]  ;;  %v13336_v39 = vrot.slane %v8322_v15, %v16556_v6 }
 0x549   :  { %v2366_v41 = vmul.f32 %v13308_v13, %v2281_v31  ;;  %v2283_v1 = vpop.f32.mrb[83].mxu0  ;;  %v13349_v16 = vrot.slane %v8323_v29, %v16556_v6  ;;  %v13354_v31 = vrot.slane %v8323_v29, %v16558_v7 }
 0x54a   :  { %v2367_v56 = vmul.f32 %v13312_v20, %v2283_v1  ;;  %16564 = vst [vmem:[#allocation64_spill] sm:$0xff] %v13336_v39 }
 0x54b   :  { %v2374_v35 = vadd.f32 %v2366_v41, %v2345_v26  ;;  %16566 = vst [vmem:[#allocation74_spill] sm:$0xff] %v13349_v16  ;;  %16567 = vst [vmem:[#allocation75_spill] sm:$0xff] %v13354_v31 }
 0x54c   :  { %v2375_v62 = vadd.f32 %v2367_v56, %v2346_v48  ;;  %v2287_v40 = vpop.f32.mrb[84].mxu0  ;;  %v13359_v56 = vrot.slane %v8324_v5, %v16556_v6 }
 0x54d   :  { %v2368_v50 = vmul.f32 %v13308_v13, %v2287_v40  ;;  %v2289_v19 = vpop.f32.mrb[85].mxu0 }
 0x54e   :  { %v2369_v43 = vmul.f32 %v13312_v20, %v2289_v19  ;;  %16568 = vst [vmem:[#allocation57_spill] sm:$0xff] %v13359_v56 }
 0x54f   :  { %v2376_v51 = vadd.f32 %v2368_v50, %v2347_v37  ;;  %v13343_v37 = vrot.slane %v8322_v15, %v16558_v7 }
 0x550   :  { %v2377_v46 = vadd.f32 %v2369_v43, %v2348_v57  ;;  %v2293_v28 = vpop.f32.mrb[86].mxu0  ;;  %v8325_v57 = vld [vmem:[%s15939_s6 + $0x16] ss:$8 sm:$0x3]  ;;  %v13366_v43 = vrot.slane %v8324_v5, %v16558_v7 }
 0x551   :  { %v2370_v26 = vmul.f32 %v13308_v13, %v2293_v28  ;;  %v2295_v48 = vpop.f32.mrb[87].mxu0  ;;  %16565 = vst [vmem:[#allocation65_spill] sm:$0xff] %v13343_v37  ;;  %v13363_v19 = vrot.slane %v8325_v57, %v16556_v6  ;;  %v13370_v15 = vrot.slane %v8325_v57, %v16558_v7 }
 0x552   :  { %v2371_v42 = vmul.f32 %v13312_v20, %v2295_v48  ;;  %16570 = vst [vmem:[#allocation58_spill] sm:$0xff] %v13366_v43  ;;  %v16575_v20 = vld [vmem:[#allocation83_spill] sm:$0xff] }
 0x553   :  { %v13351_v25 = vadd.f32 %v2370_v26, %v2349_v58  ;;  %16569 = vst [vmem:[#allocation159_spill] sm:$0xff] %v13363_v19  ;;  %16571 = vst [vmem:[#allocation67_spill] sm:$0xff] %v13370_v15  ;;  %v16573_v26 = vld [vmem:[#allocation81_spill] sm:$0xff]  ;;  %v2586_v13 = vmul.f32 %v13354_v31, %v16575_v20  ;;  %v2642_v20 = vmul.f32 %v13370_v15, %v16579_v4 }
 0x554   :  { %v13356_v41 = vadd.f32 %v2371_v42, %v2350_v23  ;;  %v2299_v1 = vpop.f32.mrb[88].mxu0  ;;  %v16572_v23 = vld [vmem:[#allocation80_spill] sm:$0xff]  ;;  %v2584_v48 = vmul.f32 %v13354_v31, %v16573_v26  ;;  %v16574_v42 = vld [vmem:[#allocation82_spill] sm:$0xff] }
 0x555   :  { %v2393_v40 = vmul.f32 %v13336_v39, %v2299_v1  ;;  %v2301_v50 = vpop.f32.mrb[89].mxu0  ;;  %v2583_v29 = vmul.f32 %v13349_v16, %v16572_v23  ;;  %v2585_v1 = vmul.f32 %v13349_v16, %v16574_v42  ;;  %v16577_v23 = vld [vmem:[#allocation12_spill] sm:$0xff] }
 0x556   :  { %v2394_v58 = vmul.f32 %v13343_v37, %v2301_v50  ;;  %v2612_v50 = vmul.f32 %v13359_v56, %v16576_v22  ;;  %v16581_v22 = vld [vmem:[#allocation86_spill] sm:$0xff] }
 0x557   :  { %v2401_v28 = vadd.f32 %v2393_v40, %v2372_v38  ;;  %v2641_v38 = vmul.f32 %v13363_v19, %v16577_v23  ;;  %v16578_v40 = vld [vmem:[#allocation91_spill] sm:$0xff]  ;;  %v2614_v23 = vmul.f32 %v13359_v56, %v16582_v49 }
 0x558   :  { %v2402_v5 = vadd.f32 %v2394_v58, %v2373_v24  ;;  %v2305_v60 = vpop.f32.mrb[90].mxu0  ;;  %v2613_v26 = vmul.f32 %v13366_v43, %v16578_v40  ;;  %v16580_v24 = vld [vmem:[#allocation85_spill] sm:$0xff]  ;;  %v2615_v40 = vmul.f32 %v13366_v43, %v16583_v55  ;;  %v16586_v55 = vld [vmem:[#allocation95_spill] sm:$0xff] }
 0x559   :  { %v2591_v57 = vadd.f32 %v2583_v29, %v2401_v28  ;;  %v2395_v2 = vmul.f32 %v13336_v39, %v2305_v60  ;;  %v2307_v59 = vpop.f32.mrb[91].mxu0  ;;  %v2587_v58 = vmul.f32 %v13349_v16, %v16580_v24  ;;  %v2588_v29 = vmul.f32 %v13354_v31, %v16581_v22  ;;  %v16584_v24 = vld [vmem:[#allocation102_spill] sm:$0xff] }
 0x55a   :  { %v2592_v44 = vadd.f32 %v2584_v48, %v2402_v5  ;;  %v2396_v42 = vmul.f32 %v13343_v37, %v2307_v59  ;;  %v2643_v9 = vmul.f32 %v13363_v19, %v16584_v24 }
 0x55b   :  { %v2403_v60 = vadd.f32 %v2395_v2, %v2374_v35  ;;  %v2620_v28 = vadd.f32 %v2612_v50, %v2591_v57  ;;  %v16585_v50 = vld [vmem:[#allocation103_spill] sm:$0xff] }
 0x55c   :  { %v2404_v48 = vadd.f32 %v2396_v42, %v2375_v62  ;;  %v2621_v5 = vadd.f32 %v2613_v26, %v2592_v44  ;;  %v2311_v59 = vpop.f32.mrb[92].mxu0  ;;  %v2644_v49 = vmul.f32 %v13370_v15, %v16585_v50  ;;  %v8326_v44 = vld [vmem:[%s15939_s6 + $0x17] ss:$8 sm:$0x3]  ;;  %v2616_v62 = vmul.f32 %v13359_v56, %v16586_v55 }
 0x55d   :  { %v2593_v21 = vadd.f32 %v2585_v1, %v2403_v60  ;;  %v2649_v36 = vadd.f32 %v2641_v38, %v2620_v28  ;;  %v2397_v4 = vmul.f32 %v13336_v39, %v2311_v59  ;;  %v2313_v0 = vpop.f32.mrb[93].mxu0  ;;  %v16587_v1 = vld [vmem:[#allocation96_spill] sm:$0xff]  ;;  %v16588_v60 = vld [vmem:[#allocation105_spill] sm:$0xff]  ;;  %v16589_v28 = vld [vmem:[#allocation107_spill] sm:$0xff]  ;;  %v13417_v55 = vrot.slane %v8326_v44, %v16556_v6 }
 0x55e   :  { %v2594_v22 = vadd.f32 %v2586_v13, %v2404_v48  ;;  %v2650_v2 = vadd.f32 %v2642_v20, %v2621_v5  ;;  %v2398_v35 = vmul.f32 %v13343_v37, %v2313_v0  ;;  %v2617_v57 = vmul.f32 %v13366_v43, %v16587_v1 }
 0x55f   :  { %v2405_v38 = vadd.f32 %v2397_v4, %v2376_v51  ;;  %v2622_v26 = vadd.f32 %v2614_v23, %v2593_v21  ;;  %v2645_v0 = vmul.f32 %v13363_v19, %v16588_v60  ;;  %v2646_v48 = vmul.f32 %v13370_v15, %v16589_v28  ;;  %16590 = vst [vmem:[#allocation51_spill] sm:$0xff] %v13417_v55  ;;  %v16592_v23 = vld [vmem:[#allocation87_spill] sm:$0xff]  ;;  %v16593_v4 = vld [vmem:[#allocation88_spill] sm:$0xff]  ;;  %v16596_v28 = vld [vmem:[#allocation109_spill] sm:$0xff] }
 0x560   :  { %v2406_v42 = vadd.f32 %v2398_v35, %v2377_v46  ;;  %v2623_v13 = vadd.f32 %v2615_v40, %v2594_v22  ;;  %v2317_v20 = vpop.f32.mrb[94].mxu0  ;;  %v13421_v46 = vrot.slane %v8326_v44, %v16558_v7  ;;  %v2589_v40 = vmul.f32 %v13349_v16, %v16592_v23  ;;  %v16594_v35 = vld [vmem:[#allocation97_spill] sm:$0xff] }
 0x561   :  { %v2595_v5 = vadd.f32 %v2587_v58, %v2405_v38  ;;  %v2651_v59 = vadd.f32 %v2643_v9, %v2622_v26  ;;  %v2399_v24 = vmul.f32 %v13336_v39, %v2317_v20  ;;  %v2319_v50 = vpop.f32.mrb[95].mxu0  ;;  %v2590_v58 = vmul.f32 %v13354_v31, %v16593_v4  ;;  %v16595_v26 = vld [vmem:[#allocation98_spill] sm:$0xff] }
 0x562   :  { %v2596_v1 = vadd.f32 %v2588_v29, %v2406_v42  ;;  %v2652_v51 = vadd.f32 %v2644_v49, %v2623_v13  ;;  %v2400_v21 = vmul.f32 %v13343_v37, %v2319_v50  ;;  %16591 = vst [vmem:[#allocation68_spill] sm:$0xff] %v13421_v46  ;;  %v2618_v38 = vmul.f32 %v13359_v56, %v16594_v35  ;;  %v16619_v56 = vld [vmem:[#allocation129_spill] sm:$0xff] }
 0x563   :  { %v2407_v9 = vadd.f32 %v2399_v24, %v13351_v25  ;;  %v2624_v22 = vadd.f32 %v2616_v62, %v2595_v5  ;;  %v2619_v29 = vmul.f32 %v13366_v43, %v16595_v26  ;;  %v2647_v50 = vmul.f32 %v13363_v19, %v16596_v28  ;;  %v16597_v24 = vld [vmem:[#allocation110_spill] sm:$0xff]  ;;  %v16615_v43 = vld [vmem:[#allocation145_spill] sm:$0xff]  ;;  %v16618_v19 = vld [vmem:[#allocation127_spill] sm:$0xff] }
 0x564   :  { %v2408_v49 = vadd.f32 %v2400_v21, %v13356_v41  ;;  %v2625_v42 = vadd.f32 %v2617_v57, %v2596_v1  ;;  %v2747_v44 = vpop.f32.mrb[96].mxu0  ;;  %v2648_v4 = vmul.f32 %v13370_v15, %v16597_v24 }
 0x565   :  { %v2597_v13 = vadd.f32 %v2589_v40, %v2407_v9  ;;  %v2653_v20 = vadd.f32 %v2645_v0, %v2624_v22  ;;  %v2831_v60 = vmul.f32 %v13417_v55, %v2747_v44  ;;  %v2749_v23 = vpop.f32.mrb[97].mxu0 }
 0x566   :  { %v2598_v25 = vadd.f32 %v2590_v58, %v2408_v49  ;;  %v2654_v62 = vadd.f32 %v2646_v48, %v2625_v42  ;;  %v2832_v5 = vmul.f32 %v13421_v46, %v2749_v23 }
 0x567   :  { %v2839_v35 = vadd.f32 %v2831_v60, %v2649_v36  ;;  %v2626_v26 = vadd.f32 %v2618_v38, %v2597_v13  ;;  %v8327_v36 = vld [vmem:[%s15939_s6 + $0x20] ss:$8 sm:$0x3] }
 0x568   :  { %v2840_v41 = vadd.f32 %v2832_v5, %v2650_v2  ;;  %v2627_v57 = vadd.f32 %v2619_v29, %v2598_v25  ;;  %v2753_v1 = vpop.f32.mrb[98].mxu0 }
 0x569   :  { %v2655_v21 = vadd.f32 %v2647_v50, %v2626_v26  ;;  %v2833_v0 = vmul.f32 %v13417_v55, %v2753_v1  ;;  %v2755_v40 = vpop.f32.mrb[99].mxu0  ;;  %v13448_v50 = vrot.slane %v8327_v36, %v16556_v6 }
 0x56a   :  { %v2656_v9 = vadd.f32 %v2648_v4, %v2627_v57  ;;  %v2834_v22 = vmul.f32 %v13421_v46, %v2755_v40 }
 0x56b   :  { %v2841_v44 = vadd.f32 %v2833_v0, %v2651_v59  ;;  %16598 = vst [vmem:[#allocation76_spill] sm:$0xff] %v13448_v50 }
 0x56c   :  { %v2842_v58 = vadd.f32 %v2834_v22, %v2652_v51  ;;  %v2759_v48 = vpop.f32.mrb[100].mxu0  ;;  %v13452_v51 = vrot.slane %v8327_v36, %v16558_v7 }
 0x56d   :  { %v2835_v49 = vmul.f32 %v13417_v55, %v2759_v48  ;;  %v2761_v42 = vpop.f32.mrb[101].mxu0 }
 0x56e   :  { %v2836_v28 = vmul.f32 %v13421_v46, %v2761_v42  ;;  %16599 = vst [vmem:[#allocation77_spill] sm:$0xff] %v13452_v51 }
 0x56f   :  { %v2843_v2 = vadd.f32 %v2835_v49, %v2653_v20 }
 0x570   :  { %v2844_v38 = vadd.f32 %v2836_v28, %v2654_v62  ;;  %v2765_v29 = vpop.f32.mrb[102].mxu0  ;;  %v8328_v28 = vld [vmem:[%s15939_s6 + $0x21] ss:$8 sm:$0x3] }
 0x571   :  { %v2837_v13 = vmul.f32 %v13417_v55, %v2765_v29  ;;  %v2767_v60 = vpop.f32.mrb[103].mxu0 }
 0x572   :  { %v2838_v59 = vmul.f32 %v13421_v46, %v2767_v60  ;;  %v8330_v60 = vld [vmem:[%s15939_s6 + $0x23] ss:$8 sm:$0x3] }
 0x573   :  { %v2845_v23 = vadd.f32 %v2837_v13, %v2655_v21  ;;  %v13468_v13 = vrot.slane %v8328_v28, %v16556_v6 }
 0x574   :  { %v2846_v25 = vadd.f32 %v2838_v59, %v2656_v9  ;;  %v2771_v5 = vpop.f32.mrb[104].mxu0 }
 0x575   :  { %v2860_v24 = vmul.f32 %v13448_v50, %v2771_v5  ;;  %v2773_v4 = vpop.f32.mrb[105].mxu0  ;;  %16600 = vst [vmem:[#allocation80_spill] sm:$0xff] %v13468_v13 }
 0x576   :  { %v2861_v20 = vmul.f32 %v13452_v51, %v2773_v4 }
 0x577   :  { %v2868_v62 = vadd.f32 %v2860_v24, %v2839_v35 }
 0x578   :  { %v2869_v26 = vadd.f32 %v2861_v20, %v2840_v41  ;;  %v2777_v57 = vpop.f32.mrb[106].mxu0  ;;  %v8329_v41 = vld [vmem:[%s15939_s6 + $0x22] ss:$8 sm:$0x3] }
 0x579   :  { %v2862_v1 = vmul.f32 %v13448_v50, %v2777_v57  ;;  %v2779_v0 = vpop.f32.mrb[107].mxu0  ;;  %v13481_v5 = vrot.slane %v8329_v41, %v16556_v6  ;;  %v13486_v4 = vrot.slane %v8329_v41, %v16558_v7  ;;  %v16609_v41 = vld [vmem:[#allocation113_spill] sm:$0xff] }
 0x57a   :  { %v2863_v40 = vmul.f32 %v13452_v51, %v2779_v0 }
 0x57b   :  { %v2870_v22 = vadd.f32 %v2862_v1, %v2841_v44  ;;  %16602 = vst [vmem:[#allocation82_spill] sm:$0xff] %v13481_v5  ;;  %16603 = vst [vmem:[#allocation83_spill] sm:$0xff] %v13486_v4  ;;  %v13491_v1 = vrot.slane %v8330_v60, %v16556_v6 }
 0x57c   :  { %v2871_v48 = vadd.f32 %v2863_v40, %v2842_v58  ;;  %v2783_v49 = vpop.f32.mrb[108].mxu0 }
 0x57d   :  { %v2864_v21 = vmul.f32 %v13448_v50, %v2783_v49  ;;  %v2785_v9 = vpop.f32.mrb[109].mxu0  ;;  %16604 = vst [vmem:[#allocation90_spill] sm:$0xff] %v13491_v1 }
 0x57e   :  { %v2865_v42 = vmul.f32 %v13452_v51, %v2785_v9 }
 0x57f   :  { %v2872_v35 = vadd.f32 %v2864_v21, %v2843_v2  ;;  %v13475_v2 = vrot.slane %v8328_v28, %v16558_v7  ;;  %v13498_v21 = vrot.slane %v8330_v60, %v16558_v7 }
 0x580   :  { %v2873_v36 = vadd.f32 %v2865_v42, %v2844_v38  ;;  %v2789_v29 = vpop.f32.mrb[110].mxu0  ;;  %v8331_v38 = vld [vmem:[%s15939_s6 + $0x24] ss:$8 sm:$0x3] }
 0x581   :  { %v2866_v44 = vmul.f32 %v13448_v50, %v2789_v29  ;;  %v2791_v58 = vpop.f32.mrb[111].mxu0  ;;  %16601 = vst [vmem:[#allocation81_spill] sm:$0xff] %v13475_v2  ;;  %v13495_v49 = vrot.slane %v8331_v38, %v16556_v6  ;;  %16606 = vst [vmem:[#allocation91_spill] sm:$0xff] %v13498_v21  ;;  %v13502_v9 = vrot.slane %v8331_v38, %v16558_v7  ;;  %v16612_v50 = vld [vmem:[#allocation123_spill] sm:$0xff] }
 0x582   :  { %v2867_v59 = vmul.f32 %v13452_v51, %v2791_v58  ;;  %v3080_v29 = vmul.f32 %v13486_v4, %v16609_v41 }
 0x583   :  { %v13483_v24 = vadd.f32 %v2866_v44, %v2845_v23  ;;  %16605 = vst [vmem:[#allocation12_spill] sm:$0xff] %v13495_v49  ;;  %16607 = vst [vmem:[#allocation100_spill] sm:$0xff] %v13502_v9  ;;  %v16610_v44 = vld [vmem:[#allocation115_spill] sm:$0xff] }
 0x584   :  { %v13488_v20 = vadd.f32 %v2867_v59, %v2846_v25  ;;  %v2795_v57 = vpop.f32.mrb[112].mxu0  ;;  %v16608_v25 = vld [vmem:[#allocation111_spill] sm:$0xff]  ;;  %v3081_v58 = vmul.f32 %v13481_v5, %v16610_v44  ;;  %v16611_v59 = vld [vmem:[#allocation116_spill] sm:$0xff] }
 0x585   :  { %v2889_v0 = vmul.f32 %v13468_v13, %v2795_v57  ;;  %v2797_v40 = vpop.f32.mrb[113].mxu0  ;;  %v3079_v42 = vmul.f32 %v13481_v5, %v16608_v25  ;;  %v3082_v57 = vmul.f32 %v13486_v4, %v16611_v59  ;;  %v16613_v25 = vld [vmem:[#allocation143_spill] sm:$0xff] }
 0x586   :  { %v2890_v23 = vmul.f32 %v13475_v2, %v2797_v40  ;;  %v3108_v40 = vmul.f32 %v13491_v1, %v16612_v50  ;;  %v16617_v50 = vld [vmem:[#allocation119_spill] sm:$0xff] }
 0x587   :  { %v2897_v28 = vadd.f32 %v2889_v0, %v2868_v62  ;;  %v3137_v62 = vmul.f32 %v13495_v49, %v16613_v25  ;;  %v16614_v0 = vld [vmem:[#allocation125_spill] sm:$0xff]  ;;  %v3110_v25 = vmul.f32 %v13491_v1, %v16618_v19 }
 0x588   :  { %v2898_v60 = vadd.f32 %v2890_v23, %v2869_v26  ;;  %v2801_v51 = vpop.f32.mrb[114].mxu0  ;;  %v3109_v41 = vmul.f32 %v13498_v21, %v16614_v0  ;;  %v3138_v26 = vmul.f32 %v13502_v9, %v16615_v43  ;;  %v16616_v23 = vld [vmem:[#allocation117_spill] sm:$0xff]  ;;  %v3111_v0 = vmul.f32 %v13498_v21, %v16619_v56 }
 0x589   :  { %v3087_v38 = vadd.f32 %v3079_v42, %v2897_v28  ;;  %v2891_v46 = vmul.f32 %v13468_v13, %v2801_v51  ;;  %v2803_v55 = vpop.f32.mrb[115].mxu0  ;;  %v3083_v59 = vmul.f32 %v13481_v5, %v16616_v23  ;;  %v3084_v42 = vmul.f32 %v13486_v4, %v16617_v50  ;;  %v16620_v23 = vld [vmem:[#allocation149_spill] sm:$0xff] }
 0x58a   :  { %v3088_v15 = vadd.f32 %v3080_v29, %v2898_v60  ;;  %v2892_v44 = vmul.f32 %v13475_v2, %v2803_v55  ;;  %v3139_v39 = vmul.f32 %v13495_v49, %v16620_v23  ;;  %v8332_v56 = vld [vmem:[%s15939_s6 + $0x25] ss:$8 sm:$0x3] }
 0x58b   :  { %v2899_v51 = vadd.f32 %v2891_v46, %v2870_v22  ;;  %v3116_v28 = vadd.f32 %v3108_v40, %v3087_v38  ;;  %v16621_v40 = vld [vmem:[#allocation150_spill] sm:$0xff] }
 0x58c   :  { %v2900_v29 = vadd.f32 %v2892_v44, %v2871_v48  ;;  %v3117_v60 = vadd.f32 %v3109_v41, %v3088_v15  ;;  %v2807_v55 = vpop.f32.mrb[116].mxu0  ;;  %v3140_v19 = vmul.f32 %v13502_v9, %v16621_v40  ;;  %v16622_v15 = vld [vmem:[#allocation133_spill] sm:$0xff] }
 0x58d   :  { %v3089_v31 = vadd.f32 %v3081_v58, %v2899_v51  ;;  %v3145_v16 = vadd.f32 %v3137_v62, %v3116_v28  ;;  %v2893_v43 = vmul.f32 %v13468_v13, %v2807_v55  ;;  %v2809_v37 = vpop.f32.mrb[117].mxu0  ;;  %v3112_v48 = vmul.f32 %v13491_v1, %v16622_v15  ;;  %v16623_v58 = vld [vmem:[#allocation135_spill] sm:$0xff]  ;;  %v16624_v51 = vld [vmem:[#allocation154_spill] sm:$0xff]  ;;  %v16625_v28 = vld [vmem:[#allocation157_spill] sm:$0xff] }
 0x58e   :  { %v3090_v50 = vadd.f32 %v3082_v57, %v2900_v29  ;;  %v3146_v46 = vadd.f32 %v3138_v26, %v3117_v60  ;;  %v2894_v22 = vmul.f32 %v13475_v2, %v2809_v37  ;;  %v3113_v38 = vmul.f32 %v13498_v21, %v16623_v58 }
 0x58f   :  { %v2901_v62 = vadd.f32 %v2893_v43, %v2872_v35  ;;  %v3118_v41 = vadd.f32 %v3110_v25, %v3089_v31  ;;  %v3141_v37 = vmul.f32 %v13495_v49, %v16624_v51  ;;  %v3142_v29 = vmul.f32 %v13502_v9, %v16625_v28  ;;  %v16628_v25 = vld [vmem:[#allocation121_spill] sm:$0xff]  ;;  %v16629_v43 = vld [vmem:[#allocation122_spill] sm:$0xff] }
 0x590   :  { %v2902_v44 = vadd.f32 %v2894_v22, %v2873_v36  ;;  %v3119_v57 = vadd.f32 %v3111_v0, %v3090_v50  ;;  %v2813_v26 = vpop.f32.mrb[118].mxu0  ;;  %v13549_v15 = vrot.slane %v8332_v56, %v16556_v6  ;;  %v13553_v36 = vrot.slane %v8332_v56, %v16558_v7  ;;  %v16630_v22 = vld [vmem:[#allocation138_spill] sm:$0xff] }
 0x591   :  { %v3091_v60 = vadd.f32 %v3083_v59, %v2901_v62  ;;  %v3147_v55 = vadd.f32 %v3139_v39, %v3118_v41  ;;  %v2895_v23 = vmul.f32 %v13468_v13, %v2813_v26  ;;  %v2815_v40 = vpop.f32.mrb[119].mxu0  ;;  %v3085_v0 = vmul.f32 %v13481_v5, %v16628_v25  ;;  %v16631_v41 = vld [vmem:[#allocation140_spill] sm:$0xff]  ;;  %v16632_v28 = vld [vmem:[#allocation162_spill] sm:$0xff] }
 0x592   :  { %16626 = vst [vmem:[#allocation85_spill] sm:$0xff] %v13549_v15  ;;  %v3092_v58 = vadd.f32 %v3084_v42, %v2902_v44  ;;  %v3148_v35 = vadd.f32 %v3140_v19, %v3119_v57  ;;  %v2896_v31 = vmul.f32 %v13475_v2, %v2815_v40  ;;  %16627 = vst [vmem:[#allocation86_spill] sm:$0xff] %v13553_v36  ;;  %v16794_v2 = vld [vmem:[#allocation130_spill] sm:$0xff] }
 0x593   :  { %v3086_v59 = vmul.f32 %v13486_v4, %v16629_v43  ;;  %v2903_v39 = vadd.f32 %v2895_v23, %v13483_v24  ;;  %v3120_v50 = vadd.f32 %v3112_v48, %v3091_v60  ;;  %v3114_v62 = vmul.f32 %v13491_v1, %v16630_v22  ;;  %v16633_v23 = vld [vmem:[#allocation53_spill] sm:$0xff]  ;;  %v16792_v1 = vld [vmem:[#allocation128_spill] sm:$0xff] }
 0x594   :  { %v3115_v42 = vmul.f32 %v13498_v21, %v16631_v41  ;;  %v2904_v19 = vadd.f32 %v2896_v31, %v13488_v20  ;;  %v3121_v44 = vadd.f32 %v3113_v38, %v3092_v58  ;;  %v3243_v56 = vpop.f32.mrb[120].mxu0  ;;  %v3143_v40 = vmul.f32 %v13495_v49, %v16632_v28 }
 0x595   :  { %v3093_v57 = vadd.f32 %v3085_v0, %v2903_v39  ;;  %v3149_v26 = vadd.f32 %v3141_v37, %v3120_v50  ;;  %v3327_v51 = vmul.f32 %v13549_v15, %v3243_v56  ;;  %v3245_v25 = vpop.f32.mrb[121].mxu0  ;;  %v3144_v43 = vmul.f32 %v13502_v9, %v16633_v23 }
 0x596   :  { %v3094_v24 = vadd.f32 %v3086_v59, %v2904_v19  ;;  %v3150_v48 = vadd.f32 %v3142_v29, %v3121_v44  ;;  %v3328_v60 = vmul.f32 %v13553_v36, %v3245_v25 }
 0x597   :  { %v3335_v22 = vadd.f32 %v3327_v51, %v3145_v16  ;;  %v3122_v41 = vadd.f32 %v3114_v62, %v3093_v57  ;;  %v8333_v16 = vld [vmem:[%s15939_s6 + $0x26] ss:$8 sm:$0x3] }
 0x598   :  { %v3336_v20 = vadd.f32 %v3328_v60, %v3146_v46  ;;  %v3123_v38 = vadd.f32 %v3115_v42, %v3094_v24  ;;  %v3249_v58 = vpop.f32.mrb[122].mxu0 }
 0x599   :  { %v3151_v31 = vadd.f32 %v3143_v40, %v3122_v41  ;;  %v3329_v37 = vmul.f32 %v13549_v15, %v3249_v58  ;;  %v3251_v0 = vpop.f32.mrb[123].mxu0  ;;  %v13580_v40 = vrot.slane %v8333_v16, %v16556_v6 }
 0x59a   :  { %v3152_v39 = vadd.f32 %v3144_v43, %v3123_v38  ;;  %v3330_v50 = vmul.f32 %v13553_v36, %v3251_v0 }
 0x59b   :  { %v3337_v56 = vadd.f32 %v3329_v37, %v3147_v55  ;;  %16634 = vst [vmem:[#allocation92_spill] sm:$0xff] %v13580_v40 }
 0x59c   :  { %v3338_v59 = vadd.f32 %v3330_v50, %v3148_v35  ;;  %v3255_v29 = vpop.f32.mrb[124].mxu0  ;;  %v13584_v35 = vrot.slane %v8333_v16, %v16558_v7 }
 0x59d   :  { %v3331_v19 = vmul.f32 %v13549_v15, %v3255_v29  ;;  %v3257_v44 = vpop.f32.mrb[125].mxu0 }
 0x59e   :  { %v3332_v28 = vmul.f32 %v13553_v36, %v3257_v44  ;;  %16635 = vst [vmem:[#allocation93_spill] sm:$0xff] %v13584_v35 }
 0x59f   :  { %v3339_v46 = vadd.f32 %v3331_v19, %v3149_v26 }
 0x5a0   :  { %v3340_v62 = vadd.f32 %v3332_v28, %v3150_v48  ;;  %v3261_v42 = vpop.f32.mrb[126].mxu0  ;;  %v8334_v28 = vld [vmem:[%s15939_s6 + $0x27] ss:$8 sm:$0x3] }
 0x5a1   :  { %v3333_v57 = vmul.f32 %v13549_v15, %v3261_v42  ;;  %v3263_v51 = vpop.f32.mrb[127].mxu0 }
 0x5a2   :  { %v3334_v55 = vmul.f32 %v13553_v36, %v3263_v51  ;;  %v8336_v51 = vld [vmem:[%s15939_s6 + $0x31] ss:$8 sm:$0x3]  ;;  %v16789_v36 = vld [vmem:[#allocation153_spill] sm:$0xff] }
 0x5a3   :  { %v3341_v25 = vadd.f32 %v3333_v57, %v3151_v31  ;;  %v13600_v57 = vrot.slane %v8334_v28, %v16556_v6 }
 0x5a4   :  { %v3342_v24 = vadd.f32 %v3334_v55, %v3152_v39  ;;  %v3267_v60 = vpop.f32.mrb[128].mxu0 }
 0x5a5   :  { %v3356_v23 = vmul.f32 %v13580_v40, %v3267_v60  ;;  %v3269_v43 = vpop.f32.mrb[129].mxu0  ;;  %16636 = vst [vmem:[#allocation102_spill] sm:$0xff] %v13600_v57 }
 0x5a6   :  { %v3357_v26 = vmul.f32 %v13584_v35, %v3269_v43 }
 0x5a7   :  { %v3364_v48 = vadd.f32 %v3356_v23, %v3335_v22 }
 0x5a8   :  { %v3365_v41 = vadd.f32 %v3357_v26, %v3336_v20  ;;  %v3273_v38 = vpop.f32.mrb[130].mxu0  ;;  %v8335_v20 = vld [vmem:[%s15939_s6 + $0x30] ss:$8 sm:$0x3] }
 0x5a9   :  { %v3358_v58 = vmul.f32 %v13580_v40, %v3273_v38  ;;  %v3275_v37 = vpop.f32.mrb[131].mxu0  ;;  %v13613_v60 = vrot.slane %v8335_v20, %v16556_v6  ;;  %v13618_v43 = vrot.slane %v8335_v20, %v16558_v7  ;;  %v16645_v20 = vld [vmem:[#allocation61_spill] sm:$0xff] }
 0x5aa   :  { %v3359_v0 = vmul.f32 %v13584_v35, %v3275_v37 }
 0x5ab   :  { %v3366_v50 = vadd.f32 %v3358_v58, %v3337_v56  ;;  %16638 = vst [vmem:[#allocation95_spill] sm:$0xff] %v13613_v60  ;;  %16639 = vst [vmem:[#allocation96_spill] sm:$0xff] %v13618_v43  ;;  %v13623_v58 = vrot.slane %v8336_v51, %v16556_v6 }
 0x5ac   :  { %v3367_v29 = vadd.f32 %v3359_v0, %v3338_v59  ;;  %v3279_v19 = vpop.f32.mrb[132].mxu0 }
 0x5ad   :  { %v3360_v31 = vmul.f32 %v13580_v40, %v3279_v19  ;;  %v3281_v39 = vpop.f32.mrb[133].mxu0  ;;  %16640 = vst [vmem:[#allocation105_spill] sm:$0xff] %v13623_v58 }
 0x5ae   :  { %v3361_v44 = vmul.f32 %v13584_v35, %v3281_v39 }
 0x5af   :  { %v3368_v22 = vadd.f32 %v3360_v31, %v3339_v46  ;;  %v13607_v46 = vrot.slane %v8334_v28, %v16558_v7  ;;  %v13630_v31 = vrot.slane %v8336_v51, %v16558_v7 }
 0x5b0   :  { %v3369_v16 = vadd.f32 %v3361_v44, %v3340_v62  ;;  %v3285_v42 = vpop.f32.mrb[134].mxu0  ;;  %v8337_v62 = vld [vmem:[%s15939_s6 + $0x32] ss:$8 sm:$0x3] }
 0x5b1   :  { %v3362_v56 = vmul.f32 %v13580_v40, %v3285_v42  ;;  %v3287_v59 = vpop.f32.mrb[135].mxu0  ;;  %16637 = vst [vmem:[#allocation103_spill] sm:$0xff] %v13607_v46  ;;  %v13627_v19 = vrot.slane %v8337_v62, %v16556_v6  ;;  %16642 = vst [vmem:[#allocation87_spill] sm:$0xff] %v13630_v31  ;;  %v13634_v39 = vrot.slane %v8337_v62, %v16558_v7 }
 0x5b2   :  { %v3363_v55 = vmul.f32 %v13584_v35, %v3287_v59  ;;  %v3576_v42 = vmul.f32 %v13618_v43, %v16645_v20 }
 0x5b3   :  { %v13615_v23 = vadd.f32 %v3362_v56, %v3341_v25  ;;  %16641 = vst [vmem:[#allocation107_spill] sm:$0xff] %v13627_v19  ;;  %16643 = vst [vmem:[#allocation88_spill] sm:$0xff] %v13634_v39  ;;  %v3633_v62 = vmul.f32 %v13627_v19, %v13283_v54  ;;  %v3606_v54 = vmul.f32 %v13623_v58, %v13241_v53 }
 0x5b4   :  { %v13620_v26 = vadd.f32 %v3363_v55, %v3342_v24  ;;  %v3291_v38 = vpop.f32.mrb[136].mxu0  ;;  %v16644_v24 = vld [vmem:[#allocation60_spill] sm:$0xff]  ;;  %v3604_v55 = vmul.f32 %v13623_v58, %v13210_v32  ;;  %v3578_v32 = vmul.f32 %v13618_v43, %v13131_v52  ;;  %v3636_v53 = vmul.f32 %v13634_v39, %v13303_v11 }
 0x5b5   :  { %v3385_v37 = vmul.f32 %v13600_v57, %v3291_v38  ;;  %v3293_v0 = vpop.f32.mrb[137].mxu0  ;;  %v3575_v44 = vmul.f32 %v13613_v60, %v16644_v24 }
 0x5b6   :  { %v3386_v25 = vmul.f32 %v13607_v46, %v3293_v0  ;;  %v3605_v0 = vmul.f32 %v13630_v31, %v13215_v3  ;;  %v3607_v3 = vmul.f32 %v13630_v31, %v13243_v8  ;;  %v3579_v8 = vmul.f32 %v13613_v60, %v13152_v33 }
 0x5b7   :  { %v3393_v28 = vadd.f32 %v3385_v37, %v3364_v48  ;;  %v3577_v37 = vmul.f32 %v13613_v60, %v13124_v61  ;;  %v3635_v61 = vmul.f32 %v13627_v19, %v13300_v47  ;;  %v3609_v47 = vmul.f32 %v13630_v31, %v13259_v30 }
 0x5b8   :  { %v3394_v56 = vadd.f32 %v3386_v25, %v3365_v41  ;;  %v3297_v59 = vpop.f32.mrb[138].mxu0  ;;  %v3634_v41 = vmul.f32 %v13634_v39, %v13286_v63  ;;  %v3638_v30 = vmul.f32 %v13634_v39, %v13316_v14  ;;  %v3639_v14 = vmul.f32 %v13627_v19, %v13320_v18 }
 0x5b9   :  { %v3583_v38 = vadd.f32 %v3575_v44, %v3393_v28  ;;  %v3387_v51 = vmul.f32 %v13600_v57, %v3297_v59  ;;  %v3299_v35 = vpop.f32.mrb[139].mxu0 }
 0x5ba   :  { %v3584_v24 = vadd.f32 %v3576_v42, %v3394_v56  ;;  %v3388_v48 = vmul.f32 %v13607_v46, %v3299_v35 }
 0x5bb   :  { %v3395_v25 = vadd.f32 %v3387_v51, %v3366_v50  ;;  %v3612_v44 = vadd.f32 %v3604_v55, %v3583_v38 }
 0x5bc   :  { %v3396_v28 = vadd.f32 %v3388_v48, %v3367_v29  ;;  %v3613_v20 = vadd.f32 %v3605_v0, %v3584_v24  ;;  %v3303_v35 = vpop.f32.mrb[140].mxu0  ;;  %v3580_v29 = vmul.f32 %v13618_v43, %v13157_v17  ;;  %v3637_v17 = vmul.f32 %v13627_v19, %v13314_v45 }
 0x5bd   :  { %v3585_v42 = vadd.f32 %v3577_v37, %v3395_v25  ;;  %v3641_v56 = vadd.f32 %v3633_v62, %v3612_v44  ;;  %v3389_v63 = vmul.f32 %v13600_v57, %v3303_v35  ;;  %v3305_v59 = vpop.f32.mrb[141].mxu0  ;;  %v3608_v62 = vmul.f32 %v13623_v58, %v13257_v12 }
 0x5be   :  { %v3586_v52 = vadd.f32 %v3578_v32, %v3396_v28  ;;  %v3642_v50 = vadd.f32 %v3634_v41, %v3613_v20  ;;  %v3390_v55 = vmul.f32 %v13607_v46, %v3305_v59  ;;  %v3610_v28 = vmul.f32 %v13623_v58, %v13269_v34  ;;  %v16647_v59 = vld [vmem:[#allocation72_spill] sm:$0xff] }
 0x5bf   :  { %v3397_v38 = vadd.f32 %v3389_v63, %v3368_v22  ;;  %v3614_v51 = vadd.f32 %v3606_v54, %v3585_v42  ;;  %v3582_v54 = vmul.f32 %v13618_v43, %v13185_v10  ;;  %v3640_v10 = vmul.f32 %v13634_v39, %v16647_v59  ;;  %v3879_v59 = vld [vmem:[%s15942_s9] sm:$0x3]  ;;  %v14383_v43 = vld [vmem:[%s15940_s7 + $0xc4] ss:$8 sps:$4 sm:$0xff]  }
 0x5c0   :  { %v3398_v0 = vadd.f32 %v3390_v55, %v3369_v16  ;;  %v3615_v24 = vadd.f32 %v3607_v3, %v3586_v52  ;;  %v3309_v48 = vpop.f32.mrb[142].mxu0  ;;  %3713 = vmatprep.mubr.f32.mxu0 %v3642_v50  ;;  %v3581_v16 = vmul.f32 %v13613_v60, %v13178_v27  ;;  %v16646_v27 = vld [vmem:[#allocation69_spill] sm:$0xff]  ;;  %16787 = vst [vmem:[#allocation149_spill] sm:$0xff] %v14383_v43 }
 0x5c1   :  { %v3587_v41 = vadd.f32 %v3579_v8, %v3397_v38  ;;  %v3643_v11 = vadd.f32 %v3635_v61, %v3614_v51  ;;  %v3391_v37 = vmul.f32 %v13600_v57, %v3309_v48  ;;  %v3311_v33 = vpop.f32.mrb[143].mxu0  ;;  %3714 = vmatmul.mubr.f32.vlgmr.msra.gmra.mrb[144].mxu0 %v3641_v56 }
 0x5c2   :  { %v3588_v22 = vadd.f32 %v3580_v29, %v3398_v0  ;;  %v3644_v32 = vadd.f32 %v3636_v53, %v3615_v24  ;;  %v3392_v12 = vmul.f32 %v13607_v46, %v3311_v33  ;;  %v16788_v46 = vld [vmem:[#allocation152_spill] sm:$0xff] }
 0x5c3   :  { %v3399_v25 = vadd.f32 %v3391_v37, %v13615_v23  ;;  %v3616_v44 = vadd.f32 %v3608_v62, %v3587_v41  ;;  %v3611_v23 = vmul.f32 %v13630_v31, %v16646_v27  ;;  %v3859_v27 = vld [vmem:[%s15941_s8] sm:$0x3]  ;;  %s10588_s8 = smov 64  }
 0x5c4   :  { %v3400_v3 = vadd.f32 %v3392_v12, %v13620_v26  ;;  %v3617_v45 = vadd.f32 %v3609_v47, %v3588_v22  ;;  %3719 = vmatprep.mubr.f32.mxu0 %v3644_v32 }
 0x5c5   :  { %v3589_v20 = vadd.f32 %v3581_v16, %v3399_v25  ;;  %v3645_v35 = vadd.f32 %v3637_v17, %v3616_v44  ;;  %3720 = vmatmul.mubr.f32.gmra.mrb[146].mxu0 %v3643_v11 }
 0x5c6   :  { %v3590_v42 = vadd.f32 %v3582_v54, %v3400_v3  ;;  %v3646_v63 = vadd.f32 %v3638_v30, %v3617_v45 }
 0x5c7   :  { %v3618_v26 = vadd.f32 %v3610_v28, %v3589_v20 }
 0x5c8   :  { %v3619_v61 = vadd.f32 %v3611_v23, %v3590_v42  ;;  %3725 = vmatprep.mubr.f32.mxu0 %v3646_v63 }
 0x5c9   :  { %v3647_v52 = vadd.f32 %v3639_v14, %v3618_v26  ;;  %3726 = vmatmul.mubr.f32.gmra.mrb[148].mxu0 %v3645_v35 }
 0x5ca   :  { %v3648_v34 = vadd.f32 %v3640_v10, %v3619_v61  ;;  %v13715_v10 = vrot.slane %v3859_v27, %v16556_v6 }
 0x5cc   :  { %3731 = vmatprep.mubr.f32.mxu0 %v3648_v34  ;;  %16648 = vst [vmem:[#allocation97_spill] sm:$0xff] %v13715_v10 }
 0x5cd   :  { %3732 = vmatmul.mubr.f32.gmra.mrb[150].mxu0 %v3647_v52 }
 0x694   :  { %v3715_v55 = vpop.f32.mrb[144].mxu0 }
 0x695   :  { %v3738_v53 = vsub.f32 %v3641_v56, %v3715_v55  ;;  %v3717_v18 = vpop.f32.mrb[145].mxu0 }
 0x696   :  { %v3739_v8 = vsub.f32 %v3642_v50, %v3717_v18 }
 0x697   :  { %v3746_v51 = vmul.f32 %v3738_v53, %v3738_v53 }
 0x698   :  { %v3747_v29 = vmul.f32 %v3739_v8, %v3739_v8  ;;  %v3721_v38 = vpop.f32.mrb[146].mxu0 }
 0x699   :  { %v3740_v62 = vsub.f32 %v3643_v11, %v3721_v38  ;;  %v3723_v47 = vpop.f32.mrb[147].mxu0  ;;  %v13718_v38 = vrot.slane %v3879_v59, %v16556_v6 }
 0x69a   :  { %v3741_v0 = vsub.f32 %v3644_v32, %v3723_v47  ;;  %3818 = vmatprep.mubr.f32.mxu1 %v3747_v29  ;;  %v13721_v47 = vrot.slane %v3859_v27, %v16558_v7 }
 0x69b   :  { %3819 = vmatmul.mubr.f32.vlgmr.msra.gmra.mrb[136].mxu1 %v3746_v51  ;;  %v3748_v41 = vmul.f32 %v3740_v62, %v3740_v62  ;;  %16649 = vst [vmem:[#allocation98_spill] sm:$0xff] %v13718_v38 }
 0x69c   :  { %v3749_v24 = vmul.f32 %v3741_v0, %v3741_v0  ;;  %v3727_v48 = vpop.f32.mrb[148].mxu0  ;;  %16650 = vst [vmem:[#allocation109_spill] sm:$0xff] %v13721_v47 }
 0x69d   :  { %v13692_v37 = vsub.f32 %v3645_v35, %v3727_v48  ;;  %v3729_v33 = vpop.f32.mrb[149].mxu0 }
 0x69e   :  { %v13694_v17 = vsub.f32 %v3646_v63, %v3729_v33  ;;  %3824 = vmatprep.mubr.f32.mxu1 %v3749_v24 }
 0x69f   :  { %3825 = vmatmul.mubr.f32.gmra.mrb[138].mxu1 %v3748_v41  ;;  %v3750_v11 = vmul.f32 %v13692_v37, %v13692_v37 }
 0x6a0   :  { %v3751_v56 = vmul.f32 %v13694_v17, %v13694_v17  ;;  %v3733_v50 = vpop.f32.mrb[150].mxu0 }
 0x6a1   :  { %v13700_v22 = vsub.f32 %v3647_v52, %v3733_v50  ;;  %v3735_v32 = vpop.f32.mrb[151].mxu0 }
 0x6a2   :  { %v13702_v12 = vsub.f32 %v3648_v34, %v3735_v32  ;;  %3830 = vmatprep.mubr.f32.mxu1 %v3751_v56 }
 0x6a3   :  { %3831 = vmatmul.mubr.f32.gmra.mrb[140].mxu1 %v3750_v11  ;;  %v3752_v16 = vmul.f32 %v13700_v22, %v13700_v22  ;;  %v13729_v11 = vrot.slane %v3879_v59, %v16558_v7 }
 0x6a4   :  { %v3753_v30 = vmul.f32 %v13702_v12, %v13702_v12 }
 0x6a5   :  { %16652 = vst [vmem:[#allocation111_spill] sm:$0xff] %v13729_v11 }
 0x6a6   :  { %3836 = vmatprep.mubr.f32.mxu1 %v3753_v30 }
 0x6a7   :  { %3837 = vmatmul.mubr.f32.gmra.mrb[142].mxu1 %v3752_v16 }
 0x76e   :  { %v3820_v25 = vpop.f32.mrb[136].mxu1 }
 0x76f   :  { %v3821_v44 = vadd.f32 1e-05, %v3820_v25  ;;  %v3822_v54 = vpop.f32.mrb[137].mxu1 }
 0x770   :  { %v3823_v3 = vadd.f32 1e-05, %v3822_v54 }
 0x771   :  { %10351 = vrsqrt.f32 %v3821_v44 }
 0x772   :  { %10353 = vrsqrt.f32 %v3823_v3  ;;  %v3826_v45 = vpop.f32.mrb[138].mxu1 }
 0x773   :  { %v3827_v28 = vadd.f32 1e-05, %v3826_v45  ;;  %v3828_v20 = vpop.f32.mrb[139].mxu1 }
 0x774   :  { %v3829_v35 = vadd.f32 1e-05, %v3828_v20 }
 0x775   :  { %10355 = vrsqrt.f32 %v3827_v28 }
 0x776   :  { %10357 = vrsqrt.f32 %v3829_v35  ;;  %v3832_v14 = vpop.f32.mrb[140].mxu1 }
 0x777   :  { %v3833_v23 = vadd.f32 1e-05, %v3832_v14  ;;  %v3834_v42 = vpop.f32.mrb[141].mxu1 }
 0x778   :  { %v3835_v63 = vadd.f32 1e-05, %v3834_v42 }
 0x779   :  { %10359 = vrsqrt.f32 %v3833_v23 }
 0x77a   :  { %10361 = vrsqrt.f32 %v3835_v63  ;;  %v3838_v26 = vpop.f32.mrb[142].mxu1 }
 0x77b   :  { %v10352_v61 = vpop.eup %10351  ;;  %v3839_v52 = vadd.f32 1e-05, %v3838_v26  ;;  %v3840_v34 = vpop.f32.mrb[143].mxu1 }
 0x77c   :  { %v10354_v55 = vpop.eup %10353  ;;  %v3851_v18 = vmul.f32 %v10352_v61, %v3738_v53  ;;  %v3841_v29 = vadd.f32 1e-05, %v3840_v34 }
 0x77d   :  { %v3852_v51 = vmul.f32 %v10354_v55, %v3739_v8  ;;  %10363 = vrsqrt.f32 %v3839_v52 }
 0x77e   :  { %v3871_v24 = vmul.f32 %v13715_v10, %v3851_v18  ;;  %10365 = vrsqrt.f32 %v3841_v29 }
 0x77f   :  { %v10356_v48 = vpop.eup %10355  ;;  %v3872_v53 = vmul.f32 %v13721_v47, %v3852_v51 }
 0x780   :  { %v10358_v41 = vpop.eup %10357  ;;  %v3853_v33 = vmul.f32 %v10356_v48, %v3740_v62  ;;  %v13725_v56 = vadd.f32 %v13718_v38, %v3871_v24 }
 0x781   :  { %v3854_v50 = vmul.f32 %v10358_v41, %v3741_v0  ;;  %v3892_v54 = vadd.f32 %v13729_v11, %v3872_v53 }
 0x782   :  { %16651 = vst [vmem:[#allocation110_spill] sm:$0xff] %v13725_v56  ;;  %v3873_v8 = vmul.f32 %v13715_v10, %v3853_v33  ;;  %v13733_v32 = vmul.f32 0.17677669, %v13725_v56 }
 0x783   :  { %v10360_v30 = vpop.eup %10359  ;;  %v3874_v16 = vmul.f32 %v13721_v47, %v3854_v50 }
 0x784   :  { %v10362_v25 = vpop.eup %10361  ;;  %v3855_v62 = vmul.f32 %v10360_v30, %v13692_v37  ;;  %3918 = vrot.lane.b32.xlu0 %v13733_v32, %s10588_s8  ;;  %v13740_v0 = vadd.f32 %v13718_v38, %v3873_v8  ;;  %v16654_v37 = vmov 0 }
 0x785   :  { %v3856_v44 = vmul.f32 %v10362_v25, %v13694_v17  ;;  %v3894_v3 = vadd.f32 %v13729_v11, %v3874_v16  ;;  %v16655_v37 = vsel %vm13751_vm2, 4294967295, %v16654_v37 }
 0x786   :  { %16653 = vst [vmem:[#allocation113_spill] sm:$0xff] %v13740_v0  ;;  %v3875_v45 = vmul.f32 %v13715_v10, %v3855_v62  ;;  %v13747_v28 = vmul.f32 0.17677669, %v13740_v0  ;;  %16656 = vst [vmem:[#allocation115_spill] sm:$0xff] %v16655_v37  ;;  %v14349_v37 = vld [vmem:[%s15940_s7 + $0xa4] ss:$8 sps:$4 sm:$0xff]  }
 0x787   :  { %v10364_v20 = vpop.eup %10363  ;;  %v9435_v35 = vpack.c.bf16 %v3894_v3, %v3892_v54  ;;  %v13755_v14 = vpack.i.bf16 %v3894_v3, %v3892_v54  ;;  %v3876_v42 = vmul.f32 %v13721_v47, %v3856_v44 }
 0x788   :  { %v10366_v17 = vpop.eup %10365  ;;  %v3857_v27 = vmul.f32 %v10364_v20, %v13700_v22  ;;  %3920 = vrot.lane.b32.xlu1 %v13747_v28, %s10588_s8  ;;  %v13761_v23 = vadd.f32 %v13718_v38, %v3875_v45 }
 0x789   :  { %v3858_v63 = vmul.f32 %v10366_v17, %v13702_v12  ;;  %9437 = vmatprep.subr.msk.bf16.mxu0 %vm13751_vm2, %v9435_v35  ;;  %v3896_v12 = vadd.f32 %v13729_v11, %v3876_v42 }
 0x78a   :  { %16657 = vst [vmem:[#allocation116_spill] sm:$0xff] %v13761_v23  ;;  %v3877_v59 = vmul.f32 %v13715_v10, %v3857_v27  ;;  %9440 = vmatpush3.bf16.xpose.msk.msra.mxu0 %vm13751_vm2, %v9435_v35  ;;  %v13771_v22 = vmul.f32 0.17677669, %v13761_v23 }
 0x78b   :  { %v3878_v26 = vmul.f32 %v13721_v47, %v3858_v63  ;;  %v14358_v47 = vld [vmem:[%s15940_s7 + $0xa0] ss:$8 sps:$4 sm:$0xff]  }
 0x78c   :  { %3922 = vrot.lane.b32.xlu0 %v13771_v22, %s10588_s8  ;;  %v13777_v61 = vadd.f32 %v13718_v38, %v3877_v59  ;;  %16781 = vst [vmem:[#allocation119_spill] sm:$0xff] %v14358_v47  ;;  %v14366_v38 = vld [vmem:[%s15940_s7 + $0xb4] ss:$8 sps:$4 sm:$0xff]  }
 0x78d   :  { %v3898_v52 = vadd.f32 %v13729_v11, %v3878_v26  ;;  %16783 = vst [vmem:[#allocation127_spill] sm:$0xff] %v14366_v38 }
 0x78e   :  { %16658 = vst [vmem:[#allocation123_spill] sm:$0xff] %v13777_v61  ;;  %v13782_v34 = vmul.f32 0.17677669, %v13777_v61 }
 0x78f   :  { %v9441_v55 = vpack.c.bf16 %v3898_v52, %v3896_v12  ;;  %v13784_v18 = vpack.i.bf16 %v3898_v52, %v3896_v12 }
 0x790   :  { %3924 = vrot.lane.b32.xlu1 %v13782_v34, %s10588_s8 }
 0x791   :  { %9443 = vmatprep.subr.msk.bf16.mxu0 %vm13751_vm2, %v9441_v55 }
 0x792   :  { %9446 = vmatpush3.bf16.xpose.msk.msra.mxu0 %vm13751_vm2, %v9441_v55 }
 0x7f6   :  { %v3919_v29 = vpop.permute.xlu0 %3918 }
 0x7f7   :  { %8843 = vmatprep.mubr.msk.f32.mxu0 %vm284_vm0, %v3919_v29 }
 0x7fa   :  { %v3921_v51 = vpop.permute.xlu1 %3920 }
 0x7fb   :  { %8844 = vmatmul.mubr.msk.f32.vlgmr.msra.gmra.mrb[152].mxu0 %vm284_vm0, %v3921_v51 }
 0x7fe   :  { %v3923_v24 = vpop.permute.xlu0 %3922 }
 0x7ff   :  { %8846 = vmatprep.mubr.msk.f32.mxu0 %vm284_vm0, %v3923_v24 }
 0x802   :  { %v3925_v48 = vpop.permute.xlu1 %3924 }
 0x803   :  { %8847 = vmatmul.mubr.msk.f32.gmra.mrb[154].mxu0 %vm284_vm0, %v3925_v48 }
 0x8ce   :  { %v8845_v41 = vpop.f32.mrb[152].mxu0 }
 0x8cf   :  { %v4012_v33 = vpop.f32.mrb[153].mxu0  ;;  %v4034_v53 = vsel %vm284_vm0, %v8845_v41, -inf }
 0x8d0   :  { %4035 = vmax.xlane.f32.xlu1 %v4034_v53  ;;  %v4031_v50 = vsel %vm284_vm0, %v4012_v33, -inf }
 0x8d1   :  { %4032 = vmax.xlane.f32.xlu0 %v4031_v50 }
 0x8d6   :  { %v8848_v8 = vpop.f32.mrb[154].mxu0 }
 0x8d7   :  { %v4022_v30 = vpop.f32.mrb[155].mxu0  ;;  %v4040_v25 = vsel %vm284_vm0, %v8848_v8, -inf }
 0x8d8   :  { %v4037_v16 = vsel %vm284_vm0, %v4022_v30, -inf }
 0x8d9   :  { %4038 = vmax.xlane.f32.xlu0 %v4037_v16 }
 0x8dd   :  { %4041 = vmax.xlane.f32.xlu0 %v4040_v25 }
 0x95d   :  { %v4036_v62 = vpop.xlane.xlu1 %4035 }
 0x95e   :  { %v4044_v44 = vsub.f32 %v8845_v41, %v4036_v62  ;;  %v4033_v54 = vpop.xlane.xlu0 %4032 }
 0x95f   :  { %v4043_v3 = vsub.f32 %v4012_v33, %v4033_v54 }
 0x960   :  { %v4049_v45 = vmul.f32 1.442695, %v4044_v44  ;;  %v4201_v44 = vld [vmem:[%s15943_s10 + $0x8] sm:$0xff] }
 0x961   :  { %v4047_v20 = vmul.f32 1.442695, %v4043_v3 }
 0x962   :  { %10367 = vpow2.f32 %v4049_v45 }
 0x963   :  { %10369 = vpow2.f32 %v4047_v20 }
 0x966   :  { %v4039_v35 = vpop.xlane.xlu0 %4038 }
 0x967   :  { %v4045_v17 = vsub.f32 %v4022_v30, %v4039_v35 }
 0x969   :  { %v4051_v27 = vmul.f32 1.442695, %v4045_v17  ;;  %v4202_v17 = vld [vmem:[%s15943_s10 + $0x10] sm:$0xff] }
 0x96a   :  { %v4042_v42 = vpop.xlane.xlu0 %4041 }
 0x96b   :  { %10371 = vpow2.f32 %v4051_v27  ;;  %v4046_v63 = vsub.f32 %v8848_v8, %v4042_v42  ;;  %v4203_v27 = vld [vmem:[%s15943_s10 + $0x18] sm:$0xff] }
 0x96c   :  { %v10368_v59 = vpop.eup %10367 }
 0x96d   :  { %v10370_v26 = vpop.eup %10369  ;;  %v4053_v12 = vmul.f32 1.442695, %v4046_v63  ;;  %v4058_v52 = vsel %vm284_vm0, %v10368_v59, 0.0 }
 0x96e   :  { %4059 = vadd.xlane.f32.xlu0 %v4058_v52  ;;  %v4055_v55 = vsel %vm284_vm0, %v10370_v26, 0.0 }
 0x96f   :  { %10373 = vpow2.f32 %v4053_v12  ;;  %4056 = vadd.xlane.f32.xlu1 %v4055_v55  ;;  %v13844_v12 = vpack.c.bf16 %v4203_v27, %v4202_v17  ;;  %v4589_v17 = vld [vmem:[%s15943_s10 + $0x30] sm:$0xff]  ;;  %v4590_v27 = vld [vmem:[%s15943_s10 + $0x38] sm:$0xff] }
 0x971   :  { %16660 = vst [vmem:[#allocation125_spill] sm:$0xff] %v13844_v12 }
 0x975   :  { %v10372_v29 = vpop.eup %10371 }
 0x976   :  { %v4061_v51 = vsel %vm284_vm0, %v10372_v29, 0.0 }
 0x977   :  { %4062 = vadd.xlane.f32.xlu1 %v4061_v51 }
 0x979   :  { %v10374_v24 = vpop.eup %10373 }
 0x97a   :  { %v4064_v48 = vsel %vm284_vm0, %v10374_v24, 0.0 }
 0x97b   :  { %4065 = vadd.xlane.f32.xlu0 %v4064_v48 }
 0x988   :  { %10180 = vrot.lane.b32.xlu1 %v13755_v14, %s10588_s8 }
 0x98c   :  { %4091 = vrot.lane.b32.xlu1 %v13725_v56, %s10588_s8 }
 0x990   :  { %10190 = vrot.lane.b32.xlu1 %v13755_v14, %s10585_s19 }
 0x991   :  { %10185 = vrot.lane.b32.xlu0 %v13784_v18, %s10588_s8 }
 0x994   :  { %10195 = vrot.lane.b32.xlu1 %v13784_v18, %s10585_s19 }
 0x995   :  { %4093 = vrot.lane.b32.xlu0 %v13740_v0, %s10588_s8 }
 0x998   :  { %4097 = vrot.lane.b32.xlu1 %v13777_v61, %s10588_s8 }
 0x999   :  { %4095 = vrot.lane.b32.xlu0 %v13761_v23, %s10588_s8 }
 0x99c   :  { %4307 = vrot.lane.b32.xlu1 %v13747_v28, %s10587_s1 }
 0x99d   :  { %4305 = vrot.lane.b32.xlu0 %v13733_v32, %s10587_s1 }
 0x9a0   :  { %4311 = vrot.lane.b32.xlu1 %v13782_v34, %s10587_s1 }
 0x9a1   :  { %4309 = vrot.lane.b32.xlu0 %v13771_v22, %s10587_s1  ;;  %v4200_v22 = vld [vmem:[%s15943_s10] sm:$0xff] }
 0x9a2   :  { %v13835_v20 = vpack.c.bf16 %v4201_v44, %v4200_v22 }
 0x9a4   :  { %16659 = vst [vmem:[#allocation143_spill] sm:$0xff] %v13835_v20 }
 0x9fb   :  { %v4060_v33 = vpop.xlane.xlu0 %4059 }
 0x9fc   :  { %v4057_v41 = vpop.xlane.xlu1 %4056 }
 0x9fd   :  { %10375 = vrcp.f32 %v4057_v41 }
 0x9fe   :  { %10377 = vrcp.f32 %v4060_v33 }
 0xa04   :  { %v4063_v53 = vpop.xlane.xlu1 %4062 }
 0xa05   :  { %10379 = vrcp.f32 %v4063_v53 }
 0xa07   :  { %v10376_v50 = vpop.eup %10375 }
 0xa08   :  { %v4066_v8 = vpop.xlane.xlu0 %4065  ;;  %v10181_v30 = vpop.permute.xlu1 %10180  ;;  %v4071_v16 = vmul.f32 %v10376_v50, %v10370_v26 }
 0xa09   :  { %v10183_v28 = vunpack.i.h.bf16 %v10181_v30  ;;  %v10182_v25 = vunpack.i.l.bf16 %v10181_v30  ;;  %10381 = vrcp.f32 %v4066_v8  ;;  %v10378_v35 = vpop.eup %10377 }
 0xa0a   :  { %8857 = vmatprep.mubr.msk.f32.mxu0 %vm284_vm0, %v4071_v16  ;;  %v4072_v26 = vmul.f32 %v10378_v35, %v10368_v59 }
 0xa0b   :  { %v9447_v32 = vpack.c.bf16 %v10183_v28, %v10182_v25 }
 0xa0c   :  { %v10186_v34 = vpop.permute.xlu0 %10185  ;;  %v4092_v62 = vpop.permute.xlu1 %4091 }
 0xa0d   :  { %v10188_v54 = vunpack.i.h.bf16 %v10186_v34  ;;  %v10187_v3 = vunpack.i.l.bf16 %v10186_v34  ;;  %9448 = vmatprep.subr.bf16.mxu0 %v9447_v32 }
 0xa0e   :  { %9450 = vmatpush3.bf16.msra.mxu0 %v9447_v32 }
 0xa0f   :  { %v9451_v45 = vpack.c.bf16 %v10188_v54, %v10187_v3  ;;  %v10380_v42 = vpop.eup %10379  ;;  %v4588_v3 = vld [vmem:[%s15943_s10 + $0x28] sm:$0xff] }
 0xa10   :  { %v10191_v63 = vpop.permute.xlu1 %10190  ;;  %v4073_v55 = vmul.f32 %v10380_v42, %v10372_v29  ;;  %v4094_v59 = vpop.permute.xlu0 %4093 }
 0xa11   :  { %9452 = vmatprep.subr.bf16.mxu0 %v9451_v45  ;;  %v10193_v51 = vunpack.i.h.bf16 %v10191_v63  ;;  %v10192_v48 = vunpack.i.l.bf16 %v10191_v63  ;;  %v13880_v63 = vpack.c.bf16 %v4590_v27, %v4589_v17 }
 0xa12   :  { %9454 = vmatpush3.bf16.msra.mxu0 %v9451_v45 }
 0xa13   :  { %9456 = vmatprep.subr.bf16.mxu0 %v13835_v20  ;;  %v10382_v52 = vpop.eup %10381  ;;  %v9463_v33 = vpack.c.bf16 %v10193_v51, %v10192_v48  ;;  %16662 = vst [vmem:[#allocation117_spill] sm:$0xff] %v13880_v63 }
 0xa14   :  { %v4074_v41 = vmul.f32 %v10382_v52, %v10374_v24  ;;  %v10196_v29 = vpop.permute.xlu1 %10195  ;;  %v4096_v28 = vpop.permute.xlu0 %4095 }
 0xa15   :  { %8858 = vmatmul.mubr.msk.f32.vlgmr.msra.gmra.mrb[156].mxu0 %vm284_vm0, %v4072_v26  ;;  %v10198_v50 = vunpack.i.h.bf16 %v10196_v29  ;;  %v10197_v8 = vunpack.i.l.bf16 %v10196_v29 }
 0xa16   :  { %8860 = vmatprep.mubr.msk.f32.mxu0 %vm284_vm0, %v4073_v55  ;;  %9458 = vmatpush3.bf16.msra.mxu0 %v13835_v20  ;;  %v16663_v55 = vld [vmem:[#allocation101_spill] sm:$0xff]  ;;  %v14335_v20 = vld [vmem:[%s15940_s7 + $0x94] ss:$8 sps:$4 sm:$0xff]  }
 0xa17   :  { %9460 = vmatprep.subr.bf16.mxu0 %v13844_v12  ;;  %v9469_v32 = vpack.c.bf16 %v10198_v50, %v10197_v8 }
 0xa18   :  { %v4098_v22 = vpop.permute.xlu1 %4097  ;;  %v4306_v45 = vpop.permute.xlu0 %4305 }
 0xa19   :  { %8861 = vmatmul.mubr.msk.f32.gmra.mrb[158].mxu0 %vm284_vm0, %v4074_v41 }
 0xa1a   :  { %9462 = vmatpush3.bf16.msra.mxu0 %v13844_v12  ;;  %v14322_v12 = vld [vmem:[%s15940_s7 + $0x80] ss:$8 sps:$4 sm:$0xff]  }
 0xa1b   :  { %9465 = vmatprep.subr.msk.bf16.mxu0 %vm13751_vm2, %v9463_v33 }
 0xa1c   :  { %v4308_v42 = vpop.permute.xlu1 %4307  ;;  %v4310_v26 = vpop.permute.xlu0 %4309 }
 0xa20   :  { %v4312_v52 = vpop.permute.xlu1 %4311 }
 0xae8   :  { %v8859_v53 = vpop.f32.mrb[156].mxu0 }
 0xae9   :  { %v4181_v30 = vpop.f32.mrb[157].mxu0  ;;  %v4187_v25 = vadd.f32 %v8859_v53, %v4094_v59 }
 0xaea   :  { %v4182_v16 = vadd.f32 %v4181_v30, %v4092_v62  ;;  %v4587_v62 = vld [vmem:[%s15943_s10 + $0x20] sm:$0xff] }
 0xaeb   :  { %v13869_v35 = vpack.c.bf16 %v4588_v3, %v4587_v62 }
 0xaec   :  { %v8862_v24 = vpop.f32.mrb[158].mxu0  ;;  %8871 = vmatprep.mubr.msk.f32.mxu0 %vm284_vm0, %v4182_v16 }
 0xaed   :  { %v4191_v34 = vpop.f32.mrb[159].mxu0  ;;  %8872 = vmatmul.mubr.msk.f32.vlgmr.msra.gmra.mrb[160].mxu0 %vm284_vm0, %v4187_v25  ;;  %v4197_v54 = vadd.f32 %v8862_v24, %v4098_v22  ;;  %16661 = vst [vmem:[#allocation145_spill] sm:$0xff] %v13869_v35 }
 0xaee   :  { %v4192_v44 = vadd.f32 %v4191_v34, %v4096_v28  ;;  %9468 = vmatpush3.bf16.xpose.msk.msra.mxu0 %vm13751_vm2, %v9463_v33 }
 0xaef   :  { %9471 = vmatprep.subr.msk.bf16.mxu0 %vm13751_vm2, %v9469_v32 }
 0xaf0   :  { %8874 = vmatprep.mubr.msk.f32.mxu0 %vm284_vm0, %v4192_v44 }
 0xaf1   :  { %8875 = vmatmul.mubr.msk.f32.gmra.mrb[162].mxu0 %vm284_vm0, %v4197_v54 }
 0xaf2   :  { %8885 = vmatprep.mubr.msk.f32.mxu0 %vm284_vm0, %v4306_v45 }
 0xaf6   :  { %9474 = vmatpush3.bf16.xpose.msk.msra.mxu0 %vm13751_vm2, %v9469_v32 }
 0xaf7   :  { %9484 = vmatprep.subr.bf16.mxu0 %v13869_v35 }
 0xafd   :  { %8886 = vmatmul.mubr.msk.f32.vlgmr.msra.gmra.mrb[164].mxu0 %vm284_vm0, %v4308_v42 }
 0xafe   :  { %8888 = vmatprep.mubr.msk.f32.mxu0 %vm284_vm0, %v4310_v26  ;;  %9486 = vmatpush3.bf16.msra.mxu0 %v13869_v35  ;;  %v14228_v35 = vld [vmem:[%s15940_s7 + $0x40] ss:$8 sps:$4 sm:$0xff]  }
 0xaff   :  { %9488 = vmatprep.subr.bf16.mxu0 %v13880_v63 }
 0xb01   :  { %8889 = vmatmul.mubr.msk.f32.gmra.mrb[166].mxu0 %vm284_vm0, %v4312_v52 }
 0xb02   :  { %9490 = vmatpush3.bf16.msra.mxu0 %v13880_v63 }
 0xb03   :  { %9524 = vmatprep.subr.bf16.mxu0 %v16663_v55 }
 0xbd0   :  { %v8887_v51 = vpop.f32.mrb[164].mxu0 }
 0xbd1   :  { %v4403_v48 = vpop.f32.mrb[165].mxu0  ;;  %v4425_v41 = vsel %vm284_vm0, %v8887_v51, -inf }
 0xbd2   :  { %4426 = vmax.xlane.f32.xlu1 %v4425_v41  ;;  %v4422_v33 = vsel %vm284_vm0, %v4403_v48, -inf }
 0xbd3   :  { %4423 = vmax.xlane.f32.xlu0 %v4422_v33 }
 0xbd4   :  { %v8890_v59 = vpop.f32.mrb[166].mxu0 }
 0xbd5   :  { %v4413_v29 = vpop.f32.mrb[167].mxu0  ;;  %v4431_v50 = vsel %vm284_vm0, %v8890_v59, -inf }
 0xbd6   :  { %v4428_v53 = vsel %vm284_vm0, %v4413_v29, -inf }
 0xbd7   :  { %4429 = vmax.xlane.f32.xlu0 %v4428_v53 }
 0xbdb   :  { %4432 = vmax.xlane.f32.xlu0 %v4431_v50 }
 0xc5f   :  { %v4427_v8 = vpop.xlane.xlu1 %4426 }
 0xc60   :  { %v4435_v30 = vsub.f32 %v8887_v51, %v4427_v8  ;;  %v4424_v16 = vpop.xlane.xlu0 %4423 }
 0xc61   :  { %v4434_v28 = vsub.f32 %v4403_v48, %v4424_v16 }
 0xc62   :  { %v4440_v25 = vmul.f32 1.442695, %v4435_v30 }
 0xc63   :  { %v4438_v24 = vmul.f32 1.442695, %v4434_v28 }
 0xc64   :  { %10383 = vpow2.f32 %v4440_v25  ;;  %v4430_v54 = vpop.xlane.xlu0 %4429 }
 0xc65   :  { %10385 = vpow2.f32 %v4438_v24  ;;  %v4436_v45 = vsub.f32 %v4413_v29, %v4430_v54  ;;  %v16664_v24 = vld [vmem:[#allocation99_spill] sm:$0xff]  ;;  %v16667_v54 = vld [vmem:[#allocation114_spill] sm:$0xff] }
 0xc67   :  { %v4442_v27 = vmul.f32 1.442695, %v4436_v45  ;;  %v16671_v45 = vld [vmem:[#allocation126_spill] sm:$0xff] }
 0xc68   :  { %v4433_v62 = vpop.xlane.xlu0 %4432 }
 0xc69   :  { %v4437_v3 = vsub.f32 %v8890_v59, %v4433_v62  ;;  %v16668_v62 = vld [vmem:[#allocation112_spill] sm:$0xff] }
 0xc6b   :  { %v4444_v17 = vmul.f32 1.442695, %v4437_v3  ;;  %v16669_v3 = vld [vmem:[#allocation120_spill] sm:$0xff] }
 0xc6d   :  { %10387 = vpow2.f32 %v4444_v17  ;;  %v16673_v17 = vld [vmem:[#allocation136_spill] sm:$0xff] }
 0xc6e   :  { %v10384_v32 = vpop.eup %10383  ;;  %10389 = vpow2.f32 %v4442_v27  ;;  %v16674_v27 = vld [vmem:[#allocation134_spill] sm:$0xff] }
 0xc6f   :  { %v10386_v34 = vpop.eup %10385  ;;  %v4449_v22 = vsel %vm284_vm0, %v10384_v32, 0.0 }
 0xc70   :  { %4450 = vadd.xlane.f32.xlu0 %v4449_v22  ;;  %v4446_v44 = vsel %vm284_vm0, %v10386_v34, 0.0  ;;  %v16665_v22 = vld [vmem:[#allocation108_spill] sm:$0xff] }
 0xc71   :  { %4447 = vadd.xlane.f32.xlu1 %v4446_v44  ;;  %v16666_v44 = vld [vmem:[#allocation106_spill] sm:$0xff] }
 0xc77   :  { %v10388_v42 = vpop.eup %10387 }
 0xc78   :  { %v10390_v26 = vpop.eup %10389  ;;  %v4455_v52 = vsel %vm284_vm0, %v10388_v42, 0.0 }
 0xc79   :  { %v4452_v51 = vsel %vm284_vm0, %v10390_v26, 0.0 }
 0xc82   :  { %10200 = vrot.lane.b32.xlu1 %v13755_v14, %s10587_s1 }
 0xc86   :  { %10205 = vrot.lane.b32.xlu0 %v13784_v18, %s10587_s1 }
 0xca5   :  { %4456 = vadd.xlane.f32.xlu0 %v4455_v52  ;;  %v16675_v52 = vld [vmem:[#allocation148_spill] sm:$0xff] }
 0xca6   :  { %4453 = vadd.xlane.f32.xlu1 %v4452_v51  ;;  %v16676_v51 = vld [vmem:[#allocation144_spill] sm:$0xff] }
 0xcb7   :  { %4478 = vrot.lane.b32.xlu1 %v13725_v56, %s10587_s1  ;;  %v14308_v56 = vld [vmem:[%s15940_s7 + $0x84] ss:$8 sps:$4 sm:$0xff]  }
 0xcbb   :  { %4482 = vrot.lane.b32.xlu1 %v13761_v23, %s10587_s1  ;;  %4480 = vrot.lane.b32.xlu0 %v13740_v0, %s10587_s1  ;;  %v14234_v23 = vld [vmem:[%s15940_s7 + $0x54] ss:$8 sps:$4 sm:$0xff]   ;;  %v14294_v0 = vld [vmem:[%s15940_s7 + $0x70] ss:$8 sps:$4 sm:$0xff]  }
 0xcbf   :  { %4484 = vrot.lane.b32.xlu1 %v13777_v61, %s10587_s1 }
 0xcfd   :  { %v4451_v14 = vpop.xlane.xlu0 %4450 }
 0xcfe   :  { %v4448_v18 = vpop.xlane.xlu1 %4447 }
 0xcff   :  { %10391 = vrcp.f32 %v4448_v18  ;;  %v16678_v18 = vld [vmem:[#allocation156_spill] sm:$0xff] }
 0xd00   :  { %10393 = vrcp.f32 %v4451_v14  ;;  %v16677_v14 = vld [vmem:[#allocation158_spill] sm:$0xff] }
 0xd01   :  { %v10206_v48 = vpop.permute.xlu0 %10205 }
 0xd02   :  { %v10201_v41 = vpop.permute.xlu1 %10200  ;;  %v10208_v33 = vunpack.i.h.bf16 %v10206_v48  ;;  %v10207_v59 = vunpack.i.l.bf16 %v10206_v48 }
 0xd03   :  { %v10203_v29 = vunpack.i.h.bf16 %v10201_v41  ;;  %v10202_v53 = vunpack.i.l.bf16 %v10201_v41 }
 0xd04   :  { %v9479_v8 = vpack.c.bf16 %v10208_v33, %v10207_v59 }
 0xd05   :  { %v9475_v50 = vpack.c.bf16 %v10203_v29, %v10202_v53 }
 0xd07   :  { %9476 = vmatprep.subr.bf16.mxu1 %v9475_v50 }
 0xd08   :  { %9478 = vmatpush3.bf16.msra.mxu1 %v9475_v50  ;;  %v16679_v50 = vmov 0.0  }
 0xd09   :  { %v10392_v30 = vpop.eup %10391  ;;  %9480 = vmatprep.subr.bf16.mxu1 %v9479_v8 }
 0xd0a   :  { %v10394_v16 = vpop.eup %10393  ;;  %v4462_v28 = vmul.f32 %v10392_v30, %v10386_v34  ;;  %v16670_v34 = vld [vmem:[#allocation118_spill] sm:$0xff] }
 0xd0b   :  { %v4463_v25 = vmul.f32 %v10394_v16, %v10384_v32  ;;  %v16672_v32 = vld [vmem:[#allocation124_spill] sm:$0xff] }
 0xd0c   :  { %9482 = vmatpush3.bf16.msra.mxu1 %v9479_v8  ;;  %8899 = vmatprep.mubr.msk.f32.mxu1 %vm284_vm0, %v4462_v28  ;;  %v16680_v8 = vld [vmem:[#allocation7_spill] sm:$0xff] }
 0xd0d   :  { %9492 = vmatprep.subr.bf16.mxu1 %v16663_v55  ;;  %v16681_v30 = vunpack.c.l.bf16 %v16680_v8  ;;  %v16682_v16 = vunpack.c.h.bf16 %v16680_v8 }
 0xd0f   :  { %8900 = vmatmul.mubr.msk.f32.vlgmr.msra.gmra.mrb[144].mxu1 %vm284_vm0, %v4463_v25  ;;  %v16686_v25 = vld [vmem:[#allocation13_spill] sm:$0xff] }
 0xd10   :  { %9494 = vmatpush1.bf16.msra.mxu1 %v16664_v24 }
 0xd11   :  { %9496 = vmatprep.subr.bf16.mxu1 %v16665_v22 }
 0xd14   :  { %9498 = vmatpush1.bf16.msra.mxu1 %v16666_v44 }
 0xd15   :  { %9500 = vmatprep.subr.bf16.mxu1 %v16667_v54 }
 0xd18   :  { %9502 = vmatpush1.bf16.msra.mxu1 %v16668_v62 }
 0xd19   :  { %9504 = vmatprep.subr.bf16.mxu1 %v16669_v3 }
 0xd1c   :  { %9506 = vmatpush1.bf16.msra.mxu1 %v16670_v34 }
 0xd1d   :  { %9508 = vmatprep.subr.bf16.mxu1 %v16671_v45 }
 0xd20   :  { %9510 = vmatpush1.bf16.msra.mxu1 %v16672_v32 }
 0xd21   :  { %9512 = vmatprep.subr.bf16.mxu1 %v16673_v17 }
 0xd24   :  { %9514 = vmatpush1.bf16.msra.mxu1 %v16674_v27 }
 0xd25   :  { %9516 = vmatprep.subr.bf16.mxu1 %v16675_v52 }
 0xd28   :  { %9518 = vmatpush1.bf16.msra.mxu1 %v16676_v51 }
 0xd29   :  { %9520 = vmatprep.subr.bf16.mxu1 %v16677_v14 }
 0xd2c   :  { %9522 = vmatpush1.bf16.msra.mxu1 %v16678_v18 }
 0xd2d   :  { %9556 = vmatprep.subr.bf16.mxu1 %v16663_v55 }
 0xd32   :  { %v4457_v48 = vpop.xlane.xlu0 %4456 }
 0xd33   :  { %10395 = vrcp.f32 %v4457_v48  ;;  %v4454_v41 = vpop.xlane.xlu1 %4453  ;;  %v16687_v48 = vunpack.c.l.bf16 %v16686_v25 }
 0xd34   :  { %10397 = vrcp.f32 %v4454_v41  ;;  %v16688_v41 = vunpack.c.h.bf16 %v16686_v25 }
 0xd3d   :  { %v10396_v33 = vpop.eup %10395 }
 0xd3e   :  { %v10398_v59 = vpop.eup %10397  ;;  %v4465_v53 = vmul.f32 %v10396_v33, %v10388_v42  ;;  %v16683_v42 = vld [vmem:[#allocation8_spill] sm:$0xff]  ;;  %v16689_v33 = vld [vmem:[#allocation14_spill] sm:$0xff] }
 0xd3f   :  { %v4464_v29 = vmul.f32 %v10398_v59, %v10390_v26  ;;  %v16684_v26 = vunpack.c.l.bf16 %v16683_v42  ;;  %v16685_v28 = vunpack.c.h.bf16 %v16683_v42  ;;  %v16690_v59 = vunpack.c.l.bf16 %v16689_v33 }
 0xd41   :  { %8902 = vmatprep.mubr.msk.f32.mxu1 %vm284_vm0, %v4464_v29  ;;  %v16691_v29 = vunpack.c.h.bf16 %v16689_v33 }
 0xd42   :  { %8903 = vmatmul.mubr.msk.f32.gmra.mrb[146].mxu1 %vm284_vm0, %v4465_v53  ;;  %v16692_v53 = vld [vmem:[#allocation15_spill] sm:$0xff] }
 0xd43   :  { %4756 = vmatprep.mubr.f32.mxu1 %v16679_v50  ;;  %v16693_v8 = vunpack.c.l.bf16 %v16692_v53 }
 0xd46   :  { %4757 = vmatmul.mubr.f32.vlgmr.msra.gmra.mrb[148].mxu1 %v16681_v30  ;;  %v16694_v30 = vunpack.c.h.bf16 %v16692_v53 }
 0xd47   :  { %9558 = vmatpush1.bf16.msra.mxu1 %v16664_v24  ;;  %4762 = vmatprep.mubr.f32.mxu1 %v16679_v50 }
 0xd48   :  { %9560 = vmatprep.subr.bf16.mxu1 %v16665_v22 }
 0xd4a   :  { %4763 = vmatmul.mubr.f32.gmra.mrb[150].mxu1 %v16682_v16  ;;  %v16695_v16 = vld [vmem:[#allocation16_spill] sm:$0xff] }
 0xd4b   :  { %9562 = vmatpush1.bf16.msra.mxu1 %v16666_v44  ;;  %4768 = vmatprep.mubr.f32.mxu1 %v16679_v50  ;;  %v16696_v42 = vunpack.c.l.bf16 %v16695_v16 }
 0xd4c   :  { %9564 = vmatprep.subr.bf16.mxu1 %v16667_v54 }
 0xd4e   :  { %4769 = vmatmul.mubr.f32.gmra.mrb[152].mxu1 %v16684_v26  ;;  %v16697_v26 = vunpack.c.h.bf16 %v16695_v16 }
 0xd4f   :  { %9566 = vmatpush1.bf16.msra.mxu1 %v16668_v62  ;;  %4774 = vmatprep.mubr.f32.mxu1 %v16679_v50 }
 0xd50   :  { %9568 = vmatprep.subr.bf16.mxu1 %v16669_v3 }
 0xd52   :  { %4775 = vmatmul.mubr.f32.gmra.mrb[154].mxu1 %v16685_v28  ;;  %v16698_v28 = vld [vmem:[#allocation23_spill] sm:$0xff] }
 0xd53   :  { %9570 = vmatpush1.bf16.msra.mxu1 %v16670_v34  ;;  %4780 = vmatprep.mubr.f32.mxu1 %v16679_v50  ;;  %v16699_v25 = vunpack.c.l.bf16 %v16698_v28 }
 0xd54   :  { %9572 = vmatprep.subr.bf16.mxu1 %v16671_v45 }
 0xd56   :  { %4781 = vmatmul.mubr.f32.gmra.mrb[156].mxu1 %v16687_v48  ;;  %v16700_v48 = vunpack.c.h.bf16 %v16698_v28 }
 0xd57   :  { %9574 = vmatpush1.bf16.msra.mxu1 %v16672_v32  ;;  %4786 = vmatprep.mubr.f32.mxu1 %v16679_v50 }
 0xd58   :  { %9576 = vmatprep.subr.bf16.mxu1 %v16673_v17 }
 0xd5a   :  { %4787 = vmatmul.mubr.f32.gmra.mrb[158].mxu1 %v16688_v41  ;;  %v16701_v41 = vld [vmem:[#allocation24_spill] sm:$0xff] }
 0xd5b   :  { %9578 = vmatpush1.bf16.msra.mxu1 %v16674_v27  ;;  %4792 = vmatprep.mubr.f32.mxu1 %v16679_v50  ;;  %v16702_v33 = vunpack.c.l.bf16 %v16701_v41 }
 0xd5c   :  { %9580 = vmatprep.subr.bf16.mxu1 %v16675_v52 }
 0xd5e   :  { %4793 = vmatmul.mubr.f32.gmra.mrb[160].mxu1 %v16690_v59  ;;  %v16703_v59 = vunpack.c.h.bf16 %v16701_v41 }
 0xd5f   :  { %9582 = vmatpush1.bf16.msra.mxu1 %v16676_v51  ;;  %4798 = vmatprep.mubr.f32.mxu1 %v16679_v50 }
 0xd60   :  { %9584 = vmatprep.subr.bf16.mxu1 %v16677_v14 }
 0xd62   :  { %4799 = vmatmul.mubr.f32.gmra.mrb[162].mxu1 %v16691_v29  ;;  %v16704_v29 = vld [vmem:[#allocation25_spill] sm:$0xff] }
 0xd63   :  { %9586 = vmatpush1.bf16.msra.mxu1 %v16678_v18  ;;  %4804 = vmatprep.mubr.f32.mxu1 %v16679_v50  ;;  %v16705_v53 = vunpack.c.l.bf16 %v16704_v29 }
 0xd64   :  { %9620 = vmatprep.subr.bf16.mxu1 %v16663_v55 }
 0xd66   :  { %4805 = vmatmul.mubr.f32.gmra.mrb[164].mxu1 %v16693_v8  ;;  %v16706_v8 = vunpack.c.h.bf16 %v16704_v29 }
 0xd67   :  { %4810 = vmatprep.mubr.f32.mxu1 %v16679_v50 }
 0xd6a   :  { %4811 = vmatmul.mubr.f32.gmra.mrb[166].mxu1 %v16694_v30  ;;  %v16707_v30 = vld [vmem:[#allocation26_spill] sm:$0xff] }
 0xd6b   :  { %4816 = vmatprep.mubr.f32.mxu1 %v16679_v50  ;;  %v16708_v16 = vunpack.c.l.bf16 %v16707_v30 }
 0xd6e   :  { %4817 = vmatmul.mubr.f32.gmra.mrb[168].mxu1 %v16696_v42  ;;  %v16709_v42 = vunpack.c.h.bf16 %v16707_v30 }
 0xd6f   :  { %4822 = vmatprep.mubr.f32.mxu1 %v16679_v50 }
 0xd72   :  { %4823 = vmatmul.mubr.f32.gmra.mrb[170].mxu1 %v16697_v26  ;;  %v16710_v26 = vld [vmem:[#allocation27_spill] sm:$0xff] }
 0xd73   :  { %5126 = vmatprep.mubr.f32.mxu1 %v16679_v50  ;;  %v16711_v28 = vunpack.c.l.bf16 %v16710_v26 }
 0xd76   :  { %5127 = vmatmul.mubr.f32.vlgmr.msra.gmra.mrb[172].mxu1 %v16699_v25  ;;  %v16712_v25 = vunpack.c.h.bf16 %v16710_v26 }
 0xd77   :  { %9622 = vmatpush1.bf16.msra.mxu1 %v16664_v24  ;;  %5132 = vmatprep.mubr.f32.mxu1 %v16679_v50 }
 0xd78   :  { %9624 = vmatprep.subr.bf16.mxu1 %v16665_v22 }
 0xd7a   :  { %5133 = vmatmul.mubr.f32.gmra.mrb[174].mxu1 %v16700_v48  ;;  %v16713_v48 = vld [vmem:[#allocation28_spill] sm:$0xff] }
 0xd7b   :  { %9626 = vmatpush1.bf16.msra.mxu1 %v16666_v44  ;;  %5138 = vmatprep.mubr.f32.mxu1 %v16679_v50  ;;  %v16714_v41 = vunpack.c.l.bf16 %v16713_v48 }
 0xd7c   :  { %9628 = vmatprep.subr.bf16.mxu1 %v16667_v54 }
 0xd7e   :  { %5139 = vmatmul.mubr.f32.gmra.mrb[176].mxu1 %v16702_v33  ;;  %v16715_v33 = vunpack.c.h.bf16 %v16713_v48 }
 0xd7f   :  { %9630 = vmatpush1.bf16.msra.mxu1 %v16668_v62  ;;  %5144 = vmatprep.mubr.f32.mxu1 %v16679_v50 }
 0xd80   :  { %9632 = vmatprep.subr.bf16.mxu1 %v16669_v3 }
 0xd82   :  { %5145 = vmatmul.mubr.f32.gmra.mrb[178].mxu1 %v16703_v59  ;;  %v16716_v59 = vld [vmem:[#allocation29_spill] sm:$0xff] }
 0xd83   :  { %9634 = vmatpush1.bf16.msra.mxu1 %v16670_v34  ;;  %5150 = vmatprep.mubr.f32.mxu1 %v16679_v50  ;;  %v16717_v29 = vunpack.c.l.bf16 %v16716_v59 }
 0xd84   :  { %9636 = vmatprep.subr.bf16.mxu1 %v16671_v45 }
 0xd86   :  { %5151 = vmatmul.mubr.f32.gmra.mrb[180].mxu1 %v16705_v53  ;;  %v16718_v53 = vunpack.c.h.bf16 %v16716_v59 }
 0xd87   :  { %9638 = vmatpush1.bf16.msra.mxu1 %v16672_v32  ;;  %5156 = vmatprep.mubr.f32.mxu1 %v16679_v50 }
 0xd88   :  { %9640 = vmatprep.subr.bf16.mxu1 %v16673_v17 }
 0xd8a   :  { %5157 = vmatmul.mubr.f32.gmra.mrb[182].mxu1 %v16706_v8  ;;  %v16719_v8 = vld [vmem:[#allocation30_spill] sm:$0xff] }
 0xd8b   :  { %9642 = vmatpush1.bf16.msra.mxu1 %v16674_v27  ;;  %5162 = vmatprep.mubr.f32.mxu1 %v16679_v50  ;;  %v16720_v30 = vunpack.c.l.bf16 %v16719_v8 }
 0xd8c   :  { %9644 = vmatprep.subr.bf16.mxu1 %v16675_v52 }
 0xd8e   :  { %5163 = vmatmul.mubr.f32.gmra.mrb[184].mxu1 %v16708_v16  ;;  %v16721_v16 = vunpack.c.h.bf16 %v16719_v8 }
 0xd8f   :  { %9646 = vmatpush1.bf16.msra.mxu1 %v16676_v51  ;;  %5168 = vmatprep.mubr.f32.mxu1 %v16679_v50 }
 0xd90   :  { %9648 = vmatprep.subr.bf16.mxu1 %v16677_v14 }
 0xd92   :  { %5169 = vmatmul.mubr.f32.gmra.mrb[186].mxu1 %v16709_v42  ;;  %v16722_v42 = vld [vmem:[#allocation31_spill] sm:$0xff] }
 0xd93   :  { %9650 = vmatpush1.bf16.msra.mxu1 %v16678_v18  ;;  %5174 = vmatprep.mubr.f32.mxu1 %v16679_v50  ;;  %v16723_v26 = vunpack.c.l.bf16 %v16722_v42 }
 0xd94   :  { %9684 = vmatprep.subr.bf16.mxu1 %v16663_v55 }
 0xd96   :  { %5175 = vmatmul.mubr.f32.gmra.mrb[188].mxu1 %v16711_v28  ;;  %v16724_v28 = vunpack.c.h.bf16 %v16722_v42 }
 0xd97   :  { %5180 = vmatprep.mubr.f32.mxu1 %v16679_v50 }
 0xd9a   :  { %5181 = vmatmul.mubr.f32.gmra.mrb[190].mxu1 %v16712_v25  ;;  %v16725_v25 = vld [vmem:[#allocation32_spill] sm:$0xff] }
 0xd9b   :  { %5186 = vmatprep.mubr.f32.mxu1 %v16679_v50  ;;  %v16726_v48 = vunpack.c.l.bf16 %v16725_v25 }
 0xd9e   :  { %5187 = vmatmul.mubr.f32.gmra.mrb[192].mxu1 %v16714_v41  ;;  %v16727_v41 = vunpack.c.h.bf16 %v16725_v25 }
 0xd9f   :  { %5192 = vmatprep.mubr.f32.mxu1 %v16679_v50 }
 0xda2   :  { %5193 = vmatmul.mubr.f32.gmra.mrb[194].mxu1 %v16715_v33  ;;  %v16728_v33 = vld [vmem:[#allocation33_spill] sm:$0xff] }
 0xda3   :  { %5496 = vmatprep.mubr.f32.mxu1 %v16679_v50  ;;  %v16729_v59 = vunpack.c.l.bf16 %v16728_v33 }
 0xda6   :  { %5497 = vmatmul.mubr.f32.vlgmr.msra.gmra.mrb[196].mxu1 %v16717_v29  ;;  %v16730_v29 = vunpack.c.h.bf16 %v16728_v33  ;;  %v4479_v33 = vpop.permute.xlu1 %4478 }
 0xda7   :  { %9686 = vmatpush1.bf16.msra.mxu1 %v16664_v24  ;;  %5502 = vmatprep.mubr.f32.mxu1 %v16679_v50 }
 0xda8   :  { %9688 = vmatprep.subr.bf16.mxu1 %v16665_v22 }
 0xdaa   :  { %5503 = vmatmul.mubr.f32.gmra.mrb[198].mxu1 %v16718_v53  ;;  %v16731_v53 = vld [vmem:[#allocation34_spill] sm:$0xff] }
 0xdab   :  { %9690 = vmatpush1.bf16.msra.mxu1 %v16666_v44  ;;  %5508 = vmatprep.mubr.f32.mxu1 %v16679_v50  ;;  %v16732_v8 = vunpack.c.l.bf16 %v16731_v53 }
 0xdac   :  { %9692 = vmatprep.subr.bf16.mxu1 %v16667_v54 }
 0xdae   :  { %5509 = vmatmul.mubr.f32.gmra.mrb[200].mxu1 %v16720_v30  ;;  %v16733_v30 = vunpack.c.h.bf16 %v16731_v53 }
 0xdaf   :  { %9694 = vmatpush1.bf16.msra.mxu1 %v16668_v62  ;;  %5514 = vmatprep.mubr.f32.mxu1 %v16679_v50 }
 0xdb0   :  { %9696 = vmatprep.subr.bf16.mxu1 %v16669_v3 }
 0xdb2   :  { %5515 = vmatmul.mubr.f32.gmra.mrb[202].mxu1 %v16721_v16  ;;  %v16734_v16 = vld [vmem:[#allocation35_spill] sm:$0xff] }
 0xdb3   :  { %9698 = vmatpush1.bf16.msra.mxu1 %v16670_v34  ;;  %5520 = vmatprep.mubr.f32.mxu1 %v16679_v50  ;;  %v16735_v42 = vunpack.c.l.bf16 %v16734_v16 }
 0xdb4   :  { %9700 = vmatprep.subr.bf16.mxu1 %v16671_v45 }
 0xdb6   :  { %5521 = vmatmul.mubr.f32.gmra.mrb[204].mxu1 %v16723_v26  ;;  %v16736_v26 = vunpack.c.h.bf16 %v16734_v16 }
 0xdb7   :  { %9702 = vmatpush1.bf16.msra.mxu1 %v16672_v32  ;;  %5526 = vmatprep.mubr.f32.mxu1 %v16679_v50 }
 0xdb8   :  { %9704 = vmatprep.subr.bf16.mxu1 %v16673_v17 }
 0xdba   :  { %5527 = vmatmul.mubr.f32.gmra.mrb[206].mxu1 %v16724_v28  ;;  %v16737_v28 = vld [vmem:[#allocation36_spill] sm:$0xff] }
 0xdbb   :  { %9706 = vmatpush1.bf16.msra.mxu1 %v16674_v27  ;;  %5532 = vmatprep.mubr.f32.mxu1 %v16679_v50  ;;  %v16738_v25 = vunpack.c.l.bf16 %v16737_v28 }
 0xdbc   :  { %9708 = vmatprep.subr.bf16.mxu1 %v16675_v52 }
 0xdbe   :  { %5533 = vmatmul.mubr.f32.gmra.mrb[208].mxu1 %v16726_v48 }
 0xdbf   :  { %9710 = vmatpush1.bf16.msra.mxu1 %v16676_v51  ;;  %5538 = vmatprep.mubr.f32.mxu1 %v16679_v50 }
 0xdc0   :  { %9712 = vmatprep.subr.bf16.mxu1 %v16677_v14 }
 0xdc2   :  { %5539 = vmatmul.mubr.f32.gmra.mrb[210].mxu1 %v16727_v41  ;;  %v16739_v41 = vunpack.c.h.bf16 %v16737_v28 }
 0xdc3   :  { %9714 = vmatpush1.bf16.msra.mxu1 %v16678_v18  ;;  %5544 = vmatprep.mubr.f32.mxu1 %v16679_v50 }
 0xdc4   :  { %9748 = vmatprep.subr.bf16.mxu1 %v16663_v55 }
 0xdc6   :  { %5545 = vmatmul.mubr.f32.gmra.mrb[212].mxu1 %v16729_v59 }
 0xdc7   :  { %5550 = vmatprep.mubr.f32.mxu1 %v16679_v50 }
 0xdca   :  { %5551 = vmatmul.mubr.f32.gmra.mrb[214].mxu1 %v16730_v29  ;;  %v4481_v29 = vpop.permute.xlu0 %4480 }
 0xdcb   :  { %5556 = vmatprep.mubr.f32.mxu1 %v16679_v50 }
 0xdce   :  { %5557 = vmatmul.mubr.f32.gmra.mrb[216].mxu1 %v16732_v8 }
 0xdcf   :  { %5562 = vmatprep.mubr.f32.mxu1 %v16679_v50 }
 0xdd2   :  { %5563 = vmatmul.mubr.f32.gmra.mrb[218].mxu1 %v16733_v30  ;;  %v16740_v30 = vld [vmem:[#allocation37_spill] sm:$0xff] }
 0xdd3   :  { %5866 = vmatprep.mubr.f32.mxu1 %v16679_v50  ;;  %v16741_v16 = vunpack.c.l.bf16 %v16740_v30 }
 0xdd6   :  { %5867 = vmatmul.mubr.f32.vlgmr.msra.gmra.mrb[220].mxu1 %v16735_v42  ;;  %v16742_v42 = vunpack.c.h.bf16 %v16740_v30  ;;  %v16752_v30 = vld [vmem:[#allocation39_spill] sm:$0xff] }
 0xdd7   :  { %9750 = vmatpush1.bf16.msra.mxu1 %v16664_v24  ;;  %5872 = vmatprep.mubr.f32.mxu1 %v16679_v50 }
 0xdd8   :  { %9752 = vmatprep.subr.bf16.mxu1 %v16665_v22 }
 0xdda   :  { %5873 = vmatmul.mubr.f32.gmra.mrb[222].mxu1 %v16736_v26  ;;  %v16743_v26 = vld [vmem:[#allocation38_spill] sm:$0xff] }
 0xddb   :  { %9754 = vmatpush1.bf16.msra.mxu1 %v16666_v44  ;;  %5878 = vmatprep.mubr.f32.mxu1 %v16679_v50  ;;  %v16744_v28 = vunpack.c.l.bf16 %v16743_v26 }
 0xddc   :  { %9756 = vmatprep.subr.bf16.mxu1 %v16667_v54 }
 0xdde   :  { %5879 = vmatmul.mubr.f32.gmra.mrb[224].mxu1 %v16738_v25  ;;  %v16745_v25 = vunpack.c.h.bf16 %v16743_v26  ;;  %v14174_v26 = vld [vmem:[%s15940_s7 + $0x14] ss:$8 sps:$4 sm:$0xff]  }
 0xddf   :  { %9758 = vmatpush1.bf16.msra.mxu1 %v16668_v62  ;;  %5884 = vmatprep.mubr.f32.mxu1 %v16679_v50 }
 0xde0   :  { %9760 = vmatprep.subr.bf16.mxu1 %v16669_v3 }
 0xde2   :  { %v8901_v48 = vpop.f32.mrb[144].mxu1  ;;  %5885 = vmatmul.mubr.f32.gmra.mrb[226].mxu1 %v16739_v41  ;;  %v16746_v41 = vld [vmem:[#allocation5_spill] sm:$0xff] }
 0xde3   :  { %9762 = vmatpush1.bf16.msra.mxu1 %v16670_v34  ;;  %v4568_v59 = vpop.f32.mrb[145].mxu1  ;;  %5890 = vmatprep.mubr.f32.mxu1 %v16679_v50  ;;  %v4574_v8 = vadd.f32 %v8901_v48, %v4481_v29  ;;  %v14138_v48 = vld [vmem:[%s15940_s7 + $0x4] ss:$8 sps:$4 sm:$0xff]  }
 0xde4   :  { %v4569_v53 = vadd.f32 %v4568_v59, %v4479_v33  ;;  %9764 = vmatprep.subr.bf16.mxu1 %v16671_v45  ;;  %v16747_v33 = vunpack.c.l.bf16 %v16746_v41  ;;  %v16748_v59 = vunpack.c.h.bf16 %v16746_v41  ;;  %v16749_v29 = vld [vmem:[#allocation6_spill] sm:$0xff] }
 0xde5   :  { %v14189_v41 = vld [vmem:[%s15940_s7 + $0x24] ss:$8 sps:$4 sm:$0xff]  }
 0xde6   :  { %8913 = vmatprep.mubr.msk.f32.mxu0 %vm284_vm0, %v4569_v53  ;;  %5891 = vmatmul.mubr.f32.gmra.mrb[228].mxu1 %v16741_v16  ;;  %v16750_v53 = vunpack.c.l.bf16 %v16749_v29  ;;  %v16753_v16 = vunpack.c.l.bf16 %v16752_v30 }
 0xde7   :  { %9766 = vmatpush1.bf16.msra.mxu1 %v16672_v32  ;;  %8914 = vmatmul.mubr.msk.f32.vlgmr.msra.gmra.mrb[160].mxu0 %vm284_vm0, %v4574_v8  ;;  %v16751_v8 = vunpack.c.h.bf16 %v16749_v29  ;;  %v14198_v29 = vld [vmem:[%s15940_s7 + $0x20] ss:$8 sps:$4 sm:$0xff]  }
 0xde8   :  { %9526 = vmatpush1.bf16.msra.mxu0 %v16664_v24  ;;  %9768 = vmatprep.subr.bf16.mxu1 %v16673_v17 }
 0xde9   :  { %9528 = vmatprep.subr.bf16.mxu0 %v16665_v22  ;;  %5896 = vmatprep.mubr.f32.mxu1 %v16679_v50 }
 0xdea   :  { %5897 = vmatmul.mubr.f32.gmra.mrb[230].mxu1 %v16742_v42  ;;  %v14168_v42 = vld [vmem:[%s15940_s7] ss:$8 sps:$4 sm:$0xff]  }
 0xdeb   :  { %9770 = vmatpush1.bf16.msra.mxu1 %v16674_v27  ;;  %5902 = vmatprep.mubr.f32.mxu1 %v16679_v50 }
 0xdec   :  { %9530 = vmatpush1.bf16.msra.mxu0 %v16666_v44  ;;  %9772 = vmatprep.subr.bf16.mxu1 %v16675_v52 }
 0xded   :  { %9532 = vmatprep.subr.bf16.mxu0 %v16667_v54 }
 0xdee   :  { %5903 = vmatmul.mubr.f32.gmra.mrb[232].mxu1 %v16744_v28  ;;  %v16754_v28 = vunpack.c.h.bf16 %v16752_v30 }
 0xdef   :  { %9774 = vmatpush1.bf16.msra.mxu1 %v16676_v51  ;;  %5908 = vmatprep.mubr.f32.mxu1 %v16679_v50 }
 0xdf0   :  { %9534 = vmatpush1.bf16.msra.mxu0 %v16668_v62  ;;  %9776 = vmatprep.subr.bf16.mxu1 %v16677_v14 }
 0xdf1   :  { %9536 = vmatprep.subr.bf16.mxu0 %v16669_v3 }
 0xdf2   :  { %5909 = vmatmul.mubr.f32.gmra.mrb[234].mxu1 %v16745_v25  ;;  %v14183_v25 = vld [vmem:[%s15940_s7 + $0x10] ss:$8 sps:$4 sm:$0xff]  }
 0xdf3   :  { %9778 = vmatpush1.bf16.msra.mxu1 %v16678_v18  ;;  %5914 = vmatprep.mubr.f32.mxu1 %v16679_v50 }
 0xdf4   :  { %9538 = vmatpush1.bf16.msra.mxu0 %v16670_v34  ;;  %9844 = vmatprep.subr.bf16.mxu1 %v14138_v48 }
 0xdf5   :  { %9540 = vmatprep.subr.bf16.mxu0 %v16671_v45 }
 0xdf6   :  { %5915 = vmatmul.mubr.f32.gmra.mrb[236].mxu1 %v16747_v33  ;;  %v16755_v33 = vld [vmem:[#allocation40_spill] sm:$0xff] }
 0xdf7   :  { %5920 = vmatprep.mubr.f32.mxu1 %v16679_v50  ;;  %v16757_v30 = vunpack.c.h.bf16 %v16755_v33 }
 0xdf8   :  { %9542 = vmatpush1.bf16.msra.mxu0 %v16672_v32 }
 0xdf9   :  { %9544 = vmatprep.subr.bf16.mxu0 %v16673_v17 }
 0xdfa   :  { %5921 = vmatmul.mubr.f32.gmra.mrb[238].mxu1 %v16748_v59  ;;  %v16756_v59 = vunpack.c.l.bf16 %v16755_v33  ;;  %v16758_v33 = vld [vmem:[#allocation41_spill] sm:$0xff] }
 0xdfb   :  { %5926 = vmatprep.mubr.f32.mxu1 %v16679_v50 }
 0xdfc   :  { %9546 = vmatpush1.bf16.msra.mxu0 %v16674_v27 }
 0xdfd   :  { %9548 = vmatprep.subr.bf16.mxu0 %v16675_v52 }
 0xdfe   :  { %5927 = vmatmul.mubr.f32.gmra.mrb[240].mxu1 %v16750_v53  ;;  %v14204_v53 = vld [vmem:[%s15940_s7 + $0x34] ss:$8 sps:$4 sm:$0xff]  }
 0xdff   :  { %5932 = vmatprep.mubr.f32.mxu1 %v16679_v50 }
 0xe00   :  { %9550 = vmatpush1.bf16.msra.mxu0 %v16676_v51 }
 0xe01   :  { %9552 = vmatprep.subr.bf16.mxu0 %v16677_v14 }
 0xe02   :  { %5933 = vmatmul.mubr.f32.gmra.mrb[242].mxu1 %v16751_v8  ;;  %v4483_v8 = vpop.permute.xlu1 %4482 }
 0xe03   :  { %6236 = vmatprep.mubr.f32.mxu1 %v16679_v50 }
 0xe04   :  { %9554 = vmatpush1.bf16.msra.mxu0 %v16678_v18 }
 0xe05   :  { %9588 = vmatprep.subr.bf16.mxu0 %v16663_v55 }
 0xe06   :  { %6237 = vmatmul.mubr.f32.vlgmr.msra.gmra.mrb[244].mxu1 %v16753_v16  ;;  %v14213_v16 = vld [vmem:[%s15940_s7 + $0x30] ss:$8 sps:$4 sm:$0xff]   ;;  %v4485_v6 = vpop.permute.xlu1 %4484 }
 0xe07   :  { %6242 = vmatprep.mubr.f32.mxu1 %v16679_v50  ;;  %9846 = vmatpush1.bf16.msra.mxu1 %v14168_v42 }
 0xe08   :  { %9848 = vmatprep.subr.bf16.mxu1 %v14174_v26 }
 0xe0a   :  { %6243 = vmatmul.mubr.f32.gmra.mrb[246].mxu1 %v16754_v28  ;;  %v14219_v28 = vld [vmem:[%s15940_s7 + $0x44] ss:$8 sps:$4 sm:$0xff]  }
 0xe0b   :  { %6248 = vmatprep.mubr.f32.mxu1 %v16679_v50  ;;  %9850 = vmatpush1.bf16.msra.mxu1 %v14183_v25 }
 0xe0c   :  { %9852 = vmatprep.subr.bf16.mxu1 %v14189_v41 }
 0xe0e   :  { %6249 = vmatmul.mubr.f32.gmra.mrb[248].mxu1 %v16756_v59 }
 0xe0f   :  { %6254 = vmatprep.mubr.f32.mxu1 %v16679_v50  ;;  %9854 = vmatpush1.bf16.msra.mxu1 %v14198_v29 }
 0xe10   :  { %9856 = vmatprep.subr.bf16.mxu1 %v14204_v53 }
 0xe12   :  { %6255 = vmatmul.mubr.f32.gmra.mrb[250].mxu1 %v16757_v30  ;;  %v16759_v30 = vunpack.c.l.bf16 %v16758_v33 }
 0xe13   :  { %6260 = vmatprep.mubr.f32.mxu1 %v16679_v50  ;;  %9858 = vmatpush1.bf16.msra.mxu1 %v14213_v16 }
 0xe14   :  { %9860 = vmatprep.subr.bf16.mxu1 %v14219_v28 }
 0xe15   :  { %v8904_v59 = vpop.f32.mrb[146].mxu1 }
 0xe16   :  { %v4578_v7 = vpop.f32.mrb[147].mxu1  ;;  %6261 = vmatmul.mubr.f32.gmra.mrb[252].mxu1 %v16759_v30  ;;  %v4584_v61 = vadd.f32 %v8904_v59, %v4485_v6  ;;  %v14246_v6 = vld [vmem:[%s15940_s7 + $0x50] ss:$8 sps:$4 sm:$0xff]   ;;  %v14266_v30 = vld [vmem:[%s15940_s7 + $0x60] ss:$8 sps:$4 sm:$0xff]  }
 0xe17   :  { %v4579_v63 = vadd.f32 %v4578_v7, %v4483_v8  ;;  %6266 = vmatprep.mubr.f32.mxu1 %v16679_v50  ;;  %9862 = vmatpush1.bf16.msra.mxu1 %v14228_v35  ;;  %v16760_v7 = vunpack.c.h.bf16 %v16758_v33  ;;  %v16763_v59 = vld [vmem:[#allocation43_spill] sm:$0xff] }
 0xe18   :  { %9864 = vmatprep.subr.bf16.mxu1 %v14234_v23  ;;  %v16764_v33 = vunpack.c.l.bf16 %v16763_v59 }
 0xe19   :  { %8916 = vmatprep.mubr.msk.f32.mxu0 %vm284_vm0, %v4579_v63  ;;  %v14252_v63 = vld [vmem:[%s15940_s7 + $0x64] ss:$8 sps:$4 sm:$0xff]  }
 0xe1a   :  { %8917 = vmatmul.mubr.msk.f32.gmra.mrb[162].mxu0 %vm284_vm0, %v4584_v61  ;;  %6267 = vmatmul.mubr.f32.gmra.mrb[254].mxu1 %v16760_v7  ;;  %v16761_v61 = vld [vmem:[#allocation17_spill] sm:$0xff] }
 0xe1b   :  { %4941 = vmatprep.mubr.f32.mxu0 %v16679_v50  ;;  %6272 = vmatprep.mubr.f32.mxu1 %v16679_v50  ;;  %v16762_v8 = vunpack.c.l.bf16 %v16761_v61  ;;  %v16765_v7 = vunpack.c.h.bf16 %v16761_v61  ;;  %v16767_v61 = vld [vmem:[#allocation18_spill] sm:$0xff] }
 0xe1c   :  { %9866 = vmatpush1.bf16.msra.mxu1 %v14246_v6 }
 0xe1d   :  { %9868 = vmatprep.subr.bf16.mxu1 %v14252_v63 }
 0xe1e   :  { %4942 = vmatmul.mubr.f32.vlgmr.msra.gmra.mrb[168].mxu0 %v16762_v8  ;;  %6273 = vmatmul.mubr.f32.gmra.mrb[0].mxu1 %v16764_v33  ;;  %v16766_v8 = vunpack.c.h.bf16 %v16763_v59  ;;  %v14280_v33 = vld [vmem:[%s15940_s7 + $0x74] ss:$8 sps:$4 sm:$0xff]   ;;  %v16769_v59 = vld [vmem:[#allocation45_spill] sm:$0xff] }
 0xe1f   :  { %9590 = vmatpush1.bf16.msra.mxu0 %v16664_v24  ;;  %4947 = vmatprep.mubr.f32.mxu0 %v16679_v50 }
 0xe20   :  { %9592 = vmatprep.subr.bf16.mxu0 %v16665_v22  ;;  %6278 = vmatprep.mubr.f32.mxu1 %v16679_v50 }
 0xe21   :  { %9870 = vmatpush1.bf16.msra.mxu1 %v14266_v30 }
 0xe22   :  { %4948 = vmatmul.mubr.f32.gmra.mrb[170].mxu0 %v16765_v7  ;;  %6279 = vmatmul.mubr.f32.gmra.mrb[2].mxu1 %v16766_v8  ;;  %v16768_v7 = vunpack.c.l.bf16 %v16767_v61  ;;  %v16770_v8 = vunpack.c.l.bf16 %v16769_v59 }
 0xe23   :  { %9594 = vmatpush1.bf16.msra.mxu0 %v16666_v44  ;;  %4953 = vmatprep.mubr.f32.mxu0 %v16679_v50 }
 0xe24   :  { %9596 = vmatprep.subr.bf16.mxu0 %v16667_v54  ;;  %6284 = vmatprep.mubr.f32.mxu1 %v16679_v50 }
 0xe25   :  { %9872 = vmatprep.subr.bf16.mxu1 %v14280_v33 }
 0xe26   :  { %4954 = vmatmul.mubr.f32.gmra.mrb[172].mxu0 %v16768_v7  ;;  %6285 = vmatmul.mubr.f32.gmra.mrb[4].mxu1 %v16770_v8  ;;  %v16771_v7 = vunpack.c.h.bf16 %v16767_v61  ;;  %v16772_v8 = vunpack.c.h.bf16 %v16769_v59  ;;  %v16773_v61 = vld [vmem:[#allocation19_spill] sm:$0xff] }
 0xe27   :  { %9598 = vmatpush1.bf16.msra.mxu0 %v16668_v62  ;;  %4959 = vmatprep.mubr.f32.mxu0 %v16679_v50  ;;  %v16775_v59 = vld [vmem:[#allocation47_spill] sm:$0xff] }
 0xe28   :  { %9600 = vmatprep.subr.bf16.mxu0 %v16669_v3  ;;  %6290 = vmatprep.mubr.f32.mxu1 %v16679_v50 }
 0xe29   :  { %9874 = vmatpush1.bf16.msra.mxu1 %v14294_v0 }
 0xe2a   :  { %4960 = vmatmul.mubr.f32.gmra.mrb[174].mxu0 %v16771_v7  ;;  %6291 = vmatmul.mubr.f32.gmra.mrb[6].mxu1 %v16772_v8  ;;  %v16774_v7 = vunpack.c.l.bf16 %v16773_v61  ;;  %v16776_v8 = vunpack.c.l.bf16 %v16775_v59 }
 0xe2b   :  { %9602 = vmatpush1.bf16.msra.mxu0 %v16670_v34  ;;  %4965 = vmatprep.mubr.f32.mxu0 %v16679_v50 }
 0xe2c   :  { %9604 = vmatprep.subr.bf16.mxu0 %v16671_v45  ;;  %6296 = vmatprep.mubr.f32.mxu1 %v16679_v50 }
 0xe2d   :  { %9876 = vmatprep.subr.bf16.mxu1 %v14308_v56 }
 0xe2e   :  { %4966 = vmatmul.mubr.f32.gmra.mrb[176].mxu0 %v16774_v7  ;;  %6297 = vmatmul.mubr.f32.gmra.mrb[8].mxu1 %v16776_v8  ;;  %v16777_v7 = vunpack.c.h.bf16 %v16773_v61  ;;  %v16778_v8 = vunpack.c.h.bf16 %v16775_v59  ;;  %v14341_v61 = vld [vmem:[%s15940_s7 + $0x90] ss:$8 sps:$4 sm:$0xff]  }
 0xe2f   :  { %9606 = vmatpush1.bf16.msra.mxu0 %v16672_v32  ;;  %4971 = vmatprep.mubr.f32.mxu0 %v16679_v50  ;;  %v16779_v59 = vld [vmem:[#allocation20_spill] sm:$0xff] }
 0xe30   :  { %9608 = vmatprep.subr.bf16.mxu0 %v16673_v17  ;;  %6302 = vmatprep.mubr.f32.mxu1 %v16679_v50 }
 0xe31   :  { %9878 = vmatpush1.bf16.msra.mxu1 %v14322_v12 }
 0xe32   :  { %4972 = vmatmul.mubr.f32.gmra.mrb[178].mxu0 %v16777_v7  ;;  %6303 = vmatmul.mubr.f32.gmra.mrb[10].mxu1 %v16778_v8  ;;  %v16780_v7 = vunpack.c.l.bf16 %v16779_v59  ;;  %v4758_v8 = vpop.f32.mrb[148].mxu1 }
 0xe33   :  { %9610 = vmatpush1.bf16.msra.mxu0 %v16674_v27  ;;  %4977 = vmatprep.mubr.f32.mxu0 %v16679_v50  ;;  %v4760_v11 = vpop.f32.mrb[149].mxu1  ;;  %v4829_v57 = vmul.f32 %v4758_v8, %v16788_v46 }
 0xe34   :  { %9612 = vmatprep.subr.bf16.mxu0 %v16675_v52  ;;  %9880 = vmatprep.subr.bf16.mxu1 %v14335_v20  ;;  %v4764_v10 = vpop.f32.mrb[150].mxu1  ;;  %v4830_v15 = vmul.f32 %v4760_v11, %v16789_v36  ;;  %v14402_v11 = vld [vmem:[%s15940_s7 + $0xd4] ss:$8 sps:$4 sm:$0xff]  }
 0xe35   :  { %9882 = vmatpush1.bf16.msra.mxu1 %v14341_v61  ;;  %v4766_v39 = vpop.f32.mrb[151].mxu1  ;;  %v4831_v49 = vmul.f32 %v4764_v10, %v16788_v46  ;;  %16793 = vst [vmem:[#allocation133_spill] sm:$0xff] %v14402_v11 }
 0xe36   :  { %4978 = vmatmul.mubr.f32.gmra.mrb[180].mxu0 %v16780_v7  ;;  %9884 = vmatprep.subr.bf16.mxu1 %v14349_v37  ;;  %v16782_v7 = vunpack.c.h.bf16 %v16779_v59  ;;  %v4770_v31 = vpop.f32.mrb[152].mxu1  ;;  %v14375_v59 = vld [vmem:[%s15940_s7 + $0xb0] ss:$8 sps:$4 sm:$0xff]   ;;  %v4832_v8 = vmul.f32 %v4766_v39, %v16789_v36 }
 0xe37   :  { %9614 = vmatpush1.bf16.msra.mxu0 %v16676_v51  ;;  %4983 = vmatprep.mubr.f32.mxu0 %v16679_v50  ;;  %16784 = vst [vmem:[#allocation129_spill] sm:$0xff] %v14375_v59  ;;  %v4772_v58 = vpop.f32.mrb[153].mxu1 }
 0xe38   :  { %9616 = vmatprep.subr.bf16.mxu0 %v16677_v14  ;;  %v4776_v60 = vpop.f32.mrb[154].mxu1 }
 0xe39   :  { %9886 = vmatpush1.bf16.msra.mxu1 %v14358_v47  ;;  %v4778_v40 = vpop.f32.mrb[155].mxu1 }
 0xe3a   :  { %4984 = vmatmul.mubr.f32.gmra.mrb[182].mxu0 %v16782_v7  ;;  %9888 = vmatprep.subr.bf16.mxu1 %v14366_v38  ;;  %v16785_v7 = vld [vmem:[#allocation21_spill] sm:$0xff]  ;;  %v4782_v9 = vpop.f32.mrb[156].mxu1 }
 0xe3b   :  { %9618 = vmatpush1.bf16.msra.mxu0 %v16678_v18  ;;  %4989 = vmatprep.mubr.f32.mxu0 %v16679_v50  ;;  %v16786_v19 = vunpack.c.l.bf16 %v16785_v7  ;;  %v16791_v21 = vunpack.c.h.bf16 %v16785_v7  ;;  %v4845_v4 = vmul.f32 %v4782_v9, %v16792_v1  ;;  %v4784_v5 = vpop.f32.mrb[157].mxu1 }
 0xe3c   :  { %9652 = vmatprep.subr.bf16.mxu0 %v16663_v55  ;;  %v4846_v13 = vmul.f32 %v4784_v5, %v16794_v2  ;;  %v4788_v7 = vpop.f32.mrb[158].mxu1  ;;  %v16796_v5 = vld [vmem:[#allocation22_spill] sm:$0xff] }
 0xe3d   :  { %9890 = vmatpush1.bf16.msra.mxu1 %v14375_v59  ;;  %v4853_v10 = vadd.f32 %v4845_v4, %v4829_v57  ;;  %v4847_v9 = vmul.f32 %v4788_v7, %v16792_v1  ;;  %v16797_v39 = vunpack.c.l.bf16 %v16796_v5  ;;  %v4835_v4 = vmul.f32 %v4776_v60, %v16788_v46 }
 0xe3e   :  { %4990 = vmatmul.mubr.f32.gmra.mrb[184].mxu0 %v16786_v19  ;;  %9892 = vmatprep.subr.bf16.mxu1 %v14383_v43  ;;  %v14392_v19 = vld [vmem:[%s15940_s7 + $0xc0] ss:$8 sps:$4 sm:$0xff]   ;;  %v4834_v43 = vmul.f32 %v4772_v58, %v16789_v36  ;;  %v4854_v59 = vadd.f32 %v4846_v13, %v4830_v15  ;;  %v14425_v13 = vld [vmem:[%s15940_s7 + $0xe4] ss:$8 sps:$4 sm:$0xff]   ;;  %v4836_v15 = vmul.f32 %v4778_v40, %v16789_v36  ;;  %v16799_v36 = vunpack.c.h.bf16 %v16796_v5 }
 0xe3f   :  { %4995 = vmatprep.mubr.f32.mxu0 %v16679_v50  ;;  %16790 = vst [vmem:[#allocation150_spill] sm:$0xff] %v14392_v19  ;;  %v4855_v57 = vadd.f32 %v4847_v9, %v4831_v49  ;;  %16798 = vst [vmem:[#allocation154_spill] sm:$0xff] %v14425_v13 }
 0xe41   :  { %9894 = vmatpush1.bf16.msra.mxu1 %v14392_v19  ;;  %v4790_v19 = vpop.f32.mrb[159].mxu1 }
 0xe42   :  { %4996 = vmatmul.mubr.f32.gmra.mrb[186].mxu0 %v16791_v21  ;;  %9896 = vmatprep.subr.bf16.mxu1 %v14402_v11  ;;  %v4833_v21 = vmul.f32 %v4770_v31, %v16788_v46  ;;  %v4848_v38 = vmul.f32 %v4790_v19, %v16794_v2  ;;  %v4794_v47 = vpop.f32.mrb[160].mxu1  ;;  %v14415_v11 = vld [vmem:[%s15940_s7 + $0xd0] ss:$8 sps:$4 sm:$0xff]  }
 0xe43   :  { %5001 = vmatprep.mubr.f32.mxu0 %v16679_v50  ;;  %16795 = vst [vmem:[#allocation135_spill] sm:$0xff] %v14415_v11  ;;  %v4849_v31 = vmul.f32 %v4794_v47, %v16792_v1  ;;  %v4796_v58 = vpop.f32.mrb[161].mxu1 }
 0xe44   :  { %v4856_v19 = vadd.f32 %v4848_v38, %v4832_v8  ;;  %v4850_v7 = vmul.f32 %v4796_v58, %v16794_v2  ;;  %v16800_v38 = vld [vmem:[#allocation131_spill] sm:$0xff] }
 0xe45   :  { %9898 = vmatpush1.bf16.msra.mxu1 %v14415_v11  ;;  %v4857_v46 = vadd.f32 %v4849_v31, %v4833_v21 }
 0xe46   :  { %5002 = vmatmul.mubr.f32.gmra.mrb[188].mxu0 %v16797_v39  ;;  %9900 = vmatprep.subr.bf16.mxu1 %v14425_v13  ;;  %v4800_v39 = vpop.f32.mrb[162].mxu1  ;;  %v4858_v47 = vadd.f32 %v4850_v7, %v4834_v43  ;;  %v14436_v13 = vld [vmem:[%s15940_s7 + $0xe0] ss:$8 sps:$4 sm:$0xff]   ;;  %v16801_v43 = vld [vmem:[#allocation132_spill] sm:$0xff] }
 0xe47   :  { %5007 = vmatprep.mubr.f32.mxu0 %v16679_v50  ;;  %v4851_v49 = vmul.f32 %v4800_v39, %v16792_v1  ;;  %v4802_v60 = vpop.f32.mrb[163].mxu1  ;;  %v14445_v1 = vld [vmem:[%s15940_s7 + $0xf4] ss:$8 sps:$4 sm:$0xff]  }
 0xe48   :  { %v4852_v9 = vmul.f32 %v4802_v60, %v16794_v2  ;;  %v4806_v11 = vpop.f32.mrb[164].mxu1 }
 0xe49   :  { %9902 = vmatpush1.bf16.msra.mxu1 %v14436_v13  ;;  %v4859_v40 = vadd.f32 %v4851_v49, %v4835_v4  ;;  %v4861_v8 = vmul.f32 %v4806_v11, %v16800_v38  ;;  %v4808_v21 = vpop.f32.mrb[165].mxu1  ;;  %v14459_v49 = vld [vmem:[%s15940_s7 + $0xf0] ss:$8 sps:$4 sm:$0xff]  }
 0xe4a   :  { %5008 = vmatmul.mubr.f32.gmra.mrb[190].mxu0 %v16799_v36  ;;  %9904 = vmatprep.subr.bf16.mxu1 %v14445_v1  ;;  %v4860_v2 = vadd.f32 %v4852_v9, %v4836_v15  ;;  %v4862_v31 = vmul.f32 %v4808_v21, %v16801_v43  ;;  %v4812_v58 = vpop.f32.mrb[166].mxu1  ;;  %v16802_v15 = vld [vmem:[#allocation42_spill] sm:$0xff] }
 0xe4b   :  { %5311 = vmatprep.mubr.f32.mxu0 %v16679_v50  ;;  %v14450_v7 = vadd.f32 %v4861_v8, %v4853_v10  ;;  %v4863_v5 = vmul.f32 %v4812_v58, %v16800_v38  ;;  %v4814_v4 = vpop.f32.mrb[167].mxu1  ;;  %v16803_v60 = vunpack.c.l.bf16 %v16802_v15  ;;  %v16804_v58 = vunpack.c.h.bf16 %v16802_v15 }
 0xe4c   :  { %v14453_v11 = vadd.f32 %v4862_v31, %v4854_v59  ;;  %v4864_v39 = vmul.f32 %v4814_v4, %v16801_v43  ;;  %v4818_v10 = vpop.f32.mrb[168].mxu1 }
 0xe4d   :  { %9906 = vmatpush1.bf16.msra.mxu1 %v14459_v49  ;;  %v14464_v9 = vadd.f32 %v4863_v5, %v4855_v57  ;;  %v4865_v36 = vmul.f32 %v4818_v10, %v16800_v38  ;;  %v4820_v8 = vpop.f32.mrb[169].mxu1 }
 0xe4e   :  { %5312 = vmatmul.mubr.f32.vlgmr.msra.gmra.mrb[192].mxu0 %v16803_v60  ;;  %v14468_v59 = vadd.f32 %v4864_v39, %v4856_v19  ;;  %v4866_v21 = vmul.f32 %v4820_v8, %v16801_v43  ;;  %v4824_v5 = vpop.f32.mrb[170].mxu1 }
 0xe4f   :  { %9654 = vmatpush1.bf16.msra.mxu0 %v16664_v24  ;;  %5317 = vmatprep.mubr.f32.mxu0 %v16679_v50  ;;  %v14473_v31 = vadd.f32 %v4865_v36, %v4857_v46  ;;  %v4867_v19 = vmul.f32 %v4824_v5, %v16800_v38  ;;  %v4826_v4 = vpop.f32.mrb[171].mxu1  ;;  %v16805_v46 = vld [vmem:[#allocation44_spill] sm:$0xff] }
 0xe50   :  { %9656 = vmatprep.subr.bf16.mxu0 %v16665_v22  ;;  %v14477_v57 = vadd.f32 %v4866_v21, %v4858_v47  ;;  %v4868_v39 = vmul.f32 %v4826_v4, %v16801_v43  ;;  %v16806_v10 = vunpack.c.l.bf16 %v16805_v46  ;;  %v16807_v47 = vunpack.c.h.bf16 %v16805_v46  ;;  %v16811_v43 = vld [vmem:[#allocation48_spill] sm:$0xff]  ;;  %v16814_v21 = vld [vmem:[#allocation49_spill] sm:$0xff] }
 0xe51   :  { %v14484_v60 = vadd.f32 %v4867_v19, %v4859_v40  ;;  %v16808_v40 = vld [vmem:[#allocation46_spill] sm:$0xff]  ;;  %v16812_v36 = vunpack.c.l.bf16 %v16811_v43  ;;  %v16813_v8 = vunpack.c.h.bf16 %v16811_v43  ;;  %v16816_v5 = vunpack.c.h.bf16 %v16814_v21 }
 0xe52   :  { %5318 = vmatmul.mubr.f32.gmra.mrb[194].mxu0 %v16804_v58  ;;  %v14488_v15 = vadd.f32 %v4868_v39, %v4860_v2  ;;  %v16809_v38 = vunpack.c.l.bf16 %v16808_v40  ;;  %v16810_v2 = vunpack.c.h.bf16 %v16808_v40  ;;  %v16815_v58 = vunpack.c.l.bf16 %v16814_v21  ;;  %v16817_v19 = vld [vmem:[#allocation50_spill] sm:$0xff]  ;;  %v14527_v39 = vpop.f32.mrb[172].mxu1  ;;  %v16820_v40 = vld [vmem:[#allocation52_spill] sm:$0xff]  ;;  %v16823_v21 = vld [vmem:[#allocation55_spill] sm:$0xff] }
 0xe53   :  { %9658 = vmatpush1.bf16.msra.mxu0 %v16666_v44  ;;  %5323 = vmatprep.mubr.f32.mxu0 %v16679_v50  ;;  %v16818_v4 = vunpack.c.l.bf16 %v16817_v19  ;;  %v14529_v46 = vpop.f32.mrb[173].mxu1 }
 0xe54   :  { %9660 = vmatprep.subr.bf16.mxu0 %v16667_v54 }
 0xe56   :  { %5324 = vmatmul.mubr.f32.gmra.mrb[196].mxu0 %v16806_v10  ;;  %v14534_v10 = vpop.f32.mrb[174].mxu1 }
 0xe57   :  { %9662 = vmatpush1.bf16.msra.mxu0 %v16668_v62  ;;  %5329 = vmatprep.mubr.f32.mxu0 %v16679_v50 }
 0xe58   :  { %9664 = vmatprep.subr.bf16.mxu0 %v16669_v3 }
 0xe5a   :  { %5330 = vmatmul.mubr.f32.gmra.mrb[198].mxu0 %v16807_v47  ;;  %v14536_v47 = vpop.f32.mrb[175].mxu1 }
 0xe5b   :  { %9666 = vmatpush1.bf16.msra.mxu0 %v16670_v34  ;;  %5335 = vmatprep.mubr.f32.mxu0 %v16679_v50 }
 0xe5c   :  { %9668 = vmatprep.subr.bf16.mxu0 %v16671_v45 }
 0xe5e   :  { %5336 = vmatmul.mubr.f32.gmra.mrb[200].mxu0 %v16809_v38  ;;  %v16821_v38 = vunpack.c.l.bf16 %v16820_v40 }
 0xe5f   :  { %9670 = vmatpush1.bf16.msra.mxu0 %v16672_v32  ;;  %5341 = vmatprep.mubr.f32.mxu0 %v16679_v50 }
 0xe60   :  { %9672 = vmatprep.subr.bf16.mxu0 %v16673_v17 }
 0xe62   :  { %5342 = vmatmul.mubr.f32.gmra.mrb[202].mxu0 %v16810_v2  ;;  %v14542_v2 = vpop.f32.mrb[176].mxu1 }
 0xe63   :  { %9674 = vmatpush1.bf16.msra.mxu0 %v16674_v27  ;;  %5347 = vmatprep.mubr.f32.mxu0 %v16679_v50  ;;  %v14545_v43 = vpop.f32.mrb[177].mxu1 }
 0xe64   :  { %9676 = vmatprep.subr.bf16.mxu0 %v16675_v52 }
 0xe66   :  { %5348 = vmatmul.mubr.f32.gmra.mrb[204].mxu0 %v16812_v36  ;;  %v16822_v36 = vunpack.c.h.bf16 %v16820_v40  ;;  %v16829_v40 = vld [vmem:[#allocation66_spill] sm:$0xff] }
 0xe67   :  { %9678 = vmatpush1.bf16.msra.mxu0 %v16676_v51  ;;  %5353 = vmatprep.mubr.f32.mxu0 %v16679_v50 }
 0xe68   :  { %9680 = vmatprep.subr.bf16.mxu0 %v16677_v14 }
 0xe6a   :  { %5354 = vmatmul.mubr.f32.gmra.mrb[206].mxu0 %v16813_v8  ;;  %v14551_v8 = vpop.f32.mrb[178].mxu1 }
 0xe6b   :  { %9682 = vmatpush1.bf16.msra.mxu0 %v16678_v18  ;;  %5359 = vmatprep.mubr.f32.mxu0 %v16679_v50 }
 0xe6c   :  { %9716 = vmatprep.subr.bf16.mxu0 %v16663_v55  ;;  %v16819_v55 = vunpack.c.h.bf16 %v16817_v19  ;;  %v16826_v19 = vld [vmem:[#allocation59_spill] sm:$0xff] }
 0xe6e   :  { %5360 = vmatmul.mubr.f32.gmra.mrb[208].mxu0 %v16815_v58  ;;  %v16824_v58 = vunpack.c.l.bf16 %v16823_v21 }
 0xe6f   :  { %5365 = vmatprep.mubr.f32.mxu0 %v16679_v50 }
 0xe72   :  { %5366 = vmatmul.mubr.f32.gmra.mrb[210].mxu0 %v16816_v5  ;;  %v16825_v5 = vunpack.c.h.bf16 %v16823_v21 }
 0xe73   :  { %5371 = vmatprep.mubr.f32.mxu0 %v16679_v50 }
 0xe76   :  { %5372 = vmatmul.mubr.f32.gmra.mrb[212].mxu0 %v16818_v4  ;;  %v16827_v4 = vunpack.c.l.bf16 %v16826_v19 }
 0xe77   :  { %5377 = vmatprep.mubr.f32.mxu0 %v16679_v50 }
 0xe7a   :  { %5378 = vmatmul.mubr.f32.gmra.mrb[214].mxu0 %v16819_v55  ;;  %v16828_v55 = vunpack.c.h.bf16 %v16826_v19 }
 0xe7b   :  { %5681 = vmatprep.mubr.f32.mxu0 %v16679_v50 }
 0xe7e   :  { %5682 = vmatmul.mubr.f32.vlgmr.msra.gmra.mrb[216].mxu0 %v16821_v38  ;;  %v16830_v38 = vunpack.c.l.bf16 %v16829_v40 }
 0xe7f   :  { %9718 = vmatpush1.bf16.msra.mxu0 %v16664_v24  ;;  %5687 = vmatprep.mubr.f32.mxu0 %v16679_v50  ;;  %v14554_v24 = vpop.f32.mrb[179].mxu1 }
 0xe80   :  { %9720 = vmatprep.subr.bf16.mxu0 %v16665_v22  ;;  %v14560_v22 = vpop.f32.mrb[180].mxu1 }
 0xe82   :  { %5688 = vmatmul.mubr.f32.gmra.mrb[218].mxu0 %v16822_v36  ;;  %v16831_v36 = vunpack.c.h.bf16 %v16829_v40 }
 0xe83   :  { %9722 = vmatpush1.bf16.msra.mxu0 %v16666_v44  ;;  %5693 = vmatprep.mubr.f32.mxu0 %v16679_v50  ;;  %v14563_v44 = vpop.f32.mrb[181].mxu1 }
 0xe84   :  { %9724 = vmatprep.subr.bf16.mxu0 %v16667_v54  ;;  %v14569_v54 = vpop.f32.mrb[182].mxu1 }
 0xe86   :  { %5694 = vmatmul.mubr.f32.gmra.mrb[220].mxu0 %v16824_v58 }
 0xe87   :  { %9726 = vmatpush1.bf16.msra.mxu0 %v16668_v62  ;;  %5699 = vmatprep.mubr.f32.mxu0 %v16679_v50  ;;  %v14572_v62 = vpop.f32.mrb[183].mxu1 }
 0xe88   :  { %9728 = vmatprep.subr.bf16.mxu0 %v16669_v3  ;;  %v14578_v3 = vpop.f32.mrb[184].mxu1 }
 0xe8a   :  { %5700 = vmatmul.mubr.f32.gmra.mrb[222].mxu0 %v16825_v5 }
 0xe8b   :  { %9730 = vmatpush1.bf16.msra.mxu0 %v16670_v34  ;;  %5705 = vmatprep.mubr.f32.mxu0 %v16679_v50  ;;  %v14581_v34 = vpop.f32.mrb[185].mxu1 }
 0xe8c   :  { %9732 = vmatprep.subr.bf16.mxu0 %v16671_v45  ;;  %v14587_v45 = vpop.f32.mrb[186].mxu1 }
 0xe8e   :  { %5706 = vmatmul.mubr.f32.gmra.mrb[224].mxu0 %v16827_v4 }
 0xe8f   :  { %9734 = vmatpush1.bf16.msra.mxu0 %v16672_v32  ;;  %5711 = vmatprep.mubr.f32.mxu0 %v16679_v50  ;;  %v14590_v32 = vpop.f32.mrb[187].mxu1 }
 0xe90   :  { %9736 = vmatprep.subr.bf16.mxu0 %v16673_v17  ;;  %v14596_v17 = vpop.f32.mrb[188].mxu1 }
 0xe92   :  { %5712 = vmatmul.mubr.f32.gmra.mrb[226].mxu0 %v16828_v55  ;;  %v16836_v55 = vld [vmem:[#allocation78_spill] sm:$0xff] }
 0xe93   :  { %9738 = vmatpush1.bf16.msra.mxu0 %v16674_v27  ;;  %5717 = vmatprep.mubr.f32.mxu0 %v16679_v50  ;;  %v14599_v27 = vpop.f32.mrb[189].mxu1 }
 0xe94   :  { %9740 = vmatprep.subr.bf16.mxu0 %v16675_v52  ;;  %v14605_v52 = vpop.f32.mrb[190].mxu1 }
 0xe95   :  { %v14607_v21 = vpop.f32.mrb[191].mxu1 }
 0xe96   :  { %5718 = vmatmul.mubr.f32.gmra.mrb[228].mxu0 %v16830_v38 }
 0xe97   :  { %9742 = vmatpush1.bf16.msra.mxu0 %v16676_v51  ;;  %5723 = vmatprep.mubr.f32.mxu0 %v16679_v50  ;;  %v16832_v51 = vld [vmem:[#allocation73_spill] sm:$0xff] }
 0xe98   :  { %9744 = vmatprep.subr.bf16.mxu0 %v16677_v14  ;;  %v16833_v58 = vunpack.c.l.bf16 %v16832_v51  ;;  %v14613_v14 = vpop.f32.mrb[192].mxu1  ;;  %v16834_v19 = vunpack.c.h.bf16 %v16832_v51 }
 0xe99   :  { %v14615_v5 = vpop.f32.mrb[193].mxu1 }
 0xe9a   :  { %5724 = vmatmul.mubr.f32.gmra.mrb[230].mxu0 %v16831_v36  ;;  %v16839_v36 = vunpack.c.h.bf16 %v16836_v55 }
 0xe9b   :  { %9746 = vmatpush1.bf16.msra.mxu0 %v16678_v18  ;;  %5729 = vmatprep.mubr.f32.mxu0 %v16679_v50  ;;  %v14620_v18 = vpop.f32.mrb[194].mxu1 }
 0xe9c   :  { %9780 = vmatprep.subr.bf16.mxu0 %v14138_v48  ;;  %v14622_v4 = vpop.f32.mrb[195].mxu1  ;;  %v16837_v48 = vunpack.c.l.bf16 %v16836_v55 }
 0xe9d   :  { %16835 = vst [vmem:[#allocation157_spill] sm:$0xff] %v14622_v4  ;;  %v14627_v40 = vpop.f32.mrb[196].mxu1 }
 0xe9e   :  { %5730 = vmatmul.mubr.f32.gmra.mrb[232].mxu0 %v16833_v58  ;;  %16838 = vst [vmem:[#allocation121_spill] sm:$0xff] %v14627_v40  ;;  %v14629_v38 = vpop.f32.mrb[197].mxu1 }
 0xe9f   :  { %5735 = vmatprep.mubr.f32.mxu0 %v16679_v50  ;;  %v14634_v51 = vpop.f32.mrb[198].mxu1 }
 0xea0   :  { %v14636_v58 = vpop.f32.mrb[199].mxu1 }
 0xea1   :  { %16840 = vst [vmem:[#allocation122_spill] sm:$0xff] %v14636_v58 }
 0xea2   :  { %5736 = vmatmul.mubr.f32.gmra.mrb[234].mxu0 %v16834_v19  ;;  %v16841_v19 = vld [vmem:[#allocation79_spill] sm:$0xff] }
 0xea3   :  { %5741 = vmatprep.mubr.f32.mxu0 %v16679_v50  ;;  %v16842_v4 = vunpack.c.l.bf16 %v16841_v19  ;;  %v16844_v55 = vunpack.c.h.bf16 %v16841_v19 }
 0xea6   :  { %5742 = vmatmul.mubr.f32.gmra.mrb[236].mxu0 %v16837_v48  ;;  %v14641_v48 = vpop.f32.mrb[200].mxu1 }
 0xea7   :  { %5747 = vmatprep.mubr.f32.mxu0 %v16679_v50  ;;  %16843 = vst [vmem:[#allocation138_spill] sm:$0xff] %v14641_v48  ;;  %v14644_v40 = vpop.f32.mrb[201].mxu1  ;;  %v16847_v48 = vld [vmem:[#allocation84_spill] sm:$0xff] }
 0xea8   :  { %v16848_v58 = vunpack.c.l.bf16 %v16847_v48 }
 0xeaa   :  { %5748 = vmatmul.mubr.f32.gmra.mrb[238].mxu0 %v16839_v36  ;;  %v14650_v36 = vpop.f32.mrb[202].mxu1 }
 0xeab   :  { %6051 = vmatprep.mubr.f32.mxu0 %v16679_v50  ;;  %16845 = vst [vmem:[#allocation140_spill] sm:$0xff] %v14650_v36 }
 0xeae   :  { %6052 = vmatmul.mubr.f32.vlgmr.msra.gmra.mrb[240].mxu0 %v16842_v4  ;;  %v14653_v4 = vpop.f32.mrb[203].mxu1 }
 0xeaf   :  { %6057 = vmatprep.mubr.f32.mxu0 %v16679_v50  ;;  %9782 = vmatpush1.bf16.msra.mxu0 %v14168_v42  ;;  %16846 = vst [vmem:[#allocation162_spill] sm:$0xff] %v14653_v4  ;;  %v14659_v42 = vpop.f32.mrb[204].mxu1 }
 0xeb0   :  { %9784 = vmatprep.subr.bf16.mxu0 %v14174_v26  ;;  %v14662_v26 = vpop.f32.mrb[205].mxu1 }
 0xeb2   :  { %6058 = vmatmul.mubr.f32.gmra.mrb[242].mxu0 %v16844_v55 }
 0xeb3   :  { %6063 = vmatprep.mubr.f32.mxu0 %v16679_v50  ;;  %9786 = vmatpush1.bf16.msra.mxu0 %v14183_v25  ;;  %v16850_v25 = vunpack.c.h.bf16 %v16847_v48 }
 0xeb4   :  { %9788 = vmatprep.subr.bf16.mxu0 %v14189_v41  ;;  %v14672_v41 = vpop.f32.mrb[206].mxu1 }
 0xeb6   :  { %6064 = vmatmul.mubr.f32.gmra.mrb[244].mxu0 %v16848_v58  ;;  %v14675_v58 = vpop.f32.mrb[207].mxu1 }
 0xeb7   :  { %6069 = vmatprep.mubr.f32.mxu0 %v16679_v50  ;;  %9790 = vmatpush1.bf16.msra.mxu0 %v14198_v29  ;;  %v16852_v29 = vld [vmem:[#allocation89_spill] sm:$0xff] }
 0xeb8   :  { %9792 = vmatprep.subr.bf16.mxu0 %v14204_v53  ;;  %v16853_v4 = vunpack.c.l.bf16 %v16852_v29  ;;  %v14681_v53 = vpop.f32.mrb[208].mxu1 }
 0xeb9   :  { %v14684_v48 = vpop.f32.mrb[209].mxu1 }
 0xeba   :  { %v14665_v19 = vpop.f32.mrb[160].mxu0  ;;  %6070 = vmatmul.mubr.f32.gmra.mrb[246].mxu0 %v16850_v25  ;;  %16854 = vst [vmem:[#allocation61_spill] sm:$0xff] %v14684_v48  ;;  %v16855_v25 = vunpack.c.h.bf16 %v16852_v29 }
 0xebb   :  { %16849 = vst [vmem:[#allocation53_spill] sm:$0xff] %v14665_v19  ;;  %v14669_v55 = vpop.f32.mrb[161].mxu0  ;;  %6075 = vmatprep.mubr.f32.mxu0 %v16679_v50  ;;  %9794 = vmatpush1.bf16.msra.mxu0 %v14213_v16  ;;  %v14690_v16 = vpop.f32.mrb[210].mxu1 }
 0xebc   :  { %16851 = vst [vmem:[#allocation60_spill] sm:$0xff] %v14669_v55  ;;  %9796 = vmatprep.subr.bf16.mxu0 %v14219_v28  ;;  %16856 = vst [vmem:[#allocation69_spill] sm:$0xff] %v14690_v16  ;;  %v14693_v28 = vpop.f32.mrb[211].mxu1  ;;  %v16906_v16 = vld [vmem:[#allocation142_spill] sm:$0xff] }
 0xebd   :  { %16857 = vst [vmem:[#allocation72_spill] sm:$0xff] %v14693_v28 }
 0xebe   :  { %6076 = vmatmul.mubr.f32.gmra.mrb[248].mxu0 %v16853_v4  ;;  %v16858_v4 = vld [vmem:[#allocation94_spill] sm:$0xff] }
 0xebf   :  { %6081 = vmatprep.mubr.f32.mxu0 %v16679_v50  ;;  %9798 = vmatpush1.bf16.msra.mxu0 %v14228_v35  ;;  %v16859_v19 = vunpack.c.l.bf16 %v16858_v4  ;;  %v14699_v35 = vpop.f32.mrb[212].mxu1  ;;  %v16860_v29 = vunpack.c.h.bf16 %v16858_v4 }
 0xec0   :  { %9800 = vmatprep.subr.bf16.mxu0 %v14234_v23  ;;  %v14702_v23 = vpop.f32.mrb[213].mxu1 }
 0xec2   :  { %6082 = vmatmul.mubr.f32.gmra.mrb[250].mxu0 %v16855_v25 }
 0xec3   :  { %6087 = vmatprep.mubr.f32.mxu0 %v16679_v50  ;;  %9802 = vmatpush1.bf16.msra.mxu0 %v14246_v6  ;;  %v14708_v6 = vpop.f32.mrb[214].mxu1 }
 0xec4   :  { %9804 = vmatprep.subr.bf16.mxu0 %v14252_v63  ;;  %v14711_v63 = vpop.f32.mrb[215].mxu1 }
 0xec6   :  { %6088 = vmatmul.mubr.f32.gmra.mrb[252].mxu0 %v16859_v19  ;;  %v16861_v19 = vld [vmem:[#allocation11_spill] sm:$0xff] }
 0xec7   :  { %6093 = vmatprep.mubr.f32.mxu0 %v16679_v50  ;;  %9806 = vmatpush1.bf16.msra.mxu0 %v14266_v30  ;;  %v16862_v25 = vunpack.c.l.bf16 %v16861_v19  ;;  %v14717_v30 = vpop.f32.mrb[216].mxu1  ;;  %v16865_v4 = vunpack.c.h.bf16 %v16861_v19 }
 0xec8   :  { %9808 = vmatprep.subr.bf16.mxu0 %v14280_v33  ;;  %16863 = vst [vmem:[#allocation101_spill] sm:$0xff] %v14717_v30  ;;  %v14720_v33 = vpop.f32.mrb[217].mxu1  ;;  %v16923_v30 = vld [vmem:[#allocation161_spill] sm:$0xff] }
 0xec9   :  { %16864 = vst [vmem:[#allocation99_spill] sm:$0xff] %v14720_v33  ;;  %v16922_v33 = vld [vmem:[#allocation54_spill] sm:$0xff] }
 0xeca   :  { %6094 = vmatmul.mubr.f32.gmra.mrb[254].mxu0 %v16860_v29  ;;  %v16868_v29 = vld [vmem:[#allocation104_spill] sm:$0xff] }
 0xecb   :  { %6099 = vmatprep.mubr.f32.mxu0 %v16679_v50  ;;  %9810 = vmatpush1.bf16.msra.mxu0 %v14294_v0  ;;  %v14726_v0 = vpop.f32.mrb[218].mxu1  ;;  %v16874_v55 = vunpack.c.h.bf16 %v16868_v29 }
 0xecc   :  { %9812 = vmatprep.subr.bf16.mxu0 %v14308_v56  ;;  %16866 = vst [vmem:[#allocation108_spill] sm:$0xff] %v14726_v0  ;;  %v14729_v56 = vpop.f32.mrb[219].mxu1 }
 0xecd   :  { %16867 = vst [vmem:[#allocation106_spill] sm:$0xff] %v14729_v56  ;;  %v16876_v56 = vld [vmem:[#allocation129_spill] sm:$0xff] }
 0xece   :  { %6100 = vmatmul.mubr.f32.gmra.mrb[0].mxu0 %v16862_v25  ;;  %v16869_v25 = vunpack.c.l.bf16 %v16868_v29  ;;  %v16884_v29 = vld [vmem:[#allocation135_spill] sm:$0xff] }
 0xecf   :  { %6105 = vmatprep.mubr.f32.mxu0 %v16679_v50  ;;  %9814 = vmatpush1.bf16.msra.mxu0 %v14322_v12  ;;  %v14735_v12 = vpop.f32.mrb[220].mxu1 }
 0xed0   :  { %9816 = vmatprep.subr.bf16.mxu0 %v14335_v20  ;;  %16870 = vst [vmem:[#allocation114_spill] sm:$0xff] %v14735_v12  ;;  %v16871_v20 = vld [vmem:[#allocation119_spill] sm:$0xff]  ;;  %v14738_v19 = vpop.f32.mrb[221].mxu1  ;;  %v16880_v12 = vld [vmem:[#allocation150_spill] sm:$0xff] }
 0xed1   :  { %16872 = vst [vmem:[#allocation112_spill] sm:$0xff] %v14738_v19  ;;  %v16882_v19 = vld [vmem:[#allocation133_spill] sm:$0xff] }
 0xed2   :  { %6106 = vmatmul.mubr.f32.gmra.mrb[2].mxu0 %v16865_v4  ;;  %v16873_v4 = vld [vmem:[#allocation127_spill] sm:$0xff] }
 0xed3   :  { %6111 = vmatprep.mubr.f32.mxu0 %v16679_v50  ;;  %9818 = vmatpush1.bf16.msra.mxu0 %v14341_v61  ;;  %v14743_v61 = vpop.f32.mrb[222].mxu1 }
 0xed4   :  { %9820 = vmatprep.subr.bf16.mxu0 %v14349_v37  ;;  %16875 = vst [vmem:[#allocation120_spill] sm:$0xff] %v14743_v61  ;;  %v14746_v37 = vpop.f32.mrb[223].mxu1  ;;  %v16886_v61 = vld [vmem:[#allocation154_spill] sm:$0xff] }
 0xed5   :  { %16877 = vst [vmem:[#allocation118_spill] sm:$0xff] %v14746_v37 }
 0xed6   :  { %6112 = vmatmul.mubr.f32.gmra.mrb[4].mxu0 %v16869_v25  ;;  %v16878_v25 = vld [vmem:[#allocation149_spill] sm:$0xff] }
 0xed7   :  { %6117 = vmatprep.mubr.f32.mxu0 %v16679_v50  ;;  %9822 = vmatpush1.bf16.msra.mxu0 %v16871_v20  ;;  %v14749_v50 = vpop.f32.mrb[224].mxu1 }
 0xed8   :  { %9824 = vmatprep.subr.bf16.mxu0 %v16873_v4  ;;  %16879 = vst [vmem:[#allocation126_spill] sm:$0xff] %v14749_v50  ;;  %v14752_v20 = vpop.f32.mrb[225].mxu1 }
 0xed9   :  { %16881 = vst [vmem:[#allocation124_spill] sm:$0xff] %v14752_v20  ;;  %v14755_v4 = vpop.f32.mrb[226].mxu1 }
 0xeda   :  { %6118 = vmatmul.mubr.f32.gmra.mrb[6].mxu0 %v16874_v55  ;;  %16883 = vst [vmem:[#allocation136_spill] sm:$0xff] %v14755_v4  ;;  %v14758_v55 = vpop.f32.mrb[227].mxu1 }
 0xedb   :  { %9826 = vmatpush1.bf16.msra.mxu0 %v16876_v56  ;;  %16885 = vst [vmem:[#allocation134_spill] sm:$0xff] %v14758_v55  ;;  %v14761_v56 = vpop.f32.mrb[228].mxu1 }
 0xedc   :  { %9828 = vmatprep.subr.bf16.mxu0 %v16878_v25  ;;  %16887 = vst [vmem:[#allocation148_spill] sm:$0xff] %v14761_v56  ;;  %v14764_v25 = vpop.f32.mrb[229].mxu1 }
 0xedd   :  { %16888 = vst [vmem:[#allocation144_spill] sm:$0xff] %v14764_v25  ;;  %v16896_v25 = vld [vmem:[#allocation139_spill] sm:$0xff] }
 0xedf   :  { %9830 = vmatpush1.bf16.msra.mxu0 %v16880_v12  ;;  %v14767_v12 = vpop.f32.mrb[230].mxu1 }
 0xee0   :  { %9832 = vmatprep.subr.bf16.mxu0 %v16882_v19  ;;  %16889 = vst [vmem:[#allocation158_spill] sm:$0xff] %v14767_v12  ;;  %v14770_v19 = vpop.f32.mrb[231].mxu1 }
 0xee1   :  { %16890 = vst [vmem:[#allocation156_spill] sm:$0xff] %v14770_v19  ;;  %v14776_v55 = vpop.f32.mrb[232].mxu1 }
 0xee2   :  { %16893 = vst [vmem:[#allocation13_spill] sm:$0xff] %v14776_v55 }
 0xee3   :  { %9834 = vmatpush1.bf16.msra.mxu0 %v16884_v29 }
 0xee4   :  { %9836 = vmatprep.subr.bf16.mxu0 %v16886_v61  ;;  %v14778_v61 = vpop.f32.mrb[233].mxu1 }
 0xee5   :  { %16894 = vst [vmem:[#allocation14_spill] sm:$0xff] %v14778_v61  ;;  %v14782_v56 = vpop.f32.mrb[234].mxu1 }
 0xee6   :  { %16897 = vst [vmem:[#allocation15_spill] sm:$0xff] %v14782_v56  ;;  %v14785_v12 = vpop.f32.mrb[235].mxu1 }
 0xee7   :  { %9838 = vmatpush1.bf16.msra.mxu0 %v14436_v13  ;;  %v16895_v13 = vld [vmem:[#allocation137_spill] sm:$0xff]  ;;  %16898 = vst [vmem:[#allocation16_spill] sm:$0xff] %v14785_v12  ;;  %v14790_v0 = vpop.f32.mrb[236].mxu1 }
 0xee8   :  { %9840 = vmatprep.subr.bf16.mxu0 %v14445_v1  ;;  %16899 = vst [vmem:[#allocation23_spill] sm:$0xff] %v14790_v0  ;;  %v14793_v28 = vpop.f32.mrb[237].mxu1 }
 0xee9   :  { %16900 = vst [vmem:[#allocation24_spill] sm:$0xff] %v14793_v28 }
 0xeeb   :  { %9842 = vmatpush1.bf16.msra.mxu0 %v14459_v49 }
 0xeed   :  { %v14772_v4 = vpop.f32.mrb[162].mxu0 }
 0xeee   :  { %16891 = vst [vmem:[#allocation7_spill] sm:$0xff] %v14772_v4  ;;  %v14774_v29 = vpop.f32.mrb[163].mxu0 }
 0xeef   :  { %16892 = vst [vmem:[#allocation8_spill] sm:$0xff] %v14774_v29 }
 0xef1   :  { %v4943_v20 = vpop.f32.mrb[168].mxu0 }
 0xef2   :  { %v5014_v50 = vmul.f32 %v4943_v20, %v16895_v13  ;;  %v4945_v37 = vpop.f32.mrb[169].mxu0 }
 0xef3   :  { %v5015_v1 = vmul.f32 %v4945_v37, %v16896_v25 }
 0xef4   :  { %v5022_v49 = vadd.f32 %v5014_v50, %v14450_v7 }
 0xef5   :  { %v5023_v4 = vadd.f32 %v5015_v1, %v14453_v11  ;;  %v4949_v19 = vpop.f32.mrb[170].mxu0  ;;  %v14798_v1 = vpop.f32.mrb[238].mxu1 }
 0xef6   :  { %v5016_v29 = vmul.f32 %v4949_v19, %v16895_v13  ;;  %v4951_v55 = vpop.f32.mrb[171].mxu0  ;;  %16901 = vst [vmem:[#allocation25_spill] sm:$0xff] %v14798_v1  ;;  %v14801_v12 = vpop.f32.mrb[239].mxu1 }
 0xef7   :  { %v5017_v61 = vmul.f32 %v4951_v55, %v16896_v25  ;;  %16902 = vst [vmem:[#allocation26_spill] sm:$0xff] %v14801_v12 }
 0xef8   :  { %v5024_v20 = vadd.f32 %v5016_v29, %v14464_v9 }
 0xef9   :  { %v5025_v37 = vadd.f32 %v5017_v61, %v14468_v59  ;;  %v4955_v56 = vpop.f32.mrb[172].mxu0  ;;  %v14806_v61 = vpop.f32.mrb[240].mxu1 }
 0xefa   :  { %v5018_v50 = vmul.f32 %v4955_v56, %v16895_v13  ;;  %v4957_v7 = vpop.f32.mrb[173].mxu0  ;;  %16903 = vst [vmem:[#allocation27_spill] sm:$0xff] %v14806_v61  ;;  %v14809_v28 = vpop.f32.mrb[241].mxu1 }
 0xefb   :  { %v5019_v11 = vmul.f32 %v4957_v7, %v16896_v25  ;;  %16904 = vst [vmem:[#allocation28_spill] sm:$0xff] %v14809_v28 }
 0xefc   :  { %v5026_v19 = vadd.f32 %v5018_v50, %v14473_v31  ;;  %v16905_v31 = vld [vmem:[#allocation141_spill] sm:$0xff] }
 0xefd   :  { %v5027_v55 = vadd.f32 %v5019_v11, %v14477_v57  ;;  %v4961_v0 = vpop.f32.mrb[174].mxu0  ;;  %v14814_v11 = vpop.f32.mrb[242].mxu1 }
 0xefe   :  { %v5020_v9 = vmul.f32 %v4961_v0, %v16895_v13  ;;  %v4963_v29 = vpop.f32.mrb[175].mxu0  ;;  %16907 = vst [vmem:[#allocation29_spill] sm:$0xff] %v14814_v11  ;;  %v14816_v13 = vpop.f32.mrb[243].mxu1 }
 0xeff   :  { %v5021_v59 = vmul.f32 %v4963_v29, %v16896_v25  ;;  %16908 = vst [vmem:[#allocation30_spill] sm:$0xff] %v14816_v13  ;;  %v14820_v28 = vpop.f32.mrb[244].mxu1 }
 0xf00   :  { %v5028_v56 = vadd.f32 %v5020_v9, %v14484_v60  ;;  %16909 = vst [vmem:[#allocation31_spill] sm:$0xff] %v14820_v28 }
 0xf01   :  { %v5029_v7 = vadd.f32 %v5021_v59, %v14488_v15  ;;  %v4967_v1 = vpop.f32.mrb[176].mxu0  ;;  %v14822_v59 = vpop.f32.mrb[245].mxu1 }
 0xf02   :  { %v5030_v50 = vmul.f32 %v4967_v1, %v16905_v31  ;;  %v4969_v12 = vpop.f32.mrb[177].mxu0  ;;  %16910 = vst [vmem:[#allocation32_spill] sm:$0xff] %v14822_v59 }
 0xf03   :  { %v5031_v57 = vmul.f32 %v4969_v12, %v16906_v16 }
 0xf04   :  { %v5038_v0 = vadd.f32 %v5030_v50, %v5022_v49  ;;  %v14826_v50 = vpop.f32.mrb[246].mxu1 }
 0xf05   :  { %v5039_v25 = vadd.f32 %v5031_v57, %v5023_v4  ;;  %v4973_v29 = vpop.f32.mrb[178].mxu0  ;;  %16911 = vst [vmem:[#allocation33_spill] sm:$0xff] %v14826_v50  ;;  %v14828_v57 = vpop.f32.mrb[247].mxu1  ;;  %v16915_v50 = vld [vmem:[#allocation146_spill] sm:$0xff] }
 0xf06   :  { %v5032_v61 = vmul.f32 %v4973_v29, %v16905_v31  ;;  %v4975_v60 = vpop.f32.mrb[179].mxu0  ;;  %16912 = vst [vmem:[#allocation34_spill] sm:$0xff] %v14828_v57  ;;  %v16916_v57 = vld [vmem:[#allocation147_spill] sm:$0xff] }
 0xf07   :  { %v5033_v9 = vmul.f32 %v4975_v60, %v16906_v16 }
 0xf08   :  { %v5040_v15 = vadd.f32 %v5032_v61, %v5024_v20  ;;  %v14832_v61 = vpop.f32.mrb[248].mxu1 }
 0xf09   :  { %v5041_v1 = vadd.f32 %v5033_v9, %v5025_v37  ;;  %v4979_v36 = vpop.f32.mrb[180].mxu0  ;;  %16913 = vst [vmem:[#allocation35_spill] sm:$0xff] %v14832_v61 }
 0xf0a   :  { %v5034_v12 = vmul.f32 %v4979_v36, %v16905_v31  ;;  %v4981_v11 = vpop.f32.mrb[181].mxu0  ;;  %v14836_v36 = vpop.f32.mrb[249].mxu1 }
 0xf0b   :  { %v5035_v49 = vmul.f32 %v4981_v11, %v16906_v16  ;;  %16914 = vst [vmem:[#allocation36_spill] sm:$0xff] %v14836_v36 }
 0xf0c   :  { %v5042_v4 = vadd.f32 %v5034_v12, %v5026_v19 }
 0xf0d   :  { %v5043_v29 = vadd.f32 %v5035_v49, %v5027_v55  ;;  %v4985_v13 = vpop.f32.mrb[182].mxu0  ;;  %v14842_v49 = vpop.f32.mrb[250].mxu1 }
 0xf0e   :  { %v5036_v60 = vmul.f32 %v4985_v13, %v16905_v31  ;;  %v4987_v28 = vpop.f32.mrb[183].mxu0  ;;  %16917 = vst [vmem:[#allocation37_spill] sm:$0xff] %v14842_v49  ;;  %v16918_v31 = vld [vmem:[#allocation151_spill] sm:$0xff]  ;;  %v5231_v49 = vmul.f32 %v14596_v17, %v16922_v33 }
 0xf0f   :  { %v5037_v20 = vmul.f32 %v4987_v28, %v16906_v16  ;;  %v5199_v13 = vmul.f32 %v14527_v39, %v16918_v31  ;;  %v14846_v28 = vpop.f32.mrb[251].mxu1  ;;  %v5216_v39 = vmul.f32 %v14563_v44, %v16923_v30 }
 0xf10   :  { %v14834_v37 = vadd.f32 %v5036_v60, %v5028_v56  ;;  %16919 = vst [vmem:[#allocation38_spill] sm:$0xff] %v14846_v28  ;;  %v16920_v56 = vld [vmem:[#allocation155_spill] sm:$0xff]  ;;  %v16924_v28 = vld [vmem:[#allocation56_spill] sm:$0xff] }
 0xf11   :  { %v14838_v9 = vadd.f32 %v5037_v20, %v5029_v7  ;;  %v4991_v11 = vpop.f32.mrb[184].mxu0  ;;  %v5200_v60 = vmul.f32 %v14529_v46, %v16920_v56  ;;  %v16921_v20 = vld [vmem:[#allocation160_spill] sm:$0xff]  ;;  %v5232_v46 = vmul.f32 %v14599_v27, %v16924_v28 }
 0xf12   :  { %v5046_v19 = vmul.f32 %v4991_v11, %v16915_v50  ;;  %v4993_v12 = vpop.f32.mrb[185].mxu0  ;;  %v5215_v61 = vmul.f32 %v14560_v22, %v16921_v20  ;;  %v5201_v22 = vmul.f32 %v14534_v10, %v16918_v31  ;;  %v5217_v44 = vmul.f32 %v14569_v54, %v16921_v20 }
 0xf13   :  { %v5047_v55 = vmul.f32 %v4993_v12, %v16916_v57  ;;  %v5234_v54 = vmul.f32 %v14607_v21, %v16924_v28 }
 0xf14   :  { %v5054_v16 = vadd.f32 %v5046_v19, %v5038_v0 }
 0xf15   :  { %v5055_v36 = vadd.f32 %v5047_v55, %v5039_v25  ;;  %v4997_v7 = vpop.f32.mrb[186].mxu0  ;;  %v14860_v25 = vpop.f32.mrb[252].mxu1  ;;  %v5202_v55 = vmul.f32 %v14536_v47, %v16920_v56  ;;  %v5233_v47 = vmul.f32 %v14605_v52, %v16922_v33  ;;  %v5219_v52 = vmul.f32 %v14578_v3, %v16921_v20 }
 0xf16   :  { %v5207_v11 = vadd.f32 %v5199_v13, %v5054_v16  ;;  %v5048_v59 = vmul.f32 %v4997_v7, %v16915_v50  ;;  %v4999_v12 = vpop.f32.mrb[187].mxu0  ;;  %16925 = vst [vmem:[#allocation5_spill] sm:$0xff] %v14860_v25  ;;  %v14866_v17 = vpop.f32.mrb[253].mxu1  ;;  %v5236_v3 = vmul.f32 %v14615_v5, %v16924_v28 }
 0xf17   :  { %v5208_v0 = vadd.f32 %v5200_v60, %v5055_v36  ;;  %v5049_v19 = vmul.f32 %v4999_v12, %v16916_v57  ;;  %v5218_v36 = vmul.f32 %v14572_v62, %v16923_v30  ;;  %v5203_v62 = vmul.f32 %v14542_v2, %v16918_v31 }
 0xf18   :  { %v5056_v13 = vadd.f32 %v5048_v59, %v5040_v15  ;;  %v5223_v16 = vadd.f32 %v5215_v61, %v5207_v11  ;;  %v14878_v11 = vpop.f32.mrb[254].mxu1 }
 0xf19   :  { %v5057_v60 = vadd.f32 %v5049_v19, %v5041_v1  ;;  %v5224_v27 = vadd.f32 %v5216_v39, %v5208_v0  ;;  %v5003_v7 = vpop.f32.mrb[188].mxu0  ;;  %v5204_v1 = vmul.f32 %v14545_v43, %v16920_v56  ;;  %v14884_v0 = vpop.f32.mrb[255].mxu1  ;;  %v5235_v43 = vmul.f32 %v14613_v14, %v16922_v33 }
 0xf1a   :  { %v5209_v12 = vadd.f32 %v5201_v22, %v5056_v13  ;;  %v5239_v25 = vadd.f32 %v5231_v49, %v5223_v16  ;;  %v5050_v10 = vmul.f32 %v5003_v7, %v16915_v50  ;;  %v5005_v48 = vpop.f32.mrb[189].mxu0  ;;  %v5221_v14 = vmul.f32 %v14587_v45, %v16921_v20  ;;  %v16928_v45 = vld [vmem:[#allocation157_spill] sm:$0xff] }
 0xf1b   :  { %v5210_v15 = vadd.f32 %v5202_v55, %v5057_v60  ;;  %v5240_v59 = vadd.f32 %v5232_v46, %v5224_v27  ;;  %v5051_v61 = vmul.f32 %v5005_v48, %v16916_v57  ;;  %v5220_v48 = vmul.f32 %v14581_v34, %v16923_v30  ;;  %v14896_v60 = vpop.f32.mrb[0].mxu1 }
 0xf1c   :  { %v5058_v49 = vadd.f32 %v5050_v10, %v5042_v4  ;;  %v5225_v39 = vadd.f32 %v5217_v44, %v5209_v12  ;;  %v5205_v34 = vmul.f32 %v14551_v8, %v16918_v31  ;;  %v14903_v27 = vpop.f32.mrb[1].mxu1  ;;  %v16926_v31 = vld [vmem:[#allocation62_spill] sm:$0xff]  ;;  %v5238_v20 = vmul.f32 %v16928_v45, %v16924_v28 }
 0xf1d   :  { %v5059_v19 = vadd.f32 %v5051_v61, %v5043_v29  ;;  %v5226_v21 = vadd.f32 %v5218_v36, %v5210_v15  ;;  %v5009_v46 = vpop.f32.mrb[190].mxu0  ;;  %v5206_v29 = vmul.f32 %v14554_v24, %v16920_v56  ;;  %v5237_v24 = vmul.f32 %v14620_v18, %v16922_v33  ;;  %v16927_v61 = vld [vmem:[#allocation63_spill] sm:$0xff] }
 0xf1e   :  { %v5211_v22 = vadd.f32 %v5203_v62, %v5058_v49  ;;  %v5241_v55 = vadd.f32 %v5233_v47, %v5225_v39  ;;  %v5052_v2 = vmul.f32 %v5009_v46, %v16915_v50  ;;  %v5011_v13 = vpop.f32.mrb[191].mxu0 }
 0xf1f   :  { %v5212_v4 = vadd.f32 %v5204_v1, %v5059_v19  ;;  %v5242_v16 = vadd.f32 %v5234_v54, %v5226_v21  ;;  %v5053_v44 = vmul.f32 %v5011_v13, %v16916_v57  ;;  %v5222_v57 = vmul.f32 %v14590_v32, %v16923_v30  ;;  %v14916_v32 = vpop.f32.mrb[2].mxu1 }
 0xf20   :  { %v5060_v50 = vadd.f32 %v5052_v2, %v14834_v37  ;;  %v5227_v36 = vadd.f32 %v5219_v52, %v5211_v22  ;;  %v14918_v62 = vpop.f32.mrb[3].mxu1 }
 0xf21   :  { %v5061_v5 = vadd.f32 %v5053_v44, %v14838_v9  ;;  %v5228_v7 = vadd.f32 %v5220_v48, %v5212_v4  ;;  %v5313_v12 = vpop.f32.mrb[192].mxu0  ;;  %v14922_v21 = vpop.f32.mrb[4].mxu1 }
 0xf22   :  { %v5213_v10 = vadd.f32 %v5205_v34, %v5060_v50  ;;  %v5243_v8 = vadd.f32 %v5235_v43, %v5227_v36  ;;  %v5384_v47 = vmul.f32 %v5313_v12, %v16926_v31  ;;  %v5315_v37 = vpop.f32.mrb[193].mxu0  ;;  %v14924_v28 = vpop.f32.mrb[5].mxu1 }
 0xf23   :  { %v5214_v56 = vadd.f32 %v5206_v29, %v5061_v5  ;;  %v5244_v15 = vadd.f32 %v5236_v3, %v5228_v7  ;;  %v5385_v54 = vmul.f32 %v5315_v37, %v16927_v61  ;;  %v14928_v43 = vpop.f32.mrb[6].mxu1  ;;  %v16929_v7 = vld [vmem:[#allocation70_spill] sm:$0xff] }
 0xf24   :  { %v5392_v30 = vadd.f32 %v5384_v47, %v5239_v25  ;;  %v5229_v9 = vadd.f32 %v5221_v14, %v5213_v10  ;;  %v14930_v44 = vpop.f32.mrb[7].mxu1 }
 0xf25   :  { %v5393_v1 = vadd.f32 %v5385_v54, %v5240_v59  ;;  %v5230_v49 = vadd.f32 %v5222_v57, %v5214_v56  ;;  %v5319_v39 = vpop.f32.mrb[194].mxu0  ;;  %v14934_v36 = vpop.f32.mrb[8].mxu1 }
 0xf26   :  { %v5245_v52 = vadd.f32 %v5237_v24, %v5229_v9  ;;  %v5386_v18 = vmul.f32 %v5319_v39, %v16926_v31  ;;  %v5321_v33 = vpop.f32.mrb[195].mxu0  ;;  %v14936_v14 = vpop.f32.mrb[9].mxu1 }
 0xf27   :  { %v5246_v48 = vadd.f32 %v5238_v20, %v5230_v49  ;;  %v5387_v19 = vmul.f32 %v5321_v33, %v16927_v61  ;;  %v14940_v24 = vpop.f32.mrb[10].mxu1 }
 0xf28   :  { %v5394_v46 = vadd.f32 %v5386_v18, %v5241_v55  ;;  %v14942_v56 = vpop.f32.mrb[11].mxu1 }
 0xf29   :  { %v5395_v22 = vadd.f32 %v5387_v19, %v5242_v16  ;;  %v5325_v25 = vpop.f32.mrb[196].mxu0 }
 0xf2a   :  { %v5388_v2 = vmul.f32 %v5325_v25, %v16926_v31  ;;  %v5327_v13 = vpop.f32.mrb[197].mxu0 }
 0xf2b   :  { %v5389_v59 = vmul.f32 %v5327_v13, %v16927_v61 }
 0xf2c   :  { %v5396_v4 = vadd.f32 %v5388_v2, %v5243_v8  ;;  %v16930_v8 = vld [vmem:[#allocation71_spill] sm:$0xff] }
 0xf2d   :  { %v5397_v3 = vadd.f32 %v5389_v59, %v5244_v15  ;;  %v5331_v34 = vpop.f32.mrb[198].mxu0 }
 0xf2e   :  { %v5390_v29 = vmul.f32 %v5331_v34, %v16926_v31  ;;  %v5333_v50 = vpop.f32.mrb[199].mxu0  ;;  %v16931_v34 = vld [vmem:[#allocation64_spill] sm:$0xff] }
 0xf2f   :  { %v5391_v55 = vmul.f32 %v5333_v50, %v16927_v61 }
 0xf30   :  { %v5398_v16 = vadd.f32 %v5390_v29, %v5245_v52  ;;  %v16932_v29 = vld [vmem:[#allocation65_spill] sm:$0xff] }
 0xf31   :  { %v5399_v57 = vadd.f32 %v5391_v55, %v5246_v48  ;;  %v5337_v5 = vpop.f32.mrb[200].mxu0  ;;  %v16933_v55 = vld [vmem:[#allocation74_spill] sm:$0xff] }
 0xf32   :  { %v5400_v12 = vmul.f32 %v5337_v5, %v16929_v7  ;;  %v5339_v10 = vpop.f32.mrb[201].mxu0  ;;  %v16934_v5 = vld [vmem:[#allocation121_spill] sm:$0xff] }
 0xf33   :  { %v5401_v47 = vmul.f32 %v5339_v10, %v16930_v8 }
 0xf34   :  { %v5408_v37 = vadd.f32 %v5400_v12, %v5392_v30  ;;  %v5569_v12 = vmul.f32 %v16934_v5, %v16933_v55 }
 0xf35   :  { %v5409_v31 = vadd.f32 %v5401_v47, %v5393_v1  ;;  %v5343_v15 = vpop.f32.mrb[202].mxu0 }
 0xf36   :  { %v5402_v61 = vmul.f32 %v5343_v15, %v16929_v7  ;;  %v5345_v54 = vpop.f32.mrb[203].mxu0  ;;  %v16936_v15 = vld [vmem:[#allocation57_spill] sm:$0xff] }
 0xf37   :  { %v5403_v45 = vmul.f32 %v5345_v54, %v16930_v8  ;;  %v16937_v54 = vld [vmem:[#allocation159_spill] sm:$0xff] }
 0xf38   :  { %v5410_v20 = vadd.f32 %v5402_v61, %v5394_v46 }
 0xf39   :  { %v5411_v9 = vadd.f32 %v5403_v45, %v5395_v22  ;;  %v5349_v49 = vpop.f32.mrb[204].mxu0  ;;  %v5601_v45 = vmul.f32 %v14699_v35, %v16937_v54  ;;  %v5587_v35 = vmul.f32 %v14672_v41, %v16936_v15 }
 0xf3a   :  { %v5404_v39 = vmul.f32 %v5349_v49, %v16929_v7  ;;  %v5351_v52 = vpop.f32.mrb[205].mxu0  ;;  %v16938_v49 = vld [vmem:[#allocation58_spill] sm:$0xff] }
 0xf3b   :  { %v5405_v18 = vmul.f32 %v5351_v52, %v16930_v8 }
 0xf3c   :  { %v5412_v33 = vadd.f32 %v5404_v39, %v5396_v4  ;;  %v16935_v4 = vld [vmem:[#allocation75_spill] sm:$0xff]  ;;  %v5586_v39 = vmul.f32 %v14662_v26, %v16938_v49  ;;  %v5588_v26 = vmul.f32 %v14675_v58, %v16938_v49  ;;  %v16941_v58 = vld [vmem:[#allocation138_spill] sm:$0xff] }
 0xf3d   :  { %v5413_v48 = vadd.f32 %v5405_v18, %v5397_v3  ;;  %v5355_v30 = vpop.f32.mrb[206].mxu0  ;;  %v5570_v3 = vmul.f32 %v14629_v38, %v16935_v4  ;;  %v16939_v18 = vld [vmem:[#allocation67_spill] sm:$0xff] }
 0xf3e   :  { %v5406_v19 = vmul.f32 %v5355_v30, %v16929_v7  ;;  %v5357_v1 = vpop.f32.mrb[207].mxu0  ;;  %v5602_v38 = vmul.f32 %v14702_v23, %v16939_v18  ;;  %v5604_v41 = vmul.f32 %v14711_v63, %v16939_v18 }
 0xf3f   :  { %v5407_v25 = vmul.f32 %v5357_v1, %v16930_v8  ;;  %v5585_v8 = vmul.f32 %v14659_v42, %v16936_v15  ;;  %v16940_v42 = vld [vmem:[#allocation122_spill] sm:$0xff] }
 0xf40   :  { %v5414_v2 = vadd.f32 %v5406_v19, %v5398_v16  ;;  %v5572_v30 = vmul.f32 %v16940_v42, %v16935_v4 }
 0xf41   :  { %v5415_v13 = vadd.f32 %v5407_v25, %v5399_v57  ;;  %v5361_v59 = vpop.f32.mrb[208].mxu0 }
 0xf42   :  { %v5416_v46 = vmul.f32 %v5361_v59, %v16931_v34  ;;  %v5363_v22 = vpop.f32.mrb[209].mxu0 }
 0xf43   :  { %v5417_v50 = vmul.f32 %v5363_v22, %v16932_v29 }
 0xf44   :  { %v5424_v10 = vadd.f32 %v5416_v46, %v5408_v37 }
 0xf45   :  { %v5425_v47 = vadd.f32 %v5417_v50, %v5409_v31  ;;  %v5367_v7 = vpop.f32.mrb[210].mxu0  ;;  %v5571_v31 = vmul.f32 %v14634_v51, %v16933_v55  ;;  %v5603_v51 = vmul.f32 %v14708_v6, %v16937_v54  ;;  %v16942_v6 = vld [vmem:[#allocation61_spill] sm:$0xff] }
 0xf46   :  { %v5577_v16 = vadd.f32 %v5569_v12, %v5424_v10  ;;  %v5418_v57 = vmul.f32 %v5367_v7, %v16931_v34  ;;  %v5369_v61 = vpop.f32.mrb[211].mxu0 }
 0xf47   :  { %v5578_v52 = vadd.f32 %v5570_v3, %v5425_v47  ;;  %v5419_v37 = vmul.f32 %v5369_v61, %v16932_v29  ;;  %v5574_v3 = vmul.f32 %v14644_v40, %v16935_v4 }
 0xf48   :  { %v5426_v19 = vadd.f32 %v5418_v57, %v5410_v20  ;;  %v5593_v1 = vadd.f32 %v5585_v8, %v5577_v16  ;;  %v5589_v8 = vmul.f32 %v14681_v53, %v16936_v15  ;;  %v5590_v16 = vmul.f32 %v16942_v6, %v16938_v49  ;;  %v16944_v53 = vld [vmem:[#allocation99_spill] sm:$0xff] }
 0xf49   :  { %v5427_v25 = vadd.f32 %v5419_v37, %v5411_v9  ;;  %v5594_v59 = vadd.f32 %v5586_v39, %v5578_v52  ;;  %v5373_v46 = vpop.f32.mrb[212].mxu0  ;;  %v5573_v9 = vmul.f32 %v16941_v58, %v16933_v55 }
 0xf4a   :  { %v5579_v22 = vadd.f32 %v5571_v31, %v5426_v19  ;;  %v5609_v50 = vadd.f32 %v5601_v45, %v5593_v1  ;;  %v5420_v23 = vmul.f32 %v5373_v46, %v16931_v34  ;;  %v5375_v5 = vpop.f32.mrb[213].mxu0  ;;  %v16945_v19 = vld [vmem:[#allocation140_spill] sm:$0xff]  ;;  %v16946_v1 = vld [vmem:[#allocation162_spill] sm:$0xff] }
 0xf4b   :  { %v5580_v12 = vadd.f32 %v5572_v30, %v5427_v25  ;;  %v5610_v20 = vadd.f32 %v5602_v38, %v5594_v59  ;;  %v5421_v10 = vmul.f32 %v5375_v5, %v16932_v29  ;;  %v16943_v38 = vld [vmem:[#allocation101_spill] sm:$0xff]  ;;  %v5606_v30 = vmul.f32 %v16944_v53, %v16939_v18  ;;  %v16948_v46 = vld [vmem:[#allocation72_spill] sm:$0xff] }
 0xf4c   :  { %v5428_v47 = vadd.f32 %v5420_v23, %v5412_v33  ;;  %v5595_v7 = vadd.f32 %v5587_v35, %v5579_v22  ;;  %v5605_v31 = vmul.f32 %v16943_v38, %v16937_v54  ;;  %v5576_v35 = vmul.f32 %v16946_v1, %v16935_v4 }
 0xf4d   :  { %v5429_v57 = vadd.f32 %v5421_v10, %v5413_v48  ;;  %v5596_v61 = vadd.f32 %v5588_v26, %v5580_v12  ;;  %v5379_v45 = vpop.f32.mrb[214].mxu0  ;;  %v5575_v48 = vmul.f32 %v16945_v19, %v16933_v55  ;;  %v5592_v22 = vmul.f32 %v16948_v46, %v16938_v49  ;;  %v16949_v10 = vld [vmem:[#allocation51_spill] sm:$0xff]  ;;  %v16950_v55 = vld [vmem:[#allocation108_spill] sm:$0xff] }
 0xf4e   :  { %v5581_v39 = vadd.f32 %v5573_v9, %v5428_v47  ;;  %v5611_v52 = vadd.f32 %v5603_v51, %v5595_v7  ;;  %v5422_v63 = vmul.f32 %v5379_v45, %v16931_v34  ;;  %v5381_v37 = vpop.f32.mrb[215].mxu0  ;;  %v16947_v34 = vld [vmem:[#allocation69_spill] sm:$0xff]  ;;  %v5607_v58 = vmul.f32 %v16950_v55, %v16937_v54 }
 0xf4f   :  { %v5582_v40 = vadd.f32 %v5574_v3, %v5429_v57  ;;  %v5612_v33 = vadd.f32 %v5604_v41, %v5596_v61  ;;  %v5423_v42 = vmul.f32 %v5381_v37, %v16932_v29  ;;  %v5591_v59 = vmul.f32 %v16947_v34, %v16936_v15  ;;  %v16951_v3 = vld [vmem:[#allocation68_spill] sm:$0xff]  ;;  %v16952_v15 = vld [vmem:[#allocation106_spill] sm:$0xff] }
 0xf50   :  { %v5430_v26 = vadd.f32 %v5422_v63, %v5414_v2  ;;  %v5597_v25 = vadd.f32 %v5589_v8, %v5581_v39  ;;  %v5608_v7 = vmul.f32 %v16952_v15, %v16939_v18 }
 0xf51   :  { %v5431_v23 = vadd.f32 %v5423_v42, %v5415_v13  ;;  %v5598_v5 = vadd.f32 %v5590_v16, %v5582_v40  ;;  %v5683_v29 = vpop.f32.mrb[216].mxu0 }
 0xf52   :  { %v5583_v51 = vadd.f32 %v5575_v48, %v5430_v26  ;;  %v5613_v12 = vadd.f32 %v5605_v31, %v5597_v25  ;;  %v5754_v41 = vmul.f32 %v5683_v29, %v16949_v10  ;;  %v5685_v9 = vpop.f32.mrb[217].mxu0  ;;  %v16953_v26 = vld [vmem:[#allocation76_spill] sm:$0xff]  ;;  %v16954_v25 = vld [vmem:[#allocation77_spill] sm:$0xff] }
 0xf53   :  { %v5584_v4 = vadd.f32 %v5576_v35, %v5431_v23  ;;  %v5614_v2 = vadd.f32 %v5606_v30, %v5598_v5  ;;  %v5755_v47 = vmul.f32 %v5685_v9, %v16951_v3 }
 0xf54   :  { %v5762_v8 = vadd.f32 %v5754_v41, %v5609_v50  ;;  %v5599_v49 = vadd.f32 %v5591_v59, %v5583_v51 }
 0xf55   :  { %v5763_v13 = vadd.f32 %v5755_v47, %v5610_v20  ;;  %v5600_v6 = vadd.f32 %v5592_v22, %v5584_v4  ;;  %v5689_v16 = vpop.f32.mrb[218].mxu0 }
 0xf56   :  { %v5615_v57 = vadd.f32 %v5607_v58, %v5599_v49  ;;  %v5756_v61 = vmul.f32 %v5689_v16, %v16949_v10  ;;  %v5691_v45 = vpop.f32.mrb[219].mxu0 }
 0xf57   :  { %v5616_v39 = vadd.f32 %v5608_v7, %v5600_v6  ;;  %v5757_v54 = vmul.f32 %v5691_v45, %v16951_v3  ;;  %v16957_v45 = vld [vmem:[#allocation82_spill] sm:$0xff] }
 0xf58   :  { %v5764_v63 = vadd.f32 %v5756_v61, %v5611_v52 }
 0xf59   :  { %v5765_v37 = vadd.f32 %v5757_v54, %v5612_v33  ;;  %v5695_v38 = vpop.f32.mrb[220].mxu0 }
 0xf5a   :  { %v5758_v31 = vmul.f32 %v5695_v38, %v16949_v10  ;;  %v5697_v40 = vpop.f32.mrb[221].mxu0  ;;  %v16960_v38 = vld [vmem:[#allocation112_spill] sm:$0xff] }
 0xf5b   :  { %v5759_v18 = vmul.f32 %v5697_v40, %v16951_v3 }
 0xf5c   :  { %v5766_v50 = vadd.f32 %v5758_v31, %v5613_v12 }
 0xf5d   :  { %v5767_v42 = vadd.f32 %v5759_v18, %v5614_v2  ;;  %v5701_v20 = vpop.f32.mrb[222].mxu0 }
 0xf5e   :  { %v5760_v53 = vmul.f32 %v5701_v20, %v16949_v10  ;;  %v5703_v30 = vpop.f32.mrb[223].mxu0 }
 0xf5f   :  { %v5761_v19 = vmul.f32 %v5703_v30, %v16951_v3 }
 0xf60   :  { %v5768_v48 = vadd.f32 %v5760_v53, %v5615_v57  ;;  %v16956_v57 = vld [vmem:[#allocation81_spill] sm:$0xff] }
 0xf61   :  { %v5769_v1 = vadd.f32 %v5761_v19, %v5616_v39  ;;  %v5707_v35 = vpop.f32.mrb[224].mxu0  ;;  %v16958_v39 = vld [vmem:[#allocation114_spill] sm:$0xff] }
 0xf62   :  { %v5770_v52 = vmul.f32 %v5707_v35, %v16953_v26  ;;  %v5709_v33 = vpop.f32.mrb[225].mxu0  ;;  %v5939_v54 = vmul.f32 %v16958_v39, %v16957_v45 }
 0xf63   :  { %v5771_v34 = vmul.f32 %v5709_v33, %v16954_v25 }
 0xf64   :  { %v5778_v59 = vadd.f32 %v5770_v52, %v5762_v8  ;;  %v16966_v52 = vld [vmem:[#allocation144_spill] sm:$0xff] }
 0xf65   :  { %v5779_v46 = vadd.f32 %v5771_v34, %v5763_v13  ;;  %v5713_v22 = vpop.f32.mrb[226].mxu0  ;;  %v16955_v13 = vld [vmem:[#allocation80_spill] sm:$0xff] }
 0xf66   :  { %v5772_v23 = vmul.f32 %v5713_v22, %v16953_v26  ;;  %v5715_v5 = vpop.f32.mrb[227].mxu0  ;;  %v16968_v22 = vld [vmem:[#allocation24_spill] sm:$0xff] }
 0xf67   :  { %v5773_v29 = vmul.f32 %v5715_v5, %v16954_v25 }
 0xf68   :  { %v5780_v51 = vadd.f32 %v5772_v23, %v5764_v63  ;;  %v16969_v23 = vld [vmem:[#allocation120_spill] sm:$0xff] }
 0xf69   :  { %v5781_v12 = vadd.f32 %v5773_v29, %v5765_v37  ;;  %v5719_v10 = vpop.f32.mrb[228].mxu0  ;;  %v16959_v37 = vld [vmem:[#allocation83_spill] sm:$0xff]  ;;  %v5941_v5 = vmul.f32 %v16969_v23, %v16957_v45  ;;  %v16970_v29 = vld [vmem:[#allocation118_spill] sm:$0xff] }
 0xf6a   :  { %v5774_v41 = vmul.f32 %v5719_v10, %v16953_v26  ;;  %v5721_v55 = vpop.f32.mrb[229].mxu0  ;;  %v5940_v31 = vmul.f32 %v16960_v38, %v16959_v37  ;;  %v5942_v10 = vmul.f32 %v16970_v29, %v16959_v37 }
 0xf6b   :  { %v5775_v58 = vmul.f32 %v5721_v55, %v16954_v25 }
 0xf6c   :  { %v5782_v9 = vadd.f32 %v5774_v41, %v5766_v50  ;;  %v16961_v50 = vld [vmem:[#allocation90_spill] sm:$0xff] }
 0xf6d   :  { %v5783_v4 = vadd.f32 %v5775_v58, %v5767_v42  ;;  %v5725_v2 = vpop.f32.mrb[230].mxu0  ;;  %v16962_v42 = vld [vmem:[#allocation148_spill] sm:$0xff]  ;;  %v16971_v58 = vld [vmem:[#allocation158_spill] sm:$0xff] }
 0xf6e   :  { %v5776_v3 = vmul.f32 %v5725_v2, %v16953_v26  ;;  %v5727_v47 = vpop.f32.mrb[231].mxu0  ;;  %v5955_v20 = vmul.f32 %v16962_v42, %v16961_v50  ;;  %v16965_v26 = vld [vmem:[#allocation91_spill] sm:$0xff]  ;;  %v5957_v2 = vmul.f32 %v16971_v58, %v16961_v50 }
 0xf6f   :  { %v5777_v15 = vmul.f32 %v5727_v47, %v16954_v25  ;;  %v5956_v33 = vmul.f32 %v16966_v52, %v16965_v26 }
 0xf70   :  { %v5784_v7 = vadd.f32 %v5776_v3, %v5768_v48  ;;  %v16963_v48 = vld [vmem:[#allocation12_spill] sm:$0xff] }
 0xf71   :  { %v5785_v8 = vadd.f32 %v5777_v15, %v5769_v1  ;;  %v5731_v49 = vpop.f32.mrb[232].mxu0  ;;  %v16964_v1 = vld [vmem:[#allocation23_spill] sm:$0xff]  ;;  %v16972_v3 = vld [vmem:[#allocation156_spill] sm:$0xff] }
 0xf72   :  { %v5786_v6 = vmul.f32 %v5731_v49, %v16955_v13  ;;  %v5733_v16 = vpop.f32.mrb[233].mxu0  ;;  %v5971_v35 = vmul.f32 %v16964_v1, %v16963_v48  ;;  %v5958_v47 = vmul.f32 %v16972_v3, %v16965_v26  ;;  %v16980_v3 = vld [vmem:[#allocation28_spill] sm:$0xff] }
 0xf73   :  { %v5787_v61 = vmul.f32 %v5733_v16, %v16956_v57 }
 0xf74   :  { %v5794_v63 = vadd.f32 %v5786_v6, %v5778_v59  ;;  %v16967_v59 = vld [vmem:[#allocation100_spill] sm:$0xff] }
 0xf75   :  { %v5795_v40 = vadd.f32 %v5787_v61, %v5779_v46  ;;  %v5737_v18 = vpop.f32.mrb[234].mxu0  ;;  %v5972_v46 = vmul.f32 %v16968_v22, %v16967_v59 }
 0xf76   :  { %v5947_v53 = vadd.f32 %v5939_v54, %v5794_v63  ;;  %v5788_v30 = vmul.f32 %v5737_v18, %v16955_v13  ;;  %v5739_v19 = vpop.f32.mrb[235].mxu0  ;;  %v16973_v63 = vld [vmem:[#allocation25_spill] sm:$0xff]  ;;  %v16974_v18 = vld [vmem:[#allocation26_spill] sm:$0xff] }
 0xf77   :  { %v5948_v25 = vadd.f32 %v5940_v31, %v5795_v40  ;;  %v5789_v34 = vmul.f32 %v5739_v19, %v16956_v57  ;;  %v5973_v38 = vmul.f32 %v16973_v63, %v16963_v48  ;;  %v5974_v42 = vmul.f32 %v16974_v18, %v16967_v59  ;;  %v16984_v63 = vld [vmem:[#allocation16_spill] sm:$0xff] }
 0xf78   :  { %v5796_v41 = vadd.f32 %v5788_v30, %v5780_v51  ;;  %v5963_v55 = vadd.f32 %v5955_v20, %v5947_v53  ;;  %v16975_v20 = vld [vmem:[#allocation126_spill] sm:$0xff]  ;;  %v16976_v53 = vld [vmem:[#allocation124_spill] sm:$0xff] }
 0xf79   :  { %v5797_v15 = vadd.f32 %v5789_v34, %v5781_v12  ;;  %v5964_v49 = vadd.f32 %v5956_v33, %v5948_v25  ;;  %v5743_v6 = vpop.f32.mrb[236].mxu0  ;;  %v5943_v12 = vmul.f32 %v16975_v20, %v16957_v45  ;;  %v5944_v30 = vmul.f32 %v16976_v53, %v16959_v37  ;;  %v16978_v33 = vld [vmem:[#allocation14_spill] sm:$0xff]  ;;  %v16985_v20 = vld [vmem:[#allocation85_spill] sm:$0xff] }
 0xf7a   :  { %v5949_v16 = vadd.f32 %v5941_v5, %v5796_v41  ;;  %v5979_v61 = vadd.f32 %v5971_v35, %v5963_v55  ;;  %v5790_v39 = vmul.f32 %v5743_v6, %v16955_v13  ;;  %v5745_v54 = vpop.f32.mrb[237].mxu0  ;;  %v16977_v35 = vld [vmem:[#allocation13_spill] sm:$0xff]  ;;  %v5960_v25 = vmul.f32 %v16978_v33, %v16965_v26  ;;  %v16979_v41 = vld [vmem:[#allocation27_spill] sm:$0xff] }
 0xf7b   :  { %v5950_v31 = vadd.f32 %v5942_v10, %v5797_v15  ;;  %v5980_v51 = vadd.f32 %v5972_v46, %v5964_v49  ;;  %v5791_v40 = vmul.f32 %v5745_v54, %v16956_v57  ;;  %v5959_v52 = vmul.f32 %v16977_v35, %v16961_v50  ;;  %v16981_v49 = vld [vmem:[#allocation136_spill] sm:$0xff] }
 0xf7c   :  { %v5798_v19 = vadd.f32 %v5790_v39, %v5782_v9  ;;  %v5965_v1 = vadd.f32 %v5957_v2, %v5949_v16  ;;  %v5975_v55 = vmul.f32 %v16979_v41, %v16963_v48  ;;  %v5976_v15 = vmul.f32 %v16980_v3, %v16967_v59 }
 0xf7d   :  { %v5799_v34 = vadd.f32 %v5791_v40, %v5783_v4  ;;  %v5966_v22 = vadd.f32 %v5958_v47, %v5950_v31  ;;  %v5749_v46 = vpop.f32.mrb[238].mxu0  ;;  %v5945_v4 = vmul.f32 %v16981_v49, %v16957_v45  ;;  %v16982_v47 = vld [vmem:[#allocation134_spill] sm:$0xff]  ;;  %v16986_v45 = vld [vmem:[#allocation29_spill] sm:$0xff] }
 0xf7e   :  { %v5951_v23 = vadd.f32 %v5943_v12, %v5798_v19  ;;  %v5981_v5 = vadd.f32 %v5973_v38, %v5965_v1  ;;  %v5792_v29 = vmul.f32 %v5749_v46, %v16955_v13  ;;  %v5751_v10 = vpop.f32.mrb[239].mxu0  ;;  %v5946_v6 = vmul.f32 %v16982_v47, %v16959_v37  ;;  %v16983_v13 = vld [vmem:[#allocation15_spill] sm:$0xff]  ;;  %v16987_v19 = vld [vmem:[#allocation86_spill] sm:$0xff] }
 0xf7f   :  { %v5952_v58 = vadd.f32 %v5944_v30, %v5799_v34  ;;  %v5982_v9 = vadd.f32 %v5974_v42, %v5966_v22  ;;  %v5793_v2 = vmul.f32 %v5751_v10, %v16956_v57  ;;  %v5961_v54 = vmul.f32 %v16983_v13, %v16961_v50  ;;  %v16988_v50 = vld [vmem:[#allocation30_spill] sm:$0xff] }
 0xf80   :  { %v5800_v16 = vadd.f32 %v5792_v29, %v5784_v7  ;;  %v5967_v39 = vadd.f32 %v5959_v52, %v5951_v23  ;;  %v5962_v38 = vmul.f32 %v16984_v63, %v16965_v26  ;;  %v5977_v53 = vmul.f32 %v16986_v45, %v16963_v48 }
 0xf81   :  { %v5801_v31 = vadd.f32 %v5793_v2, %v5785_v8  ;;  %v5968_v40 = vadd.f32 %v5960_v25, %v5952_v58  ;;  %v6053_v57 = vpop.f32.mrb[240].mxu0  ;;  %v5978_v35 = vmul.f32 %v16988_v50, %v16967_v59 }
 0xf82   :  { %v5953_v18 = vadd.f32 %v5945_v4, %v5800_v16  ;;  %v5983_v42 = vadd.f32 %v5975_v55, %v5967_v39  ;;  %v6124_v12 = vmul.f32 %v6053_v57, %v16985_v20  ;;  %v6055_v30 = vpop.f32.mrb[241].mxu0  ;;  %v16989_v16 = vld [vmem:[#allocation92_spill] sm:$0xff]  ;;  %v16990_v39 = vld [vmem:[#allocation93_spill] sm:$0xff] }
 0xf83   :  { %v5954_v37 = vadd.f32 %v5946_v6, %v5801_v31  ;;  %v5984_v7 = vadd.f32 %v5976_v15, %v5968_v40  ;;  %v6125_v1 = vmul.f32 %v6055_v30, %v16987_v19 }
 0xf84   :  { %v6132_v52 = vadd.f32 %v6124_v12, %v5979_v61  ;;  %v5969_v26 = vadd.f32 %v5961_v54, %v5953_v18 }
 0xf85   :  { %v6133_v8 = vadd.f32 %v6125_v1, %v5980_v51  ;;  %v5970_v33 = vadd.f32 %v5962_v38, %v5954_v37  ;;  %v6059_v25 = vpop.f32.mrb[242].mxu0 }
 0xf86   :  { %v5985_v34 = vadd.f32 %v5977_v53, %v5969_v26  ;;  %v6126_v22 = vmul.f32 %v6059_v25, %v16985_v20  ;;  %v6061_v46 = vpop.f32.mrb[243].mxu0 }
 0xf87   :  { %v5986_v23 = vadd.f32 %v5978_v35, %v5970_v33  ;;  %v6127_v48 = vmul.f32 %v6061_v46, %v16987_v19  ;;  %v16993_v46 = vld [vmem:[#allocation95_spill] sm:$0xff] }
 0xf88   :  { %v6134_v29 = vadd.f32 %v6126_v22, %v5981_v5 }
 0xf89   :  { %v6135_v10 = vadd.f32 %v6127_v48, %v5982_v9  ;;  %v6065_v41 = vpop.f32.mrb[244].mxu0 }
 0xf8a   :  { %v6128_v55 = vmul.f32 %v6065_v41, %v16985_v20  ;;  %v6067_v58 = vpop.f32.mrb[245].mxu0  ;;  %v16996_v41 = vld [vmem:[#allocation32_spill] sm:$0xff] }
 0xf8b   :  { %v6129_v59 = vmul.f32 %v6067_v58, %v16987_v19 }
 0xf8c   :  { %v6136_v61 = vadd.f32 %v6128_v55, %v5983_v42 }
 0xf8d   :  { %v6137_v2 = vadd.f32 %v6129_v59, %v5984_v7  ;;  %v6071_v51 = vpop.f32.mrb[246].mxu0 }
 0xf8e   :  { %v6130_v3 = vmul.f32 %v6071_v51, %v16985_v20  ;;  %v6073_v15 = vpop.f32.mrb[247].mxu0 }
 0xf8f   :  { %v6131_v49 = vmul.f32 %v6073_v15, %v16987_v19 }
 0xf90   :  { %v6138_v4 = vadd.f32 %v6130_v3, %v5985_v34  ;;  %v16992_v34 = vld [vmem:[#allocation103_spill] sm:$0xff] }
 0xf91   :  { %v6139_v47 = vadd.f32 %v6131_v49, %v5986_v23  ;;  %v6077_v6 = vpop.f32.mrb[248].mxu0  ;;  %v16994_v23 = vld [vmem:[#allocation31_spill] sm:$0xff] }
 0xf92   :  { %v6140_v5 = vmul.f32 %v6077_v6, %v16989_v16  ;;  %v6079_v9 = vpop.f32.mrb[249].mxu0  ;;  %v6309_v48 = vmul.f32 %v16994_v23, %v16993_v46  ;;  %v17000_v6 = vld [vmem:[#allocation87_spill] sm:$0xff] }
 0xf93   :  { %v6141_v13 = vmul.f32 %v6079_v9, %v16990_v39 }
 0xf94   :  { %v6148_v54 = vadd.f32 %v6140_v5, %v6132_v52 }
 0xf95   :  { %v6149_v63 = vadd.f32 %v6141_v13, %v6133_v8  ;;  %v6083_v38 = vpop.f32.mrb[250].mxu0  ;;  %v16991_v8 = vld [vmem:[#allocation102_spill] sm:$0xff] }
 0xf96   :  { %v6142_v31 = vmul.f32 %v6083_v38, %v16989_v16  ;;  %v6085_v40 = vpop.f32.mrb[251].mxu0  ;;  %v17003_v38 = vld [vmem:[#allocation34_spill] sm:$0xff] }
 0xf97   :  { %v6143_v57 = vmul.f32 %v6085_v40, %v16990_v39 }
 0xf98   :  { %v6150_v18 = vadd.f32 %v6142_v31, %v6134_v29 }
 0xf99   :  { %v6151_v42 = vadd.f32 %v6143_v57, %v6135_v10  ;;  %v6089_v20 = vpop.f32.mrb[252].mxu0  ;;  %v16995_v10 = vld [vmem:[#allocation96_spill] sm:$0xff] }
 0xf9a   :  { %v6144_v12 = vmul.f32 %v6089_v20, %v16989_v16  ;;  %v6091_v45 = vpop.f32.mrb[253].mxu0  ;;  %v6310_v55 = vmul.f32 %v16996_v41, %v16995_v10  ;;  %v6312_v31 = vmul.f32 %v17003_v38, %v16995_v10 }
 0xf9b   :  { %v6145_v53 = vmul.f32 %v6091_v45, %v16990_v39 }
 0xf9c   :  { %v6152_v30 = vadd.f32 %v6144_v12, %v6136_v61  ;;  %v16997_v61 = vld [vmem:[#allocation105_spill] sm:$0xff] }
 0xf9d   :  { %v6153_v37 = vadd.f32 %v6145_v53, %v6137_v2  ;;  %v6095_v7 = vpop.f32.mrb[254].mxu0  ;;  %v16998_v2 = vld [vmem:[#allocation5_spill] sm:$0xff] }
 0xf9e   :  { %v6146_v19 = vmul.f32 %v6095_v7, %v16989_v16  ;;  %v6097_v1 = vpop.f32.mrb[255].mxu0  ;;  %v6325_v51 = vmul.f32 %v16998_v2, %v16997_v61  ;;  %v6326_v16 = vmul.f32 %v14866_v17, %v17000_v6  ;;  %v6328_v17 = vmul.f32 %v14884_v0, %v17000_v6  ;;  %v17004_v0 = vld [vmem:[#allocation35_spill] sm:$0xff] }
 0xf9f   :  { %v6147_v50 = vmul.f32 %v6097_v1, %v16990_v39  ;;  %v17001_v39 = vld [vmem:[#allocation88_spill] sm:$0xff] }
 0xfa0   :  { %v6154_v35 = vadd.f32 %v6146_v19, %v6138_v4  ;;  %v16999_v4 = vld [vmem:[#allocation107_spill] sm:$0xff]  ;;  %v6342_v13 = vmul.f32 %v14924_v28, %v17001_v39 }
 0xfa1   :  { %v6155_v52 = vadd.f32 %v6147_v50, %v6139_v47  ;;  %v6101_v26 = vpop.f32.mrb[0].mxu0  ;;  %v6341_v47 = vmul.f32 %v14922_v21, %v16999_v4  ;;  %v6327_v21 = vmul.f32 %v14878_v11, %v16997_v61  ;;  %v6343_v1 = vmul.f32 %v14928_v43, %v16999_v4 }
 0xfa2   :  { %v6156_v33 = vmul.f32 %v6101_v26, %v16991_v8  ;;  %v6103_v25 = vpop.f32.mrb[1].mxu0  ;;  %v6344_v11 = vmul.f32 %v14930_v44, %v17001_v39  ;;  %v6330_v43 = vmul.f32 %v14903_v27, %v17000_v6  ;;  %v6346_v27 = vmul.f32 %v14936_v14, %v17001_v39 }
 0xfa3   :  { %v6157_v22 = vmul.f32 %v6103_v25, %v16992_v34  ;;  %v6332_v14 = vmul.f32 %v14918_v62, %v17000_v6 }
 0xfa4   :  { %v6164_v29 = vadd.f32 %v6156_v33, %v6148_v54  ;;  %v17002_v54 = vld [vmem:[#allocation33_spill] sm:$0xff]  ;;  %v17005_v33 = vld [vmem:[#allocation36_spill] sm:$0xff] }
 0xfa5   :  { %v6165_v58 = vadd.f32 %v6157_v22, %v6149_v63  ;;  %v6107_v59 = vpop.f32.mrb[2].mxu0  ;;  %v6311_v63 = vmul.f32 %v17002_v54, %v16993_v46  ;;  %v6314_v25 = vmul.f32 %v17005_v33, %v16995_v10 }
 0xfa6   :  { %v6317_v3 = vadd.f32 %v6309_v48, %v6164_v29  ;;  %v6158_v15 = vmul.f32 %v6107_v59, %v16991_v8  ;;  %v6109_v49 = vpop.f32.mrb[3].mxu0  ;;  %v6329_v48 = vmul.f32 %v14896_v60, %v16997_v61 }
 0xfa7   :  { %v6318_v5 = vadd.f32 %v6310_v55, %v6165_v58  ;;  %v6159_v9 = vmul.f32 %v6109_v49, %v16992_v34 }
 0xfa8   :  { %v6166_v40 = vadd.f32 %v6158_v15, %v6150_v18  ;;  %v6333_v57 = vadd.f32 %v6325_v51, %v6317_v3  ;;  %v6345_v51 = vmul.f32 %v14934_v36, %v16999_v4  ;;  %v6331_v36 = vmul.f32 %v14916_v32, %v16997_v61 }
 0xfa9   :  { %v6167_v20 = vadd.f32 %v6159_v9, %v6151_v42  ;;  %v6334_v12 = vadd.f32 %v6326_v16, %v6318_v5  ;;  %v6113_v45 = vpop.f32.mrb[4].mxu0  ;;  %v6313_v42 = vmul.f32 %v17004_v0, %v16993_v46  ;;  %v17007_v16 = vld [vmem:[#allocation38_spill] sm:$0xff]  ;;  %v17008_v0 = vmov 0.0  }
 0xfaa   :  { %v6319_v53 = vadd.f32 %v6311_v63, %v6166_v40  ;;  %v6349_v7 = vadd.f32 %v6341_v47, %v6333_v57  ;;  %v6160_v28 = vmul.f32 %v6113_v45, %v16991_v8  ;;  %v6115_v19 = vpop.f32.mrb[5].mxu0 }
 0xfab   :  { %v6320_v50 = vadd.f32 %v6312_v31, %v6167_v20  ;;  %v6350_v18 = vadd.f32 %v6342_v13, %v6334_v12  ;;  %v6161_v26 = vmul.f32 %v6115_v19, %v16992_v34 }
 0xfac   :  { %v6168_v22 = vadd.f32 %v6160_v28, %v6152_v30  ;;  %v6335_v23 = vadd.f32 %v6327_v21, %v6319_v53 }
 0xfad   :  { %v6169_v29 = vadd.f32 %v6161_v26, %v6153_v37  ;;  %v6336_v41 = vadd.f32 %v6328_v17, %v6320_v50  ;;  %v6119_v55 = vpop.f32.mrb[6].mxu0  ;;  %6421 = vmatprep.mubr.f32.mxu0 %v6350_v18  ;;  %v17006_v37 = vld [vmem:[#allocation37_spill] sm:$0xff] }
 0xfae   :  { %v6321_v58 = vadd.f32 %v6313_v42, %v6168_v22  ;;  %v6351_v44 = vadd.f32 %v6343_v1, %v6335_v23  ;;  %v6162_v59 = vmul.f32 %v6119_v55, %v16991_v8  ;;  %v6121_v2 = vpop.f32.mrb[7].mxu0  ;;  %6422 = vmatmul.mubr.f32.vlgmr.msra.gmra.mrb[8].mxu0 %v6349_v7  ;;  %v6315_v15 = vmul.f32 %v17006_v37, %v16993_v46 }
 0xfaf   :  { %v6322_v30 = vadd.f32 %v6314_v25, %v6169_v29  ;;  %v6352_v3 = vadd.f32 %v6344_v11, %v6336_v41  ;;  %v6163_v60 = vmul.f32 %v6121_v2, %v16992_v34  ;;  %v6316_v8 = vmul.f32 %v17007_v16, %v16995_v10 }
 0xfb0   :  { %v6170_v49 = vadd.f32 %v6162_v59, %v6154_v35  ;;  %v6337_v47 = vadd.f32 %v6329_v48, %v6321_v58  ;;  %v6347_v34 = vmul.f32 %v14940_v24, %v16999_v4  ;;  %v6348_v10 = vmul.f32 %v14942_v56, %v17001_v39 }
 0xfb1   :  { %v6171_v5 = vadd.f32 %v6163_v60, %v6155_v52  ;;  %v6338_v9 = vadd.f32 %v6330_v43, %v6322_v30  ;;  %6427 = vmatprep.mubr.f32.mxu0 %v6352_v3 }
 0xfb2   :  { %v6323_v13 = vadd.f32 %v6315_v15, %v6170_v49  ;;  %v6353_v54 = vadd.f32 %v6345_v51, %v6337_v47  ;;  %6428 = vmatmul.mubr.f32.gmra.mrb[10].mxu0 %v6351_v44  ;;  %v17009_v15 = vld [vmem:[#allocation97_spill] sm:$0xff] }
 0xfb3   :  { %v6324_v35 = vadd.f32 %v6316_v8, %v6171_v5  ;;  %v6354_v46 = vadd.f32 %v6346_v27, %v6338_v9  ;;  %v17010_v5 = vld [vmem:[#allocation98_spill] sm:$0xff] }
 0xfb4   :  { %v6339_v52 = vadd.f32 %v6331_v36, %v6323_v13  ;;  %v17011_v36 = vld [vmem:[#allocation109_spill] sm:$0xff] }
 0xfb5   :  { %v6340_v63 = vadd.f32 %v6332_v14, %v6324_v35  ;;  %6433 = vmatprep.mubr.f32.mxu0 %v6354_v46 }
 0xfb6   :  { %v6355_v38 = vadd.f32 %v6347_v34, %v6339_v52  ;;  %6434 = vmatmul.mubr.f32.gmra.mrb[12].mxu0 %v6353_v54 }
 0xfb7   :  { %v6356_v32 = vadd.f32 %v6348_v10, %v6340_v63 }
 0xfb9   :  { %6439 = vmatprep.mubr.f32.mxu0 %v6356_v32 }
 0xfba   :  { %6440 = vmatmul.mubr.f32.gmra.mrb[14].mxu0 %v6355_v38 }
0x1081   :  { %v6423_v61 = vpop.f32.mrb[8].mxu0 }
0x1082   :  { %v6446_v31 = vsub.f32 %v6349_v7, %v6423_v61  ;;  %v6425_v24 = vpop.f32.mrb[9].mxu0 }
0x1083   :  { %v6447_v4 = vsub.f32 %v6350_v18, %v6425_v24 }
0x1084   :  { %v6454_v62 = vmul.f32 %v6446_v31, %v6446_v31 }
0x1085   :  { %v6455_v40 = vmul.f32 %v6447_v4, %v6447_v4  ;;  %v6429_v57 = vpop.f32.mrb[10].mxu0 }
0x1086   :  { %v6448_v6 = vsub.f32 %v6351_v44, %v6429_v57  ;;  %v6431_v21 = vpop.f32.mrb[11].mxu0 }
0x1087   :  { %v6449_v17 = vsub.f32 %v6352_v3, %v6431_v21  ;;  %6526 = vmatprep.mubr.f32.mxu1 %v6455_v40 }
0x1088   :  { %6527 = vmatmul.mubr.f32.vlgmr.msra.gmra.mrb[12].mxu1 %v6454_v62  ;;  %v6456_v20 = vmul.f32 %v6448_v6, %v6448_v6 }
0x1089   :  { %v6457_v56 = vmul.f32 %v6449_v17, %v6449_v17  ;;  %v6435_v39 = vpop.f32.mrb[12].mxu0 }
0x108a   :  { %v6450_v12 = vsub.f32 %v6353_v54, %v6435_v39  ;;  %v6437_v45 = vpop.f32.mrb[13].mxu0 }
0x108b   :  { %v6451_v53 = vsub.f32 %v6354_v46, %v6437_v45  ;;  %6532 = vmatprep.mubr.f32.mxu1 %v6457_v56 }
0x108c   :  { %6533 = vmatmul.mubr.f32.gmra.mrb[14].mxu1 %v6456_v20  ;;  %v6458_v19 = vmul.f32 %v6450_v12, %v6450_v12 }
0x108d   :  { %v6459_v28 = vmul.f32 %v6451_v53, %v6451_v53  ;;  %v6441_v7 = vpop.f32.mrb[14].mxu0 }
0x108e   :  { %v6452_v1 = vsub.f32 %v6355_v38, %v6441_v7  ;;  %v6443_v50 = vpop.f32.mrb[15].mxu0 }
0x108f   :  { %v15150_v18 = vsub.f32 %v6356_v32, %v6443_v50  ;;  %6538 = vmatprep.mubr.f32.mxu1 %v6459_v28  ;;  %v17012_v32 = vld [vmem:[#allocation111_spill] sm:$0xff] }
0x1090   :  { %6539 = vmatmul.mubr.f32.gmra.mrb[16].mxu1 %v6458_v19  ;;  %v6460_v11 = vmul.f32 %v6452_v1, %v6452_v1 }
0x1091   :  { %v6461_v26 = vmul.f32 %v15150_v18, %v15150_v18 }
0x1093   :  { %6544 = vmatprep.mubr.f32.mxu1 %v6461_v26 }
0x1094   :  { %6545 = vmatmul.mubr.f32.gmra.mrb[18].mxu1 %v6460_v11 }
0x1095   :  { %7612 = vmatprep.mubr.f32.mxu1 %v17008_v0 }
0x115b   :  { %v6528_v42 = vpop.f32.mrb[12].mxu1 }
0x115c   :  { %v6529_v33 = vadd.f32 1e-05, %v6528_v42  ;;  %v6530_v25 = vpop.f32.mrb[13].mxu1 }
0x115d   :  { %v6531_v22 = vadd.f32 1e-05, %v6530_v25 }
0x115e   :  { %10399 = vrsqrt.f32 %v6529_v33 }
0x115f   :  { %10401 = vrsqrt.f32 %v6531_v22  ;;  %v6534_v23 = vpop.f32.mrb[14].mxu1 }
0x1160   :  { %v6535_v48 = vadd.f32 1e-05, %v6534_v23  ;;  %v6536_v43 = vpop.f32.mrb[15].mxu1 }
0x1161   :  { %v6537_v29 = vadd.f32 1e-05, %v6536_v43 }
0x1162   :  { %10403 = vrsqrt.f32 %v6535_v48 }
0x1163   :  { %10405 = vrsqrt.f32 %v6537_v29  ;;  %v6540_v41 = vpop.f32.mrb[16].mxu1 }
0x1164   :  { %v6541_v55 = vadd.f32 1e-05, %v6540_v41  ;;  %v6542_v58 = vpop.f32.mrb[17].mxu1 }
0x1165   :  { %v6543_v44 = vadd.f32 1e-05, %v6542_v58 }
0x1166   :  { %10407 = vrsqrt.f32 %v6541_v55 }
0x1167   :  { %10409 = vrsqrt.f32 %v6543_v44  ;;  %v6546_v59 = vpop.f32.mrb[18].mxu1 }
0x1168   :  { %v10400_v2 = vpop.eup %10399  ;;  %v6547_v51 = vadd.f32 1e-05, %v6546_v59  ;;  %v6548_v30 = vpop.f32.mrb[19].mxu1 }
0x1169   :  { %v10402_v3 = vpop.eup %10401  ;;  %v6559_v60 = vmul.f32 %v10400_v2, %v6446_v31  ;;  %v6549_v27 = vadd.f32 1e-05, %v6548_v30 }
0x116a   :  { %v6560_v37 = vmul.f32 %v10402_v3, %v6447_v4  ;;  %10411 = vrsqrt.f32 %v6547_v51 }
0x116b   :  { %v6567_v49 = vmul.f32 %v6559_v60, %v17009_v15  ;;  %10413 = vrsqrt.f32 %v6549_v27 }
0x116c   :  { %v10404_v47 = vpop.eup %10403  ;;  %v6568_v13 = vmul.f32 %v6560_v37, %v17011_v36 }
0x116d   :  { %v10406_v16 = vpop.eup %10405  ;;  %v6561_v8 = vmul.f32 %v10404_v47, %v6448_v6  ;;  %v15157_v9 = vadd.f32 %v6567_v49, %v17010_v5 }
0x116e   :  { %v6562_v54 = vmul.f32 %v10406_v16, %v6449_v17  ;;  %v6576_v61 = vadd.f32 %v6568_v13, %v17012_v32 }
0x116f   :  { %v6569_v34 = vmul.f32 %v6561_v8, %v17009_v15  ;;  %v15162_v14 = vmul.f32 0.17677669, %v15157_v9 }
0x1170   :  { %v10408_v35 = vpop.eup %10407  ;;  %v6570_v46 = vmul.f32 %v6562_v54, %v17011_v36 }
0x1171   :  { %v10410_v10 = vpop.eup %10409  ;;  %v6563_v52 = vmul.f32 %v10408_v35, %v6450_v12  ;;  %6595 = vrot.lane.b32.xlu0 %v15162_v14, %s10588_s8  ;;  %v15168_v63 = vadd.f32 %v6569_v34, %v17010_v5 }
0x1172   :  { %v6564_v38 = vmul.f32 %v10410_v10, %v6451_v53  ;;  %v6578_v31 = vadd.f32 %v6570_v46, %v17012_v32 }
0x1173   :  { %v6571_v24 = vmul.f32 %v6563_v52, %v17009_v15  ;;  %v15174_v4 = vmul.f32 0.17677669, %v15168_v63 }
0x1174   :  { %v10412_v40 = vpop.eup %10411  ;;  %v9907_v57 = vpack.c.bf16 %v6578_v31, %v6576_v61  ;;  %v15176_v62 = vpack.i.bf16 %v6578_v31, %v6576_v61  ;;  %v6572_v56 = vmul.f32 %v6564_v38, %v17011_v36 }
0x1175   :  { %v10414_v6 = vpop.eup %10413  ;;  %v6565_v21 = vmul.f32 %v10412_v40, %v6452_v1  ;;  %6597 = vrot.lane.b32.xlu1 %v15174_v4, %s10588_s8  ;;  %v15181_v17 = vadd.f32 %v6571_v24, %v17010_v5 }
0x1176   :  { %v6566_v39 = vmul.f32 %v10414_v6, %v15150_v18  ;;  %9909 = vmatprep.subr.msk.bf16.mxu0 %vm13751_vm2, %v9907_v57  ;;  %v6580_v7 = vadd.f32 %v6572_v56, %v17012_v32 }
0x1177   :  { %v6573_v12 = vmul.f32 %v6565_v21, %v17009_v15  ;;  %9912 = vmatpush3.bf16.xpose.msk.msra.mxu0 %vm13751_vm2, %v9907_v57  ;;  %v15191_v45 = vmul.f32 0.17677669, %v15181_v17 }
0x1178   :  { %v6574_v53 = vmul.f32 %v6566_v39, %v17011_v36 }
0x1179   :  { %6599 = vrot.lane.b32.xlu0 %v15191_v45, %s10588_s8  ;;  %v15197_v28 = vadd.f32 %v6573_v12, %v17010_v5 }
0x117a   :  { %v6582_v19 = vadd.f32 %v6574_v53, %v17012_v32  ;;  %v17014_v53 = vld [vmem:[#allocation143_spill] sm:$0xff] }
0x117b   :  { %v15202_v1 = vmul.f32 0.17677669, %v15197_v28 }
0x117c   :  { %v9913_v50 = vpack.c.bf16 %v6582_v19, %v6580_v7  ;;  %v15204_v18 = vpack.i.bf16 %v6582_v19, %v6580_v7 }
0x117d   :  { %6601 = vrot.lane.b32.xlu1 %v15202_v1, %s10588_s8 }
0x117e   :  { %9915 = vmatprep.subr.msk.bf16.mxu0 %vm13751_vm2, %v9913_v50 }
0x117f   :  { %9918 = vmatpush3.bf16.xpose.msk.msra.mxu0 %vm13751_vm2, %v9913_v50 }
0x11e3   :  { %v6596_v26 = vpop.permute.xlu0 %6595 }
0x11e4   :  { %8927 = vmatprep.mubr.msk.f32.mxu0 %vm284_vm0, %v6596_v26 }
0x11e7   :  { %v6598_v11 = vpop.permute.xlu1 %6597 }
0x11e8   :  { %8928 = vmatmul.mubr.msk.f32.vlgmr.msra.gmra.mrb[16].mxu0 %vm284_vm0, %v6598_v11  ;;  %v17015_v11 = vld [vmem:[#allocation125_spill] sm:$0xff] }
0x11eb   :  { %v6600_v42 = vpop.permute.xlu0 %6599 }
0x11ec   :  { %8930 = vmatprep.mubr.msk.f32.mxu0 %vm284_vm0, %v6600_v42 }
0x11ef   :  { %v6602_v33 = vpop.permute.xlu1 %6601 }
0x11f0   :  { %8931 = vmatmul.mubr.msk.f32.gmra.mrb[18].mxu0 %vm284_vm0, %v6602_v33 }
0x12bb   :  { %v8929_v25 = vpop.f32.mrb[16].mxu0 }
0x12bc   :  { %v6689_v22 = vpop.f32.mrb[17].mxu0  ;;  %v6711_v23 = vsel %vm284_vm0, %v8929_v25, -inf }
0x12bd   :  { %6712 = vmax.xlane.f32.xlu1 %v6711_v23  ;;  %v6708_v48 = vsel %vm284_vm0, %v6689_v22, -inf }
0x12be   :  { %6709 = vmax.xlane.f32.xlu0 %v6708_v48 }
0x12c3   :  { %v8932_v43 = vpop.f32.mrb[18].mxu0 }
0x12c4   :  { %v6699_v29 = vpop.f32.mrb[19].mxu0  ;;  %v6717_v55 = vsel %vm284_vm0, %v8932_v43, -inf }
0x12c5   :  { %v6714_v41 = vsel %vm284_vm0, %v6699_v29, -inf }
0x12c6   :  { %6715 = vmax.xlane.f32.xlu0 %v6714_v41 }
0x12ca   :  { %6718 = vmax.xlane.f32.xlu0 %v6717_v55 }
0x134a   :  { %v6713_v58 = vpop.xlane.xlu1 %6712 }
0x134b   :  { %v6721_v44 = vsub.f32 %v8929_v25, %v6713_v58  ;;  %v6710_v59 = vpop.xlane.xlu0 %6709 }
0x134c   :  { %v6720_v2 = vsub.f32 %v6689_v22, %v6710_v59 }
0x134d   :  { %v6726_v51 = vmul.f32 1.442695, %v6721_v44 }
0x134e   :  { %v6724_v30 = vmul.f32 1.442695, %v6720_v2 }
0x134f   :  { %10415 = vpow2.f32 %v6726_v51 }
0x1350   :  { %10417 = vpow2.f32 %v6724_v30 }
0x1353   :  { %v6716_v3 = vpop.xlane.xlu0 %6715 }
0x1354   :  { %v6722_v60 = vsub.f32 %v6699_v29, %v6716_v3 }
0x1356   :  { %v6728_v27 = vmul.f32 1.442695, %v6722_v60 }
0x1357   :  { %v6719_v37 = vpop.xlane.xlu0 %6718 }
0x1358   :  { %10419 = vpow2.f32 %v6728_v27  ;;  %v6723_v15 = vsub.f32 %v8932_v43, %v6719_v37 }
0x1359   :  { %v10416_v49 = vpop.eup %10415 }
0x135a   :  { %v10418_v47 = vpop.eup %10417  ;;  %v6730_v16 = vmul.f32 1.442695, %v6723_v15  ;;  %v6735_v8 = vsel %vm284_vm0, %v10416_v49, 0.0 }
0x135b   :  { %6736 = vadd.xlane.f32.xlu0 %v6735_v8  ;;  %v6732_v5 = vsel %vm284_vm0, %v10418_v47, 0.0 }
0x135c   :  { %10421 = vpow2.f32 %v6730_v16  ;;  %6733 = vadd.xlane.f32.xlu1 %v6732_v5 }
0x1362   :  { %v10420_v36 = vpop.eup %10419 }
0x1363   :  { %v6738_v13 = vsel %vm284_vm0, %v10420_v36, 0.0 }
0x1364   :  { %6739 = vadd.xlane.f32.xlu1 %v6738_v13 }
0x1366   :  { %v10422_v54 = vpop.eup %10421 }
0x1367   :  { %v6741_v34 = vsel %vm284_vm0, %v10422_v54, 0.0 }
0x1368   :  { %6742 = vadd.xlane.f32.xlu0 %v6741_v34 }
0x1375   :  { %10210 = vrot.lane.b32.xlu1 %v15176_v62, %s10588_s8 }
0x1379   :  { %6768 = vrot.lane.b32.xlu1 %v15157_v9, %s10588_s8 }
0x137d   :  { %10220 = vrot.lane.b32.xlu1 %v15176_v62, %s10585_s19 }
0x137e   :  { %10215 = vrot.lane.b32.xlu0 %v15204_v18, %s10588_s8 }
0x1381   :  { %10225 = vrot.lane.b32.xlu1 %v15204_v18, %s10585_s19 }
0x1382   :  { %6770 = vrot.lane.b32.xlu0 %v15168_v63, %s10588_s8 }
0x1385   :  { %6774 = vrot.lane.b32.xlu1 %v15197_v28, %s10588_s8 }
0x1386   :  { %6772 = vrot.lane.b32.xlu0 %v15181_v17, %s10588_s8 }
0x1389   :  { %6980 = vrot.lane.b32.xlu1 %v15174_v4, %s10587_s1 }
0x138a   :  { %6978 = vrot.lane.b32.xlu0 %v15162_v14, %s10587_s1 }
0x138d   :  { %6984 = vrot.lane.b32.xlu1 %v15202_v1, %s10587_s1 }
0x138e   :  { %6982 = vrot.lane.b32.xlu0 %v15191_v45, %s10587_s1 }
0x13e8   :  { %v6737_v46 = vpop.xlane.xlu0 %6736 }
0x13e9   :  { %v6734_v35 = vpop.xlane.xlu1 %6733 }
0x13ea   :  { %10423 = vrcp.f32 %v6734_v35 }
0x13eb   :  { %10425 = vrcp.f32 %v6737_v46 }
0x13f1   :  { %v6740_v10 = vpop.xlane.xlu1 %6739 }
0x13f2   :  { %10427 = vrcp.f32 %v6740_v10 }
0x13f4   :  { %v10424_v52 = vpop.eup %10423 }
0x13f5   :  { %v6743_v38 = vpop.xlane.xlu0 %6742  ;;  %v10211_v32 = vpop.permute.xlu1 %10210  ;;  %v6748_v61 = vmul.f32 %v10424_v52, %v10418_v47 }
0x13f6   :  { %v10213_v31 = vunpack.i.h.bf16 %v10211_v32  ;;  %v10212_v24 = vunpack.i.l.bf16 %v10211_v32  ;;  %10429 = vrcp.f32 %v6743_v38  ;;  %v10426_v56 = vpop.eup %10425 }
0x13f7   :  { %8941 = vmatprep.mubr.msk.f32.mxu0 %vm284_vm0, %v6748_v61  ;;  %v6749_v45 = vmul.f32 %v10426_v56, %v10416_v49 }
0x13f8   :  { %v9919_v14 = vpack.c.bf16 %v10213_v31, %v10212_v24 }
0x13f9   :  { %v10216_v4 = vpop.permute.xlu0 %10215  ;;  %v6769_v40 = vpop.permute.xlu1 %6768 }
0x13fa   :  { %v10218_v57 = vunpack.i.h.bf16 %v10216_v4  ;;  %v10217_v6 = vunpack.i.l.bf16 %v10216_v4  ;;  %9920 = vmatprep.subr.bf16.mxu0 %v9919_v14 }
0x13fb   :  { %9922 = vmatpush3.bf16.msra.mxu0 %v9919_v14 }
0x13fc   :  { %v9923_v21 = vpack.c.bf16 %v10218_v57, %v10217_v6  ;;  %v10428_v39 = vpop.eup %10427 }
0x13fd   :  { %v10221_v12 = vpop.permute.xlu1 %10220  ;;  %v6750_v19 = vmul.f32 %v10428_v39, %v10420_v36  ;;  %v6771_v33 = vpop.permute.xlu0 %6770 }
0x13fe   :  { %9924 = vmatprep.subr.bf16.mxu0 %v9923_v21  ;;  %v10223_v1 = vunpack.i.h.bf16 %v10221_v12  ;;  %v10222_v50 = vunpack.i.l.bf16 %v10221_v12  ;;  %v15295_v12 = vld [vmem:[%s15944_s11] ss:$0 sm:$0xff] }
0x13ff   :  { %9926 = vmatpush3.bf16.msra.mxu0 %v9923_v21 }
0x1400   :  { %9928 = vmatprep.subr.bf16.mxu0 %v17014_v53  ;;  %v10430_v7 = vpop.eup %10429  ;;  %v9935_v42 = vpack.c.bf16 %v10223_v1, %v10222_v50  ;;  %v17019_v1 = vld [vmem:[#allocation116_spill] sm:$0xff] }
0x1401   :  { %v6751_v26 = vmul.f32 %v10430_v7, %v10422_v54  ;;  %v10226_v25 = vpop.permute.xlu1 %10225  ;;  %v6773_v41 = vpop.permute.xlu0 %6772  ;;  %v3908_v50 = vadd.f32 %v15295_v12, %v17019_v1 }
0x1402   :  { %8942 = vmatmul.mubr.msk.f32.vlgmr.msra.gmra.mrb[20].mxu0 %vm284_vm0, %v6749_v45  ;;  %v10228_v23 = vunpack.i.h.bf16 %v10226_v25  ;;  %v10227_v48 = vunpack.i.l.bf16 %v10226_v25 }
0x1403   :  { %8944 = vmatprep.mubr.msk.f32.mxu0 %vm284_vm0, %v6750_v19  ;;  %9930 = vmatpush3.bf16.msra.mxu0 %v17014_v53  ;;  %v17017_v53 = vld [vmem:[#allocation60_spill] sm:$0xff]  ;;  %v17018_v19 = vld [vmem:[#allocation113_spill] sm:$0xff] }
0x1404   :  { %9932 = vmatprep.subr.bf16.mxu0 %v17015_v11  ;;  %v9941_v44 = vpack.c.bf16 %v10228_v23, %v10227_v48  ;;  %v17023_v48 = vld [vmem:[#allocation7_spill] sm:$0xff] }
0x1405   :  { %v6775_v2 = vpop.permute.xlu1 %6774  ;;  %v6979_v3 = vpop.permute.xlu0 %6978 }
0x1406   :  { %8945 = vmatmul.mubr.msk.f32.gmra.mrb[22].mxu0 %vm284_vm0, %v6751_v26  ;;  %v17020_v26 = vld [vmem:[#allocation53_spill] sm:$0xff] }
0x1407   :  { %9934 = vmatpush3.bf16.msra.mxu0 %v17015_v11 }
0x1408   :  { %9937 = vmatprep.subr.msk.bf16.mxu0 %vm13751_vm2, %v9935_v42 }
0x1409   :  { %v6981_v60 = vpop.permute.xlu1 %6980  ;;  %v6983_v27 = vpop.permute.xlu0 %6982 }
0x140d   :  { %v6985_v37 = vpop.permute.xlu1 %6984 }
0x14d5   :  { %v8943_v22 = vpop.f32.mrb[20].mxu0 }
0x14d6   :  { %v6858_v43 = vpop.f32.mrb[21].mxu0  ;;  %v6864_v55 = vadd.f32 %v8943_v22, %v6771_v33  ;;  %v17022_v22 = vld [vmem:[#allocation123_spill] sm:$0xff] }
0x14d7   :  { %v6859_v29 = vadd.f32 %v6858_v43, %v6769_v40  ;;  %v3909_v23 = vadd.f32 %v15295_v12, %v17022_v22 }
0x14d9   :  { %v8946_v58 = vpop.f32.mrb[22].mxu0  ;;  %8955 = vmatprep.mubr.msk.f32.mxu0 %vm284_vm0, %v6859_v29  ;;  %v15317_v43 = vadd.f32 %v17023_v48, %v3909_v23 }
0x14da   :  { %v6868_v59 = vpop.f32.mrb[23].mxu0  ;;  %8956 = vmatmul.mubr.msk.f32.vlgmr.msra.gmra.mrb[24].mxu0 %vm284_vm0, %v6864_v55  ;;  %v6874_v30 = vadd.f32 %v8946_v58, %v6775_v2 }
0x14db   :  { %v6869_v51 = vadd.f32 %v6868_v59, %v6773_v41  ;;  %9940 = vmatpush3.bf16.xpose.msk.msra.mxu0 %vm13751_vm2, %v9935_v42  ;;  %v17021_v42 = vld [vmem:[#allocation8_spill] sm:$0xff]  ;;  %v7370_v55 = vsel %vm968_vm1, %v15317_v43, 0.0 }
0x14dc   :  { %9943 = vmatprep.subr.msk.bf16.mxu0 %vm13751_vm2, %v9941_v44  ;;  %v15310_v33 = vadd.f32 %v17021_v42, %v3908_v50 }
0x14dd   :  { %8958 = vmatprep.mubr.msk.f32.mxu0 %vm284_vm0, %v6869_v51 }
0x14de   :  { %8959 = vmatmul.mubr.msk.f32.gmra.mrb[26].mxu0 %vm284_vm0, %v6874_v30  ;;  %v7367_v41 = vsel %vm968_vm1, %v15310_v33, 0.0 }
0x14df   :  { %8969 = vmatprep.mubr.msk.f32.mxu0 %vm284_vm0, %v6979_v3 }
0x14e3   :  { %9946 = vmatpush3.bf16.xpose.msk.msra.mxu0 %vm13751_vm2, %v9941_v44 }
0x14ea   :  { %8970 = vmatmul.mubr.msk.f32.vlgmr.msra.gmra.mrb[28].mxu0 %vm284_vm0, %v6981_v60 }
0x14eb   :  { %8972 = vmatprep.mubr.msk.f32.mxu0 %vm284_vm0, %v6983_v27 }
0x14ee   :  { %8973 = vmatmul.mubr.msk.f32.gmra.mrb[30].mxu0 %vm284_vm0, %v6985_v37 }
0x15bd   :  { %v8971_v15 = vpop.f32.mrb[28].mxu0 }
0x15be   :  { %v7076_v49 = vpop.f32.mrb[29].mxu0  ;;  %v7098_v47 = vsel %vm284_vm0, %v8971_v15, -inf }
0x15bf   :  { %7099 = vmax.xlane.f32.xlu1 %v7098_v47  ;;  %v7095_v16 = vsel %vm284_vm0, %v7076_v49, -inf }
0x15c0   :  { %7096 = vmax.xlane.f32.xlu0 %v7095_v16 }
0x15c1   :  { %v8974_v8 = vpop.f32.mrb[30].mxu0 }
0x15c2   :  { %v7086_v20 = vpop.f32.mrb[31].mxu0  ;;  %v7104_v36 = vsel %vm284_vm0, %v8974_v8, -inf }
0x15c3   :  { %v7101_v5 = vsel %vm284_vm0, %v7086_v20, -inf }
0x15c4   :  { %7102 = vmax.xlane.f32.xlu0 %v7101_v5 }
0x15c8   :  { %7105 = vmax.xlane.f32.xlu0 %v7104_v36  ;;  %v17024_v36 = vld [vmem:[#allocation145_spill] sm:$0xff] }
0x164c   :  { %v7100_v13 = vpop.xlane.xlu1 %7099 }
0x164d   :  { %v7108_v54 = vsub.f32 %v8971_v15, %v7100_v13  ;;  %v7097_v34 = vpop.xlane.xlu0 %7096 }
0x164e   :  { %v7107_v35 = vsub.f32 %v7076_v49, %v7097_v34 }
0x164f   :  { %v7113_v46 = vmul.f32 1.442695, %v7108_v54 }
0x1650   :  { %v7111_v10 = vmul.f32 1.442695, %v7107_v35  ;;  %v17025_v35 = vld [vmem:[#allocation117_spill] sm:$0xff] }
0x1651   :  { %10431 = vpow2.f32 %v7113_v46  ;;  %v7103_v52 = vpop.xlane.xlu0 %7102 }
0x1652   :  { %10433 = vpow2.f32 %v7111_v10  ;;  %v7109_v38 = vsub.f32 %v7086_v20, %v7103_v52 }
0x1654   :  { %v7115_v32 = vmul.f32 1.442695, %v7109_v38 }
0x1655   :  { %v7106_v61 = vpop.xlane.xlu0 %7105 }
0x1656   :  { %10435 = vpow2.f32 %v7115_v32  ;;  %v7110_v31 = vsub.f32 %v8974_v8, %v7106_v61 }
0x1658   :  { %v7117_v24 = vmul.f32 1.442695, %v7110_v31 }
0x165a   :  { %10437 = vpow2.f32 %v7117_v24 }
0x165b   :  { %v10432_v14 = vpop.eup %10431 }
0x165c   :  { %v10434_v4 = vpop.eup %10433  ;;  %v7122_v40 = vsel %vm284_vm0, %v10432_v14, 0.0 }
0x165d   :  { %7123 = vadd.xlane.f32.xlu0 %v7122_v40  ;;  %v7119_v57 = vsel %vm284_vm0, %v10434_v4, 0.0 }
0x165e   :  { %7120 = vadd.xlane.f32.xlu1 %v7119_v57 }
0x1660   :  { %v10436_v6 = vpop.eup %10435 }
0x1661   :  { %v7125_v21 = vsel %vm284_vm0, %v10436_v6, 0.0 }
0x1662   :  { %7126 = vadd.xlane.f32.xlu1 %v7125_v21 }
0x1664   :  { %v10438_v56 = vpop.eup %10437 }
0x1665   :  { %v7128_v39 = vsel %vm284_vm0, %v10438_v56, 0.0 }
0x1666   :  { %7129 = vadd.xlane.f32.xlu0 %v7128_v39 }
0x1673   :  { %10230 = vrot.lane.b32.xlu1 %v15176_v62, %s10587_s1  ;;  %v17016_v62 = vld [vmem:[#allocation110_spill] sm:$0xff] }
0x1674   :  { %v3906_v45 = vadd.f32 %v15295_v12, %v17016_v62  ;;  %v6584_v62 = vadd.f32 %v15295_v12, %v15168_v63 }
0x1676   :  { %v15300_v7 = vadd.f32 %v17017_v53, %v3906_v45 }
0x1677   :  { %7151 = vrot.lane.b32.xlu1 %v15157_v9, %s10587_s1 }
0x1678   :  { %v7361_v25 = vsel %vm968_vm1, %v15300_v7, 0.0 }
0x167b   :  { %7153 = vrot.lane.b32.xlu1 %v15168_v63, %s10587_s1  ;;  %v6586_v63 = vadd.f32 %v15295_v12, %v15197_v28 }
0x167c   :  { %10235 = vrot.lane.b32.xlu0 %v15204_v18, %s10587_s1  ;;  %v3907_v18 = vadd.f32 %v15295_v12, %v17018_v19 }
0x167e   :  { %v15307_v11 = vadd.f32 %v17020_v26, %v3907_v18  ;;  %v6583_v18 = vadd.f32 %v15295_v12, %v15157_v9 }
0x167f   :  { %7157 = vrot.lane.b32.xlu1 %v15197_v28, %s10587_s1 }
0x1680   :  { %7155 = vrot.lane.b32.xlu0 %v15181_v17, %s10587_s1  ;;  %v7364_v29 = vsel %vm968_vm1, %v15307_v11, 0.0 }
0x169f   :  { %7362 = vadd.xlane.f32.xlu0 %v7361_v25 }
0x16a3   :  { %7365 = vadd.xlane.f32.xlu1 %v7364_v29  ;;  %7368 = vadd.xlane.f32.xlu0 %v7367_v41  ;;  %v6585_v41 = vadd.f32 %v15295_v12, %v15181_v17 }
0x16a7   :  { %7371 = vadd.xlane.f32.xlu0 %v7370_v55 }
0x16ea   :  { %v7124_v44 = vpop.xlane.xlu0 %7123 }
0x16eb   :  { %v7121_v58 = vpop.xlane.xlu1 %7120 }
0x16ec   :  { %10439 = vrcp.f32 %v7121_v58 }
0x16ed   :  { %10441 = vrcp.f32 %v7124_v44 }
0x16ef   :  { %v7127_v59 = vpop.xlane.xlu1 %7126 }
0x16f0   :  { %10443 = vrcp.f32 %v7127_v59 }
0x16f3   :  { %v10231_v2 = vpop.permute.xlu1 %10230  ;;  %v7130_v51 = vpop.xlane.xlu0 %7129 }
0x16f4   :  { %v10233_v30 = vunpack.i.h.bf16 %v10231_v2  ;;  %v10232_v3 = vunpack.i.l.bf16 %v10231_v2  ;;  %10445 = vrcp.f32 %v7130_v51 }
0x16f6   :  { %v10440_v60 = vpop.eup %10439  ;;  %v9947_v27 = vpack.c.bf16 %v10233_v30, %v10232_v3 }
0x16f7   :  { %v10236_v37 = vpop.permute.xlu0 %10235  ;;  %v7135_v15 = vmul.f32 %v10440_v60, %v10434_v4  ;;  %v10442_v8 = vpop.eup %10441 }
0x16f8   :  { %v10238_v49 = vunpack.i.h.bf16 %v10236_v37  ;;  %v10237_v47 = vunpack.i.l.bf16 %v10236_v37  ;;  %9948 = vmatprep.subr.bf16.mxu0 %v9947_v27  ;;  %v7136_v5 = vmul.f32 %v10442_v8, %v10432_v14  ;;  %v7152_v46 = vpop.permute.xlu1 %7151  ;;  %v7496_v8 = vld [vmem:[%s15947_s14] sm:$0xff] }
0x16f9   :  { %9950 = vmatpush3.bf16.msra.mxu0 %v9947_v27  ;;  %8983 = vmatprep.mubr.msk.f32.mxu0 %vm284_vm0, %v7135_v15 }
0x16fa   :  { %v9951_v16 = vpack.c.bf16 %v10238_v49, %v10237_v47  ;;  %v10444_v20 = vpop.eup %10443  ;;  %v7497_v49 = vld [vmem:[%s15947_s14 + $0x8] sm:$0xff]  ;;  %v7499_v47 = vld [vmem:[%s15947_s14 + $0x18] sm:$0xff] }
0x16fb   :  { %v7137_v54 = vmul.f32 %v10444_v20, %v10436_v6  ;;  %v7156_v24 = vpop.permute.xlu0 %7155  ;;  %v7498_v20 = vld [vmem:[%s15947_s14 + $0x10] sm:$0xff] }
0x16fc   :  { %9952 = vmatprep.subr.bf16.mxu0 %v9951_v16  ;;  %v7154_v10 = vpop.permute.xlu1 %7153 }
0x16fd   :  { %9954 = vmatpush3.bf16.msra.mxu0 %v9951_v16  ;;  %v9963_v16 = vpack.c.bf16 %v7499_v47, %v7497_v49 }
0x16fe   :  { %9956 = vmatprep.subr.bf16.mxu0 %v17024_v36  ;;  %v10446_v13 = vpop.eup %10445 }
0x16ff   :  { %v7138_v34 = vmul.f32 %v10446_v13, %v10438_v56  ;;  %9964 = vmatprep.subr.bf16.mxu1 %v9963_v16  ;;  %v7503_v13 = vld [vmem:[%s15947_s14 + $0x38] sm:$0xff] }
0x1700   :  { %8984 = vmatmul.mubr.msk.f32.vlgmr.msra.gmra.mrb[32].mxu0 %vm284_vm0, %v7136_v5  ;;  %v7158_v4 = vpop.permute.xlu1 %7157  ;;  %v9965_v5 = vpack.c.bf16 %v7498_v20, %v7496_v8 }
0x1701   :  { %8986 = vmatprep.mubr.msk.f32.mxu0 %vm284_vm0, %v7137_v54  ;;  %9958 = vmatpush3.bf16.msra.mxu0 %v17024_v36  ;;  %v7501_v36 = vld [vmem:[%s15947_s14 + $0x28] sm:$0xff] }
0x1702   :  { %9960 = vmatprep.subr.bf16.mxu0 %v17025_v35  ;;  %9966 = vmatpush1.bf16.msra.mxu1 %v9965_v5  ;;  %v9967_v54 = vpack.c.bf16 %v7503_v13, %v7501_v36  ;;  %v15460_v13 = vld [vmem:[%s15945_s12] ss:$0 sm:$0xff] }
0x1704   :  { %8987 = vmatmul.mubr.msk.f32.gmra.mrb[34].mxu0 %vm284_vm0, %v7138_v34  ;;  %v7500_v34 = vld [vmem:[%s15947_s14 + $0x20] sm:$0xff]  ;;  %9968 = vmatprep.subr.bf16.mxu1 %v9967_v54 }
0x1705   :  { %9962 = vmatpush3.bf16.msra.mxu0 %v17025_v35  ;;  %v7502_v35 = vld [vmem:[%s15947_s14 + $0x30] sm:$0xff] }
0x172c   :  { %v7363_v6 = vpop.xlane.xlu0 %7362 }
0x172d   :  { %v7386_v45 = vmul.f32 0.015625, %v7363_v6 }
0x172f   :  { %v15353_v23 = vsub.f32 %v15300_v7, %v7386_v45 }
0x1730   :  { %v7369_v21 = vpop.xlane.xlu0 %7368  ;;  %v7366_v56 = vpop.xlane.xlu1 %7365 }
0x1731   :  { %v7387_v39 = vmul.f32 0.015625, %v7366_v56  ;;  %v7388_v48 = vmul.f32 0.015625, %v7369_v21  ;;  %v7402_v12 = vmul.f32 %v15353_v23, %v15353_v23 }
0x1733   :  { %v15346_v42 = vsub.f32 %v15307_v11, %v7387_v39  ;;  %v15371_v51 = vsub.f32 %v15310_v33, %v7388_v48  ;;  %v7410_v60 = vsel %vm968_vm1, %v7402_v12, 0.0 }
0x1734   :  { %v7372_v53 = vpop.xlane.xlu0 %7371 }
0x1735   :  { %v7389_v25 = vmul.f32 0.015625, %v7372_v53  ;;  %v7403_v2 = vmul.f32 %v15346_v42, %v15346_v42  ;;  %v7404_v27 = vmul.f32 %v15371_v51, %v15371_v51 }
0x1737   :  { %v15364_v28 = vsub.f32 %v15317_v43, %v7389_v25  ;;  %v7413_v30 = vsel %vm968_vm1, %v7403_v2, 0.0  ;;  %v7416_v15 = vsel %vm968_vm1, %v7404_v27, 0.0 }
0x1739   :  { %v7405_v3 = vmul.f32 %v15364_v28, %v15364_v28 }
0x173b   :  { %v7419_v37 = vsel %vm968_vm1, %v7405_v3, 0.0 }
0x17d3   :  { %v8985_v52 = vpop.f32.mrb[32].mxu0 }
0x17d4   :  { %v7241_v38 = vpop.f32.mrb[33].mxu0  ;;  %v7247_v61 = vadd.f32 %v8985_v52, %v7154_v10  ;;  %v7505_v10 = vld [vmem:[%s15947_s14 + $0x48] sm:$0xff]  ;;  %v7507_v52 = vld [vmem:[%s15947_s14 + $0x58] sm:$0xff] }
0x17d5   :  { %v7242_v32 = vadd.f32 %v7241_v38, %v7152_v46  ;;  %v9969_v46 = vpack.c.bf16 %v7502_v35, %v7500_v34  ;;  %v9971_v38 = vpack.c.bf16 %v7507_v52, %v7505_v10  ;;  %v15467_v35 = vld [vmem:[%s15946_s13] ss:$0 sm:$0xff] }
0x17d7   :  { %v8988_v31 = vpop.f32.mrb[34].mxu0  ;;  %8997 = vmatprep.mubr.msk.f32.mxu0 %vm284_vm0, %v7242_v32  ;;  %9970 = vmatpush1.bf16.msra.mxu1 %v9969_v46  ;;  %v7504_v32 = vld [vmem:[%s15947_s14 + $0x40] sm:$0xff] }
0x17d8   :  { %v7251_v14 = vpop.f32.mrb[35].mxu0  ;;  %8998 = vmatmul.mubr.msk.f32.vlgmr.msra.gmra.mrb[24].mxu0 %vm284_vm0, %v7247_v61  ;;  %v7257_v57 = vadd.f32 %v8988_v31, %v7158_v4  ;;  %v7506_v61 = vld [vmem:[%s15947_s14 + $0x50] sm:$0xff]  ;;  %9972 = vmatprep.subr.bf16.mxu1 %v9971_v38 }
0x17d9   :  { %v7252_v40 = vadd.f32 %v7251_v14, %v7156_v24  ;;  %v9973_v31 = vpack.c.bf16 %v7506_v61, %v7504_v32  ;;  %v7509_v24 = vld [vmem:[%s15947_s14 + $0x68] sm:$0xff]  ;;  %v7511_v14 = vld [vmem:[%s15947_s14 + $0x78] sm:$0xff] }
0x17da   :  { %v9975_v4 = vpack.c.bf16 %v7511_v14, %v7509_v24 }
0x17db   :  { %9000 = vmatprep.mubr.msk.f32.mxu0 %vm284_vm0, %v7252_v40  ;;  %9974 = vmatpush1.bf16.msra.mxu1 %v9973_v31  ;;  %v7508_v40 = vld [vmem:[%s15947_s14 + $0x60] sm:$0xff] }
0x17dc   :  { %9001 = vmatmul.mubr.msk.f32.gmra.mrb[26].mxu0 %vm284_vm0, %v7257_v57  ;;  %v7510_v57 = vld [vmem:[%s15947_s14 + $0x70] sm:$0xff]  ;;  %9976 = vmatprep.subr.bf16.mxu1 %v9975_v4  ;;  %v8110_v4 = vld [vmem:[%s15949_s16 + $0x88] sm:$0xff] }
0x17dd   :  { %v9977_v6 = vpack.c.bf16 %v7510_v57, %v7508_v40  ;;  %v8093_v57 = vld [vmem:[%s15949_s16] sm:$0xff] }
0x17df   :  { %9978 = vmatpush1.bf16.msra.mxu1 %v9977_v6  ;;  %v8094_v6 = vld [vmem:[%s15949_s16 + $0x8] sm:$0xff] }
0x18ab   :  { %v8999_v19 = vpop.f32.mrb[24].mxu0 }
0x18ac   :  { %v15341_v1 = vadd.f32 %v8999_v19, %v6584_v62  ;;  %v7338_v50 = vpop.f32.mrb[25].mxu0 }
0x18ad   :  { %v15343_v26 = vadd.f32 %v7338_v50, %v6583_v18 }
0x18ae   :  { %v7376_v22 = vsel %vm968_vm1, %v15341_v1, 0.0 }
0x18af   :  { %7377 = vadd.xlane.f32.xlu0 %v7376_v22  ;;  %v9002_v9 = vpop.f32.mrb[26].mxu0  ;;  %v7373_v29 = vsel %vm968_vm1, %v15343_v26, 0.0 }
0x18b0   :  { %v15359_v55 = vadd.f32 %v9002_v9, %v6586_v63  ;;  %7374 = vadd.xlane.f32.xlu1 %v7373_v29  ;;  %v7348_v58 = vpop.f32.mrb[27].mxu0 }
0x18b1   :  { %v15361_v44 = vadd.f32 %v7348_v58, %v6585_v41 }
0x18b2   :  { %v7382_v59 = vsel %vm968_vm1, %v15359_v55, 0.0 }
0x18b3   :  { %7383 = vadd.xlane.f32.xlu0 %v7382_v59  ;;  %v7379_v17 = vsel %vm968_vm1, %v15361_v44, 0.0 }
0x18b4   :  { %7380 = vadd.xlane.f32.xlu1 %v7379_v17 }
0x18b7   :  { %7414 = vadd.xlane.f32.xlu0 %v7413_v30 }
0x18b8   :  { %7411 = vadd.xlane.f32.xlu1 %v7410_v60 }
0x18bb   :  { %7420 = vadd.xlane.f32.xlu0 %v7419_v37 }
0x18bc   :  { %7417 = vadd.xlane.f32.xlu1 %v7416_v15 }
0x193c   :  { %v7378_v21 = vpop.xlane.xlu0 %7377 }
0x193d   :  { %v7391_v56 = vmul.f32 0.015625, %v7378_v21  ;;  %v7375_v39 = vpop.xlane.xlu1 %7374  ;;  %v9981_v21 = vpack.c.bf16 %v8094_v6, %v8093_v57 }
0x193e   :  { %v7390_v62 = vmul.f32 0.015625, %v7375_v39  ;;  %v8112_v39 = vld [vmem:[%s15949_s16 + $0x98] sm:$0xff] }
0x193f   :  { %v15434_v45 = vsub.f32 %v15341_v1, %v7391_v56  ;;  %v8111_v56 = vld [vmem:[%s15949_s16 + $0x90] sm:$0xff] }
0x1940   :  { %v15437_v53 = vsub.f32 %v15343_v26, %v7390_v62  ;;  %v7384_v19 = vpop.xlane.xlu0 %7383  ;;  %v9983_v62 = vpack.c.bf16 %v8112_v39, %v8111_v56  ;;  %v8105_v56 = vld [vmem:[%s15949_s16 + $0x60] sm:$0xff]  ;;  %v8106_v39 = vld [vmem:[%s15949_s16 + $0x68] sm:$0xff] }
0x1941   :  { %v7393_v18 = vmul.f32 0.015625, %v7384_v19  ;;  %v7381_v50 = vpop.xlane.xlu1 %7380  ;;  %v7407_v25 = vmul.f32 %v15434_v45, %v15434_v45  ;;  %v8095_v19 = vld [vmem:[%s15949_s16 + $0x10] sm:$0xff] }
0x1942   :  { %v7392_v22 = vmul.f32 0.015625, %v7381_v50  ;;  %v7406_v63 = vmul.f32 %v15437_v53, %v15437_v53 }
0x1943   :  { %v15444_v48 = vsub.f32 %v15359_v55, %v7393_v18  ;;  %v7425_v9 = vsel %vm968_vm1, %v7407_v25, 0.0  ;;  %v8096_v18 = vld [vmem:[%s15949_s16 + $0x18] sm:$0xff] }
0x1944   :  { %v15448_v29 = vsub.f32 %v15361_v44, %v7392_v22  ;;  %7426 = vadd.xlane.f32.xlu0 %v7425_v9  ;;  %v7415_v41 = vpop.xlane.xlu0 %7414  ;;  %v7422_v58 = vsel %vm968_vm1, %v7406_v63, 0.0  ;;  %v9985_v50 = vpack.c.bf16 %v8096_v18, %v8095_v19  ;;  %v8113_v22 = vld [vmem:[%s15949_s16 + $0xa0] sm:$0xff]  ;;  %v8114_v63 = vld [vmem:[%s15949_s16 + $0xa8] sm:$0xff] }
0x1945   :  { %v7435_v59 = vmul.f32 0.015625, %v7415_v41  ;;  %7423 = vadd.xlane.f32.xlu1 %v7422_v58  ;;  %v7412_v2 = vpop.xlane.xlu1 %7411  ;;  %v7409_v17 = vmul.f32 %v15444_v48, %v15444_v48  ;;  %v9987_v58 = vpack.c.bf16 %v8114_v63, %v8113_v22 }
0x1946   :  { %v7434_v12 = vmul.f32 0.015625, %v7412_v2  ;;  %v7408_v30 = vmul.f32 %v15448_v29, %v15448_v29  ;;  %v8098_v2 = vld [vmem:[%s15949_s16 + $0x28] sm:$0xff] }
0x1947   :  { %v7443_v3 = vadd.f32 1e-06, %v7435_v59  ;;  %v7431_v60 = vsel %vm968_vm1, %v7409_v17, 0.0  ;;  %v8097_v59 = vld [vmem:[%s15949_s16 + $0x20] sm:$0xff] }
0x1948   :  { %v7442_v27 = vadd.f32 1e-06, %v7434_v12  ;;  %7432 = vadd.xlane.f32.xlu0 %v7431_v60  ;;  %v7421_v37 = vpop.xlane.xlu0 %7420  ;;  %v7428_v15 = vsel %vm968_vm1, %v7408_v30, 0.0  ;;  %v9989_v12 = vpack.c.bf16 %v8098_v2, %v8097_v59 }
0x1949   :  { %10447 = vrsqrt.f32 %v7443_v3  ;;  %v7437_v49 = vmul.f32 0.015625, %v7421_v37  ;;  %7429 = vadd.xlane.f32.xlu1 %v7428_v15  ;;  %v7418_v47 = vpop.xlane.xlu1 %7417  ;;  %v8116_v37 = vld [vmem:[%s15949_s16 + $0xb8] sm:$0xff] }
0x194a   :  { %10449 = vrsqrt.f32 %v7442_v27  ;;  %v7436_v16 = vmul.f32 0.015625, %v7418_v47  ;;  %v8115_v27 = vld [vmem:[%s15949_s16 + $0xb0] sm:$0xff] }
0x194b   :  { %v7445_v8 = vadd.f32 1e-06, %v7437_v49  ;;  %v9991_v47 = vpack.c.bf16 %v8116_v37, %v8115_v27  ;;  %v17027_v37 = vld [vmem:[#allocation10_spill] sm:$0xff] }
0x194c   :  { %v7444_v20 = vadd.f32 1e-06, %v7436_v16  ;;  %v8099_v16 = vld [vmem:[%s15949_s16 + $0x30] sm:$0xff] }
0x194e   :  { %10451 = vrsqrt.f32 %v7444_v20 }
0x194f   :  { %10453 = vrsqrt.f32 %v7445_v8  ;;  %v8100_v8 = vld [vmem:[%s15949_s16 + $0x38] sm:$0xff] }
0x1953   :  { %v10448_v5 = vpop.eup %10447 }
0x1954   :  { %v10450_v36 = vpop.eup %10449  ;;  %v7459_v54 = vmul.f32 %v10448_v5, %v15346_v42  ;;  %v9993_v5 = vpack.c.bf16 %v8100_v8, %v8099_v16 }
0x1955   :  { %v7458_v34 = vmul.f32 %v10450_v36, %v15353_v23 }
0x1956   :  { %v7474_v52 = vmul.f32 %v15460_v13, %v7459_v54 }
0x1957   :  { %v7473_v46 = vmul.f32 %v15460_v13, %v7458_v34  ;;  %v8117_v34 = vld [vmem:[%s15949_s16 + $0xc0] sm:$0xff] }
0x1958   :  { %v10452_v10 = vpop.eup %10451  ;;  %v7489_v42 = vadd.f32 %v15467_v35, %v7474_v52  ;;  %v8101_v52 = vld [vmem:[%s15949_s16 + $0x40] sm:$0xff] }
0x1959   :  { %v7488_v38 = vadd.f32 %v15467_v35, %v7473_v46  ;;  %v7460_v32 = vmul.f32 %v10452_v10, %v15371_v51  ;;  %v10454_v61 = vpop.eup %10453  ;;  %v8118_v46 = vld [vmem:[%s15949_s16 + $0xc8] sm:$0xff] }
0x195a   :  { %v7461_v23 = vmul.f32 %v10454_v61, %v15364_v28  ;;  %v8109_v28 = vld [vmem:[%s15949_s16 + $0x80] sm:$0xff]  ;;  %v9995_v10 = vpack.c.bf16 %v8118_v46, %v8117_v34  ;;  %v8119_v61 = vld [vmem:[%s15949_s16 + $0xd0] sm:$0xff] }
0x195b   :  { %8405 = vmatmul.mubr.msk.f32.vlgmr.msra.gmra.mrb[20].mxu1 %vm968_vm1, %v7488_v38  ;;  %v7475_v31 = vmul.f32 %v15460_v13, %v7460_v32  ;;  %v9979_v40 = vpack.c.bf16 %v8110_v4, %v8109_v28  ;;  %v8102_v38 = vld [vmem:[%s15949_s16 + $0x48] sm:$0xff]  ;;  %v8121_v4 = vld [vmem:[%s15949_s16 + $0xe0] sm:$0xff] }
0x195c   :  { %7618 = vmatprep.mubr.f32.mxu1 %v17008_v0  ;;  %v7476_v24 = vmul.f32 %v15460_v13, %v7461_v23  ;;  %v9997_v32 = vpack.c.bf16 %v8102_v38, %v8101_v52 }
0x195d   :  { %v7490_v14 = vadd.f32 %v15467_v35, %v7475_v31  ;;  %9980 = vmatprep.subr.bf16.mxu1 %v9979_v40  ;;  %v8103_v31 = vld [vmem:[%s15949_s16 + $0x50] sm:$0xff]  ;;  %v8122_v40 = vld [vmem:[%s15949_s16 + $0xe8] sm:$0xff] }
0x195e   :  { %v7491_v51 = vadd.f32 %v15467_v35, %v7476_v24  ;;  %9982 = vmatpush3.bf16.msra.mxu1 %v9981_v21  ;;  %v8104_v24 = vld [vmem:[%s15949_s16 + $0x58] sm:$0xff]  ;;  %v10003_v21 = vpack.c.bf16 %v8122_v40, %v8121_v4 }
0x195f   :  { %8406 = vmatmul.mubr.msk.f32.gmra.mrb[22].mxu1 %vm968_vm1, %v7489_v42  ;;  %9984 = vmatprep.subr.bf16.mxu1 %v9983_v62  ;;  %v8120_v42 = vld [vmem:[%s15949_s16 + $0xd8] sm:$0xff]  ;;  %v10005_v62 = vpack.c.bf16 %v8106_v39, %v8105_v56 }
0x1960   :  { %7624 = vmatprep.mubr.f32.mxu1 %v17008_v0  ;;  %v9999_v23 = vpack.c.bf16 %v8120_v42, %v8119_v61 }
0x1962   :  { %9986 = vmatpush3.bf16.msra.mxu1 %v9985_v50 }
0x1963   :  { %8407 = vmatmul.mubr.msk.f32.gmra.mrb[24].mxu1 %vm968_vm1, %v7490_v14  ;;  %9988 = vmatprep.subr.bf16.mxu1 %v9987_v58  ;;  %v10001_v14 = vpack.c.bf16 %v8104_v24, %v8103_v31 }
0x1964   :  { %7630 = vmatprep.mubr.f32.mxu1 %v17008_v0 }
0x1966   :  { %9990 = vmatpush3.bf16.msra.mxu1 %v9989_v12 }
0x1967   :  { %8408 = vmatmul.mubr.msk.f32.gmra.mrb[26].mxu1 %vm968_vm1, %v7491_v51  ;;  %9992 = vmatprep.subr.bf16.mxu1 %v9991_v47 }
0x1968   :  { %7636 = vmatprep.mubr.f32.mxu1 %v17008_v0 }
0x196a   :  { %9994 = vmatpush3.bf16.msra.mxu1 %v9993_v5 }
0x196b   :  { %9996 = vmatprep.subr.bf16.mxu1 %v9995_v10 }
0x196e   :  { %9998 = vmatpush3.bf16.msra.mxu1 %v9997_v32 }
0x196f   :  { %10000 = vmatprep.subr.bf16.mxu1 %v9999_v23 }
0x1972   :  { %10002 = vmatpush3.bf16.msra.mxu1 %v10001_v14 }
0x1973   :  { %10004 = vmatprep.subr.bf16.mxu1 %v10003_v21 }
0x1976   :  { %10006 = vmatpush3.bf16.msra.mxu1 %v10005_v62 }
0x19d1   :  { %v7427_v25 = vpop.xlane.xlu0 %7426 }
0x19d2   :  { %v7439_v9 = vmul.f32 0.015625, %v7427_v25  ;;  %v7424_v41 = vpop.xlane.xlu1 %7423 }
0x19d3   :  { %v7438_v17 = vmul.f32 0.015625, %v7424_v41  ;;  %v8108_v41 = vld [vmem:[%s15949_s16 + $0x78] sm:$0xff] }
0x19d4   :  { %v7447_v30 = vadd.f32 1e-06, %v7439_v9  ;;  %v8107_v9 = vld [vmem:[%s15949_s16 + $0x70] sm:$0xff] }
0x19d5   :  { %v7446_v3 = vadd.f32 1e-06, %v7438_v17  ;;  %v7433_v60 = vpop.xlane.xlu0 %7432  ;;  %v10009_v59 = vpack.c.bf16 %v8108_v41, %v8107_v9 }
0x19d6   :  { %10455 = vrsqrt.f32 %v7447_v30  ;;  %v7441_v15 = vmul.f32 0.015625, %v7433_v60  ;;  %v7430_v49 = vpop.xlane.xlu1 %7429  ;;  %v17026_v60 = vld [vmem:[#allocation9_spill] sm:$0xff] }
0x19d7   :  { %10457 = vrsqrt.f32 %v7446_v3  ;;  %v7440_v20 = vmul.f32 0.015625, %v7430_v49 }
0x19d8   :  { %v7449_v36 = vadd.f32 1e-06, %v7441_v15 }
0x19d9   :  { %v7448_v54 = vadd.f32 1e-06, %v7440_v20 }
0x19db   :  { %10459 = vrsqrt.f32 %v7448_v54 }
0x19dc   :  { %10461 = vrsqrt.f32 %v7449_v36 }
0x19e0   :  { %v10456_v51 = vpop.eup %10455 }
0x19e1   :  { %v10458_v28 = vpop.eup %10457  ;;  %v7463_v57 = vmul.f32 %v10456_v51, %v15434_v45  ;;  %v8123_v45 = vld [vmem:[%s15949_s16 + $0xf0] sm:$0xff] }
0x19e2   :  { %v7462_v6 = vmul.f32 %v10458_v28, %v15437_v53  ;;  %v8124_v53 = vld [vmem:[%s15949_s16 + $0xf8] sm:$0xff] }
0x19e3   :  { %v7478_v50 = vmul.f32 %v15460_v13, %v7463_v57  ;;  %v10007_v63 = vpack.c.bf16 %v8124_v53, %v8123_v45 }
0x19e4   :  { %v7477_v19 = vmul.f32 %v15460_v13, %v7462_v6 }
0x19e5   :  { %v10460_v18 = vpop.eup %10459  ;;  %10008 = vmatprep.subr.bf16.mxu1 %v10007_v63  ;;  %v7493_v2 = vadd.f32 %v15467_v35, %v7478_v50 }
0x19e6   :  { %v7492_v25 = vadd.f32 %v15467_v35, %v7477_v19  ;;  %v7464_v22 = vmul.f32 %v10460_v18, %v15448_v29  ;;  %v10462_v58 = vpop.eup %10461  ;;  %10010 = vmatpush3.bf16.msra.mxu1 %v10009_v59  ;;  %v10589_v59 = vmov -1.0  }
0x19e7   :  { %v7465_v29 = vmul.f32 %v10462_v58, %v15444_v48  ;;  %v7512_v48 = vld [vmem:[%s15948_s15] sm:$0x3] }
0x19e8   :  { %8409 = vmatmul.mubr.msk.f32.gmra.mrb[28].mxu1 %vm968_vm1, %v7492_v25  ;;  %v7479_v17 = vmul.f32 %v15460_v13, %v7464_v22  ;;  %v15606_v27 = vrot.slane %v7512_v48, %v17026_v60  ;;  %v15609_v15 = vrot.slane %v7512_v48, %v17027_v37 }
0x19e9   :  { %7642 = vmatprep.mubr.f32.mxu1 %v17008_v0  ;;  %v7480_v12 = vmul.f32 %v15460_v13, %v7465_v29 }
0x19ea   :  { %v7494_v30 = vadd.f32 %v15467_v35, %v7479_v17 }
0x19eb   :  { %v7495_v3 = vadd.f32 %v15467_v35, %v7480_v12 }
0x19ec   :  { %8410 = vmatmul.mubr.msk.f32.gmra.mrb[30].mxu1 %vm968_vm1, %v7493_v2 }
0x19ed   :  { %7648 = vmatprep.mubr.f32.mxu1 %v17008_v0 }
0x19f0   :  { %8411 = vmatmul.mubr.msk.f32.gmra.mrb[32].mxu1 %vm968_vm1, %v7494_v30 }
0x19f1   :  { %7654 = vmatprep.mubr.f32.mxu1 %v17008_v0 }
0x19f4   :  { %8412 = vmatmul.mubr.msk.f32.gmra.mrb[34].mxu1 %vm968_vm1, %v7495_v3 }
0x1a2e   :  { %v7614_v13 = vpop.f32.mrb[20].mxu1 }
0x1a2f   :  { %v7615_v49 = vadd.f32 %v7614_v13, %v15606_v27  ;;  %v7616_v47 = vpop.f32.mrb[21].mxu1 }
0x1a30   :  { %v7617_v0 = vadd.f32 %v7616_v47, %v15609_v15 }
0x1a31   :  { %v7677_v16 = vmul.f32 0.70710677, %v7615_v49  ;;  %v15641_v50 = vmul.f32 0.5, %v7615_v49 }
0x1a32   :  { %v7678_v35 = vmul.f32 0.70710677, %v7617_v0  ;;  %v7620_v8 = vpop.f32.mrb[22].mxu1  ;;  %v15643_v22 = vmul.f32 0.5, %v7617_v0 }
0x1a33   :  { %v7725_v20 = vand.u32 2147483647, %v7677_v16  ;;  %v15614_v5 = vadd.f32 %v7620_v8, %v15606_v27  ;;  %v7622_v36 = vpop.f32.mrb[23].mxu1  ;;  %vm7693_vm3 = vcmp.ge.f32.partialorder %v7677_v16, 0.0 }
0x1a34   :  { %v7726_v54 = vand.u32 2147483647, %v7678_v35  ;;  %v15617_v34 = vadd.f32 %v7622_v36, %v15609_v15  ;;  %vm7694_vm4 = vcmp.ge.f32.partialorder %v7678_v35, 0.0  ;;  %v15651_v2 = vsel %vm7693_vm3, 1.0, %v10589_v59 }
0x1a35   :  { %v7741_v46 = vmul.f32 0.3275911, %v7725_v20  ;;  %v7679_v52 = vmul.f32 0.70710677, %v15614_v5  ;;  %v7949_v40 = vsub.f32 0.0, %v7725_v20  ;;  %v15661_v60 = vsel %vm7694_vm4, 1.0, %v10589_v59 }
0x1a36   :  { %v7742_v10 = vmul.f32 0.3275911, %v7726_v54  ;;  %v15621_v32 = vmul.f32 0.70710677, %v15617_v34  ;;  %v7626_v61 = vpop.f32.mrb[24].mxu1  ;;  %v7950_v39 = vsub.f32 0.0, %v7726_v54 }
0x1a37   :  { %v7757_v38 = vadd.f32 1.0, %v7741_v46  ;;  %v7727_v23 = vand.u32 2147483647, %v7679_v52  ;;  %v7628_v31 = vpop.f32.mrb[25].mxu1  ;;  %v15627_v28 = vadd.f32 %v7626_v61, %v15606_v27  ;;  %v7965_v45 = vmul.f32 %v7949_v40, %v7725_v20 }
0x1a38   :  { %v7758_v42 = vadd.f32 1.0, %v7742_v10  ;;  %v15624_v51 = vand.u32 2147483647, %v15621_v32  ;;  %v15630_v6 = vadd.f32 %v7628_v31, %v15609_v15  ;;  %v7966_v63 = vmul.f32 %v7950_v39, %v7726_v54 }
0x1a39   :  { %10463 = vrcp.f32 %v7757_v38  ;;  %v7743_v24 = vmul.f32 0.3275911, %v7727_v23  ;;  %v15634_v56 = vmul.f32 0.70710677, %v15627_v28  ;;  %v7951_v29 = vsub.f32 0.0, %v7727_v23 }
0x1a3a   :  { %10465 = vrcp.f32 %v7758_v42  ;;  %v7632_v14 = vpop.f32.mrb[26].mxu1  ;;  %v7744_v21 = vmul.f32 0.3275911, %v15624_v51  ;;  %v15637_v62 = vmul.f32 0.70710677, %v15630_v6  ;;  %vm7695_vm5 = vcmp.ge.f32.partialorder %v7679_v52, 0.0 }
0x1a3b   :  { %v7634_v4 = vpop.f32.mrb[27].mxu1  ;;  %v7759_v57 = vadd.f32 1.0, %v7743_v24  ;;  %v7729_v18 = vand.u32 2147483647, %v15634_v56  ;;  %v15646_v41 = vadd.f32 %v7632_v14, %v15606_v27  ;;  %v7981_v48 = vmul.f32 1.442695, %v7965_v45 }
0x1a3c   :  { %v7760_v19 = vadd.f32 1.0, %v7744_v21  ;;  %v7730_v53 = vand.u32 2147483647, %v15637_v62  ;;  %v15654_v12 = vadd.f32 %v7634_v4, %v15609_v15  ;;  %vm7696_vm6 = vcmp.ge.f32.partialorder %v15621_v32, 0.0 }
0x1a3d   :  { %10467 = vrcp.f32 %v7759_v57  ;;  %v7745_v25 = vmul.f32 0.3275911, %v7729_v18  ;;  %v15665_v13 = vmul.f32 0.70710677, %v15646_v41  ;;  %v7983_v47 = vmul.f32 1.442695, %v7966_v63 }
0x1a3e   :  { %10469 = vrcp.f32 %v7760_v19  ;;  %v7746_v9 = vmul.f32 0.3275911, %v7730_v53  ;;  %v15668_v0 = vmul.f32 0.70710677, %v15654_v12  ;;  %v7967_v16 = vmul.f32 %v7951_v29, %v7727_v23 }
0x1a3f   :  { %v7761_v17 = vadd.f32 1.0, %v7745_v25  ;;  %v7952_v8 = vsub.f32 0.0, %v15624_v51  ;;  %v7731_v35 = vand.u32 2147483647, %v15665_v13  ;;  %v15677_v46 = vsel %vm7695_vm5, 1.0, %v10589_v59 }
0x1a40   :  { %v7762_v37 = vadd.f32 1.0, %v7746_v9  ;;  %v7953_v10 = vsub.f32 0.0, %v7729_v18  ;;  %v15683_v38 = vsel %vm7696_vm6, 1.0, %v10589_v59  ;;  %v7954_v61 = vsub.f32 0.0, %v7730_v53 }
0x1a41   :  { %10471 = vrcp.f32 %v7761_v17  ;;  %v7747_v42 = vmul.f32 0.3275911, %v7731_v35  ;;  %v15686_v31 = vand.u32 2147483647, %v15668_v0  ;;  %v7985_v40 = vmul.f32 1.442695, %v7967_v16 }
0x1a42   :  { %10473 = vrcp.f32 %v7762_v37  ;;  %v7968_v57 = vmul.f32 %v7952_v8, %v15624_v51  ;;  %v7969_v32 = vmul.f32 %v7953_v10, %v7729_v18  ;;  %v7970_v63 = vmul.f32 %v7954_v61, %v7730_v53 }
0x1a43   :  { %v15648_v58 = vpop.eup %10463  ;;  %10475 = vpow2.f32 %v7981_v48  ;;  %v7763_v21 = vadd.f32 1.0, %v7747_v42  ;;  %v7748_v19 = vmul.f32 0.3275911, %v15686_v31  ;;  %v7955_v17 = vsub.f32 0.0, %v7731_v35 }
0x1a44   :  { %v15656_v30 = vpop.eup %10465  ;;  %v7805_v3 = vmul.f32 1.0614054, %v15648_v58  ;;  %10477 = vpow2.f32 %v7983_v47  ;;  %v7989_v53 = vmul.f32 1.442695, %v7969_v32  ;;  %vm7697_vm7 = vcmp.ge.f32.partialorder %v15634_v56, 0.0 }
0x1a45   :  { %v7806_v20 = vmul.f32 1.0614054, %v15656_v30  ;;  %10479 = vrcp.f32 %v7763_v21  ;;  %vm7698_vm8 = vcmp.ge.f32.partialorder %v15637_v62, 0.0  ;;  %vm7699_vm9 = vcmp.ge.f32.partialorder %v15665_v13, 0.0 }
0x1a46   :  { %v7821_v49 = vadd.f32 -1.4531521, %v7805_v3  ;;  %v7764_v3 = vadd.f32 1.0, %v7748_v19  ;;  %10481 = vpow2.f32 %v7985_v40  ;;  %v7665_v62 = vmul.f32 0.5, %v15627_v28 }
0x1a47   :  { %v15673_v36 = vpop.eup %10467  ;;  %v7822_v24 = vadd.f32 -1.4531521, %v7806_v20  ;;  %vm7700_vm10 = vcmp.ge.f32.partialorder %v15668_v0, 0.0  ;;  %v7668_v28 = vmul.f32 0.5, %v15654_v12 }
0x1a48   :  { %v7837_v54 = vmul.f32 %v15648_v58, %v7821_v49  ;;  %v7807_v52 = vmul.f32 1.0614054, %v15673_v36  ;;  %v15688_v14 = vpop.eup %10469  ;;  %v7987_v49 = vmul.f32 1.442695, %v7968_v57  ;;  %10483 = vrcp.f32 %v7764_v3 }
0x1a49   :  { %v7838_v45 = vmul.f32 %v15656_v30, %v7822_v24  ;;  %v7808_v9 = vmul.f32 1.0614054, %v15688_v14  ;;  %v7991_v24 = vmul.f32 1.442695, %v7970_v63  ;;  %v7716_v13 = vsel %vm7700_vm10, 1.0, %v10589_v59 }
0x1a4a   :  { %v7853_v23 = vadd.f32 1.4214138, %v7837_v54  ;;  %v7823_v4 = vadd.f32 -1.4531521, %v7807_v52  ;;  %10485 = vpow2.f32 %v7987_v49 }
0x1a4b   :  { %v7854_v48 = vadd.f32 1.4214138, %v7838_v45  ;;  %v15696_v37 = vpop.eup %10471  ;;  %v7824_v18 = vadd.f32 -1.4531521, %v7808_v9  ;;  %10487 = vpow2.f32 %v7989_v53  ;;  %v7956_v9 = vsub.f32 0.0, %v15686_v31 }
0x1a4c   :  { %v7869_v39 = vmul.f32 %v15648_v58, %v7853_v23  ;;  %v7839_v25 = vmul.f32 %v15673_v36, %v7823_v4  ;;  %v15698_v47 = vpop.eup %10473  ;;  %v7809_v8 = vmul.f32 1.0614054, %v15696_v37  ;;  %v7971_v4 = vmul.f32 %v7955_v17, %v7731_v35 }
0x1a4d   :  { %v7870_v54 = vmul.f32 %v15656_v30, %v7854_v48  ;;  %v7840_v10 = vmul.f32 %v15688_v14, %v7824_v18  ;;  %v7810_v52 = vmul.f32 1.0614054, %v15698_v47  ;;  %v10476_v61 = vpop.eup %10475  ;;  %10489 = vpow2.f32 %v7991_v24 }
0x1a4e   :  { %v7885_v29 = vadd.f32 -0.28449672, %v7869_v39  ;;  %v7855_v51 = vadd.f32 1.4214138, %v7839_v25  ;;  %v7825_v23 = vadd.f32 -1.4531521, %v7809_v8  ;;  %v10478_v39 = vpop.eup %10477 }
0x1a4f   :  { %v7886_v57 = vadd.f32 -0.28449672, %v7870_v54  ;;  %v7856_v21 = vadd.f32 1.4214138, %v7840_v10  ;;  %v7826_v45 = vadd.f32 -1.4531521, %v7810_v52  ;;  %v7972_v52 = vmul.f32 %v7956_v9, %v15686_v31 }
0x1a50   :  { %v7901_v16 = vmul.f32 %v15648_v58, %v7885_v29  ;;  %v7871_v20 = vmul.f32 %v15673_v36, %v7855_v51  ;;  %v7841_v19 = vmul.f32 %v15696_v37, %v7825_v23  ;;  %v7993_v3 = vmul.f32 1.442695, %v7971_v4  ;;  %v15713_v51 = vpop.eup %10479 }
0x1a51   :  { %v7902_v29 = vmul.f32 %v15656_v30, %v7886_v57  ;;  %v7872_v63 = vmul.f32 %v15688_v14, %v7856_v21  ;;  %v7842_v48 = vmul.f32 %v15698_v47, %v7826_v45  ;;  %v7811_v53 = vmul.f32 1.0614054, %v15713_v51  ;;  %v10482_v54 = vpop.eup %10481 }
0x1a52   :  { %v7917_v42 = vadd.f32 0.2548296, %v7901_v16  ;;  %v7887_v40 = vadd.f32 -0.28449672, %v7871_v20  ;;  %v7857_v17 = vadd.f32 1.4214138, %v7841_v19  ;;  %v15721_v23 = vpop.eup %10483  ;;  %10491 = vpow2.f32 %v7993_v3 }
0x1a53   :  { %v7918_v49 = vadd.f32 0.2548296, %v7902_v29  ;;  %v7888_v18 = vadd.f32 -0.28449672, %v7872_v63  ;;  %v7858_v20 = vadd.f32 1.4214138, %v7842_v48 }
0x1a54   :  { %v7933_v32 = vmul.f32 %v15648_v58, %v7917_v42  ;;  %v7903_v25 = vmul.f32 %v15673_v36, %v7887_v40  ;;  %v7873_v8 = vmul.f32 %v15696_v37, %v7857_v17  ;;  %v7827_v40 = vadd.f32 -1.4531521, %v7811_v53 }
0x1a55   :  { %v7904_v42 = vmul.f32 %v15688_v14, %v7888_v18  ;;  %v7874_v57 = vmul.f32 %v15698_v47, %v7858_v20 }
0x1a56   :  { %v8013_v35 = vmul.f32 %v10476_v61, %v7933_v32  ;;  %v7919_v58 = vadd.f32 0.2548296, %v7903_v25  ;;  %v7934_v61 = vmul.f32 %v15656_v30, %v7918_v49  ;;  %v7889_v4 = vadd.f32 -0.28449672, %v7873_v8  ;;  %v10486_v25 = vpop.eup %10485 }
0x1a57   :  { %v7920_v19 = vadd.f32 0.2548296, %v7904_v42  ;;  %v7843_v30 = vmul.f32 %v15713_v51, %v7827_v40  ;;  %v7890_v45 = vadd.f32 -0.28449672, %v7874_v57 }
0x1a58   :  { %v8029_v16 = vsub.f32 1.0, %v8013_v35  ;;  %v7935_v10 = vmul.f32 %v15673_v36, %v7919_v58  ;;  %v8014_v32 = vmul.f32 %v10478_v39, %v7934_v61  ;;  %v7812_v36 = vmul.f32 1.0614054, %v15721_v23  ;;  %v10488_v35 = vpop.eup %10487 }
0x1a59   :  { %v7905_v31 = vmul.f32 %v15696_v37, %v7889_v4  ;;  %v7936_v29 = vmul.f32 %v15688_v14, %v7920_v19  ;;  %v7859_v48 = vadd.f32 1.4214138, %v7843_v30  ;;  %v7995_v58 = vmul.f32 1.442695, %v7972_v52 }
0x1a5a   :  { %v8045_v24 = vmul.f32 %v8029_v16, %v15651_v2  ;;  %v8015_v21 = vmul.f32 %v10482_v54, %v7935_v10  ;;  %v8030_v2 = vsub.f32 1.0, %v8014_v32  ;;  %v7828_v63 = vadd.f32 -1.4531521, %v7812_v36  ;;  %v10490_v54 = vpop.eup %10489 }
0x1a5b   :  { %v7921_v17 = vadd.f32 0.2548296, %v7905_v31  ;;  %v7906_v39 = vmul.f32 %v15698_v47, %v7890_v45  ;;  %v8016_v16 = vmul.f32 %v10486_v25, %v7936_v29  ;;  %v7875_v20 = vmul.f32 %v15713_v51, %v7859_v48 }
0x1a5c   :  { %v8031_v9 = vsub.f32 1.0, %v8015_v21  ;;  %v8061_v49 = vadd.f32 1.0, %v8045_v24  ;;  %v8046_v18 = vmul.f32 %v8030_v2, %v15661_v60  ;;  %v7844_v8 = vmul.f32 %v15721_v23, %v7828_v63  ;;  %v10492_v30 = vpop.eup %10491 }
0x1a5d   :  { %v7937_v53 = vmul.f32 %v15696_v37, %v7921_v17  ;;  %v7922_v14 = vadd.f32 0.2548296, %v7906_v39  ;;  %v8032_v52 = vsub.f32 1.0, %v8016_v16  ;;  %v7891_v24 = vadd.f32 -0.28449672, %v7875_v20 }
0x1a5e   :  { %v8047_v3 = vmul.f32 %v8031_v9, %v15677_v46  ;;  %v8062_v10 = vadd.f32 1.0, %v8046_v18  ;;  %v7860_v61 = vadd.f32 1.4214138, %v7844_v8  ;;  %10493 = vpow2.f32 %v7995_v58 }
0x1a5f   :  { %v8017_v42 = vmul.f32 %v10488_v35, %v7937_v53  ;;  %v7938_v60 = vmul.f32 %v15698_v47, %v7922_v14  ;;  %v8077_v4 = vmul.f32 %v8061_v49, %v15641_v50  ;;  %v8048_v37 = vmul.f32 %v8032_v52, %v15683_v38 }
0x1a60   :  { %v8078_v46 = vmul.f32 %v8062_v10, %v15643_v22  ;;  %v7876_v40 = vmul.f32 %v15721_v23, %v7860_v61  ;;  %v8063_v57 = vadd.f32 1.0, %v8047_v3  ;;  %v7907_v32 = vmul.f32 %v15713_v51, %v7891_v24 }
0x1a61   :  { %v8033_v21 = vsub.f32 1.0, %v8017_v42  ;;  %v8018_v19 = vmul.f32 %v10490_v54, %v7938_v60  ;;  %v7664_v36 = vmul.f32 0.5, %v15617_v34  ;;  %v7713_v31 = vsel %vm7697_vm7, 1.0, %v10589_v59 }
0x1a62   :  { %8189 = vmatprep.mubr.f32.mxu1 %v8078_v46  ;;  %v8064_v47 = vadd.f32 1.0, %v8048_v37  ;;  %v7892_v50 = vadd.f32 -0.28449672, %v7876_v40  ;;  %v7663_v22 = vmul.f32 0.5, %v15614_v5  ;;  %v7923_v45 = vadd.f32 0.2548296, %v7907_v32 }
0x1a63   :  { %v8049_v38 = vmul.f32 %v8033_v21, %v7713_v31  ;;  %8190 = vmatmul.mubr.f32.vlgmr.msra.gmra.mrb[36].mxu1 %v8077_v4  ;;  %v8034_v25 = vsub.f32 1.0, %v8018_v19  ;;  %v7714_v9 = vsel %vm7698_vm8, 1.0, %v10589_v59  ;;  %v7666_v5 = vmul.f32 0.5, %v15630_v6 }
0x1a64   :  { %v8080_v2 = vmul.f32 %v8064_v47, %v7664_v36  ;;  %v7908_v34 = vmul.f32 %v15721_v23, %v7892_v50  ;;  %v8079_v29 = vmul.f32 %v8063_v57, %v7663_v22  ;;  %v7939_v56 = vmul.f32 %v15713_v51, %v7923_v45 }
0x1a65   :  { %v8050_v63 = vmul.f32 %v8034_v25, %v7714_v9  ;;  %v8065_v35 = vadd.f32 1.0, %v8049_v38  ;;  %v7715_v51 = vsel %vm7699_vm9, 1.0, %v10589_v59  ;;  %v7667_v54 = vmul.f32 0.5, %v15646_v41 }
0x1a66   :  { %8194 = vmatprep.mubr.f32.mxu1 %v8080_v2  ;;  %v7924_v17 = vadd.f32 0.2548296, %v7908_v34  ;;  %v8019_v48 = vmul.f32 %v10492_v30, %v7939_v56 }
0x1a67   :  { %8195 = vmatmul.mubr.f32.gmra.mrb[38].mxu1 %v8079_v29  ;;  %v8066_v58 = vadd.f32 1.0, %v8050_v63  ;;  %v8081_v8 = vmul.f32 %v8065_v35, %v7665_v62 }
0x1a68   :  { %v7940_v39 = vmul.f32 %v15721_v23, %v7924_v17  ;;  %v10494_v49 = vpop.eup %10493  ;;  %v8035_v18 = vsub.f32 1.0, %v8019_v48 }
0x1a69   :  { %v8082_v16 = vmul.f32 %v8066_v58, %v7666_v5 }
0x1a6a   :  { %v8020_v3 = vmul.f32 %v10494_v49, %v7940_v39  ;;  %v8051_v53 = vmul.f32 %v8035_v18, %v7715_v51 }
0x1a6b   :  { %8199 = vmatprep.mubr.f32.mxu1 %v8082_v16 }
0x1a6c   :  { %8200 = vmatmul.mubr.f32.gmra.mrb[40].mxu1 %v8081_v8  ;;  %v8036_v6 = vsub.f32 1.0, %v8020_v3  ;;  %v8067_v14 = vadd.f32 1.0, %v8051_v53 }
0x1a6e   :  { %v8052_v20 = vmul.f32 %v8036_v6, %v7716_v13  ;;  %v8083_v52 = vmul.f32 %v8067_v14, %v7667_v54 }
0x1a70   :  { %v8068_v23 = vadd.f32 1.0, %v8052_v20 }
0x1a72   :  { %v8084_v10 = vmul.f32 %v8068_v23, %v7668_v28 }
0x1a74   :  { %8204 = vmatprep.mubr.f32.mxu1 %v8084_v10 }
0x1a75   :  { %8205 = vmatmul.mubr.f32.gmra.mrb[42].mxu1 %v8083_v52 }
0x1abb   :  { %v7638_v61 = vpop.f32.mrb[28].mxu1 }
0x1abc   :  { %v7639_v0 = vadd.f32 %v7638_v61, %v15606_v27  ;;  %v7640_v42 = vpop.f32.mrb[29].mxu1 }
0x1abd   :  { %v7641_v24 = vadd.f32 %v7640_v42, %v15609_v15 }
0x1abe   :  { %v7685_v60 = vmul.f32 0.70710677, %v7639_v0  ;;  %v15786_v49 = vmul.f32 0.5, %v7639_v0 }
0x1abf   :  { %v7686_v4 = vmul.f32 0.70710677, %v7641_v24  ;;  %v7644_v46 = vpop.f32.mrb[30].mxu1  ;;  %v15788_v16 = vmul.f32 0.5, %v7641_v24 }
0x1ac0   :  { %v7733_v37 = vand.u32 2147483647, %v7685_v60  ;;  %v15765_v40 = vadd.f32 %v7644_v46, %v15606_v27  ;;  %v7646_v12 = vpop.f32.mrb[31].mxu1  ;;  %vm7701_vm11 = vcmp.ge.f32.partialorder %v7685_v60, 0.0 }
0x1ac1   :  { %v7734_v57 = vand.u32 2147483647, %v7686_v4  ;;  %v15768_v41 = vadd.f32 %v7646_v12, %v15609_v15  ;;  %vm7702_vm12 = vcmp.ge.f32.partialorder %v7686_v4, 0.0  ;;  %v15796_v6 = vsel %vm7701_vm11, 1.0, %v10589_v59 }
0x1ac2   :  { %v7749_v21 = vmul.f32 0.3275911, %v7733_v37  ;;  %v7687_v19 = vmul.f32 0.70710677, %v15765_v40  ;;  %v7957_v34 = vsub.f32 0.0, %v7733_v37  ;;  %v15805_v10 = vsel %vm7702_vm12, 1.0, %v10589_v59 }
0x1ac3   :  { %v7750_v32 = vmul.f32 0.3275911, %v7734_v57  ;;  %v7688_v31 = vmul.f32 0.70710677, %v15768_v41  ;;  %v7650_v47 = vpop.f32.mrb[32].mxu1  ;;  %v7958_v17 = vsub.f32 0.0, %v7734_v57 }
0x1ac4   :  { %v7765_v36 = vadd.f32 1.0, %v7749_v21  ;;  %v7735_v30 = vand.u32 2147483647, %v7687_v19  ;;  %v7652_v22 = vpop.f32.mrb[33].mxu1  ;;  %v15773_v9 = vadd.f32 %v7650_v47, %v15606_v27  ;;  %v7973_v62 = vmul.f32 %v7957_v34, %v7733_v37 }
0x1ac5   :  { %v7766_v50 = vadd.f32 1.0, %v7750_v32  ;;  %v7736_v25 = vand.u32 2147483647, %v7688_v31  ;;  %v15776_v56 = vadd.f32 %v7652_v22, %v15609_v15  ;;  %v7974_v8 = vmul.f32 %v7958_v17, %v7734_v57 }
0x1ac6   :  { %10495 = vrcp.f32 %v7765_v36  ;;  %v7751_v38 = vmul.f32 0.3275911, %v7735_v30  ;;  %v15779_v35 = vmul.f32 0.70710677, %v15773_v9  ;;  %v7959_v13 = vsub.f32 0.0, %v7735_v30 }
0x1ac7   :  { %10497 = vrcp.f32 %v7766_v50  ;;  %v7656_v45 = vpop.f32.mrb[34].mxu1  ;;  %v7752_v63 = vmul.f32 0.3275911, %v7736_v25  ;;  %v15782_v5 = vmul.f32 0.70710677, %v15776_v56  ;;  %vm7703_vm13 = vcmp.ge.f32.partialorder %v7687_v19, 0.0 }
0x1ac8   :  { %v7658_v2 = vpop.f32.mrb[35].mxu1  ;;  %v7767_v29 = vadd.f32 1.0, %v7751_v38  ;;  %v7737_v58 = vand.u32 2147483647, %v15779_v35  ;;  %v15791_v3 = vadd.f32 %v7656_v45, %v15606_v27  ;;  %v7997_v54 = vmul.f32 1.442695, %v7973_v62 }
0x1ac9   :  { %v7768_v48 = vadd.f32 1.0, %v7752_v63  ;;  %v7738_v39 = vand.u32 2147483647, %v15782_v5  ;;  %v15799_v14 = vadd.f32 %v7658_v2, %v15609_v15  ;;  %vm7704_vm14 = vcmp.ge.f32.partialorder %v7688_v31, 0.0 }
0x1aca   :  { %10499 = vrcp.f32 %v7767_v29  ;;  %v7753_v18 = vmul.f32 0.3275911, %v7737_v58  ;;  %v15808_v52 = vmul.f32 0.70710677, %v15791_v3  ;;  %v7999_v0 = vmul.f32 1.442695, %v7974_v8 }
0x1acb   :  { %10501 = vrcp.f32 %v7768_v48  ;;  %v7754_v51 = vmul.f32 0.3275911, %v7738_v39  ;;  %v15811_v15 = vmul.f32 0.70710677, %v15799_v14  ;;  %v7975_v42 = vmul.f32 %v7959_v13, %v7735_v30 }
0x1acc   :  { %v7769_v20 = vadd.f32 1.0, %v7753_v18  ;;  %v7960_v24 = vsub.f32 0.0, %v7736_v25  ;;  %v7739_v60 = vand.u32 2147483647, %v15808_v52  ;;  %v15819_v12 = vsel %vm7703_vm13, 1.0, %v10589_v59 }
0x1acd   :  { %v7770_v27 = vadd.f32 1.0, %v7754_v51  ;;  %v7961_v57 = vsub.f32 0.0, %v7737_v58  ;;  %v15824_v32 = vsel %vm7704_vm14, 1.0, %v10589_v59  ;;  %v7962_v19 = vsub.f32 0.0, %v7738_v39 }
0x1ace   :  { %10503 = vrcp.f32 %v7769_v20  ;;  %v7755_v36 = vmul.f32 0.3275911, %v7739_v60  ;;  %v15827_v50 = vand.u32 2147483647, %v15811_v15  ;;  %v8001_v45 = vmul.f32 1.442695, %v7975_v42 }
0x1acf   :  { %10505 = vrcp.f32 %v7770_v27  ;;  %v7976_v2 = vmul.f32 %v7960_v24, %v7736_v25  ;;  %v7977_v63 = vmul.f32 %v7961_v57, %v7737_v58  ;;  %v7978_v62 = vmul.f32 %v7962_v19, %v7738_v39 }
0x1ad0   :  { %v15793_v53 = vpop.eup %10495  ;;  %10507 = vpow2.f32 %v7997_v54  ;;  %v7771_v34 = vadd.f32 1.0, %v7755_v36  ;;  %v7756_v31 = vmul.f32 0.3275911, %v15827_v50  ;;  %v7963_v51 = vsub.f32 0.0, %v7739_v60 }
0x1ad1   :  { %v15801_v28 = vpop.eup %10497  ;;  %v7813_v23 = vmul.f32 1.0614054, %v15793_v53  ;;  %10509 = vpow2.f32 %v7999_v0  ;;  %v8003_v54 = vmul.f32 1.442695, %v7976_v2  ;;  %v8005_v39 = vmul.f32 1.442695, %v7977_v63 }
0x1ad2   :  { %v7814_v4 = vmul.f32 1.0614054, %v15801_v28  ;;  %10511 = vrcp.f32 %v7771_v34  ;;  %v7772_v13 = vadd.f32 1.0, %v7756_v31  ;;  %v8007_v36 = vmul.f32 1.442695, %v7978_v62 }
0x1ad3   :  { %v7829_v61 = vadd.f32 -1.4531521, %v7813_v23  ;;  %10513 = vpow2.f32 %v8001_v45  ;;  %vm7705_vm15 = vcmp.ge.f32.partialorder %v15779_v35, 0.0  ;;  %vm7706_vm0 = vcmp.ge.f32.partialorder %v15782_v5, 0.0 }
0x1ad4   :  { %v15815_v46 = vpop.eup %10499  ;;  %v7830_v30 = vadd.f32 -1.4531521, %v7814_v4  ;;  %10515 = vrcp.f32 %v7772_v13  ;;  %vm7707_vm2 = vcmp.ge.f32.partialorder %v15808_v52, 0.0  ;;  %v7673_v5 = vmul.f32 0.5, %v15773_v9 }
0x1ad5   :  { %v7845_v37 = vmul.f32 %v15793_v53, %v7829_v61  ;;  %v7815_v21 = vmul.f32 1.0614054, %v15815_v46  ;;  %v15829_v22 = vpop.eup %10501  ;;  %10517 = vpow2.f32 %v8003_v54  ;;  %vm7708_vm3 = vcmp.ge.f32.partialorder %v15811_v15, 0.0 }
0x1ad6   :  { %v7846_v17 = vmul.f32 %v15801_v28, %v7830_v30  ;;  %v7816_v18 = vmul.f32 1.0614054, %v15829_v22  ;;  %10519 = vpow2.f32 %v8005_v39  ;;  %v7724_v52 = vsel %vm7708_vm3, 1.0, %v10589_v59 }
0x1ad7   :  { %v7861_v47 = vadd.f32 1.4214138, %v7845_v37  ;;  %v7831_v38 = vadd.f32 -1.4531521, %v7815_v21  ;;  %10521 = vpow2.f32 %v8007_v36  ;;  %v7676_v9 = vmul.f32 0.5, %v15799_v14 }
0x1ad8   :  { %v7862_v20 = vadd.f32 1.4214138, %v7846_v17  ;;  %v15836_v23 = vpop.eup %10503  ;;  %v7832_v58 = vadd.f32 -1.4531521, %v7816_v18  ;;  %v7964_v17 = vsub.f32 0.0, %v15827_v50 }
0x1ad9   :  { %v7877_v29 = vmul.f32 %v15793_v53, %v7861_v47  ;;  %v7847_v48 = vmul.f32 %v15815_v46, %v7831_v38  ;;  %v15838_v27 = vpop.eup %10505  ;;  %v7817_v0 = vmul.f32 1.0614054, %v15836_v23  ;;  %v7979_v47 = vmul.f32 %v7963_v51, %v7739_v60 }
0x1ada   :  { %v7878_v24 = vmul.f32 %v15801_v28, %v7862_v20  ;;  %v7848_v4 = vmul.f32 %v15829_v22, %v7832_v58  ;;  %v7818_v37 = vmul.f32 1.0614054, %v15838_v27  ;;  %v10508_v57 = vpop.eup %10507 }
0x1adb   :  { %v7893_v8 = vadd.f32 -0.28449672, %v7877_v29  ;;  %v7863_v25 = vadd.f32 1.4214138, %v7847_v48  ;;  %v7833_v19 = vadd.f32 -1.4531521, %v7817_v0  ;;  %v10510_v2 = vpop.eup %10509 }
0x1adc   :  { %v7894_v38 = vadd.f32 -0.28449672, %v7878_v24  ;;  %v7864_v45 = vadd.f32 1.4214138, %v7848_v4  ;;  %v7834_v63 = vadd.f32 -1.4531521, %v7818_v37  ;;  %v15853_v13 = vpop.eup %10511  ;;  %v7980_v24 = vmul.f32 %v7964_v17, %v15827_v50 }
0x1add   :  { %v7909_v61 = vmul.f32 %v15793_v53, %v7893_v8  ;;  %v7879_v42 = vmul.f32 %v15815_v46, %v7863_v25  ;;  %v7849_v29 = vmul.f32 %v15836_v23, %v7833_v19  ;;  %v8009_v8 = vmul.f32 1.442695, %v7979_v47  ;;  %v10514_v39 = vpop.eup %10513 }
0x1ade   :  { %v7910_v48 = vmul.f32 %v15801_v28, %v7894_v38  ;;  %v7880_v62 = vmul.f32 %v15829_v22, %v7864_v45  ;;  %v7850_v51 = vmul.f32 %v15838_v27, %v7834_v63 }
0x1adf   :  { %v7925_v21 = vadd.f32 0.2548296, %v7909_v61  ;;  %v7895_v30 = vadd.f32 -0.28449672, %v7879_v42  ;;  %v7865_v18 = vadd.f32 1.4214138, %v7849_v29  ;;  %10523 = vpow2.f32 %v8009_v8 }
0x1ae0   :  { %v7926_v20 = vadd.f32 0.2548296, %v7910_v48  ;;  %v7896_v25 = vadd.f32 -0.28449672, %v7880_v62  ;;  %v7819_v61 = vmul.f32 1.0614054, %v15853_v13 }
0x1ae1   :  { %v7941_v34 = vmul.f32 %v15793_v53, %v7925_v21  ;;  %v7911_v31 = vmul.f32 %v15815_v46, %v7895_v30  ;;  %v7881_v58 = vmul.f32 %v15836_v23, %v7865_v18  ;;  %v7866_v0 = vadd.f32 1.4214138, %v7850_v51 }
0x1ae2   :  { %v7942_v4 = vmul.f32 %v15801_v28, %v7926_v20  ;;  %v7912_v37 = vmul.f32 %v15829_v22, %v7896_v25  ;;  %v7835_v36 = vadd.f32 -1.4531521, %v7819_v61  ;;  %v8011_v18 = vmul.f32 1.442695, %v7980_v24 }
0x1ae3   :  { %v8021_v60 = vmul.f32 %v10508_v57, %v7941_v34  ;;  %v7927_v53 = vadd.f32 0.2548296, %v7911_v31  ;;  %v15861_v57 = vpop.eup %10515  ;;  %v7897_v19 = vadd.f32 -0.28449672, %v7881_v58  ;;  %v7882_v47 = vmul.f32 %v15838_v27, %v7866_v0 }
0x1ae4   :  { %v8022_v38 = vmul.f32 %v10510_v2, %v7942_v4  ;;  %v7928_v45 = vadd.f32 0.2548296, %v7912_v37  ;;  %v7851_v28 = vmul.f32 %v15853_v13, %v7835_v36  ;;  %v10518_v29 = vpop.eup %10517  ;;  %10525 = vpow2.f32 %v8011_v18 }
0x1ae5   :  { %v8037_v54 = vsub.f32 1.0, %v8021_v60  ;;  %v7943_v42 = vmul.f32 %v15815_v46, %v7927_v53  ;;  %v7820_v46 = vmul.f32 1.0614054, %v15861_v57  ;;  %v7913_v50 = vmul.f32 %v15836_v23, %v7897_v19  ;;  %v10520_v48 = vpop.eup %10519 }
0x1ae6   :  { %v7898_v34 = vadd.f32 -0.28449672, %v7882_v47  ;;  %v7944_v31 = vmul.f32 %v15829_v22, %v7928_v45  ;;  %v7867_v60 = vadd.f32 1.4214138, %v7851_v28  ;;  %v10522_v61 = vpop.eup %10521  ;;  %v7721_v45 = vsel %vm7705_vm15, 1.0, %v10589_v59 }
0x1ae7   :  { %v8053_v21 = vmul.f32 %v8037_v54, %v15796_v6  ;;  %v8023_v30 = vmul.f32 %v10514_v39, %v7943_v42  ;;  %v8038_v6 = vsub.f32 1.0, %v8022_v38  ;;  %v7836_v17 = vadd.f32 -1.4531521, %v7820_v46 }
0x1ae8   :  { %v7929_v62 = vadd.f32 0.2548296, %v7913_v50  ;;  %v7914_v2 = vmul.f32 %v15838_v27, %v7898_v34  ;;  %v8024_v20 = vmul.f32 %v10518_v29, %v7944_v31  ;;  %v7883_v58 = vmul.f32 %v15853_v13, %v7867_v60 }
0x1ae9   :  { %v8039_v63 = vsub.f32 1.0, %v8023_v30  ;;  %v8069_v51 = vadd.f32 1.0, %v8053_v21  ;;  %v8054_v53 = vmul.f32 %v8038_v6, %v15805_v10  ;;  %v7852_v25 = vmul.f32 %v15861_v57, %v7836_v17  ;;  %v10524_v46 = vpop.eup %10523 }
0x1aea   :  { %v7945_v54 = vmul.f32 %v15836_v23, %v7929_v62  ;;  %v7930_v22 = vadd.f32 0.2548296, %v7914_v2  ;;  %v8040_v39 = vsub.f32 1.0, %v8024_v20  ;;  %v7899_v4 = vadd.f32 -0.28449672, %v7883_v58 }
0x1aeb   :  { %v8055_v8 = vmul.f32 %v8039_v63, %v15819_v12  ;;  %v8070_v0 = vadd.f32 1.0, %v8054_v53  ;;  %v7868_v42 = vadd.f32 1.4214138, %v7852_v25  ;;  %v8085_v37 = vmul.f32 %v8069_v51, %v15786_v49 }
0x1aec   :  { %v8025_v24 = vmul.f32 %v10520_v48, %v7945_v54  ;;  %v7946_v10 = vmul.f32 %v15838_v27, %v7930_v22  ;;  %v8056_v23 = vmul.f32 %v8040_v39, %v15824_v32  ;;  %v7915_v47 = vmul.f32 %v15853_v13, %v7899_v4 }
0x1aed   :  { %v8086_v12 = vmul.f32 %v8070_v0, %v15788_v16  ;;  %v7884_v21 = vmul.f32 %v15861_v57, %v7868_v42  ;;  %v8071_v19 = vadd.f32 1.0, %v8055_v8  ;;  %v7672_v38 = vmul.f32 0.5, %v15768_v41  ;;  %v8413_v42 = vld [vmem:[%s15950_s17] ss:$0 sm:$0xff]  ;;  %s10590_s17 = smov [#allocation2]  }
0x1aee   :  { %v8041_v36 = vsub.f32 1.0, %v8025_v24  ;;  %v8026_v30 = vmul.f32 %v10522_v61, %v7946_v10  ;;  %v8072_v27 = vadd.f32 1.0, %v8056_v23  ;;  %v7671_v16 = vmul.f32 0.5, %v15765_v40  ;;  %v10526_v18 = vpop.eup %10525  ;;  %s8267_s2 = sshll.u32 %s10590_s17, 4  ;;  %s8268_s2 = int_to_ptr.vmem [resolvable:$true] %s8267_s2 }
0x1aef   :  { %8209 = vmatprep.mubr.f32.mxu1 %v8086_v12  ;;  %v7900_v49 = vadd.f32 -0.28449672, %v7884_v21  ;;  %v7931_v50 = vadd.f32 0.2548296, %v7915_v47  ;;  %v7722_v34 = vsel %vm7706_vm0, 1.0, %v10589_v59  ;;  %v7674_v40 = vmul.f32 0.5, %v15776_v56  ;;  %p10566_p1 = scmp.lt.s32.totalorder %s8268_s2, %s8268_s2 }
0x1af0   :  { %v8057_v32 = vmul.f32 %v8041_v36, %v7721_v45  ;;  %8210 = vmatmul.mubr.f32.gmra.mrb[44].mxu1 %v8085_v37  ;;  %v8042_v28 = vsub.f32 1.0, %v8026_v30  ;;  %v8088_v29 = vmul.f32 %v8072_v27, %v7672_v38  ;;  %v8087_v63 = vmul.f32 %v8071_v19, %v7671_v16  ;;  %s10561_s7 = scalar_lea.vmem %s8268_s2, 1024 }
0x1af1   :  { %v7916_v41 = vmul.f32 %v15861_v57, %v7900_v49  ;;  %v7947_v35 = vmul.f32 %v15853_v13, %v7931_v50  ;;  %v7723_v13 = vsel %vm7707_vm2, 1.0, %v10589_v59  ;;  %v7675_v58 = vmul.f32 0.5, %v15791_v3  ;;  %p10562_p0 = scmp.ne.s32.totalorder %s8268_s2, %s10561_s7  ;;  %p10567_p2 = scmp.lt.s32.totalorder %s10561_s7, %s10561_s7 }
0x1af2   :  { %v8058_v6 = vmul.f32 %v8042_v28, %v7722_v34  ;;  %v8073_v31 = vadd.f32 1.0, %v8057_v32  ;;  %8214 = vmatprep.mubr.f32.mxu1 %v8088_v29 }
0x1af3   :  { %v7932_v17 = vadd.f32 0.2548296, %v7916_v41  ;;  %v8027_v48 = vmul.f32 %v10524_v46, %v7947_v35  ;;  %p10568_p3 = por %p10567_p2, %p10566_p1 }
0x1af4   :  { %8215 = vmatmul.mubr.f32.gmra.mrb[46].mxu1 %v8087_v63  ;;  %v8074_v62 = vadd.f32 1.0, %v8058_v6  ;;  %v8089_v53 = vmul.f32 %v8073_v31, %v7673_v5 }
0x1af5   :  { %v7948_v60 = vmul.f32 %v15861_v57, %v7932_v17  ;;  %v8043_v2 = vsub.f32 1.0, %v8027_v48  ;;  %p10569_p4 = pnand %p10568_p3, %p10562_p0 }
0x1af6   :  { %v8090_v51 = vmul.f32 %v8074_v62, %v7674_v40 }
0x1af7   :  { %v8028_v20 = vmul.f32 %v10526_v18, %v7948_v60  ;;  %v8059_v25 = vmul.f32 %v8043_v2, %v7723_v13 }
0x1af8   :  { %8219 = vmatprep.mubr.f32.mxu1 %v8090_v51 }
0x1af9   :  { %8220 = vmatmul.mubr.f32.gmra.mrb[48].mxu1 %v8089_v53  ;;  %v8044_v56 = vsub.f32 1.0, %v8028_v20  ;;  %v8075_v54 = vadd.f32 1.0, %v8059_v25 }
0x1afb   :  { %v8060_v8 = vmul.f32 %v8044_v56, %v7724_v52  ;;  %v8091_v61 = vmul.f32 %v8075_v54, %v7675_v58 }
0x1afd   :  { %v8076_v57 = vadd.f32 1.0, %v8060_v8 }
0x1aff   :  { %v8092_v22 = vmul.f32 %v8076_v57, %v7676_v9 }
0x1b01   :  { %8224 = vmatprep.mubr.f32.mxu1 %v8092_v22 }
0x1b02   :  { %8225 = vmatmul.mubr.f32.gmra.mrb[50].mxu1 %v8091_v61 }
0x1b36   :  { %v8811_v0 = vpop.f32.mrb[36].mxu1 }
0x1b37   :  { %v8812_v15 = vpop.f32.mrb[37].mxu1 }
0x1b38   :  { %v8813_v39 = vadd.f32 %v8812_v15, %v8811_v0 }
0x1b3a   :  { %v8230_v59 = vadd.f32 %v15300_v7, %v8813_v39  ;;  %v8814_v24 = vpop.f32.mrb[38].mxu1 }
0x1b3b   :  { %v8815_v4 = vpop.f32.mrb[39].mxu1 }
0x1b3c   :  { %v8245_v10 = vadd.f32 %v8413_v42, %v8230_v59  ;;  %v8816_v14 = vadd.f32 %v8815_v4, %v8814_v24 }
0x1b3e   :  { %8253 = vst.msk [vmem:[#allocation2] sm:$0xff] %vm968_vm1, %v8245_v10  ;;  %v8231_v3 = vadd.f32 %v15307_v11, %v8816_v14 }
0x1b3f   :  { %v8817_v37 = vpop.f32.mrb[40].mxu1 }
0x1b40   :  { %v8246_v12 = vadd.f32 %v8413_v42, %v8231_v3  ;;  %v8818_v23 = vpop.f32.mrb[41].mxu1 }
0x1b41   :  { %v8819_v21 = vadd.f32 %v8818_v23, %v8817_v37 }
0x1b42   :  { %8254 = vst.msk [vmem:[#allocation2 + $0x8] sm:$0xff] %vm968_vm1, %v8246_v12 }
0x1b43   :  { %v8232_v19 = vadd.f32 %v15310_v33, %v8819_v21 }
0x1b45   :  { %v8247_v36 = vadd.f32 %v8413_v42, %v8232_v19 }
0x1b47   :  { %8255 = vst.msk [vmem:[#allocation2 + $0x10] sm:$0xff] %vm968_vm1, %v8247_v36 }
0x1b48   :  { %v8820_v7 = vpop.f32.mrb[42].mxu1 }
0x1b49   :  { %v8821_v47 = vpop.f32.mrb[43].mxu1 }
0x1b4a   :  { %v8822_v30 = vadd.f32 %v8821_v47, %v8820_v7 }
0x1b4c   :  { %v8233_v38 = vadd.f32 %v15317_v43, %v8822_v30 }
0x1b4e   :  { %v8248_v45 = vadd.f32 %v8413_v42, %v8233_v38 }
0x1b50   :  { %8256 = vst.msk [vmem:[#allocation2 + $0x18] sm:$0xff] %vm968_vm1, %v8248_v45 }
0x1bc3   :  { %v8823_v11 = vpop.f32.mrb[44].mxu1 }
0x1bc4   :  { %v8824_v27 = vpop.f32.mrb[45].mxu1 }
0x1bc5   :  { %v8825_v49 = vadd.f32 %v8824_v27, %v8823_v11 }
0x1bc7   :  { %v8234_v46 = vadd.f32 %v15343_v26, %v8825_v49  ;;  %v8826_v16 = vpop.f32.mrb[46].mxu1 }
0x1bc8   :  { %v8827_v32 = vpop.f32.mrb[47].mxu1 }
0x1bc9   :  { %v8249_v50 = vadd.f32 %v8413_v42, %v8234_v46  ;;  %v8828_v33 = vadd.f32 %v8827_v32, %v8826_v16 }
0x1bcb   :  { %8258 = vst.msk [vmem:[#allocation2 + $0x20] sm:$0xff] %vm968_vm1, %v8249_v50  ;;  %v8235_v28 = vadd.f32 %v15341_v1, %v8828_v33 }
0x1bcc   :  { %v8829_v34 = vpop.f32.mrb[48].mxu1 }
0x1bcd   :  { %v8250_v29 = vadd.f32 %v8413_v42, %v8235_v28  ;;  %v8830_v41 = vpop.f32.mrb[49].mxu1 }
0x1bce   :  { %v8831_v43 = vadd.f32 %v8830_v41, %v8829_v34 }
0x1bcf   :  { %8259 = vst.msk [vmem:[#allocation2 + $0x28] sm:$0xff] %vm968_vm1, %v8250_v29 }
0x1bd0   :  { %v8236_v63 = vadd.f32 %v15361_v44, %v8831_v43 }
0x1bd2   :  { %v8251_v35 = vadd.f32 %v8413_v42, %v8236_v63 }
0x1bd4   :  { %8260 = vst.msk [vmem:[#allocation2 + $0x30] sm:$0xff] %vm968_vm1, %v8251_v35 }
0x1bd5   :  { %v8832_v26 = vpop.f32.mrb[50].mxu1 }
0x1bd6   :  { %v8833_v6 = vpop.f32.mrb[51].mxu1 }
0x1bd7   :  { %v8834_v31 = vadd.f32 %v8833_v6, %v8832_v26 }
0x1bd9   :  { %v8237_v17 = vadd.f32 %v15359_v55, %v8834_v31 }
0x1bdb   :  { %v8252_v1 = vadd.f32 %v8413_v42, %v8237_v17 }
0x1bdd   :  { %8261 = vst.msk [vmem:[#allocation2 + $0x38] sm:$0xff] %vm968_vm1, %v8252_v1 }
0x1bde   :  { %10572 = shalt.err (!%p10569_p4)
}
0x1bdf   :  { %s10573_s1 = scalar_lea.hbm %s15951_s18, 1024 }
0x1be0   :  { %p10574_p5 = scmp.ne.s32.totalorder %s15951_s18, %s10573_s1  ;;  %p10577_p6 = scmp.lt.u32.totalorder %s10573_s1, %s15951_s18 }
0x1be2   :  { %p10579_p7 = pnand %p10577_p6, %p10574_p5 }
0x1be4   :  { %10582 = shalt.err (!%p10579_p7)
}
0x1be5   :  { %s10591_s3 = smov 128   ;;  %s10592_s5 = smov 8  }
0x1be6   :  { %8273 = dma.vmem_to_hbm [thread:$0]  %s8268_s2, 1024, %s15951_s18, [#allocation3], %s10591_s3, %s10591_s3, %s10592_s5  }
0x1be7   :  { %10583 = dma.done.wait [#allocation3], 1024  }
0x1be8   :  { %10584 = vsyncadd [#allocation3], 4294966272 }
0x1be9   :  { %8277 = vsyncpa [#allocation3], 1 }

</bundles_post_ra>
